<compile_context>
chip_gen: v7x
topology: tpu7x:2x2x1
jax: 0.10.0
libtpu: 0.0.40
codegen_flags: <defaults>
</compile_context>

<pallas_src>
import functools
import math

import jax
import jax.numpy as jnp
from jax import lax
from jax.experimental import pallas as pl
from jax.experimental.pallas import tpu as pltpu

S_IN = 384      # sequence length
K_IN = 3072     # linear in_features
N_OUT = 768     # linear out_features / layernorm width
EPS = 1e-12


def _gelu_exact(x):
    # torch._C._nn.gelu default = exact erf formulation
    return 0.5 * x * (1.0 + lax.erf(x * (1.0 / math.sqrt(2.0))))


def _fused_kernel(a_ref, w_ref, b_ref, res_ref, g_ref, beta_ref, o_ref):
    """One grid step = one seq tile: GELU -> bf16 matmul (fp32 acc) -> bias
    -> residual -> LayerNorm -> single lane-dense store."""
    # GELU in fp32 (exact erf, matches torch), bf16 operands for the MXU.
    a = _gelu_exact(a_ref[...].astype(jnp.float32)).astype(jnp.bfloat16)
    y = jnp.dot(a, w_ref[...], preferred_element_type=jnp.float32)
    y = y + b_ref[...] + res_ref[...].astype(jnp.float32)
    # Single-pass LayerNorm statistics: var = E[y^2] - mean^2.
    mean = jnp.mean(y, axis=-1, keepdims=True)
    mean_sq = jnp.mean(y * y, axis=-1, keepdims=True)
    var = mean_sq - mean * mean
    inv = lax.rsqrt(var + EPS)
    o_ref[...] = ((y - mean) * inv * g_ref[...] + beta_ref[...]).astype(o_ref.dtype)


def prepare_params(w, b, gamma, beta):
    """One-time parameter preparation -- call OUTSIDE the per-step jit.

    w: [K, N] fp32 -> bf16 (VMEM-resident weight), bias/gamma/beta -> fp32 rows.
    """
    w_bf = jnp.asarray(w, dtype=jnp.bfloat16)
    b2 = jnp.asarray(b, dtype=jnp.float32).reshape(1, -1)
    g2 = jnp.asarray(gamma, dtype=jnp.float32).reshape(1, -1)
    beta2 = jnp.asarray(beta, dtype=jnp.float32).reshape(1, -1)
    return w_bf, b2, g2, beta2


def fused_gelu_linear_add_layernorm(x107, x106, w_bf, b2, g2, beta2, *, tm=96):
    """x107: [1, S, K], x106: [1, S, N], pre-prepared params -> [1, S, N]."""
    a = x107[0]          # [S, K]
    res = x106[0]        # [S, N]
    S, K = a.shape
    N = res.shape[-1]

    grid = (S // tm,)

    out = pl.pallas_call(
        _fused_kernel,
        out_shape=jax.ShapeDtypeStruct((S, N), x107.dtype),
        grid_spec=pltpu.PrefetchScalarGridSpec(
            num_scalar_prefetch=0,
            grid=grid,
            in_specs=[
                # streamed per-tile operands (default double-buffering)
                pl.BlockSpec((tm, K), lambda i: (i, 0)),            # gelu input tile
                # VMEM-resident constants: fetched once, single-buffered
                pl.BlockSpec((K, N), lambda i: (0, 0),
                             pipeline_mode=pl.Buffered(1)),         # weight
                pl.BlockSpec((1, N), lambda i: (0, 0),
                             pipeline_mode=pl.Buffered(1)),         # bias
                pl.BlockSpec((tm, N), lambda i: (i, 0)),            # residual tile
                pl.BlockSpec((1, N), lambda i: (0, 0),
                             pipeline_mode=pl.Buffered(1)),         # ln gamma
                pl.BlockSpec((1, N), lambda i: (0, 0),
                             pipeline_mode=pl.Buffered(1)),         # ln beta
            ],
            out_specs=pl.BlockSpec((tm, N), lambda i: (i, 0)),
        ),
        compiler_params=pltpu.CompilerParams(
            dimension_semantics=("parallel",),
            vmem_limit_bytes=32 << 20),
    )(a, w_bf, b2, res, g2, beta2)

    return out[None, :, :]


def _reference(x107, x106, w, b, gamma, beta):
    a = _gelu_exact(x107.astype(jnp.float32))
    y = jnp.einsum("bsk,kn->bsn", a, w.astype(jnp.float32)) + b
    y = y + x106.astype(jnp.float32)
    mean = jnp.mean(y, axis=-1, keepdims=True)
    var = jnp.mean((y - mean) ** 2, axis=-1, keepdims=True)
    return ((y - mean) * lax.rsqrt(var + EPS)) * gamma + beta


if __name__ == "__main__":
    key = jax.random.PRNGKey(0)
    k1, k2, k3, k4 = jax.random.split(key, 4)

    # inputs (deterministic), shapes from the module spec
    x107 = jax.random.normal(k1, (1, S_IN, K_IN), dtype=jnp.float32)
    x106 = jax.random.normal(k2, (1, S_IN, N_OUT), dtype=jnp.float32)

    # parameters (deterministic, nn.Linear-style fan-in scaling)
    bound = 1.0 / math.sqrt(K_IN)
    w_t = jax.random.uniform(k3, (N_OUT, K_IN), minval=-bound, maxval=bound,
                             dtype=jnp.float32)          # torch stores [out, in]
    w = w_t.T                                            # kernel uses [in, out]
    b = jax.random.uniform(k4, (N_OUT,), minval=-bound, maxval=bound,
                           dtype=jnp.float32)
    gamma = jnp.ones((N_OUT,), dtype=jnp.float32)
    beta = jnp.zeros((N_OUT,), dtype=jnp.float32)

    # One-time parameter prep (hoisted out of the jitted per-call path).
    w_bf, b2, g2, beta2 = jax.block_until_ready(prepare_params(w, b, gamma, beta))

    run = jax.jit(functools.partial(fused_gelu_linear_add_layernorm, tm=96))
    out = run(x107, x106, w_bf, b2, g2, beta2)
    out = jax.block_until_ready(out)

    ref = _reference(x107, x106, w, b, gamma, beta)
    assert out.shape == (1, S_IN, N_OUT), out.shape
    # bf16 matmul operands (fp32 accumulation) introduce ~1e-3 abs error on the
    # unit-variance LayerNorm output; tolerance chosen accordingly.
    assert jnp.allclose(out, ref, atol=1e-2, rtol=1e-2), (
        float(jnp.max(jnp.abs(out - ref))))

    print("KERNEL_OK")
</pallas_src>

<mosaic_0001>
module attributes {stable_mosaic.version = 11 : i64} {
  func.func @_fused_kernel(%arg0: i32, %arg1: memref<96x3072xf32, #tpu.memory_space<vmem>>, %arg2: memref<3072x768xbf16, #tpu.memory_space<vmem>>, %arg3: memref<1x768xf32, #tpu.memory_space<vmem>>, %arg4: memref<96x768xf32, #tpu.memory_space<vmem>>, %arg5: memref<1x768xf32, #tpu.memory_space<vmem>>, %arg6: memref<1x768xf32, #tpu.memory_space<vmem>>, %arg7: memref<96x768xf32, #tpu.memory_space<vmem>>) attributes {dimension_semantics = [#tpu.dimension_semantics<parallel>], iteration_bounds = array<i64: 4>, scalar_prefetch = 0 : i64, scratch_operands = 0 : i64, tpu.core_type = #tpu.core_type<tc>, window_params = [{transform_indices = @transform_0, window_bounds = array<i64: 96, 3072>}, {pipeline_mode = #tpu.pipeline_mode<synchronous>, transform_indices = @transform_1, window_bounds = array<i64: 3072, 768>}, {pipeline_mode = #tpu.pipeline_mode<synchronous>, transform_indices = @transform_2, window_bounds = array<i64: 1, 768>}, {transform_indices = @transform_3, window_bounds = array<i64: 96, 768>}, {pipeline_mode = #tpu.pipeline_mode<synchronous>, transform_indices = @transform_4, window_bounds = array<i64: 1, 768>}, {pipeline_mode = #tpu.pipeline_mode<synchronous>, transform_indices = @transform_5, window_bounds = array<i64: 1, 768>}, {transform_indices = @transform_6, window_bounds = array<i64: 96, 768>}]} {
    %c0 = arith.constant 0 : index
    %c0_0 = arith.constant 0 : index
    %0 = vector.load %arg1[%c0, %c0_0] : memref<96x3072xf32, #tpu.memory_space<vmem>>, vector<96x3072xf32>
    %cst = arith.constant 5.000000e-01 : f32
    %1 = vector.broadcast %cst : f32 to vector<96x3072xf32>
    %2 = arith.mulf %1, %0 : vector<96x3072xf32>
    %cst_1 = arith.constant 0.707106769 : f32
    %3 = vector.broadcast %cst_1 : f32 to vector<96x3072xf32>
    %4 = arith.mulf %0, %3 : vector<96x3072xf32>
    %5 = math.erf %4 : vector<96x3072xf32>
    %cst_2 = arith.constant 1.000000e+00 : f32
    %6 = vector.broadcast %cst_2 : f32 to vector<96x3072xf32>
    %7 = arith.addf %6, %5 : vector<96x3072xf32>
    %8 = arith.mulf %2, %7 : vector<96x3072xf32>
    %9 = arith.truncf %8 : vector<96x3072xf32> to vector<96x3072xbf16>
    %c0_3 = arith.constant 0 : index
    %c0_4 = arith.constant 0 : index
    %10 = vector.load %arg2[%c0_3, %c0_4] : memref<3072x768xbf16, #tpu.memory_space<vmem>>, vector<3072x768xbf16>
    %cst_5 = arith.constant dense<0.000000e+00> : vector<96x768xf32>
    %11 = tpu.matmul %9, %10, %cst_5 {dimension_numbers = #tpu.dot_dimension_numbers<[1], [0], [0], [1], [0, 0, 1, 1], [], []>} : vector<96x3072xbf16>, vector<3072x768xbf16>, vector<96x768xf32> -> vector<96x768xf32>
    %c0_6 = arith.constant 0 : index
    %c0_7 = arith.constant 0 : index
    %12 = vector.load %arg3[%c0_6, %c0_7] : memref<1x768xf32, #tpu.memory_space<vmem>>, vector<1x768xf32>
    %13 = vector.broadcast %12 : vector<1x768xf32> to vector<96x768xf32>
    %14 = arith.addf %11, %13 : vector<96x768xf32>
    %c0_8 = arith.constant 0 : index
    %c0_9 = arith.constant 0 : index
    %15 = vector.load %arg4[%c0_8, %c0_9] : memref<96x768xf32, #tpu.memory_space<vmem>>, vector<96x768xf32>
    %16 = arith.addf %14, %15 : vector<96x768xf32>
    %cst_10 = arith.constant dense<0.000000e+00> : vector<96xf32>
    %17 = vector.multi_reduction <add>, %16, %cst_10 [1] : vector<96x768xf32> to vector<96xf32>
    %18 = vector.shape_cast %17 : vector<96xf32> to vector<96x1xf32>
    %cst_11 = arith.constant 7.680000e+02 : f32
    %19 = vector.broadcast %cst_11 : f32 to vector<96x1xf32>
    %20 = arith.divf %18, %19 : vector<96x1xf32>
    %21 = arith.mulf %16, %16 : vector<96x768xf32>
    %cst_12 = arith.constant dense<0.000000e+00> : vector<96xf32>
    %22 = vector.multi_reduction <add>, %21, %cst_12 [1] : vector<96x768xf32> to vector<96xf32>
    %23 = vector.shape_cast %22 : vector<96xf32> to vector<96x1xf32>
    %cst_13 = arith.constant 7.680000e+02 : f32
    %24 = vector.broadcast %cst_13 : f32 to vector<96x1xf32>
    %25 = arith.divf %23, %24 : vector<96x1xf32>
    %26 = arith.mulf %20, %20 : vector<96x1xf32>
    %27 = arith.subf %25, %26 : vector<96x1xf32>
    %cst_14 = arith.constant 9.99999996E-13 : f32
    %28 = vector.broadcast %cst_14 : f32 to vector<96x1xf32>
    %29 = arith.addf %27, %28 : vector<96x1xf32>
    %30 = math.rsqrt %29 : vector<96x1xf32>
    %31 = vector.broadcast %20 : vector<96x1xf32> to vector<96x768xf32>
    %32 = arith.subf %16, %31 : vector<96x768xf32>
    %33 = vector.broadcast %30 : vector<96x1xf32> to vector<96x768xf32>
    %34 = arith.mulf %32, %33 : vector<96x768xf32>
    %c0_15 = arith.constant 0 : index
    %c0_16 = arith.constant 0 : index
    %35 = vector.load %arg5[%c0_15, %c0_16] : memref<1x768xf32, #tpu.memory_space<vmem>>, vector<1x768xf32>
    %36 = vector.broadcast %35 : vector<1x768xf32> to vector<96x768xf32>
    %37 = arith.mulf %34, %36 : vector<96x768xf32>
    %c0_17 = arith.constant 0 : index
    %c0_18 = arith.constant 0 : index
    %38 = vector.load %arg6[%c0_17, %c0_18] : memref<1x768xf32, #tpu.memory_space<vmem>>, vector<1x768xf32>
    %39 = vector.broadcast %38 : vector<1x768xf32> to vector<96x768xf32>
    %40 = arith.addf %37, %39 : vector<96x768xf32>
    %c0_19 = arith.constant 0 : index
    %c0_20 = arith.constant 0 : index
    %41 = vector.load %arg7[%c0_19, %c0_20] : memref<96x768xf32, #tpu.memory_space<vmem>>, vector<96x768xf32>
    tpu.vector_store %arg7[%c0_19, %c0_20], %40 {strides = array<i32>} : memref<96x768xf32, #tpu.memory_space<vmem>>, vector<96x768xf32>,
    return
  }
  func.func @transform_0(%arg0: i32) -> (i32, i32) {
    %c0_i32 = arith.constant 0 : i32
    %c0_i32_0 = arith.constant 0 : i32
    return %arg0, %c0_i32 : i32, i32
  }
  func.func @transform_1(%arg0: i32) -> (i32, i32) {
    %c0_i32 = arith.constant 0 : i32
    %c0_i32_0 = arith.constant 0 : i32
    %c0_i32_1 = arith.constant 0 : i32
    return %c0_i32, %c0_i32_0 : i32, i32
  }
  func.func @transform_2(%arg0: i32) -> (i32, i32) {
    %c0_i32 = arith.constant 0 : i32
    %c0_i32_0 = arith.constant 0 : i32
    %c0_i32_1 = arith.constant 0 : i32
    return %c0_i32, %c0_i32_0 : i32, i32
  }
  func.func @transform_3(%arg0: i32) -> (i32, i32) {
    %c0_i32 = arith.constant 0 : i32
    %c0_i32_0 = arith.constant 0 : i32
    return %arg0, %c0_i32 : i32, i32
  }
  func.func @transform_4(%arg0: i32) -> (i32, i32) {
    %c0_i32 = arith.constant 0 : i32
    %c0_i32_0 = arith.constant 0 : i32
    %c0_i32_1 = arith.constant 0 : i32
    return %c0_i32, %c0_i32_0 : i32, i32
  }
  func.func @transform_5(%arg0: i32) -> (i32, i32) {
    %c0_i32 = arith.constant 0 : i32
    %c0_i32_0 = arith.constant 0 : i32
    %c0_i32_1 = arith.constant 0 : i32
    return %c0_i32, %c0_i32_0 : i32, i32
  }
  func.func @transform_6(%arg0: i32) -> (i32, i32) {
    %c0_i32 = arith.constant 0 : i32
    %c0_i32_0 = arith.constant 0 : i32
    return %arg0, %c0_i32 : i32, i32
  }
}

</mosaic_0001>

<bundles_post_ra>
// kernel: fused_gelu_linear_add_layernorm.1
= control target key start
LH: loop header
LB: loop body
LE: loop exit
PB: predicated region body
PF: predicated region fallthrough
CT: control target
= control target key end

     0   :  { %s21914_s0 = inlined_call_operand.hbm [shape: f32[384,3072], index: 0, kind: input, shape index: {}]   ;;  %s21915_s1 = inlined_call_operand.hbm [shape: bf16[3072,768], index: 1, kind: input, shape index: {}]   ;;  %s21916_s2 = inlined_call_operand.hbm [shape: f32[1,768], index: 2, kind: input, shape index: {}]   ;;  %s21917_s3 = inlined_call_operand.hbm [shape: f32[384,768], index: 3, kind: input, shape index: {}]   ;;  %s21918_s4 = inlined_call_operand.hbm [shape: f32[1,768], index: 4, kind: input, shape index: {}]   ;;  %s21919_s5 = inlined_call_operand.hbm [shape: f32[1,768], index: 5, kind: input, shape index: {}]   ;;  %s21920_s6 = inlined_call_operand.hbm [shape: f32[384,768], index: 6, kind: output, shape index: {}]  }
   0x1   :  { %22216 = sst [smem:[#allocation127_spill]] %s21914_s0 }
   0x2   :  { %22217 = sst [smem:[#allocation128_spill]] %s21915_s1 }
   0x3   :  { %22218 = sst [smem:[#allocation129_spill]] %s21916_s2 }
   0x4   :  { %22219 = sst [smem:[#allocation130_spill]] %s21918_s4 }
   0x5   :  { %11 = vsyncpa [#allocation3], 0 }
   0x6   :  { %13 = vsyncpa [#allocation3 + $0x1], 0 }
   0x7   :  { %14 = vsyncpa [#allocation6], 0 }
   0x8   :  { %15 = vsyncpa [#allocation9], 0 }
   0x9   :  { %17 = vsyncpa [#allocation9 + $0x1], 0 }
   0xa   :  { %18 = vsyncpa [#allocation12], 0 }
   0xb   :  { %19 = vsyncpa [#allocation4], 0 }
   0xc   :  { %21 = vsyncpa [#allocation4 + $0x1], 0  ;;  %s18339_s21 = smov 0   ;;  %s18341_s22 = smov 0  }
   0xd   :  { %s18343_s23 = smov 0   ;;  %s18345_s24 = smov 0  }
   0xe LB: > { %s18360_s25 = sadd.s32 4294967295, %s18287_s24   ;;  %s13561_s26 = sadd.s32 4294967294, %s18287_s24   ;;  %s18287_s24 = sphi %s18345_s24, %s22597_s24   ;;  %s18283_s23 = sphi %s18343_s23, %s22596_s23   ;;  %s18279_s22 = sphi %s18341_s22, %s22595_s22   ;;  %s18275_s21 = sphi %s18339_s21, %s22594_s21  }
   0xf   : > { %p47_p0 = scmp.ne.s32.totalorder %s18279_s22, %s18275_s21  ;;  %p21921_p1 = scmp.eq.s32.totalorder %s18360_s25, 0 }
  0x10   : > { %p187_p3 = scmp.eq.s32.totalorder %s13561_s26, 3  ;;  %p13562_p5 = scmp.ge.s32.totalorder %s18287_s24, 1 }
  0x11   : > { %p18369_p4 = por %p21921_p1, %p47_p0  ;;  %p194_p7 = scmp.lt.s32.totalorder %s18287_s24, 5 }
  0x12   : > { %p18374_p6 = por %p187_p3, %p47_p0  ;;  %s18289_s30 = smov [#allocation5]  }
  0x13   : > { %s22220_s27 = scalar_select %p18369_p4, 1, 0 }
  0x14   : > { %s22221_s28 = scalar_select %p18374_p6, 1, 0 }
  0x15   : > { %p18379_p8 = pnand %p13562_p5, %p194_p7  ;;  %s206_s7 = sshll.u32 %s18289_s30, 4  ;;  %s207_s7 = int_to_ptr.vmem [resolvable:$true] %s206_s7 }
  0x16   : > { %s18290_s9 = smov [#allocation10]   ;;  %s22224_s1 = sld [smem:[#allocation128_spill]] }
  0x17   : > { %s22222_s29 = scalar_select %p18379_p8, 1, 0 }
  0x18   : > { %p15623_p9 = pneg %p18379_p8  ;;  %s231_s10 = sshll.u32 %s18290_s9, 4  ;;  %s18391_s10 = int_to_ptr.vmem [resolvable:$true] %s231_s10 }
  0x1a   : > { %p18387_p10 = pnand %p15623_p9, %p21921_p1 }
  0x1c   : > { %s18033_s13 = scalar_lea.hbm %s22224_s1, 147456  ;;  %p18401_p12 = pneg %p18387_p10 }
  0x1d   : > { %p18034_p11 = scmp.ne.s32.totalorder %s22224_s1, %s18033_s13  ;;  %p18040_p3 = scmp.lt.u32.totalorder %s18033_s13, %s22224_s1 }
  0x1f   : > { %p18036_p13 = pnand %p18401_p12, %p18034_p11 }
  0x21   : > { %p18037_p0 = pneg %p18036_p13 }
  0x23   : > { %p18042_p5 = pnand %p18040_p3, %p18037_p0 }
  0x25   : > { %18045 = shalt.err (!%p18042_p5)
}
  0x26   : > { %s18046_s19 = scalar_lea.vmem %s207_s7, 147456  ;;  %p18054_p2 = scmp.lt.s32.totalorder %s207_s7, %s207_s7 }
  0x27   : > { %p18047_p7 = scmp.ne.s32.totalorder %s207_s7, %s18046_s19  ;;  %p18055_p6 = scmp.lt.s32.totalorder %s18046_s19, %s18046_s19 }
  0x29   : > { %p18049_p9 = pnand %p18047_p7, %p18401_p12  ;;  %p18056_p4 = por %p18055_p6, %p18054_p2 }
  0x2b   : > { %p18050_p1 = pneg %p18049_p9 }
  0x2d   : > { %p18057_p8 = pnand %p18056_p4, %p18050_p1 }
  0x2f   : > { %18060 = shalt.err (!%p18057_p8)
}
  0x30   : > { %s18291_s20 = smov 384   ;;  %s18292_s26 = smov 24  }
  0x31   : > { %15626 = dma.hbm_to_vmem [thread:$0]  (!%p18387_p10), %s22224_s1, 147456, %s207_s7, [#allocation6], %s18291_s20, %s18291_s20, %s18292_s26  }
  0x32   : > { %s22226_s4 = sld [smem:[#allocation130_spill]] }
  0x38   : > { %s18061_s13 = scalar_lea.hbm %s22226_s4, 96 }
  0x39   : > { %p18062_p11 = scmp.ne.s32.totalorder %s22226_s4, %s18061_s13  ;;  %p18068_p4 = scmp.lt.u32.totalorder %s18061_s13, %s22226_s4 }
  0x3b   : > { %p18064_p1 = pnand %p18062_p11, %p18401_p12 }
  0x3d   : > { %p18065_p2 = pneg %p18064_p1 }
  0x3f   : > { %p18070_p6 = pnand %p18068_p4, %p18065_p2 }
  0x41   : > { %18073 = shalt.err (!%p18070_p6)
}
  0x42   : > { %s18074_s7 = scalar_lea.vmem %s18391_s10, 96  ;;  %p18082_p3 = scmp.lt.s32.totalorder %s18391_s10, %s18391_s10 }
  0x43   : > { %p18075_p8 = scmp.ne.s32.totalorder %s18391_s10, %s18074_s7  ;;  %p18083_p5 = scmp.lt.s32.totalorder %s18074_s7, %s18074_s7 }
  0x45   : > { %p18077_p13 = pnand %p18075_p8, %p18401_p12  ;;  %p18084_p7 = por %p18083_p5, %p18082_p3 }
  0x47   : > { %p18078_p0 = pneg %p18077_p13 }
  0x49   : > { %p18085_p9 = pnand %p18084_p7, %p18078_p0 }
  0x4b   : > { %18088 = shalt.err (!%p18085_p9)
}
  0x4c   : > { %15632 = dma.hbm_to_vmem [thread:$0]  (!%p18387_p10), %s22226_s4, 96, %s18391_s10, [#allocation9]  }
  0x4d   : > { %s18293_s26 = smov [#allocation7]   ;;  %s18294_s9 = smov [#allocation11]  }
  0x4e   : > { %s220_s30 = sshll.u32 %s18293_s26, 4  ;;  %s242_s11 = sshll.u32 %s18294_s9, 4  ;;  %s221_s30 = int_to_ptr.vmem [resolvable:$true] %s220_s30  ;;  %s243_s11 = int_to_ptr.vmem [resolvable:$true] %s242_s11 }
  0x4f   : > { %s22227_s2 = sld [smem:[#allocation129_spill]] }
  0x55   : > { %s18089_s14 = scalar_lea.hbm %s22227_s2, 96 }
  0x56   : > { %p18090_p11 = scmp.ne.s32.totalorder %s22227_s2, %s18089_s14  ;;  %p18096_p4 = scmp.lt.u32.totalorder %s18089_s14, %s22227_s2 }
  0x58   : > { %p18092_p1 = pnand %p18090_p11, %p18401_p12 }
  0x5a   : > { %p18093_p2 = pneg %p18092_p1 }
  0x5c   : > { %p18098_p6 = pnand %p18096_p4, %p18093_p2 }
  0x5e   : > { %18101 = shalt.err (!%p18098_p6)
}
  0x5f   : > { %s18102_s10 = scalar_lea.vmem %s221_s30, 96  ;;  %p18110_p3 = scmp.lt.s32.totalorder %s221_s30, %s221_s30 }
  0x60   : > { %p18103_p8 = scmp.ne.s32.totalorder %s221_s30, %s18102_s10  ;;  %p18111_p5 = scmp.lt.s32.totalorder %s18102_s10, %s18102_s10 }
  0x62   : > { %p18105_p13 = pnand %p18103_p8, %p18401_p12  ;;  %p18112_p7 = por %p18111_p5, %p18110_p3 }
  0x64   : > { %p18106_p0 = pneg %p18105_p13 }
  0x66   : > { %p18113_p9 = pnand %p18112_p7, %p18106_p0 }
  0x68   : > { %18116 = shalt.err (!%p18113_p9)
}
  0x69   : > { %15629 = dma.hbm_to_vmem [thread:$0]  (!%p18387_p10), %s22227_s2, 96, %s221_s30, [#allocation6]  }
  0x6a   : > { %s18117_s12 = scalar_lea.hbm %s21919_s5, 96 }
  0x6b   : > { %p18118_p11 = scmp.ne.s32.totalorder %s21919_s5, %s18117_s12  ;;  %p18124_p4 = scmp.lt.u32.totalorder %s18117_s12, %s21919_s5 }
  0x6d   : > { %p18120_p1 = pnand %p18118_p11, %p18401_p12 }
  0x6f   : > { %p18121_p2 = pneg %p18120_p1 }
  0x71   : > { %p18126_p6 = pnand %p18124_p4, %p18121_p2 }
  0x73   : > { %18129 = shalt.err (!%p18126_p6)
}
  0x74   : > { %s18130_s18 = scalar_lea.vmem %s243_s11, 96  ;;  %p18138_p3 = scmp.lt.s32.totalorder %s243_s11, %s243_s11 }
  0x75   : > { %p18131_p8 = scmp.ne.s32.totalorder %s243_s11, %s18130_s18  ;;  %p18139_p5 = scmp.lt.s32.totalorder %s18130_s18, %s18130_s18 }
  0x77   : > { %p18133_p13 = pnand %p18131_p8, %p18401_p12  ;;  %p18140_p7 = por %p18139_p5, %p18138_p3 }
  0x79   : > { %p18134_p0 = pneg %p18133_p13 }
  0x7b   : > { %p18141_p9 = pnand %p18140_p7, %p18134_p0 }
  0x7d   : > { %18144 = shalt.err (!%p18141_p9)
}
  0x7e   : > { %15635 = dma.hbm_to_vmem [thread:$0]  (!%p18387_p10), %s21919_s5, 96, %s243_s11, [#allocation12]  }
  0x7f   : > { %s18477_s16 = sadd.s32 1, %s18287_s24   ;;  %s34_s8 = sadd.s32 1, %s18283_s23 }
  0x80   : > { %s31_s10 = ssub.s32 %s18287_s24, %s18477_s16  ;;  %p41_p11 = scmp.ne.s32.totalorder %s18283_s23, %s18279_s22 }
  0x81   : > { %p32_p12 = scmp.eq.s32.totalorder %s31_s10, 0  ;;  %p42_p1 = scmp.eq.s32.totalorder %s18287_s24, 0 }
  0x82   : > { %p15651_p2 = scmp.lt.s32.totalorder %s18287_s24, 4  ;;  %p22228_p6 = scmp.eq.s32.totalorder %s18360_s25, 3 }
  0x83   : > { %s18487_s19 = scalar_select %p32_p12, %s18283_s23, %s34_s8  }
  0x84   : > { %p43_p4 = por %p42_p1, %p41_p11  ;;  %p18491_p8 = por %p22228_p6, %p41_p11 }
  0x85   : > { %s18496_s26 = sand.u32 1, %s18283_s23   ;;  %s15652_s11 = smul.u32 36864, %s18287_s24 }
  0x86   : > { %s15594_s9 = smul.u32 2304, %s18496_s26  ;;  %s22230_s0 = sld [smem:[#allocation127_spill]] }
  0x87   : > { %p18505_p10 = pnand %p15651_p2, %p43_p4  ;;  %s254_s30 = scalar_lea.sflag [#allocation3], %s18496_s26 }
  0x88   : > { %s257_s17 = scalar_lea.vmem [#allocation2], %s15594_s9 }
  0x89   : > { %s265_s18 = sshll.u32 %s257_s17, 4  ;;  %p18147_p0 = pneg %p18505_p10  ;;  %s18509_s18 = int_to_ptr.vmem [resolvable:$true] %s265_s18 }
  0x8c   : > { %s18503_s14 = scalar_lea.hbm %s22230_s0, %s15652_s11  ;;  %s18150_s11 = scalar_lea.hbm %s22230_s0, 147456 }
  0x8d   : > { %s18145_s7 = scalar_lea.hbm %s18503_s14, 36864  ;;  %p18151_p7 = scmp.lt.u32.totalorder %s18503_s14, %s22230_s0 }
  0x8e   : > { %p18146_p13 = scmp.ne.s32.totalorder %s18503_s14, %s18145_s7  ;;  %p18152_p9 = scmp.lt.u32.totalorder %s18150_s11, %s18145_s7 }
  0x8f   : > { %p18154_p11 = scmp.lt.u32.totalorder %s18145_s7, %s18503_s14 }
  0x90   : > { %p18148_p3 = pnand %p18147_p0, %p18146_p13  ;;  %p18153_p12 = por %p18152_p9, %p18151_p7 }
  0x92   : > { %p18149_p5 = pneg %p18148_p3  ;;  %p18155_p1 = por %p18154_p11, %p18153_p12 }
  0x94   : > { %p18156_p2 = pnand %p18155_p1, %p18149_p5 }
  0x96   : > { %18159 = shalt.err (!%p18156_p2)
}
  0x97   : > { %s18160_s9 = scalar_lea.vmem %s18509_s18, 36864  ;;  %s18295_s17 = smov [#allocation2]  }
  0x98   : > { %p18161_p4 = scmp.ne.s32.totalorder %s18509_s18, %s18160_s9  ;;  %s18165_s10 = sshll.u32 %s18295_s17, 4  ;;  %s18166_s10 = int_to_ptr.vmem [resolvable:$false] %s18165_s10 }
  0x99   : > { %s18167_s8 = scalar_lea.vmem %s18166_s10, 73728  ;;  %p18168_p3 = scmp.lt.s32.totalorder %s18509_s18, %s18166_s10 }
  0x9a   : > { %p18163_p6 = pnand %p18161_p4, %p18147_p0  ;;  %p18169_p7 = scmp.lt.s32.totalorder %s18167_s8, %s18160_s9 }
  0x9c   : > { %p18164_p13 = pneg %p18163_p6  ;;  %p18170_p9 = por %p18169_p7, %p18168_p3 }
  0x9e   : > { %p18171_p12 = pnand %p18170_p9, %p18164_p13 }
  0xa0   : > { %18174 = shalt.err (!%p18171_p12)
}
  0xa1   : > { %s18296_s7 = smov 3072   ;;  %s18297_s11 = smov 192  }
  0xa2   : > { %15639 = dma.hbm_to_vmem [thread:$0]  (!%p18505_p10), %s18503_s14, 36864, %s18509_s18, %s254_s30, %s18296_s7, %s18296_s7, %s18297_s11  }
  0xa3   : > { %s275_s12 = sand.u32 1, %s18287_s24   ;;  %s15596_s13 = smul.u32 576, %s18496_s26 }
  0xa4   : > { %s15653_s17 = smul.u32 9216, %s18287_s24  ;;  %s18549_s2 = scalar_lea.sflag [#allocation9], %s275_s12 }
  0xa5   : > { %s279_s0 = scalar_lea.vmem [#allocation8], %s15596_s13  ;;  %s18180_s18 = scalar_lea.hbm %s21917_s3, 36864 }
  0xa6   : > { %s18545_s8 = scalar_lea.hbm %s21917_s3, %s15653_s17  ;;  %s287_s1 = sshll.u32 %s279_s0, 4  ;;  %s18547_s1 = int_to_ptr.vmem [resolvable:$true] %s287_s1 }
  0xa7   : > { %s18175_s4 = scalar_lea.hbm %s18545_s8, 9216  ;;  %p18181_p2 = scmp.lt.u32.totalorder %s18545_s8, %s21917_s3 }
  0xa8   : > { %p18176_p5 = scmp.ne.s32.totalorder %s18545_s8, %s18175_s4  ;;  %p18182_p4 = scmp.lt.u32.totalorder %s18180_s18, %s18175_s4 }
  0xa9   : > { %p18184_p13 = scmp.lt.u32.totalorder %s18175_s4, %s18545_s8 }
  0xaa   : > { %p18178_p11 = pnand %p18176_p5, %p18147_p0  ;;  %p18183_p6 = por %p18182_p4, %p18181_p2 }
  0xac   : > { %p18179_p1 = pneg %p18178_p11  ;;  %p18185_p3 = por %p18184_p13, %p18183_p6 }
  0xae   : > { %p18186_p7 = pnand %p18185_p3, %p18179_p1 }
  0xb0   : > { %18189 = shalt.err (!%p18186_p7)
}
  0xb1   : > { %s18190_s0 = scalar_lea.vmem %s18547_s1, 9216  ;;  %s18298_s11 = smov [#allocation8]  }
  0xb2   : > { %p18191_p9 = scmp.ne.s32.totalorder %s18547_s1, %s18190_s0  ;;  %s18195_s12 = sshll.u32 %s18298_s11, 4  ;;  %s18196_s12 = int_to_ptr.vmem [resolvable:$false] %s18195_s12 }
  0xb3   : > { %s18197_s13 = scalar_lea.vmem %s18196_s12, 18432  ;;  %p18198_p11 = scmp.lt.s32.totalorder %s18547_s1, %s18196_s12 }
  0xb4   : > { %p18193_p12 = pnand %p18191_p9, %p18147_p0  ;;  %p18199_p2 = scmp.lt.s32.totalorder %s18197_s13, %s18190_s0 }
  0xb6   : > { %p18194_p5 = pneg %p18193_p12  ;;  %p18200_p4 = por %p18199_p2, %p18198_p11 }
  0xb8   : > { %p18201_p6 = pnand %p18200_p4, %p18194_p5 }
  0xba   : > { %18204 = shalt.err (!%p18201_p6)
}
  0xbb   : > { %s18299_s4 = smov 768   ;;  %s18300_s17 = smov 48  }
  0xbc   : > { %15642 = dma.hbm_to_vmem [thread:$0]  (!%p18505_p10), %s18545_s8, 9216, %s18547_s1, %s18549_s2, %s18299_s4, %s18299_s4, %s18300_s17  }
  0xbd   : > { %p22232_p0 = scmp.ne.s32.totalorder %s22222_s29, 0 }
  0xbf   : > { %299 = sbr.rel (%p22232_p0) target bundleno = 1919 (0x77f), region = 44 }
  0xc6   : > { %s18578_s9 = sand.u32 1, %s18279_s22   ;;  %p22233_p1 = scmp.ne.s32.totalorder %s22220_s27, 0 }
  0xc7   : > { %s15598_s10 = smul.u32 2304, %s18578_s9  ;;  %s302_s26 = scalar_lea.sflag [#allocation3], %s18578_s9 }
  0xc9   : > { %s18582_s14 = scalar_lea.vmem [#allocation2], %s15598_s10 }
  0xca   : > { %18250 = dma.done.wait (%p22233_p1), %s302_s26, 36864  }
  0xcb   : > { %18252 = vsyncadd (%p22233_p1), %s302_s26, 4294930432  ;;  %p22234_p10 = scmp.eq.s32.totalorder %s18360_s25, 0 }
  0xcd   : > { %18254 = dma.done.wait (%p22234_p10), [#allocation6], 147552   ;;  %p22235_p13 = pmov %p22234_p10 }
  0xce   : > { %s318_s1 = sand.u32 1, %s18360_s25   ;;  %s15599_s2 = smul.u32 576, %s18578_s9 }
  0xcf   : > { %18256 = vsyncadd (%p22235_p13), [#allocation6], 4294819744  ;;  %s319_s29 = scalar_lea.sflag [#allocation9], %s318_s1 }
  0xd0   : > { %s18596_s15 = scalar_lea.vmem [#allocation8], %s15599_s2 }
  0xd1   : > { %18258 = dma.done.wait (%p22233_p1), %s319_s29, 9216  }
  0xd2   : > { %18260 = vsyncadd (%p22233_p1), %s319_s29, 4294958080  ;;  %p22236_p3 = pmov %p22234_p10 }
  0xd4   : > { %18262 = dma.done.wait (%p22236_p3), [#allocation9], 96   ;;  %p22237_p7 = pmov %p22236_p3 }
  0xd5   : > { %p22238_p9 = pmov %p22236_p3 }
  0xd6   : > { %18264 = vsyncadd (%p22237_p7), [#allocation9], 4294967200 }
  0xd7   : > { %18266 = dma.done.wait (%p22238_p9), [#allocation12], 96   ;;  %p22239_p12 = pmov %p22236_p3 }
  0xd8   : > { %v15704_v0 = vld [vmem:[#allocation5 + $0x4] ss:$24 sps:$4 sm:$0xff]   ;;  %v15708_v2 = vld [vmem:[#allocation5] ss:$24 sps:$4 sm:$0xff]   ;;  %v15710_v4 = vld [vmem:[#allocation5 + $0x34] ss:$24 sps:$4 sm:$0xff]  }
  0xd9   : > { %18268 = vsyncadd (%p22239_p12), [#allocation12], 4294967200  ;;  %v15706_v1 = vld [vmem:[#allocation5 + $0x1204] ss:$24 sps:$4 sm:$0xff]   ;;  %9183 = vmatprep.subr.bf16.mxu1 %v15704_v0  ;;  %v15709_v3 = vld [vmem:[#allocation5 + $0x1200] ss:$24 sps:$4 sm:$0xff]  }
  0xda   : > { %9741 = vmatprep.subr.bf16.mxu0 %v15706_v1  ;;  %9184 = vmatpush1.bf16.msra.mxu1 %v15708_v2  ;;  %v15712_v5 = vld [vmem:[#allocation5 + $0x1234] ss:$24 sps:$4 sm:$0xff]   ;;  %v15714_v6 = vld [vmem:[#allocation5 + $0x30] ss:$24 sps:$4 sm:$0xff]   ;;  %v15716_v8 = vld [vmem:[#allocation5 + $0x64] ss:$24 sps:$4 sm:$0xff]  }
  0xdb   : > { %9742 = vmatpush1.bf16.msra.mxu0 %v15709_v3  ;;  %9185 = vmatprep.subr.bf16.mxu1 %v15710_v4  ;;  %v15715_v7 = vld [vmem:[#allocation5 + $0x1230] ss:$24 sps:$4 sm:$0xff]   ;;  %v15718_v9 = vld [vmem:[#allocation5 + $0x1264] ss:$24 sps:$4 sm:$0xff]   ;;  %v15720_v10 = vld [vmem:[#allocation5 + $0x60] ss:$24 sps:$4 sm:$0xff]  }
  0xdc   : > { %9743 = vmatprep.subr.bf16.mxu0 %v15712_v5  ;;  %v15721_v11 = vld [vmem:[#allocation5 + $0x1260] ss:$24 sps:$4 sm:$0xff]   ;;  %v15722_v12 = vld [vmem:[#allocation5 + $0x94] ss:$24 sps:$4 sm:$0xff]   ;;  %v15726_v14 = vld [vmem:[#allocation5 + $0x90] ss:$24 sps:$4 sm:$0xff]  }
  0xdd   : > { %v15724_v13 = vld [vmem:[#allocation5 + $0x1294] ss:$24 sps:$4 sm:$0xff]   ;;  %v15727_v15 = vld [vmem:[#allocation5 + $0x1290] ss:$24 sps:$4 sm:$0xff]   ;;  %v15728_v16 = vld [vmem:[#allocation5 + $0xc4] ss:$24 sps:$4 sm:$0xff]  }
  0xde   : > { %9186 = vmatpush1.bf16.msra.mxu1 %v15714_v6  ;;  %v15730_v17 = vld [vmem:[#allocation5 + $0x12c4] ss:$24 sps:$4 sm:$0xff]   ;;  %v15732_v18 = vld [vmem:[#allocation5 + $0xc0] ss:$24 sps:$4 sm:$0xff]   ;;  %v15734_v20 = vld [vmem:[#allocation5 + $0xf4] ss:$24 sps:$4 sm:$0xff]  }
  0xdf   : > { %9744 = vmatpush1.bf16.msra.mxu0 %v15715_v7  ;;  %9187 = vmatprep.subr.bf16.mxu1 %v15716_v8  ;;  %v15733_v19 = vld [vmem:[#allocation5 + $0x12c0] ss:$24 sps:$4 sm:$0xff]   ;;  %v15736_v21 = vld [vmem:[#allocation5 + $0x12f4] ss:$24 sps:$4 sm:$0xff]   ;;  %v15738_v22 = vld [vmem:[#allocation5 + $0xf0] ss:$24 sps:$4 sm:$0xff]  }
  0xe0   : > { %9745 = vmatprep.subr.bf16.mxu0 %v15718_v9  ;;  %v15739_v23 = vld [vmem:[#allocation5 + $0x12f0] ss:$24 sps:$4 sm:$0xff]   ;;  %v15740_v24 = vld [vmem:[#allocation5 + $0x124] ss:$24 sps:$4 sm:$0xff]   ;;  %v15744_v26 = vld [vmem:[#allocation5 + $0x120] ss:$24 sps:$4 sm:$0xff]  }
  0xe1   : > { %v15742_v25 = vld [vmem:[#allocation5 + $0x1324] ss:$24 sps:$4 sm:$0xff]   ;;  %v15745_v27 = vld [vmem:[#allocation5 + $0x1320] ss:$24 sps:$4 sm:$0xff]   ;;  %v15746_v28 = vld [vmem:[#allocation5 + $0x154] ss:$24 sps:$4 sm:$0xff]  }
  0xe2   : > { %9188 = vmatpush1.bf16.msra.mxu1 %v15720_v10  ;;  %v15748_v29 = vld [vmem:[#allocation5 + $0x1354] ss:$24 sps:$4 sm:$0xff]   ;;  %v15750_v30 = vld [vmem:[#allocation5 + $0x150] ss:$24 sps:$4 sm:$0xff]   ;;  %v15752_v32 = vld [vmem:[#allocation5 + $0x184] ss:$24 sps:$4 sm:$0xff]  }
  0xe3   : > { %9746 = vmatpush1.bf16.msra.mxu0 %v15721_v11  ;;  %9189 = vmatprep.subr.bf16.mxu1 %v15722_v12  ;;  %v15751_v31 = vld [vmem:[#allocation5 + $0x1350] ss:$24 sps:$4 sm:$0xff]   ;;  %v15754_v33 = vld [vmem:[#allocation5 + $0x1384] ss:$24 sps:$4 sm:$0xff]   ;;  %v15756_v34 = vld [vmem:[#allocation5 + $0x180] ss:$24 sps:$4 sm:$0xff]  }
  0xe4   : > { %9747 = vmatprep.subr.bf16.mxu0 %v15724_v13  ;;  %v15757_v35 = vld [vmem:[#allocation5 + $0x1380] ss:$24 sps:$4 sm:$0xff]   ;;  %v15758_v36 = vld [vmem:[#allocation5 + $0x1b4] ss:$24 sps:$4 sm:$0xff]   ;;  %v15762_v38 = vld [vmem:[#allocation5 + $0x1b0] ss:$24 sps:$4 sm:$0xff]  }
  0xe5   : > { %v15760_v37 = vld [vmem:[#allocation5 + $0x13b4] ss:$24 sps:$4 sm:$0xff]   ;;  %v15763_v39 = vld [vmem:[#allocation5 + $0x13b0] ss:$24 sps:$4 sm:$0xff]   ;;  %v15764_v40 = vld [vmem:[#allocation5 + $0x1e4] ss:$24 sps:$4 sm:$0xff]  }
  0xe6   : > { %9190 = vmatpush1.bf16.msra.mxu1 %v15726_v14  ;;  %v15766_v41 = vld [vmem:[#allocation5 + $0x13e4] ss:$24 sps:$4 sm:$0xff]   ;;  %v15768_v42 = vld [vmem:[#allocation5 + $0x1e0] ss:$24 sps:$4 sm:$0xff]   ;;  %v15770_v44 = vld [vmem:[#allocation5 + $0x214] ss:$24 sps:$4 sm:$0xff]  }
  0xe7   : > { %9748 = vmatpush1.bf16.msra.mxu0 %v15727_v15  ;;  %9191 = vmatprep.subr.bf16.mxu1 %v15728_v16  ;;  %v15769_v43 = vld [vmem:[#allocation5 + $0x13e0] ss:$24 sps:$4 sm:$0xff]   ;;  %v15772_v45 = vld [vmem:[#allocation5 + $0x1414] ss:$24 sps:$4 sm:$0xff]   ;;  %v15774_v46 = vld [vmem:[#allocation5 + $0x210] ss:$24 sps:$4 sm:$0xff]  }
  0xe8   : > { %9749 = vmatprep.subr.bf16.mxu0 %v15730_v17  ;;  %v15775_v47 = vld [vmem:[#allocation5 + $0x1410] ss:$24 sps:$4 sm:$0xff]   ;;  %v15776_v51 = vld [vmem:[#allocation5 + $0x244] ss:$24 sps:$4 sm:$0xff]   ;;  %v15780_v57 = vld [vmem:[#allocation5 + $0x240] ss:$24 sps:$4 sm:$0xff]  }
  0xe9   : > { %v368_v48 = vld [vmem:[%s18582_s14 + $0x8] sm:$0xff]  ;;  %v15778_v54 = vld [vmem:[#allocation5 + $0x1444] ss:$24 sps:$4 sm:$0xff]   ;;  %v15781_v58 = vld [vmem:[#allocation5 + $0x1440] ss:$24 sps:$4 sm:$0xff]   ;;  %s21447_s27 = scalar_lea.vmem [#allocation13], %s15599_s2 }
  0xea   : > { %9192 = vmatpush1.bf16.msra.mxu1 %v15732_v18  ;;  %v392_v49 = vld [vmem:[%s18582_s14 + $0xc8] sm:$0xff]  ;;  %v944_v50 = vmul.f32 0.70710677, %v368_v48  ;;  %v367_v60 = vld [vmem:[%s18582_s14] sm:$0xff]  ;;  %v656_v11 = vmul.f32 0.5, %v368_v48  ;;  %s15658_s8 = smul.u32 9216, %s18360_s25 }
  0xeb   : > { %9750 = vmatpush1.bf16.msra.mxu0 %v15733_v19  ;;  %9193 = vmatprep.subr.bf16.mxu1 %v15734_v20  ;;  %v968_v52 = vmul.f32 0.70710677, %v392_v49  ;;  %v380_v53 = vld [vmem:[%s18582_s14 + $0x68] sm:$0xff]  ;;  %v391_v63 = vld [vmem:[%s18582_s14 + $0xc0] sm:$0xff]  ;;  %v943_v0 = vmul.f32 0.70710677, %v367_v60 }
  0xec   : > { %9751 = vmatprep.subr.bf16.mxu0 %v15736_v21  ;;  %17432 = verf.f32 %v944_v50  ;;  %v404_v55 = vld [vmem:[%s18582_s14 + $0x128] sm:$0xff]  ;;  %v956_v56 = vmul.f32 0.70710677, %v380_v53  ;;  %v967_v1 = vmul.f32 0.70710677, %v391_v63  ;;  %v379_v2 = vld [vmem:[%s18582_s14 + $0x60] sm:$0xff]  ;;  %s21861_s7 = scalar_lea.hbm %s21920_s6, %s15658_s8 }
  0xed   : > { %17434 = verf.f32 %v968_v52  ;;  %v980_v59 = vmul.f32 0.70710677, %v404_v55  ;;  %v15782_v61 = vld [vmem:[#allocation5 + $0x274] ss:$24 sps:$4 sm:$0xff]   ;;  %v403_v3 = vld [vmem:[%s18582_s14 + $0x120] sm:$0xff]  ;;  %v680_v14 = vmul.f32 0.5, %v392_v49 }
  0xee   : > { %9194 = vmatpush1.bf16.msra.mxu1 %v15738_v22  ;;  %v15784_v62 = vld [vmem:[#allocation5 + $0x1474] ss:$24 sps:$4 sm:$0xff]   ;;  %17436 = verf.f32 %v956_v56  ;;  %v955_v4 = vmul.f32 0.70710677, %v379_v2  ;;  %v979_v5 = vmul.f32 0.70710677, %v403_v3 }
  0xef   : > { %9752 = vmatpush1.bf16.msra.mxu0 %v15739_v23  ;;  %9195 = vmatprep.subr.bf16.mxu1 %v15740_v24  ;;  %17438 = verf.f32 %v980_v59  ;;  %v15786_v6 = vld [vmem:[#allocation5 + $0x270] ss:$24 sps:$4 sm:$0xff]   ;;  %v15788_v8 = vld [vmem:[#allocation5 + $0x2a4] ss:$24 sps:$4 sm:$0xff]   ;;  %v15792_v10 = vld [vmem:[#allocation5 + $0x2a0] ss:$24 sps:$4 sm:$0xff]  }
  0xf0   : > { %9753 = vmatprep.subr.bf16.mxu0 %v15742_v25  ;;  %17440 = verf.f32 %v943_v0  ;;  %v15787_v7 = vld [vmem:[#allocation5 + $0x1470] ss:$24 sps:$4 sm:$0xff]   ;;  %v15790_v9 = vld [vmem:[#allocation5 + $0x14a4] ss:$24 sps:$4 sm:$0xff]   ;;  %v15793_v13 = vld [vmem:[#allocation5 + $0x14a0] ss:$24 sps:$4 sm:$0xff]  }
  0xf1   : > { %17442 = verf.f32 %v967_v1  ;;  %v15794_v16 = vld [vmem:[#allocation5 + $0x2d4] ss:$24 sps:$4 sm:$0xff]   ;;  %v668_v18 = vmul.f32 0.5, %v380_v53  ;;  %v692_v22 = vmul.f32 0.5, %v404_v55  ;;  %v15800_v50 = vld [vmem:[#allocation5 + $0x300] ss:$24 sps:$4 sm:$0xff]  }
  0xf2   : > { %9196 = vmatpush1.bf16.msra.mxu1 %v15744_v26  ;;  %17444 = verf.f32 %v955_v4  ;;  %v15796_v20 = vld [vmem:[#allocation5 + $0x14d4] ss:$24 sps:$4 sm:$0xff]   ;;  %v15798_v26 = vld [vmem:[#allocation5 + $0x2d0] ss:$24 sps:$4 sm:$0xff]   ;;  %s13427_s18 = sshll.u32 %s21447_s27, 4  ;;  %s13413_s0 = scalar_lea.sflag [#allocation4], %s18578_s9  ;;  %s21863_s18 = int_to_ptr.vmem [resolvable:$true] %s13427_s18 }
  0xf3   : > { %9754 = vmatpush1.bf16.msra.mxu0 %v15745_v27  ;;  %9197 = vmatprep.subr.bf16.mxu1 %v15746_v28  ;;  %17446 = verf.f32 %v979_v5  ;;  %v416_v48 = vld [vmem:[%s18582_s14 + $0x188] sm:$0xff]  ;;  %v439_v5 = vld [vmem:[%s18582_s14 + $0x240] sm:$0xff]  ;;  %s18205_s11 = scalar_lea.vmem %s21863_s18, 9216  ;;  %s18301_s12 = smov [#allocation13]  }
  0xf4   : > { %9755 = vmatprep.subr.bf16.mxu0 %v15748_v29  ;;  %v655_v29 = vmul.f32 0.5, %v367_v60  ;;  %v18625_v49 = vld [vmem:[%s18582_s14 + $0x248] sm:$0xff]  ;;  %v992_v55 = vmul.f32 0.70710677, %v416_v48  ;;  %p18206_p5 = scmp.ne.s32.totalorder %s21863_s18, %s18205_s11  ;;  %s18209_s13 = sshll.u32 %s18301_s12, 4  ;;  %s18210_s13 = int_to_ptr.vmem [resolvable:$false] %s18209_s13 }
  0xf5   : > { %v1016_v56 = vmul.f32 0.70710677, %v18625_v49  ;;  %v428_v59 = vld [vmem:[%s18582_s14 + $0x1e8] sm:$0xff]  ;;  %s18211_s4 = scalar_lea.vmem %s18210_s13, 18432  ;;  %p18212_p4 = scmp.lt.s32.totalorder %s21863_s18, %s18210_s13 }
  0xf6   : > { %9198 = vmatpush1.bf16.msra.mxu1 %v15750_v30  ;;  %v17433_v12 = vpop.eup %17432  ;;  %v452_v60 = vld [vmem:[%s18582_s14 + $0x2a8] sm:$0xff]  ;;  %17448 = verf.f32 %v992_v55  ;;  %p18207_p11 = pnand %p18206_p5, %p18491_p8  ;;  %p18213_p6 = scmp.lt.s32.totalorder %s18211_s4, %s18205_s11 }
  0xf7   : > { %9756 = vmatpush1.bf16.msra.mxu0 %v15751_v31  ;;  %9199 = vmatprep.subr.bf16.mxu1 %v15752_v32  ;;  %v17435_v15 = vpop.eup %17434  ;;  %v1520_v17 = vadd.f32 1.0, %v17433_v12  ;;  %v15799_v31 = vld [vmem:[#allocation5 + $0x14d0] ss:$24 sps:$4 sm:$0xff]   ;;  %17450 = verf.f32 %v1016_v56 }
  0xf8   : > { %9757 = vmatprep.subr.bf16.mxu0 %v15754_v33  ;;  %v17437_v19 = vpop.eup %17436  ;;  %v1544_v21 = vadd.f32 1.0, %v17435_v15  ;;  %v679_v33 = vmul.f32 0.5, %v391_v63  ;;  %v415_v63 = vld [vmem:[%s18582_s14 + $0x180] sm:$0xff]  ;;  %v15806_v1 = vld [vmem:[#allocation5 + $0x330] ss:$24 sps:$4 sm:$0xff]   ;;  %p18208_p2 = pneg %p18207_p11  ;;  %p18214_p0 = por %p18213_p6, %p18212_p4 }
  0xf9   : > { %v17439_v23 = vpop.eup %17438  ;;  %v1808_v24 = vmul.f32 %v1520_v17, %v656_v11  ;;  %v1532_v25 = vadd.f32 1.0, %v17437_v19  ;;  %v15809_v4 = vld [vmem:[#allocation5 + $0x1530] ss:$24 sps:$4 sm:$0xff]   ;;  %v15815_v15 = vld [vmem:[#allocation5 + $0x1560] ss:$24 sps:$4 sm:$0xff]  }
  0xfa   : > { %9200 = vmatpush1.bf16.msra.mxu1 %v15756_v34  ;;  %v1832_v27 = vmul.f32 %v1544_v21, %v680_v14  ;;  %v1556_v28 = vadd.f32 1.0, %v17439_v23  ;;  %v17441_v30 = vpop.eup %17440  ;;  %v15817_v14 = vld [vmem:[#allocation5 + $0x1564] ss:$24 sps:$4 sm:$0xff]   ;;  %v464_v17 = vld [vmem:[%s18582_s14 + $0x308] sm:$0xff]  ;;  %p18215_p1 = pnand %p18214_p0, %p18208_p2 }
  0xfb   : > { %9758 = vmatpush1.bf16.msra.mxu0 %v15757_v35  ;;  %9201 = vmatprep.subr.bf16.mxu1 %v15758_v36  ;;  %v1820_v32 = vmul.f32 %v1532_v25, %v668_v18  ;;  %v17443_v34 = vpop.eup %17442  ;;  %v15802_v36 = vld [vmem:[#allocation5 + $0x304] ss:$24 sps:$4 sm:$0xff]   ;;  %v488_v18 = vld [vmem:[%s18582_s14 + $0x3c8] sm:$0xff]  ;;  %v1040_v19 = vmul.f32 0.70710677, %v464_v17 }
  0xfc   : > { %9759 = vmatprep.subr.bf16.mxu0 %v15760_v37  ;;  %v18618_v35 = vpack.c.bf16 %v1832_v27, %v1808_v24  ;;  %v1844_v37 = vmul.f32 %v1556_v28, %v692_v22  ;;  %v15823_v21 = vld [vmem:[#allocation5 + $0x1594] ss:$24 sps:$4 sm:$0xff]   ;;  %v704_v22 = vmul.f32 0.5, %v416_v48  ;;  %v1064_v23 = vmul.f32 0.70710677, %v488_v18  ;;  %v18659_v48 = vld [vmem:[%s18582_s14 + $0x360] sm:$0xff] }
  0xfd   : > { %v18644_v24 = vld [vmem:[%s18582_s14 + $0x368] sm:$0xff]  ;;  %v15826_v25 = vld [vmem:[#allocation5 + $0x3c4] ss:$24 sps:$4 sm:$0xff]   ;;  %v716_v27 = vmul.f32 0.5, %v428_v59 }
  0xfe   : > { %9202 = vmatpush1.bf16.msra.mxu1 %v15762_v38  ;;  %v1519_v38 = vadd.f32 1.0, %v17441_v30  ;;  %9215 = vmatprep.mubr.bf16.mxu1 %v18618_v35  ;;  %v18648_v28 = vld [vmem:[%s18582_s14 + $0x428] sm:$0xff] }
  0xff   : > { %9760 = vmatpush1.bf16.msra.mxu0 %v15763_v39  ;;  %9203 = vmatprep.subr.bf16.mxu1 %v15764_v40  ;;  %v667_v39 = vmul.f32 0.5, %v379_v2  ;;  %v17445_v40 = vpop.eup %17444  ;;  %v15811_v2 = vld [vmem:[#allocation5 + $0x1534] ss:$24 sps:$4 sm:$0xff]  }
 0x100   : > { %9761 = vmatprep.subr.bf16.mxu0 %v15766_v41  ;;  %v15805_v41 = vld [vmem:[#allocation5 + $0x1504] ss:$24 sps:$4 sm:$0xff]  }
 0x102   : > { %9204 = vmatpush1.bf16.msra.mxu1 %v15768_v42  ;;  %v1543_v42 = vadd.f32 1.0, %v17443_v34  ;;  %v18653_v34 = vld [vmem:[%s18582_s14 + $0x300] sm:$0xff] }
 0x103   : > { %9762 = vmatpush1.bf16.msra.mxu0 %v15769_v43  ;;  %9205 = vmatprep.subr.bf16.mxu1 %v15770_v44  ;;  %v691_v43 = vmul.f32 0.5, %v403_v3  ;;  %v17447_v44 = vpop.eup %17446  ;;  %v1028_v3 = vmul.f32 0.70710677, %v452_v60 }
 0x104   : > { %9763 = vmatprep.subr.bf16.mxu0 %v15772_v45  ;;  %v18621_v45 = vpack.c.bf16 %v1844_v37, %v1820_v32  ;;  %v1555_v52 = vadd.f32 1.0, %v17447_v44  ;;  %v17449_v30 = vpop.eup %17448  ;;  %v740_v32 = vmul.f32 0.5, %v452_v60  ;;  %v15829_v37 = vld [vmem:[#allocation5 + $0x15c4] ss:$24 sps:$4 sm:$0xff]  }
 0x105   : > { %v18668_v60 = vld [vmem:[%s18582_s14 + $0x420] sm:$0xff] }
 0x106   : > { %9206 = vmatpush1.bf16.msra.mxu1 %v15774_v46  ;;  %22240 = vst [vmem:[#allocation20_spill] sm:$0xff] %v18621_v45  ;;  %v1807_v46 = vmul.f32 %v1519_v38, %v655_v29  ;;  %9773 = vmatprep.mubr.bf16.mxu0 %v18621_v45  ;;  %v1052_v29 = vmul.f32 0.70710677, %v18644_v24  ;;  %v1568_v38 = vadd.f32 1.0, %v17449_v30 }
 0x107   : > { %9764 = vmatpush1.bf16.msra.mxu0 %v15775_v47  ;;  %9207 = vmatprep.subr.bf16.mxu1 %v15776_v51  ;;  %v1531_v47 = vadd.f32 1.0, %v17445_v40  ;;  %v1831_v51 = vmul.f32 %v1543_v42, %v679_v33  ;;  %v1076_v33 = vmul.f32 0.70710677, %v18648_v28  ;;  %v727_v40 = vmul.f32 0.5, %v439_v5 }
 0x108   : > { %9765 = vmatprep.subr.bf16.mxu0 %v15778_v54  ;;  %v15808_v54 = vld [vmem:[#allocation5 + $0x334] ss:$24 sps:$4 sm:$0xff]  }
 0x109   : > { %v1819_v53 = vmul.f32 %v1531_v47, %v667_v39  ;;  %v703_v39 = vmul.f32 0.5, %v415_v63 }
 0x10a   : > { %9208 = vmatpush1.bf16.msra.mxu1 %v15780_v57  ;;  %v18629_v57 = vpack.c.bf16 %v1831_v51, %v1807_v46 }
 0x10b   : > { %9766 = vmatpush1.bf16.msra.mxu0 %v15781_v58  ;;  %9209 = vmatprep.subr.bf16.mxu1 %v15782_v61  ;;  %v1843_v58 = vmul.f32 %v1555_v52, %v691_v43  ;;  %v15803_v61 = vld [vmem:[#allocation5 + $0x1500] ss:$24 sps:$4 sm:$0xff]   ;;  %v1039_v52 = vmul.f32 0.70710677, %v18653_v34 }
 0x10c   : > { %9767 = vmatprep.subr.bf16.mxu0 %v15784_v62  ;;  %v1004_v62 = vmul.f32 0.70710677, %v428_v59  ;;  %v15824_v43 = vld [vmem:[#allocation5 + $0x3c0] ss:$24 sps:$4 sm:$0xff]   ;;  %v18665_v59 = vmul.f32 0.5, %v488_v18 }
 0x10d   : > { %v18635_v0 = vpack.c.bf16 %v1843_v58, %v1819_v53  ;;  %v18663_v58 = vmul.f32 0.5, %v464_v17 }
 0x10e   : > { %9210 = vmatpush1.bf16.msra.mxu1 %v15786_v6  ;;  %17452 = verf.f32 %v1004_v62  ;;  %v991_v6 = vmul.f32 0.70710677, %v415_v63  ;;  %v15832_v62 = vld [vmem:[#allocation5 + $0x3f4] ss:$24 sps:$4 sm:$0xff]  }
 0x10f   : > { %9768 = vmatpush1.bf16.msra.mxu0 %v15787_v7  ;;  %9211 = vmatprep.subr.bf16.mxu1 %v15788_v8  ;;  %22241 = vst [vmem:[#allocation21_spill] sm:$0xff] %v18635_v0  ;;  %v427_v7 = vld [vmem:[%s18582_s14 + $0x1e0] sm:$0xff]  ;;  %17454 = verf.f32 %v1028_v3 }
 0x110   : > { %9769 = vmatprep.subr.bf16.mxu0 %v15790_v9  ;;  %v451_v8 = vld [vmem:[%s18582_s14 + $0x2a0] sm:$0xff]  ;;  %17456 = verf.f32 %v991_v6  ;;  %v1003_v11 = vmul.f32 0.70710677, %v427_v7  ;;  %v715_v46 = vmul.f32 0.5, %v427_v7 }
 0x111   : > { %v15814_v9 = vld [vmem:[#allocation5 + $0x364] ss:$24 sps:$4 sm:$0xff]   ;;  %v1027_v12 = vmul.f32 0.70710677, %v451_v8  ;;  %v739_v47 = vmul.f32 0.5, %v451_v8 }
 0x112   : > { %9212 = vmatpush1.bf16.msra.mxu1 %v15792_v10  ;;  %v1015_v10 = vmul.f32 0.70710677, %v439_v5  ;;  %v15835_v5 = vld [vmem:[#allocation5 + $0x15f4] ss:$24 sps:$4 sm:$0xff]  }
 0x113   : > { %9770 = vmatpush1.bf16.msra.mxu0 %v15793_v13  ;;  %9213 = vmatprep.subr.bf16.mxu1 %v15794_v16  ;;  %v15812_v13 = vld [vmem:[#allocation5 + $0x360] ss:$24 sps:$4 sm:$0xff]   ;;  %v15820_v16 = vld [vmem:[#allocation5 + $0x394] ss:$24 sps:$4 sm:$0xff]  }
 0x114   : > { %9771 = vmatprep.subr.bf16.mxu0 %v15796_v20  ;;  %17458 = verf.f32 %v1015_v10  ;;  %v15818_v20 = vld [vmem:[#allocation5 + $0x390] ss:$24 sps:$4 sm:$0xff]  }
 0x115   : > { %17460 = verf.f32 %v1003_v11 }
 0x116   : > { %9214 = vmatpush1.bf16.msra.mxu1 %v15798_v26  ;;  %17462 = verf.f32 %v1027_v12  ;;  %v728_v26 = vmul.f32 0.5, %v18625_v49 }
 0x117   : > { %9772 = vmatpush1.bf16.msra.mxu0 %v15799_v31  ;;  %9276 = vmatprep.subr.bf16.mxu1 %v15802_v36  ;;  %17464 = verf.f32 %v1040_v19  ;;  %v15821_v31 = vld [vmem:[#allocation5 + $0x1590] ss:$24 sps:$4 sm:$0xff]   ;;  %v17451_v36 = vpop.eup %17450 }
 0x118   : > { %9834 = vmatprep.subr.bf16.mxu0 %v15805_v41  ;;  %17466 = verf.f32 %v1064_v23  ;;  %v18656_v41 = vld [vmem:[%s18582_s14 + $0x3c0] sm:$0xff]  ;;  %v17453_v42 = vpop.eup %17452  ;;  %v1592_v44 = vadd.f32 1.0, %v17451_v36  ;;  %v18694_v36 = vld [vmem:[%s18582_s14 + $0x5a8] sm:$0xff] }
 0x119   : > { %9216 = vmatmul.mubr.bf16.vlgmr.msra.gmra.mrb[0].mxu1 %v18629_v57  ;;  %17468 = verf.f32 %v1052_v29  ;;  %v17455_v49 = vpop.eup %17454  ;;  %v1580_v51 = vadd.f32 1.0, %v17453_v42  ;;  %v1063_v53 = vmul.f32 0.70710677, %v18656_v41  ;;  %v15836_v29 = vld [vmem:[#allocation5 + $0x420] ss:$24 sps:$4 sm:$0xff]  }
 0x11a   : > { %9277 = vmatpush1.bf16.msra.mxu1 %v15800_v50  ;;  %9774 = vmatmul.mubr.bf16.vlgmr.msra.gmra.mrb[0].mxu0 %v18635_v0  ;;  %17470 = verf.f32 %v1076_v33  ;;  %v1856_v50 = vmul.f32 %v1568_v38, %v704_v22  ;;  %v1880_v55 = vmul.f32 %v1592_v44, %v728_v26  ;;  %v1604_v56 = vadd.f32 1.0, %v17455_v49  ;;  %v15838_v22 = vld [vmem:[#allocation5 + $0x424] ss:$24 sps:$4 sm:$0xff]   ;;  %v18691_v33 = vld [vmem:[%s18582_s14 + $0x4e8] sm:$0xff]  ;;  %v15839_v44 = vld [vmem:[#allocation5 + $0x1620] ss:$24 sps:$4 sm:$0xff]  }
 0x11b   : > { %9278 = vmatprep.subr.bf16.mxu1 %v15808_v54  ;;  %9835 = vmatpush1.bf16.msra.mxu0 %v15803_v61  ;;  %v17457_v54 = vpop.eup %17456  ;;  %v1868_v63 = vmul.f32 %v1580_v51, %v716_v27  ;;  %17472 = verf.f32 %v1039_v52  ;;  %v18699_v42 = vld [vmem:[%s18582_s14 + $0x480] sm:$0xff]  ;;  %v1100_v52 = vmul.f32 0.70710677, %v18691_v33 }
 0x11c   : > { %9836 = vmatprep.subr.bf16.mxu0 %v15811_v2  ;;  %v1051_v2 = vmul.f32 0.70710677, %v18659_v48  ;;  %v18671_v6 = vpack.c.bf16 %v1880_v55, %v1856_v50  ;;  %v1892_v7 = vmul.f32 %v1604_v56, %v740_v32  ;;  %17474 = verf.f32 %v1063_v53  ;;  %v18705_v51 = vld [vmem:[%s18582_s14 + $0x540] sm:$0xff] }
 0x11d   : > { %v1124_v53 = vmul.f32 0.70710677, %v18694_v36  ;;  %v763_v56 = vmul.f32 0.5, %v18659_v48  ;;  %v15845_v48 = vld [vmem:[#allocation5 + $0x1650] ss:$24 sps:$4 sm:$0xff]  }
 0x11e   : > { %9279 = vmatpush1.bf16.msra.mxu1 %v15806_v1  ;;  %v17459_v61 = vpop.eup %17458  ;;  %v1567_v1 = vadd.f32 1.0, %v17457_v54  ;;  %17476 = verf.f32 %v1051_v2  ;;  %9225 = vmatprep.mubr.bf16.mxu1 %v18671_v6  ;;  %v18681_v17 = vpack.c.bf16 %v1892_v7, %v1868_v63  ;;  %v15842_v54 = vld [vmem:[#allocation5 + $0x450] ss:$24 sps:$4 sm:$0xff]   ;;  %v1111_v2 = vmul.f32 0.70710677, %v18705_v51 }
 0x11f   : > { %9280 = vmatprep.subr.bf16.mxu1 %v15814_v9  ;;  %9837 = vmatpush1.bf16.msra.mxu0 %v15809_v4  ;;  %v17461_v3 = vpop.eup %17460  ;;  %v15827_v4 = vld [vmem:[#allocation5 + $0x15c0] ss:$24 sps:$4 sm:$0xff]   ;;  %v1591_v8 = vadd.f32 1.0, %v17459_v61  ;;  %v18674_v9 = vld [vmem:[%s18582_s14 + $0x488] sm:$0xff]  ;;  %v787_v7 = vmul.f32 0.5, %v18668_v60 }
 0x120   : > { %9838 = vmatprep.subr.bf16.mxu0 %v15817_v14  ;;  %v17463_v10 = vpop.eup %17462  ;;  %v1855_v11 = vmul.f32 %v1567_v1, %v703_v39  ;;  %v1579_v12 = vadd.f32 1.0, %v17461_v3  ;;  %v18678_v14 = vld [vmem:[%s18582_s14 + $0x548] sm:$0xff]  ;;  %22242 = vst [vmem:[#allocation22_spill] sm:$0xff] %v18681_v17  ;;  %v1088_v26 = vmul.f32 0.70710677, %v18674_v9  ;;  %9783 = vmatprep.mubr.bf16.mxu0 %v18681_v17  ;;  %v751_v39 = vmul.f32 0.5, %v18653_v34 }
 0x121   : > { %v1879_v18 = vmul.f32 %v1591_v8, %v727_v40  ;;  %v1603_v19 = vadd.f32 1.0, %v17463_v10  ;;  %v1112_v32 = vmul.f32 0.70710677, %v18678_v14  ;;  %v775_v40 = vmul.f32 0.5, %v18656_v41  ;;  %v18714_v61 = vld [vmem:[%s18582_s14 + $0x4e0] sm:$0xff] }
 0x122   : > { %9281 = vmatpush1.bf16.msra.mxu1 %v15812_v13  ;;  %v1075_v13 = vmul.f32 0.70710677, %v18668_v60  ;;  %v1867_v23 = vmul.f32 %v1579_v12, %v715_v46  ;;  %v18721_v3 = vld [vmem:[%s18582_s14 + $0x5a0] sm:$0xff]  ;;  %v800_v8 = vmul.f32 0.5, %v18674_v9 }
 0x123   : > { %9282 = vmatprep.subr.bf16.mxu1 %v15820_v16  ;;  %9839 = vmatpush1.bf16.msra.mxu0 %v15815_v15  ;;  %v15830_v15 = vld [vmem:[#allocation5 + $0x3f0] ss:$24 sps:$4 sm:$0xff]   ;;  %v18687_v30 = vpack.c.bf16 %v1879_v18, %v1855_v11  ;;  %v15850_v11 = vld [vmem:[#allocation5 + $0x484] ss:$24 sps:$4 sm:$0xff]   ;;  %v15848_v18 = vld [vmem:[#allocation5 + $0x480] ss:$24 sps:$4 sm:$0xff]  }
 0x124   : > { %9840 = vmatprep.subr.bf16.mxu0 %v15823_v21  ;;  %v15833_v16 = vld [vmem:[#allocation5 + $0x15f0] ss:$24 sps:$4 sm:$0xff]   ;;  %v17465_v21 = vpop.eup %17464  ;;  %17478 = verf.f32 %v1075_v13  ;;  %v1123_v9 = vmul.f32 0.70710677, %v18721_v3  ;;  %v16021_v0 = vld [vmem:[#allocation5 + $0x1bc4] ss:$24 sps:$4 sm:$0xff]  }
 0x125   : > { %v17467_v27 = vpop.eup %17466  ;;  %17480 = verf.f32 %v1088_v26  ;;  %9226 = vmatmul.mubr.bf16.gmra.mrb[4].mxu1 %v18687_v30  ;;  %v824_v26 = vmul.f32 0.5, %v18678_v14 }
 0x126   : > { %9283 = vmatpush1.bf16.msra.mxu1 %v15818_v20  ;;  %v764_v20 = vmul.f32 0.5, %v18644_v24  ;;  %v1891_v24 = vmul.f32 %v1603_v19, %v739_v47  ;;  %v1640_v38 = vadd.f32 1.0, %v17467_v27  ;;  %v15844_v47 = vld [vmem:[#allocation5 + $0x454] ss:$24 sps:$4 sm:$0xff]   ;;  %17482 = verf.f32 %v1112_v32 }
 0x127   : > { %9284 = vmatprep.subr.bf16.mxu1 %v15826_v25  ;;  %9841 = vmatpush1.bf16.msra.mxu0 %v15821_v31  ;;  %v788_v25 = vmul.f32 0.5, %v18648_v28  ;;  %v1616_v31 = vadd.f32 1.0, %v17465_v21  ;;  %v17469_v28 = vpop.eup %17468  ;;  %17484 = verf.f32 %v1100_v52  ;;  %v18739_v27 = vmul.f32 0.5, %v18691_v33  ;;  %v18743_v32 = vld [vmem:[%s18582_s14 + $0x668] sm:$0xff]  ;;  %v18760_v52 = vld [vmem:[%s18582_s14 + $0x6c0] sm:$0xff] }
 0x128   : > { %9842 = vmatprep.subr.bf16.mxu0 %v15829_v37  ;;  %v15841_v37 = vld [vmem:[#allocation5 + $0x1624] ss:$24 sps:$4 sm:$0xff]   ;;  %v18701_v46 = vpack.c.bf16 %v1891_v24, %v1867_v23  ;;  %v1628_v50 = vadd.f32 1.0, %v17469_v28  ;;  %v1928_v34 = vmul.f32 %v1640_v38, %v18665_v59  ;;  %v15847_v59 = vld [vmem:[#allocation5 + $0x1654] ss:$24 sps:$4 sm:$0xff]   ;;  %17486 = verf.f32 %v1124_v53 }
 0x129   : > { %v1904_v49 = vmul.f32 %v1616_v31, %v18663_v58  ;;  %v1087_v58 = vmul.f32 0.70710677, %v18699_v42  ;;  %v18746_v28 = vld [vmem:[%s18582_s14 + $0x728] sm:$0xff]  ;;  %v15851_v38 = vld [vmem:[#allocation5 + $0x1680] ss:$24 sps:$4 sm:$0xff]   ;;  %v836_v33 = vmul.f32 0.5, %v18694_v36 }
 0x12a   : > { %9285 = vmatpush1.bf16.msra.mxu1 %v15824_v43  ;;  %v17471_v43 = vpop.eup %17470  ;;  %22243 = vst [vmem:[#allocation23_spill] sm:$0xff] %v18701_v46  ;;  %v1916_v55 = vmul.f32 %v1628_v50, %v764_v20  ;;  %9784 = vmatmul.mubr.bf16.gmra.mrb[4].mxu0 %v18701_v46  ;;  %v18734_v20 = vld [vmem:[%s18582_s14 + $0x6c8] sm:$0xff]  ;;  %v823_v53 = vmul.f32 0.5, %v18705_v51  ;;  %v19243_v46 = vld [vmem:[%s18582_s14 + $0x380] sm:$0xff] }
 0x12b   : > { %9286 = vmatprep.subr.bf16.mxu1 %v15832_v62  ;;  %9843 = vmatpush1.bf16.msra.mxu0 %v15827_v4  ;;  %v1652_v41 = vadd.f32 1.0, %v17471_v43  ;;  %v17473_v62 = vpop.eup %17472  ;;  %v18717_v63 = vpack.c.bf16 %v1928_v34, %v1904_v49  ;;  %17488 = verf.f32 %v1087_v58  ;;  %v15859_v49 = vld [vmem:[#allocation5 + $0x16b4] ss:$24 sps:$4 sm:$0xff]   ;;  %v1148_v34 = vmul.f32 0.70710677, %v18743_v32 }
 0x12c   : > { %9844 = vmatprep.subr.bf16.mxu0 %v15835_v5  ;;  %v17475_v4 = vpop.eup %17474  ;;  %v1615_v5 = vadd.f32 1.0, %v17473_v62  ;;  %17490 = verf.f32 %v1111_v2  ;;  %v811_v58 = vmul.f32 0.5, %v18714_v61  ;;  %v18769_v62 = vld [vmem:[%s18582_s14 + $0x660] sm:$0xff]  ;;  %v15857_v2 = vld [vmem:[#allocation5 + $0x16b0] ss:$24 sps:$4 sm:$0xff]  }
 0x12d   : > { %v1940_v1 = vmul.f32 %v1652_v41, %v788_v25  ;;  %v17477_v10 = vpop.eup %17476  ;;  %9235 = vmatprep.mubr.bf16.mxu1 %v18717_v63  ;;  %v1639_v13 = vadd.f32 1.0, %v17475_v4  ;;  %v15856_v25 = vld [vmem:[#allocation5 + $0x4b4] ss:$24 sps:$4 sm:$0xff]   ;;  %v18757_v41 = vld [vmem:[%s18582_s14 + $0x600] sm:$0xff] }
 0x12e   : > { %9287 = vmatpush1.bf16.msra.mxu1 %v15830_v15  ;;  %v1099_v15 = vmul.f32 0.70710677, %v18714_v61  ;;  %v1903_v60 = vmul.f32 %v1615_v5, %v751_v39  ;;  %v1627_v19 = vadd.f32 1.0, %v17477_v10  ;;  %v17479_v21 = vpop.eup %17478  ;;  %v18752_v39 = vmul.f32 0.5, %v18699_v42  ;;  %v15862_v42 = vld [vmem:[#allocation5 + $0x4e4] ss:$24 sps:$4 sm:$0xff]  }
 0x12f   : > { %9288 = vmatprep.subr.bf16.mxu1 %v15838_v22  ;;  %9845 = vmatpush1.bf16.msra.mxu0 %v15833_v16  ;;  %v18726_v12 = vpack.c.bf16 %v1940_v1, %v1916_v55  ;;  %v18730_v16 = vld [vmem:[%s18582_s14 + $0x608] sm:$0xff]  ;;  %v15853_v22 = vld [vmem:[#allocation5 + $0x1684] ss:$24 sps:$4 sm:$0xff]   ;;  %v1927_v23 = vmul.f32 %v1639_v13, %v775_v40  ;;  %v1160_v40 = vmul.f32 0.70710677, %v18734_v20  ;;  %v835_v61 = vmul.f32 0.5, %v18721_v3 }
 0x130   : > { %9846 = vmatprep.subr.bf16.mxu0 %v15841_v37  ;;  %17492 = verf.f32 %v1099_v15  ;;  %v1915_v24 = vmul.f32 %v1627_v19, %v763_v56  ;;  %v1136_v31 = vmul.f32 0.70710677, %v18730_v16  ;;  %v17481_v37 = vpop.eup %17480  ;;  %v1135_v51 = vmul.f32 0.70710677, %v18757_v41 }
 0x131   : > { %22244 = vst [vmem:[#allocation24_spill] sm:$0xff] %v18726_v12  ;;  %9793 = vmatprep.mubr.bf16.mxu0 %v18726_v12  ;;  %17494 = verf.f32 %v1123_v9  ;;  %v18748_v14 = vpack.c.bf16 %v1927_v23, %v1903_v60  ;;  %v17483_v43 = vpop.eup %17482  ;;  %v1664_v50 = vadd.f32 1.0, %v17481_v37  ;;  %v18779_v10 = vmul.f32 0.5, %v18730_v16  ;;  %v15865_v60 = vld [vmem:[#allocation5 + $0x16e4] ss:$24 sps:$4 sm:$0xff]   ;;  %v18788_v23 = vld [vmem:[%s18582_s14 + $0x788] sm:$0xff] }
 0x132   : > { %9289 = vmatpush1.bf16.msra.mxu1 %v15836_v29  ;;  %v1651_v29 = vadd.f32 1.0, %v17479_v21  ;;  %17496 = verf.f32 %v1136_v31  ;;  %v1688_v36 = vadd.f32 1.0, %v17483_v43  ;;  %v17485_v1 = vpop.eup %17484  ;;  %v15868_v21 = vld [vmem:[#allocation5 + $0x514] ss:$24 sps:$4 sm:$0xff]   ;;  %v860_v31 = vmul.f32 0.5, %v18743_v32 }
 0x133   : > { %9290 = vmatprep.subr.bf16.mxu1 %v15844_v47  ;;  %9847 = vmatpush1.bf16.msra.mxu0 %v15839_v44  ;;  %v15854_v47 = vld [vmem:[#allocation5 + $0x4b0] ss:$24 sps:$4 sm:$0xff]   ;;  %17498 = verf.f32 %v1160_v40  ;;  %v1952_v56 = vmul.f32 %v1664_v50, %v800_v8  ;;  %v17487_v5 = vpop.eup %17486  ;;  %v1676_v8 = vadd.f32 1.0, %v17485_v1  ;;  %v15871_v43 = vld [vmem:[#allocation5 + $0x1714] ss:$24 sps:$4 sm:$0xff]  }
 0x134   : > { %9848 = vmatprep.subr.bf16.mxu0 %v15847_v59  ;;  %v1939_v44 = vmul.f32 %v1651_v29, %v787_v7  ;;  %9236 = vmatmul.mubr.bf16.gmra.mrb[8].mxu1 %v18748_v14  ;;  %17500 = verf.f32 %v1148_v34  ;;  %v18772_v59 = vld [vmem:[%s18582_s14 + $0x720] sm:$0xff]  ;;  %v1976_v4 = vmul.f32 %v1688_v36, %v824_v26  ;;  %v15866_v40 = vld [vmem:[#allocation5 + $0x510] ss:$24 sps:$4 sm:$0xff]   ;;  %v1184_v32 = vmul.f32 0.70710677, %v18788_v23 }
 0x135   : > { %v15860_v7 = vld [vmem:[#allocation5 + $0x4e0] ss:$24 sps:$4 sm:$0xff]   ;;  %v17489_v13 = vpop.eup %17488  ;;  %v1171_v19 = vmul.f32 0.70710677, %v18772_v59  ;;  %v1964_v3 = vmul.f32 %v1676_v8, %v18739_v27  ;;  %v18793_v27 = vld [vmem:[%s18582_s14 + $0x848] sm:$0xff] }
 0x136   : > { %9291 = vmatpush1.bf16.msra.mxu1 %v15842_v54  ;;  %v1172_v54 = vmul.f32 0.70710677, %v18746_v28  ;;  %v18765_v55 = vpack.c.bf16 %v1939_v44, %v1915_v24  ;;  %v18782_v15 = vpack.c.bf16 %v1976_v4, %v1952_v56  ;;  %v17491_v9 = vpop.eup %17490  ;;  %v1663_v16 = vadd.f32 1.0, %v17489_v13  ;;  %v15863_v29 = vld [vmem:[#allocation5 + $0x16e0] ss:$24 sps:$4 sm:$0xff]   ;;  %v18801_v50 = vld [vmem:[%s18582_s14 + $0x7e8] sm:$0xff] }
 0x137   : > { %9292 = vmatprep.subr.bf16.mxu1 %v15850_v11  ;;  %9849 = vmatpush1.bf16.msra.mxu0 %v15845_v48  ;;  %v1159_v48 = vmul.f32 0.70710677, %v18760_v52  ;;  %v1147_v11 = vmul.f32 0.70710677, %v18769_v62  ;;  %v1687_v24 = vadd.f32 1.0, %v17491_v9  ;;  %v884_v44 = vmul.f32 0.5, %v18746_v28 }
 0x138   : > { %9850 = vmatprep.subr.bf16.mxu0 %v15853_v22  ;;  %22245 = vst [vmem:[#allocation25_spill] sm:$0xff] %v18765_v55  ;;  %17502 = verf.f32 %v1172_v54  ;;  %9794 = vmatmul.mubr.bf16.gmra.mrb[8].mxu0 %v18765_v55  ;;  %v872_v22 = vmul.f32 0.5, %v18734_v20  ;;  %v1951_v20 = vmul.f32 %v1663_v16, %v18752_v39  ;;  %v18804_v34 = vld [vmem:[%s18582_s14 + $0x8a8] sm:$0xff]  ;;  %v18808_v28 = vmul.f32 0.5, %v18760_v52  ;;  %v15872_v13 = vld [vmem:[#allocation5 + $0x540] ss:$24 sps:$4 sm:$0xff]  }
 0x139   : > { %17504 = verf.f32 %v1135_v51  ;;  %9245 = vmatprep.mubr.bf16.mxu1 %v18782_v15  ;;  %v1208_v54 = vmul.f32 0.70710677, %v18793_v27  ;;  %v15874_v51 = vld [vmem:[#allocation5 + $0x544] ss:$24 sps:$4 sm:$0xff]   ;;  %v1196_v52 = vmul.f32 0.70710677, %v18801_v50 }
 0x13a   : > { %9293 = vmatpush1.bf16.msra.mxu1 %v15848_v18  ;;  %v1700_v18 = vadd.f32 1.0, %v17487_v5  ;;  %17506 = verf.f32 %v1159_v48  ;;  %v1220_v5 = vmul.f32 0.70710677, %v18804_v34  ;;  %v883_v16 = vmul.f32 0.5, %v18772_v59 }
 0x13b   : > { %9294 = vmatprep.subr.bf16.mxu1 %v15856_v25  ;;  %9851 = vmatpush1.bf16.msra.mxu0 %v15851_v38  ;;  %v17493_v25 = vpop.eup %17492  ;;  %17508 = verf.f32 %v1147_v11 }
 0x13c   : > { %9852 = vmatprep.subr.bf16.mxu0 %v15859_v49  ;;  %v1988_v26 = vmul.f32 %v1700_v18, %v836_v33  ;;  %v17495_v37 = vpop.eup %17494  ;;  %v1675_v38 = vadd.f32 1.0, %v17493_v25  ;;  %17510 = verf.f32 %v1171_v19  ;;  %v859_v19 = vmul.f32 0.5, %v18769_v62  ;;  %v18829_v25 = vld [vmem:[%s18582_s14 + $0x7e0] sm:$0xff] }
 0x13d   : > { %v1699_v49 = vadd.f32 1.0, %v17495_v37  ;;  %v17497_v36 = vpop.eup %17496  ;;  %17512 = verf.f32 %v1184_v32  ;;  %v1195_v32 = vmul.f32 0.70710677, %v18829_v25 }
 0x13e   : > { %9295 = vmatpush1.bf16.msra.mxu1 %v15854_v47  ;;  %v18797_v33 = vpack.c.bf16 %v1988_v26, %v1964_v3  ;;  %v1975_v47 = vmul.f32 %v1687_v24, %v823_v53  ;;  %v1963_v39 = vmul.f32 %v1675_v38, %v811_v58  ;;  %v17499_v53 = vpop.eup %17498  ;;  %v1712_v4 = vadd.f32 1.0, %v17497_v36  ;;  %v18815_v58 = vld [vmem:[%s18582_s14 + $0x780] sm:$0xff]  ;;  %v15883_v38 = vld [vmem:[#allocation5 + $0x1774] ss:$24 sps:$4 sm:$0xff]   ;;  %v18843_v36 = vld [vmem:[%s18582_s14 + $0x18] sm:$0xff] }
 0x13f   : > { %9296 = vmatprep.subr.bf16.mxu1 %v15862_v42  ;;  %9853 = vmatpush1.bf16.msra.mxu0 %v15857_v2  ;;  %v847_v42 = vmul.f32 0.5, %v18757_v41  ;;  %v1987_v1 = vmul.f32 %v1699_v49, %v835_v61  ;;  %v15869_v2 = vld [vmem:[#allocation5 + $0x1710] ss:$24 sps:$4 sm:$0xff]   ;;  %v17501_v41 = vpop.eup %17500  ;;  %v1736_v48 = vadd.f32 1.0, %v17499_v53  ;;  %17514 = verf.f32 %v1208_v54  ;;  %v18849_v53 = vld [vmem:[%s18582_s14 + $0xd8] sm:$0xff] }
 0x140   : > { %22246 = vst [vmem:[#allocation26_spill] sm:$0xff] %v18797_v33  ;;  %9854 = vmatprep.subr.bf16.mxu0 %v15865_v60  ;;  %9803 = vmatprep.mubr.bf16.mxu0 %v18797_v33  ;;  %v18812_v56 = vpack.c.bf16 %v1975_v47, %v1951_v20  ;;  %v2000_v11 = vmul.f32 %v1712_v4, %v18779_v10  ;;  %v1724_v18 = vadd.f32 1.0, %v17501_v41  ;;  %v15877_v60 = vld [vmem:[#allocation5 + $0x1744] ss:$24 sps:$4 sm:$0xff]   ;;  %17516 = verf.f32 %v1196_v52  ;;  %v15881_v41 = vld [vmem:[#allocation5 + $0x1770] ss:$24 sps:$4 sm:$0xff]  }
 0x141   : > { %v18823_v61 = vpack.c.bf16 %v1987_v1, %v1963_v39  ;;  %v2024_v9 = vmul.f32 %v1736_v48, %v872_v22  ;;  %17518 = verf.f32 %v1220_v5  ;;  %v1183_v62 = vmul.f32 0.70710677, %v18815_v58  ;;  %v18858_v5 = vld [vmem:[%s18582_s14 + $0x78] sm:$0xff]  ;;  %v19131_v33 = vld [vmem:[%s18582_s14 + $0xe8] sm:$0xff] }
 0x142   : > { %9297 = vmatpush1.bf16.msra.mxu1 %v15860_v7  ;;  %v18820_v7 = vld [vmem:[%s18582_s14 + $0x840] sm:$0xff]  ;;  %v17503_v8 = vpop.eup %17502  ;;  %v2012_v10 = vmul.f32 %v1724_v18, %v860_v31  ;;  %v920_v49 = vmul.f32 0.5, %v18793_v27  ;;  %v932_v48 = vmul.f32 0.5, %v18804_v34  ;;  %v946_v52 = vmul.f32 0.70710677, %v18843_v36 }
 0x143   : > { %9298 = vmatprep.subr.bf16.mxu1 %v15868_v21  ;;  %9246 = vmatmul.mubr.bf16.gmra.mrb[12].mxu1 %v18812_v56  ;;  %22247 = vst [vmem:[#allocation27_spill] sm:$0xff] %v18823_v61  ;;  %v1748_v3 = vadd.f32 1.0, %v17503_v8  ;;  %v15880_v21 = vld [vmem:[#allocation5 + $0x574] ss:$24 sps:$4 sm:$0xff]   ;;  %v17505_v26 = vpop.eup %17504  ;;  %v1207_v22 = vmul.f32 0.70710677, %v18820_v7  ;;  %v18834_v37 = vpack.c.bf16 %v2024_v9, %v2000_v11  ;;  %17520 = verf.f32 %v1183_v62 }
 0x144   : > { %9855 = vmatpush1.bf16.msra.mxu0 %v15863_v29  ;;  %v15875_v29 = vld [vmem:[#allocation5 + $0x1740] ss:$24 sps:$4 sm:$0xff]   ;;  %v17507_v24 = vpop.eup %17506  ;;  %v1711_v20 = vadd.f32 1.0, %v17505_v26  ;;  %v970_v18 = vmul.f32 0.70710677, %v18849_v53  ;;  %v18869_v26 = vld [vmem:[%s18582_s14 + $0x10] sm:$0xff] }
 0x145   : > { %9856 = vmatprep.subr.bf16.mxu0 %v15871_v43  ;;  %9804 = vmatmul.mubr.bf16.gmra.mrb[12].mxu0 %v18823_v61  ;;  %v2036_v59 = vmul.f32 %v1748_v3, %v884_v44  ;;  %v18838_v43 = vld [vmem:[%s18582_s14 + $0x8a0] sm:$0xff]  ;;  %v17509_v47 = vpop.eup %17508  ;;  %v1735_v31 = vadd.f32 1.0, %v17507_v24  ;;  %17522 = verf.f32 %v1207_v22  ;;  %v895_v3 = vmul.f32 0.5, %v18815_v58  ;;  %v18876_v62 = vld [vmem:[%s18582_s14 + $0xd0] sm:$0xff] }
 0x146   : > { %9299 = vmatpush1.bf16.msra.mxu1 %v15866_v40  ;;  %v896_v40 = vmul.f32 0.5, %v18788_v23  ;;  %v17511_v39 = vpop.eup %17510  ;;  %9255 = vmatprep.mubr.bf16.mxu1 %v18834_v37  ;;  %v1999_v23 = vmul.f32 %v1711_v20, %v847_v42  ;;  %v1723_v54 = vadd.f32 1.0, %v17509_v47  ;;  %v1219_v4 = vmul.f32 0.70710677, %v18838_v43  ;;  %v15889_v9 = vld [vmem:[#allocation5 + $0x17a4] ss:$24 sps:$4 sm:$0xff]  }
 0x147   : > { %9300 = vmatprep.subr.bf16.mxu1 %v15874_v51  ;;  %v18846_v44 = vpack.c.bf16 %v2036_v59, %v2012_v10  ;;  %v2023_v1 = vmul.f32 %v1735_v31, %v18808_v28  ;;  %v1747_v27 = vadd.f32 1.0, %v17511_v39  ;;  %17524 = verf.f32 %v1195_v32  ;;  %v17513_v28 = vpop.eup %17512  ;;  %v15887_v58 = vld [vmem:[#allocation5 + $0x17a0] ss:$24 sps:$4 sm:$0xff]   ;;  %v18882_v32 = vld [vmem:[%s18582_s14 + $0x70] sm:$0xff] }
 0x148   : > { %9857 = vmatpush1.bf16.msra.mxu0 %v15869_v2  ;;  %v15878_v2 = vld [vmem:[#allocation5 + $0x570] ss:$24 sps:$4 sm:$0xff]   ;;  %v2011_v51 = vmul.f32 %v1723_v54, %v859_v19  ;;  %v908_v42 = vmul.f32 0.5, %v18801_v50  ;;  %17526 = verf.f32 %v1219_v4  ;;  %v1760_v34 = vadd.f32 1.0, %v17513_v28  ;;  %v15884_v19 = vld [vmem:[#allocation5 + $0x5a0] ss:$24 sps:$4 sm:$0xff]  }
 0x149   : > { %22248 = vst [vmem:[#allocation28_spill] sm:$0xff] %v18846_v44  ;;  %9858 = vmatprep.subr.bf16.mxu0 %v15877_v60  ;;  %9813 = vmatprep.mubr.bf16.mxu0 %v18846_v44  ;;  %v18860_v8 = vpack.c.bf16 %v2023_v1, %v1999_v23  ;;  %v2035_v11 = vmul.f32 %v1747_v27, %v883_v16  ;;  %v18864_v60 = vld [vmem:[%s18582_s14 + $0x138] sm:$0xff]  ;;  %v17515_v50 = vpop.eup %17514  ;;  %17528 = verf.f32 %v946_v52  ;;  %v945_v31 = vmul.f32 0.70710677, %v18869_v26  ;;  %v18887_v54 = vld [vmem:[%s18582_s14 + $0x130] sm:$0xff] }
 0x14a   : > { %9301 = vmatpush1.bf16.msra.mxu1 %v15872_v13  ;;  %v15886_v13 = vld [vmem:[#allocation5 + $0x5a4] ss:$24 sps:$4 sm:$0xff]   ;;  %v1784_v10 = vadd.f32 1.0, %v17515_v50  ;;  %17530 = verf.f32 %v970_v18  ;;  %v17517_v22 = vpop.eup %17516  ;;  %v2048_v24 = vmul.f32 %v1760_v34, %v896_v40  ;;  %v982_v59 = vmul.f32 0.70710677, %v18864_v60  ;;  %v19063_v44 = vld [vmem:[%s18582_s14 + $0x670] sm:$0xff] }
 0x14b   : > { %9302 = vmatprep.subr.bf16.mxu1 %v15880_v21  ;;  %v919_v21 = vmul.f32 0.5, %v18820_v7  ;;  %9256 = vmatmul.mubr.bf16.gmra.mrb[16].mxu1 %v18860_v8  ;;  %v18872_v16 = vpack.c.bf16 %v2035_v11, %v2011_v51  ;;  %v15892_v7 = vld [vmem:[#allocation5 + $0x5d4] ss:$24 sps:$4 sm:$0xff]   ;;  %v17519_v20 = vpop.eup %17518  ;;  %v1772_v47 = vadd.f32 1.0, %v17517_v22  ;;  %v907_v40 = vmul.f32 0.5, %v18829_v25 }
 0x14c   : > { %9859 = vmatpush1.bf16.msra.mxu0 %v15875_v29  ;;  %v958_v29 = vmul.f32 0.70710677, %v18858_v5  ;;  %v1796_v39 = vadd.f32 1.0, %v17519_v20  ;;  %v969_v23 = vmul.f32 0.70710677, %v18876_v62  ;;  %v19118_v61 = vld [vmem:[%s18582_s14 + $0x8b0] sm:$0xff] }
 0x14d   : > { %9860 = vmatprep.subr.bf16.mxu0 %v15883_v38  ;;  %22249 = vst [vmem:[#allocation29_spill] sm:$0xff] %v18872_v16  ;;  %9814 = vmatmul.mubr.bf16.gmra.mrb[16].mxu0 %v18872_v16  ;;  %v2072_v38 = vmul.f32 %v1784_v10, %v920_v49  ;;  %v17521_v1 = vpop.eup %17520  ;;  %v2060_v49 = vmul.f32 %v1772_v47, %v908_v42  ;;  %v15895_v4 = vld [vmem:[#allocation5 + $0x17d4] ss:$24 sps:$4 sm:$0xff]   ;;  %v15890_v28 = vld [vmem:[#allocation5 + $0x5d0] ss:$24 sps:$4 sm:$0xff]   ;;  %v658_v10 = vmul.f32 0.5, %v18843_v36 }
 0x14e   : > { %9303 = vmatpush1.bf16.msra.mxu1 %v15878_v2  ;;  %17532 = verf.f32 %v958_v29  ;;  %v931_v2 = vmul.f32 0.5, %v18838_v43  ;;  %v2084_v52 = vmul.f32 %v1796_v39, %v932_v48  ;;  %v957_v25 = vmul.f32 0.70710677, %v18882_v32  ;;  %v15898_v18 = vld [vmem:[#allocation5 + $0x604] ss:$24 sps:$4 sm:$0xff]  }
 0x14f   : > { %9304 = vmatprep.subr.bf16.mxu1 %v15886_v13  ;;  %17534 = verf.f32 %v982_v59  ;;  %v18889_v27 = vpack.c.bf16 %v2072_v38, %v2048_v24  ;;  %v17523_v51 = vpop.eup %17522  ;;  %v981_v42 = vmul.f32 0.70710677, %v18887_v54  ;;  %v15893_v48 = vld [vmem:[#allocation5 + $0x17d0] ss:$24 sps:$4 sm:$0xff]   ;;  %v15901_v29 = vld [vmem:[#allocation5 + $0x1804] ss:$24 sps:$4 sm:$0xff]  }
 0x150   : > { %9861 = vmatpush1.bf16.msra.mxu0 %v15881_v41  ;;  %17536 = verf.f32 %v945_v31  ;;  %v1759_v41 = vadd.f32 1.0, %v17521_v1  ;;  %v1783_v13 = vadd.f32 1.0, %v17523_v51  ;;  %v18895_v50 = vpack.c.bf16 %v2084_v52, %v2060_v49 }
 0x151   : > { %9862 = vmatprep.subr.bf16.mxu0 %v15889_v9  ;;  %17538 = verf.f32 %v969_v23  ;;  %v17525_v11 = vpop.eup %17524  ;;  %9265 = vmatprep.mubr.bf16.mxu1 %v18889_v27  ;;  %v682_v59 = vmul.f32 0.5, %v18849_v53  ;;  %v670_v36 = vmul.f32 0.5, %v18858_v5  ;;  %v694_v39 = vmul.f32 0.5, %v18864_v60 }
 0x152   : > { %9305 = vmatpush1.bf16.msra.mxu1 %v15884_v19  ;;  %22250 = vst [vmem:[#allocation30_spill] sm:$0xff] %v18895_v50  ;;  %v2047_v43 = vmul.f32 %v1759_v41, %v895_v3  ;;  %v1771_v34 = vadd.f32 1.0, %v17525_v11  ;;  %17540 = verf.f32 %v957_v25  ;;  %v17527_v19 = vpop.eup %17526  ;;  %v2071_v9 = vmul.f32 %v1783_v13, %v919_v21  ;;  %9823 = vmatprep.mubr.bf16.mxu0 %v18895_v50  ;;  %v418_v13 = vld [vmem:[%s18582_s14 + $0x198] sm:$0xff] }
 0x153   : > { %9306 = vmatprep.subr.bf16.mxu1 %v15892_v7  ;;  %17542 = verf.f32 %v981_v42  ;;  %v17529_v22 = vpop.eup %17528  ;;  %v1795_v24 = vadd.f32 1.0, %v17527_v19  ;;  %v657_v49 = vmul.f32 0.5, %v18869_v26  ;;  %v681_v5 = vmul.f32 0.5, %v18876_v62 }
 0x154   : > { %9863 = vmatpush1.bf16.msra.mxu0 %v15887_v58  ;;  %v2059_v7 = vmul.f32 %v1771_v34, %v907_v40  ;;  %v17531_v3 = vpop.eup %17530  ;;  %v18900_v20 = vpack.c.bf16 %v2071_v9, %v2047_v43  ;;  %v1522_v58 = vadd.f32 1.0, %v17529_v22  ;;  %v669_v11 = vmul.f32 0.5, %v18882_v32  ;;  %v430_v34 = vld [vmem:[%s18582_s14 + $0x1f8] sm:$0xff] }
 0x155   : > { %9864 = vmatprep.subr.bf16.mxu0 %v15895_v4  ;;  %v2083_v38 = vmul.f32 %v1795_v24, %v931_v2  ;;  %v1546_v21 = vadd.f32 1.0, %v17531_v3  ;;  %v693_v42 = vmul.f32 0.5, %v18887_v54  ;;  %v994_v43 = vmul.f32 0.70710677, %v418_v13  ;;  %v454_v32 = vld [vmem:[%s18582_s14 + $0x2b8] sm:$0xff] }
 0x156   : > { %9307 = vmatpush1.bf16.msra.mxu1 %v15890_v28  ;;  %v1810_v31 = vmul.f32 %v1522_v58, %v658_v10  ;;  %v15896_v22 = vld [vmem:[#allocation5 + $0x600] ss:$24 sps:$4 sm:$0xff]   ;;  %v15904_v3 = vld [vmem:[#allocation5 + $0x634] ss:$24 sps:$4 sm:$0xff]   ;;  %v1006_v58 = vmul.f32 0.70710677, %v430_v34 }
 0x157   : > { %9369 = vmatprep.subr.bf16.mxu1 %v15898_v18  ;;  %9266 = vmatmul.mubr.bf16.gmra.mrb[20].mxu1 %v18900_v20  ;;  %v18905_v53 = vpack.c.bf16 %v2083_v38, %v2059_v7  ;;  %v1834_v23 = vmul.f32 %v1546_v21, %v682_v59  ;;  %v18915_v18 = vld [vmem:[%s18582_s14 + $0x258] sm:$0xff]  ;;  %17544 = verf.f32 %v994_v43  ;;  %v417_v38 = vld [vmem:[%s18582_s14 + $0x190] sm:$0xff]  ;;  %v706_v43 = vmul.f32 0.5, %v418_v13 }
 0x158   : > { %9865 = vmatpush1.bf16.msra.mxu0 %v15893_v48  ;;  %v17533_v47 = vpop.eup %17532  ;;  %v15899_v7 = vld [vmem:[#allocation5 + $0x1800] ss:$24 sps:$4 sm:$0xff]   ;;  %v742_v13 = vmul.f32 0.5, %v454_v32 }
 0x159   : > { %9927 = vmatprep.subr.bf16.mxu0 %v15901_v29  ;;  %v17535_v40 = vpop.eup %17534  ;;  %22251 = vst [vmem:[#allocation31_spill] sm:$0xff] %v18905_v53  ;;  %v1534_v1 = vadd.f32 1.0, %v17533_v47  ;;  %9824 = vmatmul.mubr.bf16.gmra.mrb[20].mxu0 %v18905_v53  ;;  %v18910_v52 = vpack.c.bf16 %v1834_v23, %v1810_v31  ;;  %v1018_v29 = vmul.f32 0.70710677, %v18915_v18  ;;  %v15907_v47 = vld [vmem:[#allocation5 + $0x1834] ss:$24 sps:$4 sm:$0xff]  }
 0x15a   : > { %v17537_v2 = vpop.eup %17536  ;;  %v1558_v4 = vadd.f32 1.0, %v17535_v40  ;;  %v1030_v31 = vmul.f32 0.70710677, %v454_v32  ;;  %v993_v40 = vmul.f32 0.70710677, %v417_v38 }
 0x15b   : > { %v17539_v51 = vpop.eup %17538  ;;  %v1822_v60 = vmul.f32 %v1534_v1, %v670_v36  ;;  %v1521_v41 = vadd.f32 1.0, %v17537_v2  ;;  %9308 = vmatprep.mubr.bf16.mxu1 %v18910_v52  ;;  %17546 = verf.f32 %v1018_v29  ;;  %v15902_v36 = vld [vmem:[#allocation5 + $0x630] ss:$24 sps:$4 sm:$0xff]   ;;  %v15919_v29 = vld [vmem:[#allocation5 + $0x1894] ss:$24 sps:$4 sm:$0xff]  }
 0x15c   : > { %v1846_v28 = vmul.f32 %v1558_v4, %v694_v39  ;;  %v1545_v25 = vadd.f32 1.0, %v17539_v51  ;;  %v17541_v26 = vpop.eup %17540  ;;  %v441_v39 = vld [vmem:[%s18582_s14 + $0x250] sm:$0xff]  ;;  %17548 = verf.f32 %v1006_v58  ;;  %v15922_v58 = vld [vmem:[#allocation5 + $0x6c4] ss:$24 sps:$4 sm:$0xff]  }
 0x15d   : > { %v1809_v62 = vmul.f32 %v1521_v41, %v657_v49  ;;  %v17543_v48 = vpop.eup %17542  ;;  %v1533_v10 = vadd.f32 1.0, %v17541_v26  ;;  %v1017_v23 = vmul.f32 0.70710677, %v441_v39  ;;  %v429_v1 = vld [vmem:[%s18582_s14 + $0x1f0] sm:$0xff]  ;;  %17550 = verf.f32 %v1030_v31  ;;  %v15908_v41 = vld [vmem:[#allocation5 + $0x660] ss:$24 sps:$4 sm:$0xff]  }
 0x15e   : > { %v18920_v19 = vpack.c.bf16 %v1846_v28, %v1822_v60  ;;  %v1833_v9 = vmul.f32 %v1545_v25, %v681_v5  ;;  %v1557_v24 = vadd.f32 1.0, %v17543_v48  ;;  %v453_v2 = vld [vmem:[%s18582_s14 + $0x2b0] sm:$0xff]  ;;  %v1005_v4 = vmul.f32 0.70710677, %v429_v1  ;;  %v15910_v5 = vld [vmem:[#allocation5 + $0x664] ss:$24 sps:$4 sm:$0xff]  }
 0x15f   : > { %v1821_v59 = vmul.f32 %v1533_v10, %v669_v11  ;;  %17552 = verf.f32 %v993_v40  ;;  %v1029_v51 = vmul.f32 0.70710677, %v453_v2  ;;  %v15905_v60 = vld [vmem:[#allocation5 + $0x1830] ss:$24 sps:$4 sm:$0xff]   ;;  %v18936_v28 = vld [vmem:[%s18582_s14 + $0x318] sm:$0xff] }
 0x160   : > { %22252 = vst [vmem:[#allocation32_spill] sm:$0xff] %v18920_v19  ;;  %9866 = vmatprep.mubr.bf16.mxu0 %v18920_v19  ;;  %v18925_v54 = vpack.c.bf16 %v1833_v9, %v1809_v62  ;;  %v1845_v21 = vmul.f32 %v1557_v24, %v693_v42  ;;  %17554 = verf.f32 %v1017_v23  ;;  %v18939_v25 = vld [vmem:[%s18582_s14 + $0x3d8] sm:$0xff]  ;;  %v1042_v26 = vmul.f32 0.70710677, %v18936_v28  ;;  %v15916_v42 = vld [vmem:[#allocation5 + $0x694] ss:$24 sps:$4 sm:$0xff]  }
 0x161   : > { %17556 = verf.f32 %v1005_v4  ;;  %v15913_v11 = vld [vmem:[#allocation5 + $0x1864] ss:$24 sps:$4 sm:$0xff]   ;;  %v15911_v62 = vld [vmem:[#allocation5 + $0x1860] ss:$24 sps:$4 sm:$0xff]   ;;  %v1066_v48 = vmul.f32 0.70710677, %v18939_v25  ;;  %v17545_v9 = vpop.eup %17544 }
 0x162   : > { %9309 = vmatmul.mubr.bf16.vlgmr.msra.gmra.mrb[0].mxu1 %v18925_v54  ;;  %v18931_v49 = vpack.c.bf16 %v1845_v21, %v1821_v59  ;;  %17558 = verf.f32 %v1029_v51  ;;  %v15914_v10 = vld [vmem:[#allocation5 + $0x690] ss:$24 sps:$4 sm:$0xff]   ;;  %v718_v24 = vmul.f32 0.5, %v430_v34  ;;  %v18948_v59 = vld [vmem:[%s18582_s14 + $0x438] sm:$0xff]  ;;  %v1570_v21 = vadd.f32 1.0, %v17545_v9 }
 0x163   : > { %9370 = vmatpush1.bf16.msra.mxu1 %v15896_v22  ;;  %v730_v22 = vmul.f32 0.5, %v18915_v18  ;;  %17560 = verf.f32 %v1042_v26  ;;  %v1078_v34 = vmul.f32 0.70710677, %v18948_v59  ;;  %v18953_v31 = vld [vmem:[%s18582_s14 + $0x310] sm:$0xff]  ;;  %v729_v4 = vmul.f32 0.5, %v441_v39 }
 0x164   : > { %22253 = vst [vmem:[#allocation33_spill] sm:$0xff] %v18931_v49  ;;  %9371 = vmatprep.subr.bf16.mxu1 %v15904_v3  ;;  %9867 = vmatmul.mubr.bf16.vlgmr.msra.gmra.mrb[0].mxu0 %v18931_v49  ;;  %17562 = verf.f32 %v1066_v48  ;;  %v1858_v23 = vmul.f32 %v1570_v21, %v706_v43  ;;  %v18956_v51 = vld [vmem:[%s18582_s14 + $0x3d0] sm:$0xff]  ;;  %v1041_v32 = vmul.f32 0.70710677, %v18953_v31  ;;  %v741_v26 = vmul.f32 0.5, %v453_v2 }
 0x165   : > { %9928 = vmatpush1.bf16.msra.mxu0 %v15899_v7  ;;  %v18945_v7 = vld [vmem:[%s18582_s14 + $0x378] sm:$0xff]  ;;  %v17547_v3 = vpop.eup %17546  ;;  %v18960_v48 = vld [vmem:[%s18582_s14 + $0x370] sm:$0xff]  ;;  %v1065_v39 = vmul.f32 0.70710677, %v18956_v51 }
 0x166   : > { %9929 = vmatprep.subr.bf16.mxu0 %v15907_v47  ;;  %v1594_v47 = vadd.f32 1.0, %v17547_v3  ;;  %v1054_v18 = vmul.f32 0.70710677, %v18945_v7  ;;  %v17549_v40 = vpop.eup %17548  ;;  %v15920_v43 = vld [vmem:[#allocation5 + $0x6c0] ss:$24 sps:$4 sm:$0xff]  }
 0x167   : > { %9372 = vmatpush1.bf16.msra.mxu1 %v15902_v36  ;;  %v705_v36 = vmul.f32 0.5, %v417_v38  ;;  %v17551_v38 = vpop.eup %17550  ;;  %v15925_v21 = vld [vmem:[#allocation5 + $0x18c4] ss:$24 sps:$4 sm:$0xff]   ;;  %v15941_v19 = vld [vmem:[#allocation5 + $0x1950] ss:$24 sps:$4 sm:$0xff]  }
 0x168   : > { %9373 = vmatprep.subr.bf16.mxu1 %v15910_v5  ;;  %v717_v5 = vmul.f32 0.5, %v429_v1  ;;  %17564 = verf.f32 %v1054_v18  ;;  %v1606_v3 = vadd.f32 1.0, %v17551_v38  ;;  %v15928_v18 = vld [vmem:[#allocation5 + $0x6f4] ss:$24 sps:$4 sm:$0xff]   ;;  %v754_v38 = vmul.f32 0.5, %v18936_v28 }
 0x169   : > { %9930 = vmatpush1.bf16.msra.mxu0 %v15905_v60  ;;  %v15917_v60 = vld [vmem:[#allocation5 + $0x1890] ss:$24 sps:$4 sm:$0xff]   ;;  %v17553_v9 = vpop.eup %17552  ;;  %17566 = verf.f32 %v1078_v34  ;;  %v778_v28 = vmul.f32 0.5, %v18939_v25  ;;  %v15934_v25 = vld [vmem:[#allocation5 + $0x724] ss:$24 sps:$4 sm:$0xff]  }
 0x16a   : > { %9931 = vmatprep.subr.bf16.mxu0 %v15913_v11  ;;  %v1582_v11 = vadd.f32 1.0, %v17549_v40  ;;  %v17555_v1 = vpop.eup %17554  ;;  %v1569_v2 = vadd.f32 1.0, %v17553_v9  ;;  %17568 = verf.f32 %v1041_v32  ;;  %v1894_v34 = vmul.f32 %v1606_v3, %v742_v13  ;;  %v18979_v3 = vld [vmem:[%s18582_s14 + $0x558] sm:$0xff] }
 0x16b   : > { %9374 = vmatpush1.bf16.msra.mxu1 %v15908_v41  ;;  %v1882_v41 = vmul.f32 %v1594_v47, %v730_v22  ;;  %v17557_v47 = vpop.eup %17556  ;;  %v1593_v40 = vadd.f32 1.0, %v17555_v1  ;;  %17570 = verf.f32 %v1065_v39 }
 0x16c   : > { %9375 = vmatprep.subr.bf16.mxu1 %v15916_v42  ;;  %v18964_v42 = vld [vmem:[%s18582_s14 + $0x430] sm:$0xff]  ;;  %v1870_v22 = vmul.f32 %v1582_v11, %v718_v24  ;;  %v1053_v24 = vmul.f32 0.70710677, %v18960_v48 }
 0x16d   : > { %9932 = vmatpush1.bf16.msra.mxu0 %v15911_v62  ;;  %v18966_v49 = vpack.c.bf16 %v1882_v41, %v1858_v23  ;;  %v15923_v62 = vld [vmem:[#allocation5 + $0x18c0] ss:$24 sps:$4 sm:$0xff]   ;;  %v1857_v23 = vmul.f32 %v1569_v2, %v705_v36  ;;  %v1581_v41 = vadd.f32 1.0, %v17557_v47  ;;  %v1077_v32 = vmul.f32 0.70710677, %v18964_v42 }
 0x16e   : > { %9933 = vmatprep.subr.bf16.mxu0 %v15919_v29  ;;  %v17559_v29 = vpop.eup %17558  ;;  %v18975_v13 = vpack.c.bf16 %v1894_v34, %v1870_v22  ;;  %v1881_v11 = vmul.f32 %v1593_v40, %v729_v4  ;;  %v15931_v36 = vld [vmem:[#allocation5 + $0x18f4] ss:$24 sps:$4 sm:$0xff]   ;;  %v766_v2 = vmul.f32 0.5, %v18945_v7  ;;  %17572 = verf.f32 %v1053_v24  ;;  %v15929_v22 = vld [vmem:[#allocation5 + $0x18f0] ss:$24 sps:$4 sm:$0xff]  }
 0x16f   : > { %9376 = vmatpush1.bf16.msra.mxu1 %v15914_v10  ;;  %v15926_v10 = vld [vmem:[#allocation5 + $0x6f0] ss:$24 sps:$4 sm:$0xff]   ;;  %9318 = vmatprep.mubr.bf16.mxu1 %v18966_v49  ;;  %v1605_v9 = vadd.f32 1.0, %v17559_v29  ;;  %v17561_v39 = vpop.eup %17560  ;;  %v1869_v1 = vmul.f32 %v1581_v41, %v717_v5  ;;  %17574 = verf.f32 %v1077_v32  ;;  %v18990_v5 = vld [vmem:[%s18582_s14 + $0x5b8] sm:$0xff]  ;;  %v790_v29 = vmul.f32 0.5, %v18948_v59 }
 0x170   : > { %9377 = vmatprep.subr.bf16.mxu1 %v15922_v58  ;;  %v18973_v58 = vld [vmem:[%s18582_s14 + $0x498] sm:$0xff]  ;;  %22254 = vst [vmem:[#allocation34_spill] sm:$0xff] %v18975_v13  ;;  %v17563_v4 = vpop.eup %17562  ;;  %9876 = vmatprep.mubr.bf16.mxu0 %v18975_v13  ;;  %v18987_v34 = vpack.c.bf16 %v1881_v11, %v1857_v23  ;;  %v1114_v41 = vmul.f32 0.70710677, %v18979_v3  ;;  %v753_v32 = vmul.f32 0.5, %v18953_v31 }
 0x171   : > { %9934 = vmatpush1.bf16.msra.mxu0 %v15917_v60  ;;  %v1090_v47 = vmul.f32 0.70710677, %v18973_v58  ;;  %v18984_v60 = vld [vmem:[%s18582_s14 + $0x4f8] sm:$0xff]  ;;  %v1642_v40 = vadd.f32 1.0, %v17563_v4  ;;  %v15940_v59 = vld [vmem:[#allocation5 + $0x754] ss:$24 sps:$4 sm:$0xff]  }
 0x172   : > { %9935 = vmatprep.subr.bf16.mxu0 %v15925_v21  ;;  %v1618_v21 = vadd.f32 1.0, %v17561_v39  ;;  %v15932_v7 = vld [vmem:[#allocation5 + $0x720] ss:$24 sps:$4 sm:$0xff]   ;;  %v15937_v24 = vld [vmem:[#allocation5 + $0x1924] ss:$24 sps:$4 sm:$0xff]   ;;  %9319 = vmatmul.mubr.bf16.gmra.mrb[4].mxu1 %v18987_v34  ;;  %v17565_v39 = vpop.eup %17564  ;;  %v777_v4 = vmul.f32 0.5, %v18956_v51 }
 0x173   : > { %9378 = vmatpush1.bf16.msra.mxu1 %v15920_v43  ;;  %v1893_v43 = vmul.f32 %v1605_v9, %v741_v26  ;;  %17576 = verf.f32 %v1090_v47  ;;  %v1102_v11 = vmul.f32 0.70710677, %v18984_v60  ;;  %v19003_v9 = vld [vmem:[%s18582_s14 + $0x550] sm:$0xff]  ;;  %v1930_v47 = vmul.f32 %v1642_v40, %v778_v28 }
 0x174   : > { %9379 = vmatprep.subr.bf16.mxu1 %v15928_v18  ;;  %v18995_v18 = vld [vmem:[%s18582_s14 + $0x490] sm:$0xff]  ;;  %v1906_v26 = vmul.f32 %v1618_v21, %v754_v38  ;;  %17578 = verf.f32 %v1114_v41  ;;  %v15935_v38 = vld [vmem:[#allocation5 + $0x1920] ss:$24 sps:$4 sm:$0xff]   ;;  %v1630_v31 = vadd.f32 1.0, %v17565_v39  ;;  %v1113_v21 = vmul.f32 0.70710677, %v19003_v9 }
 0x175   : > { %9936 = vmatpush1.bf16.msra.mxu0 %v15923_v62  ;;  %v18998_v23 = vpack.c.bf16 %v1893_v43, %v1869_v1  ;;  %v1126_v62 = vmul.f32 0.70710677, %v18990_v5  ;;  %v17567_v1 = vpop.eup %17566  ;;  %v765_v43 = vmul.f32 0.5, %v18960_v48  ;;  %17580 = verf.f32 %v1102_v11  ;;  %v19014_v40 = vld [vmem:[%s18582_s14 + $0x4f0] sm:$0xff]  ;;  %v15946_v11 = vld [vmem:[#allocation5 + $0x784] ss:$24 sps:$4 sm:$0xff]  }
 0x176   : > { %9937 = vmatprep.subr.bf16.mxu0 %v15931_v36  ;;  %v17569_v36 = vpop.eup %17568  ;;  %v19010_v28 = vpack.c.bf16 %v1930_v47, %v1906_v26  ;;  %v1654_v51 = vadd.f32 1.0, %v17567_v1  ;;  %v19017_v41 = vld [vmem:[%s18582_s14 + $0x5b0] sm:$0xff]  ;;  %v1918_v39 = vmul.f32 %v1630_v31, %v766_v2  ;;  %v789_v48 = vmul.f32 0.5, %v18964_v42  ;;  %v19025_v31 = vld [vmem:[%s18582_s14 + $0x618] sm:$0xff] }
 0x177   : > { %22255 = vst [vmem:[#allocation35_spill] sm:$0xff] %v18998_v23  ;;  %9380 = vmatpush1.bf16.msra.mxu1 %v15926_v10  ;;  %9877 = vmatmul.mubr.bf16.gmra.mrb[4].mxu0 %v18998_v23  ;;  %v1089_v10 = vmul.f32 0.70710677, %v18995_v18  ;;  %17582 = verf.f32 %v1126_v62  ;;  %v15938_v23 = vld [vmem:[#allocation5 + $0x750] ss:$24 sps:$4 sm:$0xff]   ;;  %v1617_v13 = vadd.f32 1.0, %v17569_v36 }
 0x178   : > { %9381 = vmatprep.subr.bf16.mxu1 %v15934_v25  ;;  %v17571_v25 = vpop.eup %17570  ;;  %v15943_v26 = vld [vmem:[#allocation5 + $0x1954] ss:$24 sps:$4 sm:$0xff]   ;;  %v1942_v47 = vmul.f32 %v1654_v51, %v790_v29  ;;  %v802_v1 = vmul.f32 0.5, %v18973_v58  ;;  %9328 = vmatprep.mubr.bf16.mxu1 %v19010_v28  ;;  %v1125_v42 = vmul.f32 0.70710677, %v19017_v41  ;;  %v814_v36 = vmul.f32 0.5, %v18984_v60 }
 0x179   : > { %9938 = vmatpush1.bf16.msra.mxu0 %v15929_v22  ;;  %17584 = verf.f32 %v1089_v10  ;;  %v1641_v62 = vadd.f32 1.0, %v17571_v25  ;;  %v1905_v2 = vmul.f32 %v1617_v13, %v753_v32  ;;  %v1101_v22 = vmul.f32 0.70710677, %v19014_v40  ;;  %v15944_v29 = vld [vmem:[#allocation5 + $0x780] ss:$24 sps:$4 sm:$0xff]  }
 0x17a   : > { %9939 = vmatprep.subr.bf16.mxu0 %v15937_v24  ;;  %17586 = verf.f32 %v1113_v21  ;;  %v17573_v24 = vpop.eup %17572  ;;  %v19030_v10 = vpack.c.bf16 %v1942_v47, %v1918_v39  ;;  %v1138_v51 = vmul.f32 0.70710677, %v19025_v31  ;;  %v19037_v25 = vld [vmem:[%s18582_s14 + $0x678] sm:$0xff]  ;;  %v838_v60 = vmul.f32 0.5, %v18990_v5 }
 0x17b   : > { %9382 = vmatpush1.bf16.msra.mxu1 %v15932_v7  ;;  %v19028_v7 = vld [vmem:[%s18582_s14 + $0x6d8] sm:$0xff]  ;;  %v1929_v58 = vmul.f32 %v1641_v62, %v777_v4  ;;  %v17575_v13 = vpop.eup %17574  ;;  %v1629_v32 = vadd.f32 1.0, %v17573_v24  ;;  %17588 = verf.f32 %v1101_v22  ;;  %v15952_v22 = vld [vmem:[#allocation5 + $0x7b4] ss:$24 sps:$4 sm:$0xff]   ;;  %v813_v16 = vmul.f32 0.5, %v19014_v40 }
 0x17c   : > { %9383 = vmatprep.subr.bf16.mxu1 %v15940_v59  ;;  %22256 = vst [vmem:[#allocation36_spill] sm:$0xff] %v19030_v10  ;;  %v826_v59 = vmul.f32 0.5, %v18979_v3  ;;  %v1162_v21 = vmul.f32 0.70710677, %v19028_v7  ;;  %v15949_v4 = vld [vmem:[#allocation5 + $0x1984] ss:$24 sps:$4 sm:$0xff]   ;;  %17590 = verf.f32 %v1125_v42  ;;  %9886 = vmatprep.mubr.bf16.mxu0 %v19030_v10 }
 0x17d   : > { %9940 = vmatpush1.bf16.msra.mxu0 %v15935_v38  ;;  %v17577_v53 = vpop.eup %17576  ;;  %v19039_v39 = vpack.c.bf16 %v1929_v58, %v1905_v2  ;;  %v1653_v3 = vadd.f32 1.0, %v17575_v13  ;;  %v19043_v38 = vld [vmem:[%s18582_s14 + $0x738] sm:$0xff]  ;;  %v1917_v62 = vmul.f32 %v1629_v32, %v765_v43  ;;  %17592 = verf.f32 %v1138_v51  ;;  %v15950_v42 = vld [vmem:[#allocation5 + $0x7b0] ss:$24 sps:$4 sm:$0xff]   ;;  %v15955_v58 = vld [vmem:[#allocation5 + $0x19b4] ss:$24 sps:$4 sm:$0xff]  }
 0x17e   : > { %9941 = vmatprep.subr.bf16.mxu0 %v15943_v26  ;;  %v15947_v47 = vld [vmem:[#allocation5 + $0x1980] ss:$24 sps:$4 sm:$0xff]   ;;  %v1666_v24 = vadd.f32 1.0, %v17577_v53  ;;  %v801_v26 = vmul.f32 0.5, %v18995_v18  ;;  %v17579_v2 = vpop.eup %17578  ;;  %17594 = verf.f32 %v1162_v21  ;;  %v1174_v13 = vmul.f32 0.70710677, %v19043_v38 }
 0x17f   : > { %9384 = vmatpush1.bf16.msra.mxu1 %v15938_v23  ;;  %v19048_v23 = vld [vmem:[%s18582_s14 + $0x610] sm:$0xff]  ;;  %v1941_v5 = vmul.f32 %v1653_v3, %v789_v48  ;;  %v17581_v43 = vpop.eup %17580  ;;  %v1690_v53 = vadd.f32 1.0, %v17579_v2  ;;  %v825_v18 = vmul.f32 0.5, %v19003_v9  ;;  %v15958_v21 = vld [vmem:[#allocation5 + $0x7e4] ss:$24 sps:$4 sm:$0xff]  }
 0x180   : > { %9385 = vmatprep.subr.bf16.mxu1 %v15946_v11  ;;  %9329 = vmatmul.mubr.bf16.gmra.mrb[8].mxu1 %v19039_v39  ;;  %v1150_v11 = vmul.f32 0.70710677, %v19037_v25  ;;  %v1954_v32 = vmul.f32 %v1666_v24, %v802_v1  ;;  %v19055_v51 = vld [vmem:[%s18582_s14 + $0x6d0] sm:$0xff]  ;;  %v1137_v10 = vmul.f32 0.70710677, %v19048_v23  ;;  %v1678_v3 = vadd.f32 1.0, %v17581_v43 }
 0x181   : > { %9942 = vmatpush1.bf16.msra.mxu0 %v15941_v19  ;;  %v17583_v50 = vpop.eup %17582  ;;  %v19058_v48 = vpack.c.bf16 %v1941_v5, %v1917_v62  ;;  %v15953_v1 = vld [vmem:[#allocation5 + $0x19b0] ss:$24 sps:$4 sm:$0xff]   ;;  %v1978_v9 = vmul.f32 %v1690_v53, %v826_v59  ;;  %v1161_v2 = vmul.f32 0.70710677, %v19055_v51  ;;  %v15956_v62 = vld [vmem:[#allocation5 + $0x7e0] ss:$24 sps:$4 sm:$0xff]  }
 0x182   : > { %9943 = vmatprep.subr.bf16.mxu0 %v15949_v4  ;;  %17596 = verf.f32 %v1150_v11  ;;  %v1702_v24 = vadd.f32 1.0, %v17583_v50  ;;  %v1966_v40 = vmul.f32 %v1678_v3, %v814_v36  ;;  %v15961_v11 = vld [vmem:[#allocation5 + $0x19e4] ss:$24 sps:$4 sm:$0xff]   ;;  %v850_v36 = vmul.f32 0.5, %v19025_v31 }
 0x183   : > { %9386 = vmatpush1.bf16.msra.mxu1 %v15944_v29  ;;  %22257 = vst [vmem:[#allocation37_spill] sm:$0xff] %v19058_v48  ;;  %v17585_v19 = vpop.eup %17584  ;;  %17598 = verf.f32 %v1174_v13  ;;  %v19066_v29 = vld [vmem:[%s18582_s14 + $0x730] sm:$0xff]  ;;  %9887 = vmatmul.mubr.bf16.gmra.mrb[8].mxu0 %v19058_v48  ;;  %v19070_v50 = vpack.c.bf16 %v1978_v9, %v1954_v32  ;;  %v19073_v43 = vld [vmem:[%s18582_s14 + $0x798] sm:$0xff]  ;;  %v1149_v3 = vmul.f32 0.70710677, %v19063_v44 }
 0x184   : > { %9387 = vmatprep.subr.bf16.mxu1 %v15952_v22  ;;  %v17587_v4 = vpop.eup %17586  ;;  %v1665_v5 = vadd.f32 1.0, %v17585_v19  ;;  %v837_v22 = vmul.f32 0.5, %v19017_v41  ;;  %17600 = verf.f32 %v1137_v10  ;;  %v1990_v59 = vmul.f32 %v1702_v24, %v838_v60  ;;  %v19076_v53 = vld [vmem:[%s18582_s14 + $0x858] sm:$0xff]  ;;  %v15964_v19 = vld [vmem:[#allocation5 + $0x814] ss:$24 sps:$4 sm:$0xff]  }
 0x185   : > { %9944 = vmatpush1.bf16.msra.mxu0 %v15947_v47  ;;  %v1689_v13 = vadd.f32 1.0, %v17587_v4  ;;  %17602 = verf.f32 %v1161_v2  ;;  %v1173_v41 = vmul.f32 0.70710677, %v19066_v29  ;;  %v17589_v10 = vpop.eup %17588  ;;  %9338 = vmatprep.mubr.bf16.mxu1 %v19070_v50  ;;  %v15959_v47 = vld [vmem:[#allocation5 + $0x19e0] ss:$24 sps:$4 sm:$0xff]  }
 0x186   : > { %9945 = vmatprep.subr.bf16.mxu0 %v15955_v58  ;;  %v1953_v48 = vmul.f32 %v1665_v5, %v801_v26  ;;  %v19082_v60 = vpack.c.bf16 %v1990_v59, %v1966_v40  ;;  %v874_v58 = vmul.f32 0.5, %v19028_v7  ;;  %v862_v26 = vmul.f32 0.5, %v19037_v25  ;;  %v17591_v31 = vpop.eup %17590  ;;  %v15962_v9 = vld [vmem:[#allocation5 + $0x810] ss:$24 sps:$4 sm:$0xff]   ;;  %v19089_v4 = vld [vmem:[%s18582_s14 + $0x7f8] sm:$0xff] }
 0x187   : > { %9388 = vmatpush1.bf16.msra.mxu1 %v15950_v42  ;;  %v1977_v32 = vmul.f32 %v1689_v13, %v825_v18  ;;  %v1677_v42 = vadd.f32 1.0, %v17589_v10  ;;  %17604 = verf.f32 %v1149_v3  ;;  %v1186_v24 = vmul.f32 0.70710677, %v19073_v43  ;;  %v19096_v25 = vld [vmem:[%s18582_s14 + $0x8b8] sm:$0xff]  ;;  %v15967_v13 = vld [vmem:[#allocation5 + $0x1a14] ss:$24 sps:$4 sm:$0xff]  }
 0x188   : > { %9389 = vmatprep.subr.bf16.mxu1 %v15958_v21  ;;  %22258 = vst [vmem:[#allocation38_spill] sm:$0xff] %v19082_v60  ;;  %v1210_v2 = vmul.f32 0.70710677, %v19076_v53  ;;  %v17593_v21 = vpop.eup %17592  ;;  %9896 = vmatprep.mubr.bf16.mxu0 %v19082_v60  ;;  %v1701_v7 = vadd.f32 1.0, %v17591_v31  ;;  %v886_v40 = vmul.f32 0.5, %v19043_v38  ;;  %17606 = verf.f32 %v1173_v41  ;;  %v19115_v60 = vld [vmem:[%s18582_s14 + $0x7f0] sm:$0xff] }
 0x189   : > { %9946 = vmatpush1.bf16.msra.mxu0 %v15953_v1  ;;  %v19092_v18 = vpack.c.bf16 %v1977_v32, %v1953_v48  ;;  %v17595_v5 = vpop.eup %17594  ;;  %v1965_v59 = vmul.f32 %v1677_v42, %v813_v16  ;;  %v1714_v3 = vadd.f32 1.0, %v17593_v21  ;;  %v15970_v10 = vld [vmem:[#allocation5 + $0x844] ss:$24 sps:$4 sm:$0xff]   ;;  %v849_v1 = vmul.f32 0.5, %v19048_v23  ;;  %v15965_v38 = vld [vmem:[#allocation5 + $0x1a10] ss:$24 sps:$4 sm:$0xff]  }
 0x18a   : > { %9947 = vmatprep.subr.bf16.mxu0 %v15961_v11  ;;  %17608 = verf.f32 %v1186_v24  ;;  %v1989_v48 = vmul.f32 %v1701_v7, %v837_v22  ;;  %v1738_v41 = vadd.f32 1.0, %v17595_v5  ;;  %v1198_v32 = vmul.f32 0.70710677, %v19089_v4  ;;  %v19102_v11 = vld [vmem:[%s18582_s14 + $0x790] sm:$0xff]  ;;  %v15968_v42 = vld [vmem:[#allocation5 + $0x840] ss:$24 sps:$4 sm:$0xff]  }
 0x18b   : > { %9390 = vmatpush1.bf16.msra.mxu1 %v15956_v62  ;;  %17610 = verf.f32 %v1210_v2  ;;  %v19105_v16 = vld [vmem:[%s18582_s14 + $0x850] sm:$0xff]  ;;  %v2002_v31 = vmul.f32 %v1714_v3, %v850_v36  ;;  %v15973_v23 = vld [vmem:[#allocation5 + $0x1a44] ss:$24 sps:$4 sm:$0xff]   ;;  %v873_v24 = vmul.f32 0.5, %v19055_v51  ;;  %v19109_v22 = vmul.f32 0.5, %v19063_v44 }
 0x18c   : > { %9339 = vmatmul.mubr.bf16.gmra.mrb[12].mxu1 %v19092_v18  ;;  %9391 = vmatprep.subr.bf16.mxu1 %v15964_v19  ;;  %v17597_v62 = vpop.eup %17596  ;;  %v1222_v19 = vmul.f32 0.70710677, %v19096_v25  ;;  %v19112_v21 = vpack.c.bf16 %v1989_v48, %v1965_v59  ;;  %v2026_v7 = vmul.f32 %v1738_v41, %v874_v58  ;;  %17612 = verf.f32 %v1198_v32  ;;  %v15971_v48 = vld [vmem:[#allocation5 + $0x1a40] ss:$24 sps:$4 sm:$0xff]  }
 0x18d   : > { %v17599_v2 = vpop.eup %17598  ;;  %9948 = vmatpush1.bf16.msra.mxu0 %v15959_v47  ;;  %v1726_v5 = vadd.f32 1.0, %v17597_v62  ;;  %v1185_v44 = vmul.f32 0.70710677, %v19102_v11  ;;  %v1209_v59 = vmul.f32 0.70710677, %v19105_v16 }
 0x18e   : > { %22259 = vst [vmem:[#allocation39_spill] sm:$0xff] %v19112_v21  ;;  %v17601_v36 = vpop.eup %17600  ;;  %9949 = vmatprep.subr.bf16.mxu0 %v15967_v13  ;;  %v1750_v51 = vadd.f32 1.0, %v17599_v2  ;;  %17614 = verf.f32 %v1222_v19  ;;  %9897 = vmatmul.mubr.bf16.gmra.mrb[12].mxu0 %v19112_v21  ;;  %v19123_v47 = vpack.c.bf16 %v2026_v7, %v2002_v31  ;;  %v885_v13 = vmul.f32 0.5, %v19066_v29  ;;  %v19128_v2 = vld [vmem:[%s18582_s14 + $0x28] sm:$0xff] }
 0x18f   : > { %9392 = vmatpush1.bf16.msra.mxu1 %v15962_v9  ;;  %v17603_v3 = vpop.eup %17602  ;;  %v2014_v58 = vmul.f32 %v1726_v5, %v862_v26  ;;  %v1713_v41 = vadd.f32 1.0, %v17601_v36  ;;  %v15976_v9 = vld [vmem:[#allocation5 + $0x874] ss:$24 sps:$4 sm:$0xff]   ;;  %v898_v19 = vmul.f32 0.5, %v19073_v43  ;;  %17616 = verf.f32 %v1185_v44 }
 0x190   : > { %9393 = vmatprep.subr.bf16.mxu1 %v15970_v10  ;;  %v2038_v32 = vmul.f32 %v1750_v51, %v886_v40  ;;  %v1737_v62 = vadd.f32 1.0, %v17603_v3  ;;  %9348 = vmatprep.mubr.bf16.mxu1 %v19123_v47  ;;  %v15974_v10 = vld [vmem:[#allocation5 + $0x870] ss:$24 sps:$4 sm:$0xff]   ;;  %17618 = verf.f32 %v1209_v59  ;;  %v1197_v26 = vmul.f32 0.70710677, %v19115_v60 }
 0x191   : > { %9950 = vmatpush1.bf16.msra.mxu0 %v15965_v38  ;;  %v2001_v31 = vmul.f32 %v1713_v41, %v849_v1  ;;  %v1221_v29 = vmul.f32 0.70710677, %v19118_v61  ;;  %v17605_v7 = vpop.eup %17604  ;;  %v15979_v5 = vld [vmem:[#allocation5 + $0x1a74] ss:$24 sps:$4 sm:$0xff]   ;;  %v922_v36 = vmul.f32 0.5, %v19076_v53  ;;  %v910_v1 = vmul.f32 0.5, %v19089_v4 }
 0x192   : > { %v19136_v40 = vpack.c.bf16 %v2038_v32, %v2014_v58  ;;  %9951 = vmatprep.subr.bf16.mxu0 %v15973_v23  ;;  %v2025_v43 = vmul.f32 %v1737_v62, %v873_v24  ;;  %v15982_v38 = vld [vmem:[#allocation5 + $0x8a4] ss:$24 sps:$4 sm:$0xff]   ;;  %v17607_v51 = vpop.eup %17606  ;;  %v1725_v44 = vadd.f32 1.0, %v17605_v7  ;;  %v15977_v59 = vld [vmem:[#allocation5 + $0x1a70] ss:$24 sps:$4 sm:$0xff]   ;;  %17620 = verf.f32 %v1197_v26 }
 0x193   : > { %9394 = vmatpush1.bf16.msra.mxu1 %v15968_v42  ;;  %v948_v3 = vmul.f32 0.70710677, %v19128_v2  ;;  %v972_v58 = vmul.f32 0.70710677, %v19131_v33  ;;  %v19143_v41 = vld [vmem:[%s18582_s14 + $0x88] sm:$0xff]  ;;  %v1749_v53 = vadd.f32 1.0, %v17607_v51  ;;  %17622 = verf.f32 %v1221_v29 }
 0x194   : > { %22260 = vst [vmem:[#allocation40_spill] sm:$0xff] %v19136_v40  ;;  %9395 = vmatprep.subr.bf16.mxu1 %v15976_v9  ;;  %v17609_v23 = vpop.eup %17608  ;;  %9906 = vmatprep.mubr.bf16.mxu0 %v19136_v40  ;;  %v19146_v42 = vpack.c.bf16 %v2025_v43, %v2001_v31  ;;  %v934_v24 = vmul.f32 0.5, %v19096_v25  ;;  %v19150_v4 = vld [vmem:[%s18582_s14 + $0x148] sm:$0xff]  ;;  %v2013_v32 = vmul.f32 %v1725_v44, %v19109_v22  ;;  %v15980_v26 = vld [vmem:[#allocation5 + $0x8a0] ss:$24 sps:$4 sm:$0xff]   ;;  %v897_v21 = vmul.f32 0.5, %v19102_v11 }
 0x195   : > { %v17611_v9 = vpop.eup %17610  ;;  %9952 = vmatpush1.bf16.msra.mxu0 %v15971_v48  ;;  %v1762_v62 = vadd.f32 1.0, %v17609_v23  ;;  %v15985_v7 = vld [vmem:[#allocation5 + $0x1aa4] ss:$24 sps:$4 sm:$0xff]   ;;  %17624 = verf.f32 %v948_v3  ;;  %v2037_v31 = vmul.f32 %v1749_v53, %v885_v13  ;;  %v960_v29 = vmul.f32 0.70710677, %v19143_v41 }
 0x196   : > { %9349 = vmatmul.mubr.bf16.gmra.mrb[16].mxu1 %v19146_v42  ;;  %9953 = vmatprep.subr.bf16.mxu0 %v15979_v5  ;;  %v1786_v25 = vadd.f32 1.0, %v17611_v9  ;;  %17626 = verf.f32 %v972_v58  ;;  %v19157_v43 = vld [vmem:[%s18582_s14 + $0x20] sm:$0xff]  ;;  %v17613_v48 = vpop.eup %17612  ;;  %v15988_v11 = vld [vmem:[#allocation5 + $0x8d4] ss:$24 sps:$4 sm:$0xff]   ;;  %v984_v3 = vmul.f32 0.70710677, %v19150_v4 }
 0x197   : > { %v19160_v22 = vld [vmem:[%s18582_s14 + $0xe0] sm:$0xff]  ;;  %9396 = vmatpush1.bf16.msra.mxu1 %v15974_v10  ;;  %v2050_v51 = vmul.f32 %v1762_v62, %v898_v19  ;;  %v19163_v13 = vpack.c.bf16 %v2037_v31, %v2013_v32  ;;  %v1774_v58 = vadd.f32 1.0, %v17613_v48  ;;  %17628 = verf.f32 %v960_v29 }
 0x198   : > { %v15983_v44 = vld [vmem:[#allocation5 + $0x1aa0] ss:$24 sps:$4 sm:$0xff]   ;;  %v17615_v23 = vpop.eup %17614  ;;  %v2074_v5 = vmul.f32 %v1786_v25, %v922_v36  ;;  %9397 = vmatprep.subr.bf16.mxu1 %v15982_v38  ;;  %17630 = verf.f32 %v984_v3  ;;  %v947_v19 = vmul.f32 0.70710677, %v19157_v43  ;;  %v971_v10 = vmul.f32 0.70710677, %v19160_v22 }
 0x199   : > { %22261 = vst [vmem:[#allocation41_spill] sm:$0xff] %v19163_v13  ;;  %v19166_v53 = vld [vmem:[%s18582_s14 + $0x80] sm:$0xff]  ;;  %9954 = vmatpush1.bf16.msra.mxu0 %v15977_v59  ;;  %v1798_v40 = vadd.f32 1.0, %v17615_v23  ;;  %v17617_v62 = vpop.eup %17616  ;;  %v2062_v36 = vmul.f32 %v1774_v58, %v910_v1  ;;  %v921_v38 = vmul.f32 0.5, %v19105_v16  ;;  %v909_v31 = vmul.f32 0.5, %v19115_v60 }
 0x19a   : > { %v19169_v9 = vld [vmem:[%s18582_s14 + $0x140] sm:$0xff]  ;;  %9907 = vmatmul.mubr.bf16.gmra.mrb[16].mxu0 %v19163_v13  ;;  %v19174_v32 = vpack.c.bf16 %v2074_v5, %v2050_v51  ;;  %9955 = vmatprep.subr.bf16.mxu0 %v15985_v7  ;;  %v15991_v25 = vld [vmem:[#allocation5 + $0x1ad4] ss:$24 sps:$4 sm:$0xff]   ;;  %v17619_v29 = vpop.eup %17618  ;;  %v1761_v48 = vadd.f32 1.0, %v17617_v62  ;;  %v15986_v3 = vld [vmem:[#allocation5 + $0x8d0] ss:$24 sps:$4 sm:$0xff]   ;;  %17632 = verf.f32 %v947_v19 }
 0x19b   : > { %v2086_v59 = vmul.f32 %v1798_v40, %v934_v24  ;;  %9398 = vmatpush1.bf16.msra.mxu1 %v15980_v26  ;;  %v959_v23 = vmul.f32 0.70710677, %v19166_v53  ;;  %v1785_v13 = vadd.f32 1.0, %v17619_v29  ;;  %v15994_v51 = vld [vmem:[#allocation5 + $0x904] ss:$24 sps:$4 sm:$0xff]   ;;  %17634 = verf.f32 %v971_v10 }
 0x19c   : > { %9358 = vmatprep.mubr.bf16.mxu1 %v19174_v32  ;;  %9399 = vmatprep.subr.bf16.mxu1 %v15988_v11  ;;  %v983_v1 = vmul.f32 0.70710677, %v19169_v9  ;;  %v17621_v16 = vpop.eup %17620  ;;  %v2049_v60 = vmul.f32 %v1761_v48, %v897_v21  ;;  %v933_v40 = vmul.f32 0.5, %v19118_v61  ;;  %v15989_v24 = vld [vmem:[#allocation5 + $0x1ad0] ss:$24 sps:$4 sm:$0xff]   ;;  %v660_v19 = vmul.f32 0.5, %v19128_v2 }
 0x19d   : > { %v19181_v7 = vpack.c.bf16 %v2086_v59, %v2062_v36  ;;  %9956 = vmatpush1.bf16.msra.mxu0 %v15983_v44  ;;  %17636 = verf.f32 %v959_v23  ;;  %v17623_v26 = vpop.eup %17622  ;;  %v2073_v5 = vmul.f32 %v1785_v13, %v921_v38  ;;  %v1773_v58 = vadd.f32 1.0, %v17621_v16  ;;  %v15997_v11 = vld [vmem:[#allocation5 + $0x1b04] ss:$24 sps:$4 sm:$0xff]  }
 0x19e   : > { %9957 = vmatprep.subr.bf16.mxu0 %v15991_v25  ;;  %17638 = verf.f32 %v983_v1  ;;  %v1797_v62 = vadd.f32 1.0, %v17623_v26  ;;  %v684_v21 = vmul.f32 0.5, %v19131_v33  ;;  %v672_v2 = vmul.f32 0.5, %v19143_v41 }
 0x19f   : > { %22262 = vst [vmem:[#allocation42_spill] sm:$0xff] %v19181_v7  ;;  %v17625_v10 = vpop.eup %17624  ;;  %9916 = vmatprep.mubr.bf16.mxu0 %v19181_v7  ;;  %9400 = vmatpush1.bf16.msra.mxu1 %v15986_v3  ;;  %v19187_v61 = vpack.c.bf16 %v2073_v5, %v2049_v60  ;;  %v2061_v44 = vmul.f32 %v1773_v58, %v909_v31  ;;  %v696_v48 = vmul.f32 0.5, %v19150_v4  ;;  %v659_v1 = vmul.f32 0.5, %v19157_v43  ;;  %v420_v58 = vld [vmem:[%s18582_s14 + $0x1a8] sm:$0xff] }
 0x1a0   : > { %v17627_v36 = vpop.eup %17626  ;;  %v1524_v29 = vadd.f32 1.0, %v17625_v10  ;;  %9462 = vmatprep.subr.bf16.mxu1 %v15994_v51  ;;  %v2085_v13 = vmul.f32 %v1797_v62, %v933_v40  ;;  %v683_v40 = vmul.f32 0.5, %v19160_v22  ;;  %v671_v5 = vmul.f32 0.5, %v19166_v53  ;;  %v15992_v53 = vld [vmem:[#allocation5 + $0x900] ss:$24 sps:$4 sm:$0xff]  }
 0x1a1   : > { %9958 = vmatpush1.bf16.msra.mxu0 %v15989_v24  ;;  %v1548_v38 = vadd.f32 1.0, %v17627_v36  ;;  %v17629_v25 = vpop.eup %17628  ;;  %9359 = vmatmul.mubr.bf16.gmra.mrb[20].mxu1 %v19187_v61  ;;  %v695_v10 = vmul.f32 0.5, %v19169_v9  ;;  %v996_v62 = vmul.f32 0.70710677, %v420_v58  ;;  %v15995_v9 = vld [vmem:[#allocation5 + $0x1b00] ss:$24 sps:$4 sm:$0xff]  }
 0x1a2   : > { %v1812_v59 = vmul.f32 %v1524_v29, %v660_v19  ;;  %10020 = vmatprep.subr.bf16.mxu0 %v15997_v11  ;;  %v17631_v33 = vpop.eup %17630  ;;  %v19192_v3 = vpack.c.bf16 %v2085_v13, %v2061_v44  ;;  %v1536_v23 = vadd.f32 1.0, %v17629_v25  ;;  %v444_v19 = vld [vmem:[%s18582_s14 + $0x268] sm:$0xff] }
 0x1a3   : > { %v1836_v31 = vmul.f32 %v1548_v38, %v684_v21  ;;  %v1560_v51 = vadd.f32 1.0, %v17631_v33  ;;  %v1020_v29 = vmul.f32 0.70710677, %v444_v19  ;;  %v432_v13 = vld [vmem:[%s18582_s14 + $0x208] sm:$0xff]  ;;  %17640 = verf.f32 %v996_v62 }
 0x1a4   : > { %22263 = vst [vmem:[#allocation43_spill] sm:$0xff] %v19192_v3  ;;  %v17633_v16 = vpop.eup %17632  ;;  %9917 = vmatmul.mubr.bf16.gmra.mrb[20].mxu0 %v19192_v3  ;;  %v1824_v60 = vmul.f32 %v1536_v23, %v672_v2  ;;  %v456_v25 = vld [vmem:[%s18582_s14 + $0x2c8] sm:$0xff] }
 0x1a5   : > { %v19196_v41 = vpack.c.bf16 %v1836_v31, %v1812_v59  ;;  %v17635_v4 = vpop.eup %17634  ;;  %v1848_v24 = vmul.f32 %v1560_v51, %v696_v48  ;;  %v1523_v26 = vadd.f32 1.0, %v17633_v16  ;;  %17642 = verf.f32 %v1020_v29  ;;  %v16000_v23 = vld [vmem:[#allocation5 + $0x934] ss:$24 sps:$4 sm:$0xff]   ;;  %v443_v16 = vld [vmem:[%s18582_s14 + $0x260] sm:$0xff]  ;;  %v16001_v62 = vld [vmem:[#allocation5 + $0x1b30] ss:$24 sps:$4 sm:$0xff]  }
 0x1a6   : > { %v1547_v43 = vadd.f32 1.0, %v17635_v4  ;;  %v1008_v48 = vmul.f32 0.70710677, %v432_v13  ;;  %v1032_v51 = vmul.f32 0.70710677, %v456_v25  ;;  %v19223_v29 = vld [vmem:[%s18582_s14 + $0x3e8] sm:$0xff] }
 0x1a7   : > { %v17637_v11 = vpop.eup %17636  ;;  %9401 = vmatprep.mubr.bf16.mxu1 %v19196_v41  ;;  %v19204_v36 = vpack.c.bf16 %v1848_v24, %v1824_v60  ;;  %v1811_v22 = vmul.f32 %v1523_v26, %v659_v1  ;;  %v419_v1 = vld [vmem:[%s18582_s14 + $0x1a0] sm:$0xff]  ;;  %v15998_v60 = vld [vmem:[#allocation5 + $0x930] ss:$24 sps:$4 sm:$0xff]   ;;  %v731_v7 = vmul.f32 0.5, %v443_v16 }
 0x1a8   : > { %v17639_v21 = vpop.eup %17638  ;;  %v1535_v44 = vadd.f32 1.0, %v17637_v11  ;;  %v1835_v38 = vmul.f32 %v1547_v43, %v683_v40  ;;  %v16003_v40 = vld [vmem:[#allocation5 + $0x1b34] ss:$24 sps:$4 sm:$0xff]   ;;  %17644 = verf.f32 %v1008_v48  ;;  %v995_v4 = vmul.f32 0.70710677, %v419_v1  ;;  %v431_v24 = vld [vmem:[%s18582_s14 + $0x200] sm:$0xff] }
 0x1a9   : > { %22264 = vst [vmem:[#allocation44_spill] sm:$0xff] %v19204_v36  ;;  %v1559_v2 = vadd.f32 1.0, %v17639_v21  ;;  %9959 = vmatprep.mubr.bf16.mxu0 %v19204_v36  ;;  %v455_v26 = vld [vmem:[%s18582_s14 + $0x2c0] sm:$0xff]  ;;  %17646 = verf.f32 %v1032_v51  ;;  %v1007_v43 = vmul.f32 0.70710677, %v431_v24  ;;  %v708_v48 = vmul.f32 0.5, %v420_v58 }
 0x1aa   : > { %v1823_v59 = vmul.f32 %v1535_v44, %v671_v5  ;;  %v19209_v33 = vpack.c.bf16 %v1835_v38, %v1811_v22  ;;  %v1019_v5 = vmul.f32 0.70710677, %v443_v16  ;;  %17648 = verf.f32 %v995_v4  ;;  %v16006_v21 = vld [vmem:[#allocation5 + $0x964] ss:$24 sps:$4 sm:$0xff]   ;;  %v16004_v22 = vld [vmem:[#allocation5 + $0x960] ss:$24 sps:$4 sm:$0xff]  }
 0x1ab   : > { %v1847_v31 = vmul.f32 %v1559_v2, %v695_v10  ;;  %v1031_v10 = vmul.f32 0.70710677, %v455_v26  ;;  %v19220_v44 = vld [vmem:[%s18582_s14 + $0x328] sm:$0xff]  ;;  %v16007_v2 = vld [vmem:[#allocation5 + $0x1b60] ss:$24 sps:$4 sm:$0xff]   ;;  %v720_v51 = vmul.f32 0.5, %v432_v13 }
 0x1ac   : > { %22265 = vst [vmem:[#allocation45_spill] sm:$0xff] %v19209_v33  ;;  %9402 = vmatmul.mubr.bf16.vlgmr.msra.gmra.mrb[0].mxu1 %v19209_v33  ;;  %17650 = verf.f32 %v1019_v5  ;;  %v1044_v38 = vmul.f32 0.70710677, %v19220_v44  ;;  %v19228_v4 = vld [vmem:[%s18582_s14 + $0x388] sm:$0xff]  ;;  %v707_v58 = vmul.f32 0.5, %v419_v1  ;;  %v719_v55 = vmul.f32 0.5, %v431_v24 }
 0x1ad   : > { %v19216_v11 = vpack.c.bf16 %v1847_v31, %v1823_v59  ;;  %9463 = vmatpush1.bf16.msra.mxu1 %v15992_v53  ;;  %17652 = verf.f32 %v1007_v43  ;;  %v16009_v53 = vld [vmem:[#allocation5 + $0x1b64] ss:$24 sps:$4 sm:$0xff]   ;;  %v16012_v59 = vld [vmem:[#allocation5 + $0x994] ss:$24 sps:$4 sm:$0xff]   ;;  %v1068_v31 = vmul.f32 0.70710677, %v19223_v29 }
 0x1ae   : > { %9464 = vmatprep.subr.bf16.mxu1 %v16000_v23  ;;  %17654 = verf.f32 %v1031_v10  ;;  %v732_v23 = vmul.f32 0.5, %v444_v19  ;;  %v19231_v5 = vld [vmem:[%s18582_s14 + $0x448] sm:$0xff]  ;;  %v1056_v19 = vmul.f32 0.70710677, %v19228_v4  ;;  %v743_v12 = vmul.f32 0.5, %v455_v26  ;;  %v19247_v24 = vld [vmem:[%s18582_s14 + $0x440] sm:$0xff] }
 0x1af   : > { %22266 = vst [vmem:[#allocation46_spill] sm:$0xff] %v19216_v11  ;;  %9960 = vmatmul.mubr.bf16.vlgmr.msra.gmra.mrb[0].mxu0 %v19216_v11  ;;  %17656 = verf.f32 %v1044_v38  ;;  %v16010_v43 = vld [vmem:[#allocation5 + $0x990] ss:$24 sps:$4 sm:$0xff]   ;;  %v16015_v10 = vld [vmem:[#allocation5 + $0x1b94] ss:$24 sps:$4 sm:$0xff]   ;;  %v744_v11 = vmul.f32 0.5, %v456_v25 }
 0x1b0   : > { %10021 = vmatpush1.bf16.msra.mxu0 %v15995_v9  ;;  %v17641_v9 = vpop.eup %17640  ;;  %17658 = verf.f32 %v1068_v31  ;;  %v1080_v13 = vmul.f32 0.70710677, %v19231_v5  ;;  %v16013_v3 = vld [vmem:[#allocation5 + $0x1b90] ss:$24 sps:$4 sm:$0xff]   ;;  %v19414_v33 = vld [vmem:[%s18582_s14 + $0xf8] sm:$0xff] }
 0x1b1   : > { %10022 = vmatprep.subr.bf16.mxu0 %v16003_v40  ;;  %9465 = vmatpush1.bf16.msra.mxu1 %v15998_v60  ;;  %v17643_v40 = vpop.eup %17642  ;;  %v1572_v60 = vadd.f32 1.0, %v17641_v9  ;;  %v19239_v9 = vld [vmem:[%s18582_s14 + $0x3e0] sm:$0xff]  ;;  %17660 = verf.f32 %v1056_v19 }
 0x1b2   : > { %9466 = vmatprep.subr.bf16.mxu1 %v16006_v21  ;;  %v1596_v36 = vadd.f32 1.0, %v17643_v40  ;;  %v19236_v21 = vld [vmem:[%s18582_s14 + $0x320] sm:$0xff]  ;;  %v17645_v38 = vpop.eup %17644  ;;  %17662 = verf.f32 %v1080_v13  ;;  %v1067_v16 = vmul.f32 0.70710677, %v19239_v9 }
 0x1b3   : > { %v1043_v25 = vmul.f32 0.70710677, %v19236_v21  ;;  %v17647_v1 = vpop.eup %17646  ;;  %v1584_v40 = vadd.f32 1.0, %v17645_v38  ;;  %v16019_v19 = vld [vmem:[#allocation5 + $0x1bc0] ss:$24 sps:$4 sm:$0xff]  }
 0x1b4   : > { %10023 = vmatpush1.bf16.msra.mxu0 %v16001_v62  ;;  %v1860_v62 = vmul.f32 %v1572_v60, %v708_v48  ;;  %v1884_v31 = vmul.f32 %v1596_v36, %v732_v23  ;;  %v17649_v17 = vpop.eup %17648  ;;  %v16016_v60 = vld [vmem:[#allocation5 + $0x9c0] ss:$24 sps:$4 sm:$0xff]  }
 0x1b5   : > { %10024 = vmatprep.subr.bf16.mxu0 %v16009_v53  ;;  %9467 = vmatpush1.bf16.msra.mxu1 %v16004_v22  ;;  %v16018_v53 = vld [vmem:[#allocation5 + $0x9c4] ss:$24 sps:$4 sm:$0xff]   ;;  %v1608_v22 = vadd.f32 1.0, %v17647_v1  ;;  %v1872_v36 = vmul.f32 %v1584_v40, %v720_v51  ;;  %v1571_v23 = vadd.f32 1.0, %v17649_v17  ;;  %17664 = verf.f32 %v1043_v25 }
 0x1b6   : > { %9468 = vmatprep.subr.bf16.mxu1 %v16012_v59  ;;  %v17651_v48 = vpop.eup %17650  ;;  %v19249_v59 = vpack.c.bf16 %v1884_v31, %v1860_v62  ;;  %v756_v1 = vmul.f32 0.5, %v19220_v44  ;;  %17666 = verf.f32 %v1067_v16  ;;  %v1055_v17 = vmul.f32 0.70710677, %v19243_v46 }
 0x1b7   : > { %v17653_v26 = vpop.eup %17652  ;;  %v1896_v38 = vmul.f32 %v1608_v22, %v744_v11  ;;  %v1595_v13 = vadd.f32 1.0, %v17651_v48  ;;  %v1079_v51 = vmul.f32 0.70710677, %v19247_v24  ;;  %v16022_v11 = vld [vmem:[#allocation5 + $0x9f0] ss:$24 sps:$4 sm:$0xff]   ;;  %v780_v40 = vmul.f32 0.5, %v19223_v29 }
 0x1b8   : > { %10025 = vmatpush1.bf16.msra.mxu0 %v16007_v2  ;;  %22267 = vst [vmem:[#allocation47_spill] sm:$0xff] %v19249_v59  ;;  %v16024_v2 = vld [vmem:[#allocation5 + $0x9f4] ss:$24 sps:$4 sm:$0xff]   ;;  %v17655_v45 = vpop.eup %17654  ;;  %9411 = vmatprep.mubr.bf16.mxu1 %v19249_v59  ;;  %v1583_v62 = vadd.f32 1.0, %v17653_v26  ;;  %v768_v48 = vmul.f32 0.5, %v19228_v4  ;;  %17668 = verf.f32 %v1055_v17  ;;  %v19349_v59 = vld [vmem:[%s18582_s14 + $0x740] sm:$0xff] }
 0x1b9   : > { %10026 = vmatprep.subr.bf16.mxu0 %v16015_v10  ;;  %9469 = vmatpush1.bf16.msra.mxu1 %v16010_v43  ;;  %v1859_v10 = vmul.f32 %v1571_v23, %v707_v58  ;;  %v19256_v43 = vld [vmem:[%s18582_s14 + $0x4a8] sm:$0xff]  ;;  %v19258_v25 = vpack.c.bf16 %v1896_v38, %v1872_v36  ;;  %v1883_v44 = vmul.f32 %v1595_v13, %v731_v7  ;;  %v1607_v31 = vadd.f32 1.0, %v17655_v45  ;;  %v17657_v22 = vpop.eup %17656  ;;  %v16030_v7 = vld [vmem:[#allocation5 + $0xa24] ss:$24 sps:$4 sm:$0xff]  }
 0x1ba   : > { %9470 = vmatprep.subr.bf16.mxu1 %v16018_v53  ;;  %v19262_v53 = vld [vmem:[%s18582_s14 + $0x568] sm:$0xff]  ;;  %v1871_v16 = vmul.f32 %v1583_v62, %v719_v55  ;;  %v1092_v23 = vmul.f32 0.70710677, %v19256_v43  ;;  %v17659_v36 = vpop.eup %17658  ;;  %v1620_v26 = vadd.f32 1.0, %v17657_v22  ;;  %17670 = verf.f32 %v1079_v51  ;;  %v16028_v62 = vld [vmem:[#allocation5 + $0xa20] ss:$24 sps:$4 sm:$0xff]  }
 0x1bb   : > { %22268 = vst [vmem:[#allocation48_spill] sm:$0xff] %v19258_v25  ;;  %v16027_v58 = vld [vmem:[#allocation5 + $0x1bf4] ss:$24 sps:$4 sm:$0xff]   ;;  %v16025_v45 = vld [vmem:[#allocation5 + $0x1bf0] ss:$24 sps:$4 sm:$0xff]   ;;  %9969 = vmatprep.mubr.bf16.mxu0 %v19258_v25  ;;  %v19270_v29 = vpack.c.bf16 %v1883_v44, %v1859_v10  ;;  %v1644_v4 = vadd.f32 1.0, %v17659_v36 }
 0x1bc   : > { %10027 = vmatpush1.bf16.msra.mxu0 %v16013_v3  ;;  %v19267_v3 = vld [vmem:[%s18582_s14 + $0x508] sm:$0xff]  ;;  %v792_v38 = vmul.f32 0.5, %v19231_v5  ;;  %v1116_v13 = vmul.f32 0.70710677, %v19262_v53  ;;  %17672 = verf.f32 %v1092_v23  ;;  %v16033_v17 = vld [vmem:[#allocation5 + $0x1c24] ss:$24 sps:$4 sm:$0xff]   ;;  %v1908_v10 = vmul.f32 %v1620_v26, %v756_v1  ;;  %v17661_v5 = vpop.eup %17660 }
 0x1bd   : > { %10028 = vmatprep.subr.bf16.mxu0 %v16021_v0  ;;  %9471 = vmatpush1.bf16.msra.mxu1 %v16016_v60  ;;  %22269 = vst [vmem:[#allocation49_spill] sm:$0xff] %v19270_v29  ;;  %v1895_v0 = vmul.f32 %v1607_v31, %v743_v12  ;;  %v19273_v55 = vld [vmem:[%s18582_s14 + $0x5c8] sm:$0xff]  ;;  %v19278_v60 = vld [vmem:[%s18582_s14 + $0x4a0] sm:$0xff]  ;;  %v755_v51 = vmul.f32 0.5, %v19236_v21  ;;  %v1932_v22 = vmul.f32 %v1644_v4, %v780_v40  ;;  %v779_v23 = vmul.f32 0.5, %v19239_v9 }
 0x1be   : > { %9472 = vmatprep.subr.bf16.mxu1 %v16024_v2  ;;  %9412 = vmatmul.mubr.bf16.gmra.mrb[4].mxu1 %v19270_v29  ;;  %v1104_v2 = vmul.f32 0.70710677, %v19267_v3  ;;  %v19286_v44 = vld [vmem:[%s18582_s14 + $0x560] sm:$0xff]  ;;  %v16036_v31 = vld [vmem:[#allocation5 + $0xa54] ss:$24 sps:$4 sm:$0xff]   ;;  %17674 = verf.f32 %v1116_v13  ;;  %v1632_v21 = vadd.f32 1.0, %v17661_v5 }
 0x1bf   : > { %v19281_v12 = vpack.c.bf16 %v1895_v0, %v1871_v16  ;;  %v17663_v16 = vpop.eup %17662  ;;  %v767_v1 = vmul.f32 0.5, %v19243_v46  ;;  %v1091_v36 = vmul.f32 0.70710677, %v19278_v60  ;;  %v19293_v40 = vpack.c.bf16 %v1932_v22, %v1908_v10  ;;  %v19297_v26 = vld [vmem:[%s18582_s14 + $0x500] sm:$0xff]  ;;  %v16039_v10 = vld [vmem:[#allocation5 + $0x1c54] ss:$24 sps:$4 sm:$0xff]  }
 0x1c0   : > { %10029 = vmatpush1.bf16.msra.mxu0 %v16019_v19  ;;  %v1128_v19 = vmul.f32 0.70710677, %v19273_v55  ;;  %17676 = verf.f32 %v1104_v2  ;;  %v1656_v9 = vadd.f32 1.0, %v17663_v16  ;;  %v1115_v0 = vmul.f32 0.70710677, %v19286_v44  ;;  %v19300_v4 = vld [vmem:[%s18582_s14 + $0x5c0] sm:$0xff] }
 0x1c1   : > { %22270 = vst [vmem:[#allocation50_spill] sm:$0xff] %v19281_v12  ;;  %10030 = vmatprep.subr.bf16.mxu0 %v16027_v58  ;;  %9473 = vmatpush1.bf16.msra.mxu1 %v16022_v11  ;;  %v17665_v58 = vpop.eup %17664  ;;  %22271 = vst [vmem:[#allocation51_spill] sm:$0xff] %v19293_v40  ;;  %v16031_v13 = vld [vmem:[#allocation5 + $0x1c20] ss:$24 sps:$4 sm:$0xff]   ;;  %v1920_v5 = vmul.f32 %v1632_v21, %v768_v48  ;;  %v791_v2 = vmul.f32 0.5, %v19247_v24  ;;  %v804_v16 = vmul.f32 0.5, %v19256_v43 }
 0x1c2   : > { %9970 = vmatmul.mubr.bf16.gmra.mrb[4].mxu0 %v19281_v12  ;;  %9474 = vmatprep.subr.bf16.mxu1 %v16030_v7  ;;  %17678 = verf.f32 %v1128_v19  ;;  %v17667_v11 = vpop.eup %17666  ;;  %v1619_v46 = vadd.f32 1.0, %v17665_v58  ;;  %v16034_v7 = vld [vmem:[#allocation5 + $0xa50] ss:$24 sps:$4 sm:$0xff]   ;;  %v1944_v22 = vmul.f32 %v1656_v9, %v792_v38  ;;  %v1103_v48 = vmul.f32 0.70710677, %v19297_v26  ;;  %v19346_v29 = vld [vmem:[%s18582_s14 + $0x680] sm:$0xff] }
 0x1c3   : > { %17680 = verf.f32 %v1091_v36  ;;  %9421 = vmatprep.mubr.bf16.mxu1 %v19293_v40  ;;  %v1643_v19 = vadd.f32 1.0, %v17667_v11  ;;  %v1127_v21 = vmul.f32 0.70710677, %v19300_v4  ;;  %v19308_v24 = vld [vmem:[%s18582_s14 + $0x628] sm:$0xff]  ;;  %v17669_v36 = vpop.eup %17668  ;;  %v16042_v58 = vld [vmem:[#allocation5 + $0xa84] ss:$24 sps:$4 sm:$0xff]  }
 0x1c4   : > { %10031 = vmatpush1.bf16.msra.mxu0 %v16025_v45  ;;  %17682 = verf.f32 %v1115_v0  ;;  %v16037_v45 = vld [vmem:[#allocation5 + $0x1c50] ss:$24 sps:$4 sm:$0xff]   ;;  %v1907_v12 = vmul.f32 %v1619_v46, %v755_v51  ;;  %v19313_v38 = vpack.c.bf16 %v1944_v22, %v1920_v5  ;;  %v828_v43 = vmul.f32 0.5, %v19262_v53  ;;  %v17671_v51 = vpop.eup %17670  ;;  %v16040_v0 = vld [vmem:[#allocation5 + $0xa80] ss:$24 sps:$4 sm:$0xff]  }
 0x1c5   : > { %10032 = vmatprep.subr.bf16.mxu0 %v16033_v17  ;;  %9475 = vmatpush1.bf16.msra.mxu1 %v16028_v62  ;;  %v19311_v17 = vld [vmem:[%s18582_s14 + $0x6e8] sm:$0xff]  ;;  %v1931_v9 = vmul.f32 %v1643_v19, %v779_v23  ;;  %v816_v62 = vmul.f32 0.5, %v19267_v3  ;;  %v1631_v11 = vadd.f32 1.0, %v17669_v36  ;;  %17684 = verf.f32 %v1103_v48  ;;  %v16045_v53 = vld [vmem:[#allocation5 + $0x1c84] ss:$24 sps:$4 sm:$0xff]  }
 0x1c6   : > { %9476 = vmatprep.subr.bf16.mxu1 %v16036_v31  ;;  %22272 = vst [vmem:[#allocation52_spill] sm:$0xff] %v19313_v38  ;;  %v1140_v46 = vmul.f32 0.70710677, %v19308_v24  ;;  %v1164_v25 = vmul.f32 0.70710677, %v19311_v17  ;;  %v19320_v40 = vld [vmem:[%s18582_s14 + $0x688] sm:$0xff]  ;;  %v17673_v31 = vpop.eup %17672  ;;  %9979 = vmatprep.mubr.bf16.mxu0 %v19313_v38  ;;  %17686 = verf.f32 %v1127_v21 }
 0x1c7   : > { %v19323_v23 = vpack.c.bf16 %v1931_v9, %v1907_v12  ;;  %v1655_v3 = vadd.f32 1.0, %v17671_v51  ;;  %v19327_v5 = vld [vmem:[%s18582_s14 + $0x748] sm:$0xff]  ;;  %v16043_v22 = vld [vmem:[#allocation5 + $0x1c80] ss:$24 sps:$4 sm:$0xff]   ;;  %v1919_v19 = vmul.f32 %v1631_v11, %v767_v1  ;;  %v1668_v48 = vadd.f32 1.0, %v17673_v31 }
 0x1c8   : > { %10033 = vmatpush1.bf16.msra.mxu0 %v16031_v13  ;;  %v840_v13 = vmul.f32 0.5, %v19273_v55  ;;  %v803_v36 = vmul.f32 0.5, %v19278_v60  ;;  %17688 = verf.f32 %v1140_v46  ;;  %v17675_v38 = vpop.eup %17674  ;;  %v16048_v9 = vld [vmem:[#allocation5 + $0xab4] ss:$24 sps:$4 sm:$0xff]   ;;  %v1152_v55 = vmul.f32 0.70710677, %v19320_v40 }
 0x1c9   : > { %10034 = vmatprep.subr.bf16.mxu0 %v16039_v10  ;;  %22273 = vst [vmem:[#allocation53_spill] sm:$0xff] %v19323_v23  ;;  %9477 = vmatpush1.bf16.msra.mxu1 %v16034_v7  ;;  %v19331_v10 = vld [vmem:[%s18582_s14 + $0x620] sm:$0xff]  ;;  %v1943_v12 = vmul.f32 %v1655_v3, %v791_v2  ;;  %17690 = verf.f32 %v1164_v25  ;;  %v1176_v7 = vmul.f32 0.70710677, %v19327_v5  ;;  %v16046_v1 = vld [vmem:[#allocation5 + $0xab0] ss:$24 sps:$4 sm:$0xff]   ;;  %v1956_v60 = vmul.f32 %v1668_v48, %v804_v16 }
 0x1ca   : > { %9478 = vmatprep.subr.bf16.mxu1 %v16042_v58  ;;  %9422 = vmatmul.mubr.bf16.gmra.mrb[8].mxu1 %v19323_v23  ;;  %v17677_v21 = vpop.eup %17676  ;;  %v1692_v51 = vadd.f32 1.0, %v17675_v38  ;;  %v827_v11 = vmul.f32 0.5, %v19286_v44  ;;  %v19338_v46 = vld [vmem:[%s18582_s14 + $0x6e0] sm:$0xff]  ;;  %v1139_v58 = vmul.f32 0.70710677, %v19331_v10  ;;  %v815_v23 = vmul.f32 0.5, %v19297_v26 }
 0x1cb   : > { %v19341_v25 = vpack.c.bf16 %v1943_v12, %v1919_v19  ;;  %v16051_v31 = vld [vmem:[#allocation5 + $0x1cb4] ss:$24 sps:$4 sm:$0xff]   ;;  %v1680_v3 = vadd.f32 1.0, %v17677_v21  ;;  %17692 = verf.f32 %v1152_v55  ;;  %v16049_v16 = vld [vmem:[#allocation5 + $0x1cb0] ss:$24 sps:$4 sm:$0xff]  }
 0x1cc   : > { %10035 = vmatpush1.bf16.msra.mxu0 %v16037_v45  ;;  %v17679_v2 = vpop.eup %17678  ;;  %v1980_v38 = vmul.f32 %v1692_v51, %v828_v43  ;;  %17694 = verf.f32 %v1176_v7  ;;  %v1163_v48 = vmul.f32 0.70710677, %v19338_v46  ;;  %v16054_v26 = vld [vmem:[#allocation5 + $0xae4] ss:$24 sps:$4 sm:$0xff]   ;;  %v19356_v51 = vld [vmem:[%s18582_s14 + $0x7a8] sm:$0xff] }
 0x1cd   : > { %10036 = vmatprep.subr.bf16.mxu0 %v16045_v53  ;;  %22274 = vst [vmem:[#allocation54_spill] sm:$0xff] %v19341_v25  ;;  %v17681_v45 = vpop.eup %17680  ;;  %9479 = vmatpush1.bf16.msra.mxu1 %v16040_v0  ;;  %v1704_v44 = vadd.f32 1.0, %v17679_v2  ;;  %v1968_v19 = vmul.f32 %v1680_v3, %v816_v62  ;;  %v839_v0 = vmul.f32 0.5, %v19300_v4  ;;  %17696 = verf.f32 %v1139_v58  ;;  %v16057_v7 = vld [vmem:[#allocation5 + $0x1ce4] ss:$24 sps:$4 sm:$0xff]   ;;  %v19359_v2 = vld [vmem:[%s18582_s14 + $0x868] sm:$0xff] }
 0x1ce   : > { %v17683_v53 = vpop.eup %17682  ;;  %9980 = vmatmul.mubr.bf16.gmra.mrb[8].mxu0 %v19341_v25  ;;  %9480 = vmatprep.subr.bf16.mxu1 %v16048_v9  ;;  %v1667_v12 = vadd.f32 1.0, %v17681_v45  ;;  %v19353_v43 = vpack.c.bf16 %v1980_v38, %v1956_v60  ;;  %17698 = verf.f32 %v1163_v48  ;;  %v16052_v25 = vld [vmem:[#allocation5 + $0xae0] ss:$24 sps:$4 sm:$0xff]   ;;  %v852_v62 = vmul.f32 0.5, %v19308_v24  ;;  %v16060_v45 = vld [vmem:[#allocation5 + $0xb14] ss:$24 sps:$4 sm:$0xff]  }
 0x1cf   : > { %v1992_v55 = vmul.f32 %v1704_v44, %v840_v13  ;;  %v1691_v21 = vadd.f32 1.0, %v17683_v53  ;;  %v1151_v3 = vmul.f32 0.70710677, %v19346_v29  ;;  %v1175_v4 = vmul.f32 0.70710677, %v19349_v59  ;;  %v19372_v48 = vld [vmem:[%s18582_s14 + $0x808] sm:$0xff] }
 0x1d0   : > { %10037 = vmatpush1.bf16.msra.mxu0 %v16043_v22  ;;  %22275 = vst [vmem:[#allocation55_spill] sm:$0xff] %v19353_v43  ;;  %v1955_v9 = vmul.f32 %v1667_v12, %v803_v36  ;;  %v17685_v22 = vpop.eup %17684  ;;  %9431 = vmatprep.mubr.bf16.mxu1 %v19353_v43  ;;  %v16055_v60 = vld [vmem:[#allocation5 + $0x1ce0] ss:$24 sps:$4 sm:$0xff]   ;;  %v864_v36 = vmul.f32 0.5, %v19320_v40  ;;  %v1188_v44 = vmul.f32 0.70710677, %v19356_v51 }
 0x1d1   : > { %10038 = vmatprep.subr.bf16.mxu0 %v16051_v31  ;;  %9481 = vmatpush1.bf16.msra.mxu1 %v16046_v1  ;;  %v19365_v13 = vpack.c.bf16 %v1992_v55, %v1968_v19  ;;  %v1979_v58 = vmul.f32 %v1691_v21, %v827_v11  ;;  %v876_v31 = vmul.f32 0.5, %v19311_v17  ;;  %v17687_v24 = vpop.eup %17686  ;;  %v1679_v38 = vadd.f32 1.0, %v17685_v22  ;;  %v19379_v40 = vld [vmem:[%s18582_s14 + $0x8c8] sm:$0xff]  ;;  %v19411_v43 = vld [vmem:[%s18582_s14 + $0x38] sm:$0xff] }
 0x1d2   : > { %9482 = vmatprep.subr.bf16.mxu1 %v16054_v26  ;;  %17700 = verf.f32 %v1151_v3  ;;  %v1212_v1 = vmul.f32 0.70710677, %v19359_v2  ;;  %v17689_v53 = vpop.eup %17688  ;;  %v1703_v17 = vadd.f32 1.0, %v17687_v24  ;;  %v888_v19 = vmul.f32 0.5, %v19327_v5  ;;  %v16058_v55 = vld [vmem:[#allocation5 + $0xb10] ss:$24 sps:$4 sm:$0xff]  }
 0x1d3   : > { %22276 = vst [vmem:[#allocation56_spill] sm:$0xff] %v19365_v13  ;;  %9989 = vmatprep.mubr.bf16.mxu0 %v19365_v13  ;;  %v19375_v11 = vpack.c.bf16 %v1979_v58, %v1955_v9  ;;  %17702 = verf.f32 %v1175_v4  ;;  %v17691_v26 = vpop.eup %17690  ;;  %v1967_v12 = vmul.f32 %v1679_v38, %v815_v23  ;;  %v16063_v21 = vld [vmem:[#allocation5 + $0x1d14] ss:$24 sps:$4 sm:$0xff]   ;;  %v1716_v3 = vadd.f32 1.0, %v17689_v53  ;;  %v16061_v22 = vld [vmem:[#allocation5 + $0x1d10] ss:$24 sps:$4 sm:$0xff]  }
 0x1d4   : > { %10039 = vmatpush1.bf16.msra.mxu0 %v16049_v16  ;;  %v851_v16 = vmul.f32 0.5, %v19331_v10  ;;  %17704 = verf.f32 %v1188_v44  ;;  %v1991_v9 = vmul.f32 %v1703_v17, %v839_v0  ;;  %v1740_v58 = vadd.f32 1.0, %v17691_v26  ;;  %v19385_v4 = vld [vmem:[%s18582_s14 + $0x7a0] sm:$0xff] }
 0x1d5   : > { %22277 = vst [vmem:[#allocation57_spill] sm:$0xff] %v19375_v11  ;;  %10040 = vmatprep.subr.bf16.mxu0 %v16057_v7  ;;  %9432 = vmatmul.mubr.bf16.gmra.mrb[12].mxu1 %v19375_v11  ;;  %17706 = verf.f32 %v1212_v1  ;;  %v1200_v5 = vmul.f32 0.70710677, %v19372_v48  ;;  %v19388_v24 = vld [vmem:[%s18582_s14 + $0x860] sm:$0xff]  ;;  %v17693_v23 = vpop.eup %17692  ;;  %v2004_v7 = vmul.f32 %v1716_v3, %v852_v62  ;;  %v875_v44 = vmul.f32 0.5, %v19338_v46 }
 0x1d6   : > { %9483 = vmatpush1.bf16.msra.mxu1 %v16052_v25  ;;  %v16066_v38 = vld [vmem:[#allocation5 + $0xb44] ss:$24 sps:$4 sm:$0xff]   ;;  %v19392_v0 = vmul.f32 0.5, %v19346_v29  ;;  %v1224_v1 = vmul.f32 0.70710677, %v19379_v40  ;;  %v17695_v53 = vpop.eup %17694  ;;  %v19395_v17 = vpack.c.bf16 %v1991_v9, %v1967_v12  ;;  %v2028_v26 = vmul.f32 %v1740_v58, %v876_v31 }
 0x1d7   : > { %v16069_v10 = vld [vmem:[#allocation5 + $0x1d44] ss:$24 sps:$4 sm:$0xff]   ;;  %9484 = vmatprep.subr.bf16.mxu1 %v16060_v45  ;;  %v1728_v13 = vadd.f32 1.0, %v17693_v23  ;;  %17708 = verf.f32 %v1200_v5  ;;  %v17697_v62 = vpop.eup %17696  ;;  %v16064_v46 = vld [vmem:[#allocation5 + $0xb40] ss:$24 sps:$4 sm:$0xff]   ;;  %v1752_v3 = vadd.f32 1.0, %v17695_v53 }
 0x1d8   : > { %22278 = vst [vmem:[#allocation58_spill] sm:$0xff] %v19395_v17  ;;  %10041 = vmatpush1.bf16.msra.mxu0 %v16055_v60  ;;  %v19398_v11 = vld [vmem:[%s18582_s14 + $0x800] sm:$0xff]  ;;  %17710 = verf.f32 %v1224_v1  ;;  %v1187_v29 = vmul.f32 0.70710677, %v19385_v4  ;;  %v1211_v12 = vmul.f32 0.70710677, %v19388_v24  ;;  %v17699_v60 = vpop.eup %17698  ;;  %v19406_v45 = vpack.c.bf16 %v2028_v26, %v2004_v7 }
 0x1d9   : > { %v19401_v25 = vld [vmem:[%s18582_s14 + $0x8c0] sm:$0xff]  ;;  %10042 = vmatprep.subr.bf16.mxu0 %v16063_v21  ;;  %9990 = vmatmul.mubr.bf16.gmra.mrb[12].mxu0 %v19395_v17  ;;  %v2016_v31 = vmul.f32 %v1728_v13, %v864_v36  ;;  %v1715_v58 = vadd.f32 1.0, %v17697_v62  ;;  %v887_v5 = vmul.f32 0.5, %v19349_v59  ;;  %v16072_v21 = vld [vmem:[#allocation5 + $0xb74] ss:$24 sps:$4 sm:$0xff]   ;;  %v2040_v23 = vmul.f32 %v1752_v3, %v888_v19 }
 0x1da   : > { %22279 = vst [vmem:[#allocation59_spill] sm:$0xff] %v19406_v45  ;;  %v16067_v9 = vld [vmem:[#allocation5 + $0x1d40] ss:$24 sps:$4 sm:$0xff]   ;;  %9485 = vmatpush1.bf16.msra.mxu1 %v16058_v55  ;;  %v1739_v1 = vadd.f32 1.0, %v17699_v60  ;;  %v900_v53 = vmul.f32 0.5, %v19356_v51  ;;  %17712 = verf.f32 %v1187_v29  ;;  %9441 = vmatprep.mubr.bf16.mxu1 %v19406_v45  ;;  %v924_v62 = vmul.f32 0.5, %v19359_v2 }
 0x1db   : > { %v2003_v7 = vmul.f32 %v1715_v58, %v851_v16  ;;  %17714 = verf.f32 %v1211_v12  ;;  %v1199_v13 = vmul.f32 0.70710677, %v19398_v11  ;;  %v1223_v59 = vmul.f32 0.70710677, %v19401_v25  ;;  %9486 = vmatprep.subr.bf16.mxu1 %v16066_v38  ;;  %v16070_v55 = vld [vmem:[#allocation5 + $0xb70] ss:$24 sps:$4 sm:$0xff]  }
 0x1dc   : > { %10043 = vmatpush1.bf16.msra.mxu0 %v16061_v22  ;;  %v17701_v36 = vpop.eup %17700  ;;  %v19419_v19 = vpack.c.bf16 %v2040_v23, %v2016_v31  ;;  %v2027_v51 = vmul.f32 %v1739_v1, %v875_v44  ;;  %v16075_v26 = vld [vmem:[#allocation5 + $0x1d74] ss:$24 sps:$4 sm:$0xff]   ;;  %v912_v22 = vmul.f32 0.5, %v19372_v48  ;;  %v16073_v29 = vld [vmem:[#allocation5 + $0x1d70] ss:$24 sps:$4 sm:$0xff]   ;;  %v19426_v38 = vld [vmem:[%s18582_s14 + $0x98] sm:$0xff] }
 0x1dd   : > { %10044 = vmatprep.subr.bf16.mxu0 %v16069_v10  ;;  %v17703_v16 = vpop.eup %17702  ;;  %v1727_v3 = vadd.f32 1.0, %v17701_v36  ;;  %17716 = verf.f32 %v1199_v13  ;;  %v950_v12 = vmul.f32 0.70710677, %v19411_v43  ;;  %v974_v60 = vmul.f32 0.70710677, %v19414_v33  ;;  %v19433_v48 = vld [vmem:[%s18582_s14 + $0x158] sm:$0xff] }
 0x1de   : > { %22280 = vst [vmem:[#allocation60_spill] sm:$0xff] %v19419_v19  ;;  %v17705_v31 = vpop.eup %17704  ;;  %9999 = vmatprep.mubr.bf16.mxu0 %v19419_v19  ;;  %v19429_v10 = vpack.c.bf16 %v2027_v51, %v2003_v7  ;;  %9487 = vmatpush1.bf16.msra.mxu1 %v16064_v46  ;;  %v1751_v2 = vadd.f32 1.0, %v17703_v16  ;;  %v936_v44 = vmul.f32 0.5, %v19379_v40  ;;  %17718 = verf.f32 %v1223_v59  ;;  %v16078_v13 = vld [vmem:[#allocation5 + $0xba4] ss:$24 sps:$4 sm:$0xff]   ;;  %v19440_v51 = vld [vmem:[%s18582_s14 + $0x30] sm:$0xff] }
 0x1df   : > { %v17707_v58 = vpop.eup %17706  ;;  %v2015_v23 = vmul.f32 %v1727_v3, %v19392_v0  ;;  %9488 = vmatprep.subr.bf16.mxu1 %v16072_v21  ;;  %v1764_v1 = vadd.f32 1.0, %v17705_v31  ;;  %v16081_v36 = vld [vmem:[#allocation5 + $0x1da4] ss:$24 sps:$4 sm:$0xff]   ;;  %v899_v7 = vmul.f32 0.5, %v19385_v4  ;;  %17720 = verf.f32 %v950_v12  ;;  %v16076_v59 = vld [vmem:[#allocation5 + $0xba0] ss:$24 sps:$4 sm:$0xff]  }
 0x1e0   : > { %22281 = vst [vmem:[#allocation61_spill] sm:$0xff] %v19429_v10  ;;  %10045 = vmatpush1.bf16.msra.mxu0 %v16067_v9  ;;  %9442 = vmatmul.mubr.bf16.gmra.mrb[16].mxu1 %v19429_v10  ;;  %v2039_v46 = vmul.f32 %v1751_v2, %v887_v5  ;;  %v1788_v40 = vadd.f32 1.0, %v17707_v58  ;;  %17722 = verf.f32 %v974_v60  ;;  %v962_v0 = vmul.f32 0.70710677, %v19426_v38  ;;  %v19443_v9 = vld [vmem:[%s18582_s14 + $0xf0] sm:$0xff]  ;;  %v19697_v45 = vld [vmem:[%s18582_s14 + $0x108] sm:$0xff] }
 0x1e1   : > { %10046 = vmatprep.subr.bf16.mxu0 %v16075_v26  ;;  %v17709_v21 = vpop.eup %17708  ;;  %v2052_v16 = vmul.f32 %v1764_v1, %v900_v53  ;;  %v16079_v3 = vld [vmem:[#allocation5 + $0x1da0] ss:$24 sps:$4 sm:$0xff]   ;;  %v16084_v4 = vld [vmem:[#allocation5 + $0xbd4] ss:$24 sps:$4 sm:$0xff]   ;;  %v986_v12 = vmul.f32 0.70710677, %v19433_v48 }
 0x1e2   : > { %v17711_v31 = vpop.eup %17710  ;;  %v19446_v5 = vpack.c.bf16 %v2039_v46, %v2015_v23  ;;  %9489 = vmatpush1.bf16.msra.mxu1 %v16070_v55  ;;  %v2076_v26 = vmul.f32 %v1788_v40, %v924_v62  ;;  %v1776_v2 = vadd.f32 1.0, %v17709_v21  ;;  %17724 = verf.f32 %v962_v0  ;;  %v19449_v60 = vld [vmem:[%s18582_s14 + $0x90] sm:$0xff] }
 0x1e3   : > { %v19452_v58 = vld [vmem:[%s18582_s14 + $0x150] sm:$0xff]  ;;  %9490 = vmatprep.subr.bf16.mxu1 %v16078_v13  ;;  %v1800_v19 = vadd.f32 1.0, %v17711_v31  ;;  %17726 = verf.f32 %v986_v12  ;;  %v949_v53 = vmul.f32 0.70710677, %v19440_v51  ;;  %v973_v1 = vmul.f32 0.70710677, %v19443_v9 }
 0x1e4   : > { %22282 = vst [vmem:[#allocation62_spill] sm:$0xff] %v19446_v5  ;;  %10047 = vmatpush1.bf16.msra.mxu0 %v16073_v29  ;;  %v17713_v17 = vpop.eup %17712  ;;  %v19457_v23 = vpack.c.bf16 %v2076_v26, %v2052_v16  ;;  %v2064_v55 = vmul.f32 %v1776_v2, %v912_v22  ;;  %v923_v62 = vmul.f32 0.5, %v19388_v24  ;;  %v16087_v46 = vld [vmem:[#allocation5 + $0x1dd4] ss:$24 sps:$4 sm:$0xff]   ;;  %v16082_v13 = vld [vmem:[#allocation5 + $0xbd0] ss:$24 sps:$4 sm:$0xff]  }
 0x1e5   : > { %10000 = vmatmul.mubr.bf16.gmra.mrb[16].mxu0 %v19446_v5  ;;  %10048 = vmatprep.subr.bf16.mxu0 %v16081_v36  ;;  %v17715_v40 = vpop.eup %17714  ;;  %v2088_v0 = vmul.f32 %v1800_v19, %v936_v44  ;;  %v1763_v29 = vadd.f32 1.0, %v17713_v17  ;;  %17728 = verf.f32 %v949_v53  ;;  %v961_v21 = vmul.f32 0.70710677, %v19449_v60  ;;  %v16085_v17 = vld [vmem:[#allocation5 + $0x1dd0] ss:$24 sps:$4 sm:$0xff]  }
 0x1e6   : > { %22283 = vst [vmem:[#allocation63_spill] sm:$0xff] %v19457_v23  ;;  %9451 = vmatprep.mubr.bf16.mxu1 %v19457_v23  ;;  %v1787_v12 = vadd.f32 1.0, %v17715_v40  ;;  %9491 = vmatpush1.bf16.msra.mxu1 %v16076_v59  ;;  %v911_v31 = vmul.f32 0.5, %v19398_v11  ;;  %17730 = verf.f32 %v973_v1  ;;  %v985_v22 = vmul.f32 0.70710677, %v19452_v58 }
 0x1e7   : > { %v17717_v36 = vpop.eup %17716  ;;  %v19464_v16 = vpack.c.bf16 %v2088_v0, %v2064_v55  ;;  %v2051_v24 = vmul.f32 %v1763_v29, %v899_v7  ;;  %v935_v19 = vmul.f32 0.5, %v19401_v25  ;;  %9492 = vmatprep.subr.bf16.mxu1 %v16084_v4  ;;  %v16090_v44 = vld [vmem:[#allocation5 + $0xc04] ss:$24 sps:$4 sm:$0xff]   ;;  %17732 = verf.f32 %v961_v21 }
 0x1e8   : > { %10049 = vmatpush1.bf16.msra.mxu0 %v16079_v3  ;;  %v17719_v26 = vpop.eup %17718  ;;  %v2075_v2 = vmul.f32 %v1787_v12, %v923_v62  ;;  %v1775_v53 = vadd.f32 1.0, %v17717_v36  ;;  %v662_v11 = vmul.f32 0.5, %v19411_v43  ;;  %v16093_v59 = vld [vmem:[#allocation5 + $0x1e04] ss:$24 sps:$4 sm:$0xff]   ;;  %17734 = verf.f32 %v985_v22 }
 0x1e9   : > { %22284 = vst [vmem:[#allocation64_spill] sm:$0xff] %v19464_v16  ;;  %10050 = vmatprep.subr.bf16.mxu0 %v16087_v46  ;;  %v17721_v1 = vpop.eup %17720  ;;  %10009 = vmatprep.mubr.bf16.mxu0 %v19464_v16  ;;  %v1799_v55 = vadd.f32 1.0, %v17719_v26  ;;  %v686_v7 = vmul.f32 0.5, %v19414_v33  ;;  %v674_v43 = vmul.f32 0.5, %v19426_v38  ;;  %v698_v21 = vmul.f32 0.5, %v19433_v48 }
 0x1ea   : > { %v17723_v25 = vpop.eup %17722  ;;  %v19470_v3 = vpack.c.bf16 %v2075_v2, %v2051_v24  ;;  %v2063_v4 = vmul.f32 %v1775_v53, %v911_v31  ;;  %9493 = vmatpush1.bf16.msra.mxu1 %v16082_v13  ;;  %v1526_v40 = vadd.f32 1.0, %v17721_v1  ;;  %v661_v36 = vmul.f32 0.5, %v19440_v51  ;;  %v422_v53 = vld [vmem:[%s18582_s14 + $0x1b8] sm:$0xff] }
 0x1eb   : > { %v2087_v0 = vmul.f32 %v1799_v55, %v935_v19  ;;  %v1550_v62 = vadd.f32 1.0, %v17723_v25  ;;  %9555 = vmatprep.subr.bf16.mxu1 %v16090_v44  ;;  %v673_v2 = vmul.f32 0.5, %v19449_v60  ;;  %v697_v1 = vmul.f32 0.5, %v19452_v58  ;;  %v16088_v60 = vld [vmem:[#allocation5 + $0xc00] ss:$24 sps:$4 sm:$0xff]  }
 0x1ec   : > { %22285 = vst [vmem:[#allocation65_spill] sm:$0xff] %v19470_v3  ;;  %10051 = vmatpush1.bf16.msra.mxu0 %v16085_v17  ;;  %v17725_v46 = vpop.eup %17724  ;;  %9452 = vmatmul.mubr.bf16.gmra.mrb[20].mxu1 %v19470_v3  ;;  %v1814_v29 = vmul.f32 %v1526_v40, %v662_v11  ;;  %v685_v17 = vmul.f32 0.5, %v19443_v9  ;;  %v446_v11 = vld [vmem:[%s18582_s14 + $0x278] sm:$0xff]  ;;  %v998_v55 = vmul.f32 0.70710677, %v422_v53 }
 0x1ed   : > { %10113 = vmatprep.subr.bf16.mxu0 %v16093_v59  ;;  %v17727_v33 = vpop.eup %17726  ;;  %v19475_v12 = vpack.c.bf16 %v2087_v0, %v2063_v4  ;;  %v1838_v13 = vmul.f32 %v1550_v62, %v686_v7  ;;  %v1538_v31 = vadd.f32 1.0, %v17725_v46  ;;  %v1022_v40 = vmul.f32 0.70710677, %v446_v11  ;;  %v434_v0 = vld [vmem:[%s18582_s14 + $0x218] sm:$0xff] }
 0x1ee   : > { %v1562_v22 = vadd.f32 1.0, %v17727_v33  ;;  %17736 = verf.f32 %v998_v55  ;;  %v458_v46 = vld [vmem:[%s18582_s14 + $0x2d8] sm:$0xff]  ;;  %v16097_v55 = vld [vmem:[#allocation5 + $0x1e30] ss:$24 sps:$4 sm:$0xff]  }
 0x1ef   : > { %22286 = vst [vmem:[#allocation66_spill] sm:$0xff] %v19475_v12  ;;  %v17729_v24 = vpop.eup %17728  ;;  %10010 = vmatmul.mubr.bf16.gmra.mrb[20].mxu0 %v19475_v12  ;;  %v19479_v38 = vpack.c.bf16 %v1838_v13, %v1814_v29  ;;  %v1826_v19 = vmul.f32 %v1538_v31, %v674_v43  ;;  %v16091_v58 = vld [vmem:[#allocation5 + $0x1e00] ss:$24 sps:$4 sm:$0xff]   ;;  %17738 = verf.f32 %v1022_v40  ;;  %v16096_v31 = vld [vmem:[#allocation5 + $0xc34] ss:$24 sps:$4 sm:$0xff]  }
 0x1f0   : > { %v17731_v48 = vpop.eup %17730  ;;  %v1850_v44 = vmul.f32 %v1562_v22, %v698_v21  ;;  %v1525_v26 = vadd.f32 1.0, %v17729_v24  ;;  %v1010_v21 = vmul.f32 0.70710677, %v434_v0  ;;  %v1034_v22 = vmul.f32 0.70710677, %v458_v46  ;;  %v445_v24 = vld [vmem:[%s18582_s14 + $0x270] sm:$0xff] }
 0x1f1   : > { %22287 = vst [vmem:[#allocation67_spill] sm:$0xff] %v19479_v38  ;;  %v17733_v59 = vpop.eup %17732  ;;  %9494 = vmatprep.mubr.bf16.mxu1 %v19479_v38  ;;  %v1549_v51 = vadd.f32 1.0, %v17731_v48  ;;  %v19506_v40 = vld [vmem:[%s18582_s14 + $0x3f8] sm:$0xff]  ;;  %v16109_v12 = vld [vmem:[#allocation5 + $0x1e90] ss:$24 sps:$4 sm:$0xff]   ;;  %v733_v16 = vmul.f32 0.5, %v445_v24 }
 0x1f2   : > { %v17735_v7 = vpop.eup %17734  ;;  %v19487_v25 = vpack.c.bf16 %v1850_v44, %v1826_v19  ;;  %v1813_v9 = vmul.f32 %v1525_v26, %v661_v36  ;;  %v1537_v4 = vadd.f32 1.0, %v17733_v59  ;;  %v421_v36 = vld [vmem:[%s18582_s14 + $0x1b0] sm:$0xff]  ;;  %17740 = verf.f32 %v1010_v21  ;;  %v16117_v23 = vld [vmem:[#allocation5 + $0x1ec4] ss:$24 sps:$4 sm:$0xff]  }
 0x1f3   : > { %v1837_v62 = vmul.f32 %v1549_v51, %v685_v17  ;;  %v1561_v43 = vadd.f32 1.0, %v17735_v7  ;;  %v16094_v19 = vld [vmem:[#allocation5 + $0xc30] ss:$24 sps:$4 sm:$0xff]   ;;  %v16099_v17 = vld [vmem:[#allocation5 + $0x1e34] ss:$24 sps:$4 sm:$0xff]   ;;  %17742 = verf.f32 %v1034_v22  ;;  %v710_v21 = vmul.f32 0.5, %v422_v53 }
 0x1f4   : > { %22288 = vst [vmem:[#allocation68_spill] sm:$0xff] %v19487_v25  ;;  %10052 = vmatprep.mubr.bf16.mxu0 %v19487_v25  ;;  %v1825_v29 = vmul.f32 %v1537_v4, %v673_v2  ;;  %v997_v48 = vmul.f32 0.70710677, %v421_v36  ;;  %v433_v44 = vld [vmem:[%s18582_s14 + $0x210] sm:$0xff]  ;;  %v1021_v2 = vmul.f32 0.70710677, %v445_v24 }
 0x1f5   : > { %v19492_v33 = vpack.c.bf16 %v1837_v62, %v1813_v9  ;;  %v1849_v13 = vmul.f32 %v1561_v43, %v697_v1  ;;  %v457_v26 = vld [vmem:[%s18582_s14 + $0x2d0] sm:$0xff]  ;;  %v1009_v51 = vmul.f32 0.70710677, %v433_v44  ;;  %v16102_v7 = vld [vmem:[#allocation5 + $0xc64] ss:$24 sps:$4 sm:$0xff]   ;;  %v722_v22 = vmul.f32 0.5, %v434_v0 }
 0x1f6   : > { %17744 = verf.f32 %v997_v48  ;;  %v1033_v1 = vmul.f32 0.70710677, %v457_v26  ;;  %v16100_v9 = vld [vmem:[#allocation5 + $0xc60] ss:$24 sps:$4 sm:$0xff]   ;;  %v709_v53 = vmul.f32 0.5, %v421_v36  ;;  %v721_v5 = vmul.f32 0.5, %v433_v44 }
 0x1f7   : > { %22289 = vst [vmem:[#allocation69_spill] sm:$0xff] %v19492_v33  ;;  %9495 = vmatmul.mubr.bf16.vlgmr.msra.gmra.mrb[0].mxu1 %v19492_v33  ;;  %v19499_v59 = vpack.c.bf16 %v1849_v13, %v1825_v29  ;;  %17746 = verf.f32 %v1021_v2  ;;  %v19503_v4 = vld [vmem:[%s18582_s14 + $0x338] sm:$0xff]  ;;  %v16108_v29 = vld [vmem:[#allocation5 + $0xc94] ss:$24 sps:$4 sm:$0xff]   ;;  %v1070_v13 = vmul.f32 0.70710677, %v19506_v40 }
 0x1f8   : > { %9556 = vmatpush1.bf16.msra.mxu1 %v16088_v60  ;;  %17748 = verf.f32 %v1009_v51  ;;  %v16105_v60 = vld [vmem:[#allocation5 + $0x1e64] ss:$24 sps:$4 sm:$0xff]   ;;  %v1046_v62 = vmul.f32 0.70710677, %v19503_v4  ;;  %v16103_v43 = vld [vmem:[#allocation5 + $0x1e60] ss:$24 sps:$4 sm:$0xff]  }
 0x1f9   : > { %22290 = vst [vmem:[#allocation70_spill] sm:$0xff] %v19499_v59  ;;  %10053 = vmatmul.mubr.bf16.vlgmr.msra.gmra.mrb[0].mxu0 %v19499_v59  ;;  %9557 = vmatprep.subr.bf16.mxu1 %v16096_v31  ;;  %17750 = verf.f32 %v1033_v1  ;;  %v734_v31 = vmul.f32 0.5, %v446_v11  ;;  %v19511_v48 = vld [vmem:[%s18582_s14 + $0x398] sm:$0xff]  ;;  %v16106_v51 = vld [vmem:[#allocation5 + $0xc90] ss:$24 sps:$4 sm:$0xff]   ;;  %v746_v59 = vmul.f32 0.5, %v458_v46 }
 0x1fa   : > { %10114 = vmatpush1.bf16.msra.mxu0 %v16091_v58  ;;  %v17737_v58 = vpop.eup %17736  ;;  %17752 = verf.f32 %v1046_v62  ;;  %v19514_v2 = vld [vmem:[%s18582_s14 + $0x458] sm:$0xff]  ;;  %v16111_v1 = vld [vmem:[#allocation5 + $0x1e94] ss:$24 sps:$4 sm:$0xff]   ;;  %v1058_v11 = vmul.f32 0.70710677, %v19511_v48  ;;  %v745_v33 = vmul.f32 0.5, %v457_v26 }
 0x1fb   : > { %10115 = vmatprep.subr.bf16.mxu0 %v16099_v17  ;;  %v17739_v17 = vpop.eup %17738  ;;  %17754 = verf.f32 %v1070_v13  ;;  %v1082_v0 = vmul.f32 0.70710677, %v19514_v2  ;;  %v19526_v38 = vld [vmem:[%s18582_s14 + $0x390] sm:$0xff] }
 0x1fc   : > { %9558 = vmatpush1.bf16.msra.mxu1 %v16094_v19  ;;  %v1574_v19 = vadd.f32 1.0, %v17737_v58  ;;  %v1598_v25 = vadd.f32 1.0, %v17739_v17  ;;  %v17741_v62 = vpop.eup %17740  ;;  %v19522_v58 = vld [vmem:[%s18582_s14 + $0x3f0] sm:$0xff]  ;;  %17756 = verf.f32 %v1058_v11  ;;  %v16115_v11 = vld [vmem:[#allocation5 + $0x1ec0] ss:$24 sps:$4 sm:$0xff]  }
 0x1fd   : > { %9559 = vmatprep.subr.bf16.mxu1 %v16102_v7  ;;  %v19519_v7 = vld [vmem:[%s18582_s14 + $0x330] sm:$0xff]  ;;  %v17743_v36 = vpop.eup %17742  ;;  %v1586_v17 = vadd.f32 1.0, %v17741_v62  ;;  %17758 = verf.f32 %v1082_v0  ;;  %v1069_v24 = vmul.f32 0.70710677, %v19522_v58 }
 0x1fe   : > { %10116 = vmatpush1.bf16.msra.mxu0 %v16097_v55  ;;  %v1862_v55 = vmul.f32 %v1574_v19, %v710_v21  ;;  %v1045_v46 = vmul.f32 0.70710677, %v19519_v7  ;;  %v1886_v13 = vmul.f32 %v1598_v25, %v734_v31  ;;  %v19530_v44 = vld [vmem:[%s18582_s14 + $0x450] sm:$0xff]  ;;  %v16112_v19 = vld [vmem:[#allocation5 + $0xcc0] ss:$24 sps:$4 sm:$0xff]  }
 0x1ff   : > { %10117 = vmatprep.subr.bf16.mxu0 %v16105_v60  ;;  %v16114_v60 = vld [vmem:[#allocation5 + $0xcc4] ss:$24 sps:$4 sm:$0xff]   ;;  %v1874_v25 = vmul.f32 %v1586_v17, %v722_v22  ;;  %v1081_v22 = vmul.f32 0.70710677, %v19530_v44  ;;  %v782_v17 = vmul.f32 0.5, %v19506_v40 }
 0x200   : > { %9560 = vmatpush1.bf16.msra.mxu1 %v16100_v9  ;;  %v17745_v3 = vpop.eup %17744  ;;  %v1610_v9 = vadd.f32 1.0, %v17743_v36  ;;  %17760 = verf.f32 %v1045_v46  ;;  %v758_v36 = vmul.f32 0.5, %v19503_v4 }
 0x201   : > { %9561 = vmatprep.subr.bf16.mxu1 %v16108_v29  ;;  %v17747_v21 = vpop.eup %17746  ;;  %v19532_v29 = vpack.c.bf16 %v1886_v13, %v1862_v55  ;;  %v1573_v31 = vadd.f32 1.0, %v17745_v3  ;;  %17762 = verf.f32 %v1069_v24  ;;  %v1057_v3 = vmul.f32 0.70710677, %v19526_v38 }
 0x202   : > { %10118 = vmatpush1.bf16.msra.mxu0 %v16103_v43  ;;  %v17749_v26 = vpop.eup %17748  ;;  %v16120_v43 = vld [vmem:[#allocation5 + $0xcf4] ss:$24 sps:$4 sm:$0xff]   ;;  %v1898_v62 = vmul.f32 %v1610_v9, %v746_v59  ;;  %v1597_v0 = vadd.f32 1.0, %v17747_v21  ;;  %v16118_v59 = vld [vmem:[#allocation5 + $0xcf0] ss:$24 sps:$4 sm:$0xff]   ;;  %v770_v21 = vmul.f32 0.5, %v19511_v48 }
 0x203   : > { %10119 = vmatprep.subr.bf16.mxu0 %v16111_v1  ;;  %22291 = vst [vmem:[#allocation71_spill] sm:$0xff] %v19532_v29  ;;  %v17751_v10 = vpop.eup %17750  ;;  %9504 = vmatprep.mubr.bf16.mxu1 %v19532_v29  ;;  %v1861_v1 = vmul.f32 %v1573_v31, %v709_v53  ;;  %v1585_v55 = vadd.f32 1.0, %v17749_v26  ;;  %v16123_v53 = vld [vmem:[#allocation5 + $0x1ef4] ss:$24 sps:$4 sm:$0xff]   ;;  %17764 = verf.f32 %v1057_v3  ;;  %v16129_v3 = vld [vmem:[#allocation5 + $0x1f24] ss:$24 sps:$4 sm:$0xff]  }
 0x204   : > { %9562 = vmatpush1.bf16.msra.mxu1 %v16106_v51  ;;  %v19539_v51 = vld [vmem:[%s18582_s14 + $0x4b8] sm:$0xff]  ;;  %v19541_v46 = vpack.c.bf16 %v1898_v62, %v1874_v25  ;;  %v1885_v4 = vmul.f32 %v1597_v0, %v733_v16  ;;  %v1609_v13 = vadd.f32 1.0, %v17751_v10  ;;  %v17753_v9 = vpop.eup %17752  ;;  %v16121_v10 = vld [vmem:[#allocation5 + $0x1ef0] ss:$24 sps:$4 sm:$0xff]   ;;  %17766 = verf.f32 %v1081_v22 }
 0x205   : > { %9563 = vmatprep.subr.bf16.mxu1 %v16114_v60  ;;  %v19545_v60 = vld [vmem:[%s18582_s14 + $0x578] sm:$0xff]  ;;  %v1873_v24 = vmul.f32 %v1585_v55, %v721_v5  ;;  %v1094_v31 = vmul.f32 0.70710677, %v19539_v51  ;;  %v17755_v25 = vpop.eup %17754  ;;  %v1622_v26 = vadd.f32 1.0, %v17753_v9  ;;  %v794_v62 = vmul.f32 0.5, %v19514_v2  ;;  %v19632_v29 = vld [vmem:[%s18582_s14 + $0x750] sm:$0xff] }
 0x206   : > { %10120 = vmatpush1.bf16.msra.mxu0 %v16109_v12  ;;  %22292 = vst [vmem:[#allocation72_spill] sm:$0xff] %v19541_v46  ;;  %v19550_v12 = vld [vmem:[%s18582_s14 + $0x518] sm:$0xff]  ;;  %10062 = vmatprep.mubr.bf16.mxu0 %v19541_v46  ;;  %v19553_v40 = vpack.c.bf16 %v1885_v4, %v1861_v1  ;;  %v1646_v48 = vadd.f32 1.0, %v17755_v25  ;;  %v1118_v0 = vmul.f32 0.70710677, %v19545_v60  ;;  %v757_v22 = vmul.f32 0.5, %v19519_v7  ;;  %v17757_v2 = vpop.eup %17756 }
 0x207   : > { %10121 = vmatprep.subr.bf16.mxu0 %v16117_v23  ;;  %v16126_v16 = vld [vmem:[#allocation5 + $0xd24] ss:$24 sps:$4 sm:$0xff]   ;;  %v1897_v23 = vmul.f32 %v1609_v13, %v745_v33  ;;  %17768 = verf.f32 %v1094_v31  ;;  %v16124_v55 = vld [vmem:[#allocation5 + $0xd20] ss:$24 sps:$4 sm:$0xff]   ;;  %v1910_v1 = vmul.f32 %v1622_v26, %v758_v36  ;;  %v19569_v4 = vld [vmem:[%s18582_s14 + $0x570] sm:$0xff]  ;;  %v781_v31 = vmul.f32 0.5, %v19522_v58 }
 0x208   : > { %9564 = vmatpush1.bf16.msra.mxu1 %v16112_v19  ;;  %22293 = vst [vmem:[#allocation73_spill] sm:$0xff] %v19553_v40  ;;  %v19556_v5 = vld [vmem:[%s18582_s14 + $0x5d8] sm:$0xff]  ;;  %v19561_v19 = vld [vmem:[%s18582_s14 + $0x4b0] sm:$0xff]  ;;  %v1934_v9 = vmul.f32 %v1646_v48, %v782_v17  ;;  %17770 = verf.f32 %v1118_v0  ;;  %v1634_v7 = vadd.f32 1.0, %v17757_v2  ;;  %v769_v36 = vmul.f32 0.5, %v19526_v38 }
 0x209   : > { %9565 = vmatprep.subr.bf16.mxu1 %v16120_v43  ;;  %9505 = vmatmul.mubr.bf16.gmra.mrb[4].mxu1 %v19553_v40  ;;  %v19564_v33 = vpack.c.bf16 %v1897_v23, %v1873_v24  ;;  %v1106_v43 = vmul.f32 0.70710677, %v19550_v12  ;;  %v16132_v13 = vld [vmem:[#allocation5 + $0xd54] ss:$24 sps:$4 sm:$0xff]   ;;  %v17759_v24 = vpop.eup %17758  ;;  %v1093_v25 = vmul.f32 0.70710677, %v19561_v19 }
 0x20a   : > { %10122 = vmatpush1.bf16.msra.mxu0 %v16115_v11  ;;  %v1130_v11 = vmul.f32 0.70710677, %v19556_v5  ;;  %v19576_v17 = vpack.c.bf16 %v1934_v9, %v1910_v1  ;;  %v1658_v58 = vadd.f32 1.0, %v17759_v24  ;;  %v1117_v23 = vmul.f32 0.70710677, %v19569_v4  ;;  %v19580_v26 = vld [vmem:[%s18582_s14 + $0x510] sm:$0xff] }
 0x20b   : > { %22294 = vst [vmem:[#allocation74_spill] sm:$0xff] %v19564_v33  ;;  %10123 = vmatprep.subr.bf16.mxu0 %v16123_v53  ;;  %10063 = vmatmul.mubr.bf16.gmra.mrb[4].mxu0 %v19564_v33  ;;  %17772 = verf.f32 %v1106_v43  ;;  %v17761_v53 = vpop.eup %17760  ;;  %v19583_v48 = vld [vmem:[%s18582_s14 + $0x5d0] sm:$0xff]  ;;  %v16127_v0 = vld [vmem:[#allocation5 + $0x1f20] ss:$24 sps:$4 sm:$0xff]   ;;  %v1922_v2 = vmul.f32 %v1634_v7, %v770_v21  ;;  %v793_v43 = vmul.f32 0.5, %v19530_v44  ;;  %v806_v24 = vmul.f32 0.5, %v19539_v51 }
 0x20c   : > { %9566 = vmatpush1.bf16.msra.mxu1 %v16118_v59  ;;  %22295 = vst [vmem:[#allocation75_spill] sm:$0xff] %v19576_v17  ;;  %17774 = verf.f32 %v1130_v11  ;;  %v17763_v59 = vpop.eup %17762  ;;  %v1621_v38 = vadd.f32 1.0, %v17761_v53  ;;  %v16135_v1 = vld [vmem:[#allocation5 + $0x1f54] ss:$24 sps:$4 sm:$0xff]   ;;  %9514 = vmatprep.mubr.bf16.mxu1 %v19576_v17  ;;  %v1946_v9 = vmul.f32 %v1658_v58, %v794_v62  ;;  %v1105_v21 = vmul.f32 0.70710677, %v19580_v26 }
 0x20d   : > { %9567 = vmatprep.subr.bf16.mxu1 %v16126_v16  ;;  %17776 = verf.f32 %v1093_v25  ;;  %v16130_v16 = vld [vmem:[#allocation5 + $0xd50] ss:$24 sps:$4 sm:$0xff]   ;;  %v1645_v11 = vadd.f32 1.0, %v17763_v59  ;;  %v1129_v7 = vmul.f32 0.70710677, %v19583_v48  ;;  %v19591_v44 = vld [vmem:[%s18582_s14 + $0x638] sm:$0xff]  ;;  %v17765_v25 = vpop.eup %17764 }
 0x20e   : > { %10124 = vmatpush1.bf16.msra.mxu0 %v16121_v10  ;;  %17778 = verf.f32 %v1117_v23  ;;  %v16133_v10 = vld [vmem:[#allocation5 + $0x1f50] ss:$24 sps:$4 sm:$0xff]   ;;  %v1909_v33 = vmul.f32 %v1621_v38, %v757_v22  ;;  %v16138_v53 = vld [vmem:[#allocation5 + $0xd84] ss:$24 sps:$4 sm:$0xff]   ;;  %v19596_v62 = vpack.c.bf16 %v1946_v9, %v1922_v2  ;;  %v830_v51 = vmul.f32 0.5, %v19545_v60  ;;  %v17767_v22 = vpop.eup %17766 }
 0x20f   : > { %10125 = vmatprep.subr.bf16.mxu0 %v16129_v3  ;;  %v19594_v3 = vld [vmem:[%s18582_s14 + $0x6f8] sm:$0xff]  ;;  %v1933_v58 = vmul.f32 %v1645_v11, %v781_v31  ;;  %v1633_v59 = vadd.f32 1.0, %v17765_v25  ;;  %17780 = verf.f32 %v1105_v21  ;;  %v1142_v38 = vmul.f32 0.70710677, %v19591_v44  ;;  %v19629_v40 = vld [vmem:[%s18582_s14 + $0x690] sm:$0xff] }
 0x210   : > { %9568 = vmatpush1.bf16.msra.mxu1 %v16124_v55  ;;  %22296 = vst [vmem:[#allocation76_spill] sm:$0xff] %v19596_v62  ;;  %v818_v55 = vmul.f32 0.5, %v19550_v12  ;;  %v16136_v23 = vld [vmem:[#allocation5 + $0xd80] ss:$24 sps:$4 sm:$0xff]   ;;  %v1166_v46 = vmul.f32 0.70710677, %v19594_v3  ;;  %10072 = vmatprep.mubr.bf16.mxu0 %v19596_v62  ;;  %17782 = verf.f32 %v1129_v7 }
 0x211   : > { %9569 = vmatprep.subr.bf16.mxu1 %v16132_v13  ;;  %v19603_v17 = vld [vmem:[%s18582_s14 + $0x698] sm:$0xff]  ;;  %v17769_v13 = vpop.eup %17768  ;;  %v19606_v31 = vpack.c.bf16 %v1933_v58, %v1909_v33  ;;  %v1657_v12 = vadd.f32 1.0, %v17767_v22  ;;  %v1921_v11 = vmul.f32 %v1633_v59, %v769_v36  ;;  %v805_v25 = vmul.f32 0.5, %v19561_v19  ;;  %v16144_v58 = vld [vmem:[#allocation5 + $0xdb4] ss:$24 sps:$4 sm:$0xff]  }
 0x212   : > { %10126 = vmatpush1.bf16.msra.mxu0 %v16127_v0  ;;  %v16141_v60 = vld [vmem:[#allocation5 + $0x1f84] ss:$24 sps:$4 sm:$0xff]   ;;  %v842_v0 = vmul.f32 0.5, %v19556_v5  ;;  %v16139_v9 = vld [vmem:[#allocation5 + $0x1f80] ss:$24 sps:$4 sm:$0xff]   ;;  %v1670_v21 = vadd.f32 1.0, %v17769_v13  ;;  %17784 = verf.f32 %v1142_v38  ;;  %v17771_v62 = vpop.eup %17770 }
 0x213   : > { %10127 = vmatprep.subr.bf16.mxu0 %v16135_v1  ;;  %22297 = vst [vmem:[#allocation77_spill] sm:$0xff] %v19606_v31  ;;  %v19610_v2 = vld [vmem:[%s18582_s14 + $0x758] sm:$0xff]  ;;  %v19614_v1 = vld [vmem:[%s18582_s14 + $0x630] sm:$0xff]  ;;  %9515 = vmatmul.mubr.bf16.gmra.mrb[8].mxu1 %v19606_v31  ;;  %v1945_v33 = vmul.f32 %v1657_v12, %v793_v43  ;;  %17786 = verf.f32 %v1166_v46  ;;  %v1154_v5 = vmul.f32 0.70710677, %v19603_v17  ;;  %v1694_v22 = vadd.f32 1.0, %v17771_v62 }
 0x214   : > { %9570 = vmatpush1.bf16.msra.mxu1 %v16130_v16  ;;  %v1178_v16 = vmul.f32 0.70710677, %v19610_v2  ;;  %v16142_v36 = vld [vmem:[#allocation5 + $0xdb0] ss:$24 sps:$4 sm:$0xff]   ;;  %v1958_v19 = vmul.f32 %v1670_v21, %v806_v24  ;;  %v829_v59 = vmul.f32 0.5, %v19569_v4  ;;  %v817_v31 = vmul.f32 0.5, %v19580_v26 }
 0x215   : > { %9571 = vmatprep.subr.bf16.mxu1 %v16138_v53  ;;  %v17773_v7 = vpop.eup %17772  ;;  %v19621_v38 = vld [vmem:[%s18582_s14 + $0x6f0] sm:$0xff]  ;;  %v1141_v53 = vmul.f32 0.70710677, %v19614_v1  ;;  %v19624_v46 = vpack.c.bf16 %v1945_v33, %v1921_v11  ;;  %17788 = verf.f32 %v1154_v5  ;;  %v1982_v62 = vmul.f32 %v1694_v22, %v830_v51  ;;  %v16150_v26 = vld [vmem:[#allocation5 + $0xde4] ss:$24 sps:$4 sm:$0xff]  }
 0x216   : > { %10128 = vmatpush1.bf16.msra.mxu0 %v16133_v10  ;;  %v17775_v43 = vpop.eup %17774  ;;  %v16147_v13 = vld [vmem:[#allocation5 + $0x1fb4] ss:$24 sps:$4 sm:$0xff]   ;;  %v1682_v12 = vadd.f32 1.0, %v17773_v7  ;;  %v16145_v24 = vld [vmem:[#allocation5 + $0x1fb0] ss:$24 sps:$4 sm:$0xff]   ;;  %17790 = verf.f32 %v1178_v16  ;;  %v19639_v22 = vld [vmem:[%s18582_s14 + $0x7b8] sm:$0xff] }
 0x217   : > { %10129 = vmatprep.subr.bf16.mxu0 %v16141_v60  ;;  %22298 = vst [vmem:[#allocation78_spill] sm:$0xff] %v19624_v46  ;;  %v17777_v10 = vpop.eup %17776  ;;  %v1706_v4 = vadd.f32 1.0, %v17775_v43  ;;  %v1165_v21 = vmul.f32 0.70710677, %v19621_v38  ;;  %10073 = vmatmul.mubr.bf16.gmra.mrb[8].mxu0 %v19624_v46  ;;  %17792 = verf.f32 %v1141_v53  ;;  %v19636_v51 = vpack.c.bf16 %v1982_v62, %v1958_v19  ;;  %v16153_v16 = vld [vmem:[#allocation5 + $0x1fe4] ss:$24 sps:$4 sm:$0xff]  }
 0x218   : > { %9572 = vmatpush1.bf16.msra.mxu1 %v16136_v23  ;;  %v17779_v60 = vpop.eup %17778  ;;  %v1970_v11 = vmul.f32 %v1682_v12, %v818_v55  ;;  %v1669_v33 = vadd.f32 1.0, %v17777_v10  ;;  %v841_v23 = vmul.f32 0.5, %v19583_v48  ;;  %v19642_v43 = vld [vmem:[%s18582_s14 + $0x878] sm:$0xff]  ;;  %v854_v55 = vmul.f32 0.5, %v19591_v44  ;;  %v16156_v10 = vld [vmem:[#allocation5 + $0xe14] ss:$24 sps:$4 sm:$0xff]  }
 0x219   : > { %9573 = vmatprep.subr.bf16.mxu1 %v16144_v58  ;;  %22299 = vst [vmem:[#allocation79_spill] sm:$0xff] %v19636_v51  ;;  %v1994_v5 = vmul.f32 %v1706_v4, %v842_v0  ;;  %v1693_v7 = vadd.f32 1.0, %v17779_v60  ;;  %17794 = verf.f32 %v1165_v21  ;;  %v16148_v46 = vld [vmem:[#allocation5 + $0xde0] ss:$24 sps:$4 sm:$0xff]   ;;  %v1153_v12 = vmul.f32 0.70710677, %v19629_v40  ;;  %9524 = vmatprep.mubr.bf16.mxu1 %v19636_v51 }
 0x21a   : > { %10130 = vmatpush1.bf16.msra.mxu0 %v16139_v9  ;;  %v1957_v58 = vmul.f32 %v1669_v33, %v805_v25  ;;  %v1177_v48 = vmul.f32 0.70710677, %v19632_v29  ;;  %v17781_v9 = vpop.eup %17780  ;;  %v16151_v19 = vld [vmem:[#allocation5 + $0x1fe0] ss:$24 sps:$4 sm:$0xff]   ;;  %v866_v25 = vmul.f32 0.5, %v19603_v17  ;;  %v19694_v51 = vld [vmem:[%s18582_s14 + $0x48] sm:$0xff] }
 0x21b   : > { %10131 = vmatprep.subr.bf16.mxu0 %v16147_v13  ;;  %v19648_v0 = vpack.c.bf16 %v1994_v5, %v1970_v11  ;;  %v1981_v53 = vmul.f32 %v1693_v7, %v829_v59  ;;  %v878_v13 = vmul.f32 0.5, %v19594_v3  ;;  %v17783_v44 = vpop.eup %17782  ;;  %v1681_v62 = vadd.f32 1.0, %v17781_v9  ;;  %v19655_v21 = vld [vmem:[%s18582_s14 + $0x818] sm:$0xff]  ;;  %v16154_v5 = vld [vmem:[#allocation5 + $0xe10] ss:$24 sps:$4 sm:$0xff]  }
 0x21c   : > { %9574 = vmatpush1.bf16.msra.mxu1 %v16142_v36  ;;  %17796 = verf.f32 %v1153_v12  ;;  %v1190_v4 = vmul.f32 0.70710677, %v19639_v22  ;;  %v1214_v36 = vmul.f32 0.70710677, %v19642_v43  ;;  %v17785_v60 = vpop.eup %17784  ;;  %v1705_v3 = vadd.f32 1.0, %v17783_v44  ;;  %v19662_v17 = vld [vmem:[%s18582_s14 + $0x8d8] sm:$0xff] }
 0x21d   : > { %22300 = vst [vmem:[#allocation80_spill] sm:$0xff] %v19648_v0  ;;  %9575 = vmatprep.subr.bf16.mxu1 %v16150_v26  ;;  %10082 = vmatprep.mubr.bf16.mxu0 %v19648_v0  ;;  %v19658_v59 = vpack.c.bf16 %v1981_v53, %v1957_v58  ;;  %v890_v11 = vmul.f32 0.5, %v19610_v2  ;;  %17798 = verf.f32 %v1177_v48  ;;  %v17787_v26 = vpop.eup %17786  ;;  %v1969_v33 = vmul.f32 %v1681_v62, %v817_v31  ;;  %v16159_v7 = vld [vmem:[#allocation5 + $0x2014] ss:$24 sps:$4 sm:$0xff]   ;;  %v16157_v9 = vld [vmem:[#allocation5 + $0x2010] ss:$24 sps:$4 sm:$0xff]  }
 0x21e   : > { %10132 = vmatpush1.bf16.msra.mxu0 %v16145_v24  ;;  %v1718_v12 = vadd.f32 1.0, %v17785_v60  ;;  %v853_v24 = vmul.f32 0.5, %v19614_v1  ;;  %17800 = verf.f32 %v1190_v4  ;;  %v1993_v58 = vmul.f32 %v1705_v3, %v841_v23  ;;  %v19668_v48 = vld [vmem:[%s18582_s14 + $0x7b0] sm:$0xff]  ;;  %v16162_v62 = vld [vmem:[#allocation5 + $0xe44] ss:$24 sps:$4 sm:$0xff]  }
 0x21f   : > { %22301 = vst [vmem:[#allocation81_spill] sm:$0xff] %v19658_v59  ;;  %10133 = vmatprep.subr.bf16.mxu0 %v16153_v16  ;;  %9525 = vmatmul.mubr.bf16.gmra.mrb[12].mxu1 %v19658_v59  ;;  %v1742_v53 = vadd.f32 1.0, %v17787_v26  ;;  %17802 = verf.f32 %v1214_v36  ;;  %v1202_v2 = vmul.f32 0.70710677, %v19655_v21  ;;  %v19671_v44 = vld [vmem:[%s18582_s14 + $0x870] sm:$0xff]  ;;  %v17789_v31 = vpop.eup %17788  ;;  %v877_v4 = vmul.f32 0.5, %v19621_v38 }
 0x220   : > { %9576 = vmatpush1.bf16.msra.mxu1 %v16148_v46  ;;  %v2006_v16 = vmul.f32 %v1718_v12, %v854_v55  ;;  %v16165_v1 = vld [vmem:[#allocation5 + $0x2044] ss:$24 sps:$4 sm:$0xff]   ;;  %v19675_v23 = vmul.f32 0.5, %v19629_v40  ;;  %v1226_v36 = vmul.f32 0.70710677, %v19662_v17  ;;  %v17791_v60 = vpop.eup %17790  ;;  %v19678_v3 = vpack.c.bf16 %v1993_v58, %v1969_v33  ;;  %v19681_v59 = vld [vmem:[%s18582_s14 + $0x810] sm:$0xff] }
 0x221   : > { %9577 = vmatprep.subr.bf16.mxu1 %v16156_v10  ;;  %v2030_v26 = vmul.f32 %v1742_v53, %v878_v13  ;;  %v1730_v0 = vadd.f32 1.0, %v17789_v31  ;;  %17804 = verf.f32 %v1202_v2  ;;  %v19684_v46 = vld [vmem:[%s18582_s14 + $0x8d0] sm:$0xff]  ;;  %v17793_v55 = vpop.eup %17792  ;;  %v16160_v38 = vld [vmem:[#allocation5 + $0xe40] ss:$24 sps:$4 sm:$0xff]   ;;  %v1754_v12 = vadd.f32 1.0, %v17791_v60 }
 0x222   : > { %22302 = vst [vmem:[#allocation82_spill] sm:$0xff] %v19678_v3  ;;  %10134 = vmatpush1.bf16.msra.mxu0 %v16151_v19  ;;  %17806 = verf.f32 %v1226_v36  ;;  %v1189_v40 = vmul.f32 0.70710677, %v19668_v48  ;;  %v1213_v33 = vmul.f32 0.70710677, %v19671_v44  ;;  %v1717_v53 = vadd.f32 1.0, %v17793_v55 }
 0x223   : > { %10135 = vmatprep.subr.bf16.mxu0 %v16159_v7  ;;  %v17795_v19 = vpop.eup %17794  ;;  %10083 = vmatmul.mubr.bf16.gmra.mrb[12].mxu0 %v19678_v3  ;;  %v19689_v10 = vpack.c.bf16 %v2030_v26, %v2006_v16  ;;  %v2018_v13 = vmul.f32 %v1730_v0, %v866_v25  ;;  %v16163_v58 = vld [vmem:[#allocation5 + $0x2040] ss:$24 sps:$4 sm:$0xff]   ;;  %v889_v2 = vmul.f32 0.5, %v19632_v29  ;;  %v16168_v7 = vld [vmem:[#allocation5 + $0xe74] ss:$24 sps:$4 sm:$0xff]   ;;  %v2042_v31 = vmul.f32 %v1754_v12, %v890_v11 }
 0x224   : > { %9578 = vmatpush1.bf16.msra.mxu1 %v16154_v5  ;;  %v1741_v36 = vadd.f32 1.0, %v17795_v19  ;;  %v902_v60 = vmul.f32 0.5, %v19639_v22  ;;  %17808 = verf.f32 %v1189_v40  ;;  %v2005_v16 = vmul.f32 %v1717_v53, %v853_v24  ;;  %v16166_v5 = vld [vmem:[#allocation5 + $0xe70] ss:$24 sps:$4 sm:$0xff]   ;;  %v16171_v26 = vld [vmem:[#allocation5 + $0x2074] ss:$24 sps:$4 sm:$0xff]  }
 0x225   : > { %22303 = vst [vmem:[#allocation83_spill] sm:$0xff] %v19689_v10  ;;  %9534 = vmatprep.mubr.bf16.mxu1 %v19689_v10  ;;  %17810 = verf.f32 %v1213_v33  ;;  %v1201_v0 = vmul.f32 0.70710677, %v19681_v59  ;;  %v1225_v29 = vmul.f32 0.70710677, %v19684_v46  ;;  %9579 = vmatprep.subr.bf16.mxu1 %v16162_v62  ;;  %v19702_v11 = vpack.c.bf16 %v2042_v31, %v2018_v13  ;;  %v19709_v62 = vld [vmem:[%s18582_s14 + $0xa8] sm:$0xff] }
 0x226   : > { %10136 = vmatpush1.bf16.msra.mxu0 %v16157_v9  ;;  %v17797_v25 = vpop.eup %17796  ;;  %v2029_v22 = vmul.f32 %v1741_v36, %v877_v4  ;;  %v926_v55 = vmul.f32 0.5, %v19642_v43  ;;  %v914_v9 = vmul.f32 0.5, %v19655_v21  ;;  %v16169_v40 = vld [vmem:[#allocation5 + $0x2070] ss:$24 sps:$4 sm:$0xff]   ;;  %v952_v33 = vmul.f32 0.70710677, %v19694_v51 }
 0x227   : > { %22304 = vst [vmem:[#allocation84_spill] sm:$0xff] %v19702_v11  ;;  %10137 = vmatprep.subr.bf16.mxu0 %v16165_v1  ;;  %v17799_v24 = vpop.eup %17798  ;;  %v1729_v12 = vadd.f32 1.0, %v17797_v25  ;;  %17812 = verf.f32 %v1201_v0  ;;  %v976_v19 = vmul.f32 0.70710677, %v19697_v45  ;;  %10092 = vmatprep.mubr.bf16.mxu0 %v19702_v11  ;;  %v938_v4 = vmul.f32 0.5, %v19662_v17  ;;  %v19716_v21 = vld [vmem:[%s18582_s14 + $0x168] sm:$0xff] }
 0x228   : > { %v17801_v13 = vpop.eup %17800  ;;  %v19712_v1 = vpack.c.bf16 %v2029_v22, %v2005_v16  ;;  %9580 = vmatpush1.bf16.msra.mxu1 %v16160_v38  ;;  %v1753_v43 = vadd.f32 1.0, %v17799_v24  ;;  %17814 = verf.f32 %v1225_v29  ;;  %v16174_v0 = vld [vmem:[#allocation5 + $0xea4] ss:$24 sps:$4 sm:$0xff]   ;;  %v901_v16 = vmul.f32 0.5, %v19668_v48  ;;  %v16172_v29 = vld [vmem:[#allocation5 + $0xea0] ss:$24 sps:$4 sm:$0xff]  }
 0x229   : > { %v17803_v53 = vpop.eup %17802  ;;  %v2017_v31 = vmul.f32 %v1729_v12, %v19675_v23  ;;  %9581 = vmatprep.subr.bf16.mxu1 %v16168_v7  ;;  %v1766_v36 = vadd.f32 1.0, %v17801_v13  ;;  %v16177_v25 = vld [vmem:[#allocation5 + $0x20a4] ss:$24 sps:$4 sm:$0xff]   ;;  %17816 = verf.f32 %v952_v33  ;;  %v964_v23 = vmul.f32 0.70710677, %v19709_v62 }
 0x22a   : > { %22305 = vst [vmem:[#allocation85_spill] sm:$0xff] %v19712_v1  ;;  %10138 = vmatpush1.bf16.msra.mxu0 %v16163_v58  ;;  %9535 = vmatmul.mubr.bf16.gmra.mrb[16].mxu1 %v19712_v1  ;;  %v2041_v38 = vmul.f32 %v1753_v43, %v889_v2  ;;  %v1790_v17 = vadd.f32 1.0, %v17803_v53  ;;  %17818 = verf.f32 %v976_v19  ;;  %v19723_v22 = vld [vmem:[%s18582_s14 + $0x40] sm:$0xff]  ;;  %v16180_v48 = vld [vmem:[#allocation5 + $0xed4] ss:$24 sps:$4 sm:$0xff]  }
 0x22b   : > { %10139 = vmatprep.subr.bf16.mxu0 %v16171_v26  ;;  %v19726_v58 = vld [vmem:[%s18582_s14 + $0x100] sm:$0xff]  ;;  %v17805_v7 = vpop.eup %17804  ;;  %v2054_v24 = vmul.f32 %v1766_v36, %v902_v60  ;;  %v988_v33 = vmul.f32 0.70710677, %v19716_v21  ;;  %17820 = verf.f32 %v964_v23  ;;  %v951_v60 = vmul.f32 0.70710677, %v19723_v22 }
 0x22c   : > { %v16175_v12 = vld [vmem:[#allocation5 + $0x20a0] ss:$24 sps:$4 sm:$0xff]   ;;  %v17807_v13 = vpop.eup %17806  ;;  %v19729_v2 = vpack.c.bf16 %v2041_v38, %v2017_v31  ;;  %9582 = vmatpush1.bf16.msra.mxu1 %v16166_v5  ;;  %v2078_v26 = vmul.f32 %v1790_v17, %v926_v55  ;;  %v1778_v43 = vadd.f32 1.0, %v17805_v7  ;;  %v975_v36 = vmul.f32 0.70710677, %v19726_v58 }
 0x22d   : > { %v19732_v19 = vld [vmem:[%s18582_s14 + $0xa0] sm:$0xff]  ;;  %9583 = vmatprep.subr.bf16.mxu1 %v16174_v0  ;;  %v1802_v11 = vadd.f32 1.0, %v17807_v13  ;;  %17822 = verf.f32 %v988_v33  ;;  %v925_v55 = vmul.f32 0.5, %v19671_v44  ;;  %v16183_v38 = vld [vmem:[#allocation5 + $0x20d4] ss:$24 sps:$4 sm:$0xff]   ;;  %v913_v13 = vmul.f32 0.5, %v19681_v59 }
 0x22e   : > { %22306 = vst [vmem:[#allocation86_spill] sm:$0xff] %v19729_v2  ;;  %v19735_v53 = vld [vmem:[%s18582_s14 + $0x160] sm:$0xff]  ;;  %10140 = vmatpush1.bf16.msra.mxu0 %v16169_v40  ;;  %v17809_v3 = vpop.eup %17808  ;;  %v19740_v31 = vpack.c.bf16 %v2078_v26, %v2054_v24  ;;  %v2066_v5 = vmul.f32 %v1778_v43, %v914_v9  ;;  %v16178_v0 = vld [vmem:[#allocation5 + $0xed0] ss:$24 sps:$4 sm:$0xff]   ;;  %17824 = verf.f32 %v951_v60  ;;  %v963_v7 = vmul.f32 0.70710677, %v19732_v19 }
 0x22f   : > { %10093 = vmatmul.mubr.bf16.gmra.mrb[16].mxu0 %v19729_v2  ;;  %10141 = vmatprep.subr.bf16.mxu0 %v16177_v25  ;;  %v17811_v17 = vpop.eup %17810  ;;  %v2090_v23 = vmul.f32 %v1802_v11, %v938_v4  ;;  %v1765_v40 = vadd.f32 1.0, %v17809_v3  ;;  %17826 = verf.f32 %v975_v36  ;;  %v987_v9 = vmul.f32 0.70710677, %v19735_v53  ;;  %v16181_v3 = vld [vmem:[#allocation5 + $0x20d0] ss:$24 sps:$4 sm:$0xff]   ;;  %v19834_v2 = vld [vmem:[%s18582_s14 + $0x3a0] sm:$0xff] }
 0x230   : > { %22307 = vst [vmem:[#allocation87_spill] sm:$0xff] %v19740_v31  ;;  %9544 = vmatprep.mubr.bf16.mxu1 %v19740_v31  ;;  %v1789_v33 = vadd.f32 1.0, %v17811_v17  ;;  %9584 = vmatpush1.bf16.msra.mxu1 %v16172_v29  ;;  %v937_v11 = vmul.f32 0.5, %v19684_v46  ;;  %v16186_v4 = vld [vmem:[#allocation5 + $0xf04] ss:$24 sps:$4 sm:$0xff]   ;;  %17828 = verf.f32 %v963_v7  ;;  %v664_v59 = vmul.f32 0.5, %v19694_v51 }
 0x231   : > { %v17813_v25 = vpop.eup %17812  ;;  %v19747_v24 = vpack.c.bf16 %v2090_v23, %v2066_v5  ;;  %v2053_v44 = vmul.f32 %v1765_v40, %v901_v16  ;;  %9585 = vmatprep.subr.bf16.mxu1 %v16180_v48  ;;  %v16189_v29 = vld [vmem:[#allocation5 + $0x2104] ss:$24 sps:$4 sm:$0xff]   ;;  %17830 = verf.f32 %v987_v9  ;;  %v688_v16 = vmul.f32 0.5, %v19697_v45 }
 0x232   : > { %10142 = vmatpush1.bf16.msra.mxu0 %v16175_v12  ;;  %v17815_v26 = vpop.eup %17814  ;;  %v2077_v43 = vmul.f32 %v1789_v33, %v925_v55  ;;  %v1777_v60 = vadd.f32 1.0, %v17813_v25  ;;  %v676_v51 = vmul.f32 0.5, %v19709_v62  ;;  %v700_v7 = vmul.f32 0.5, %v19716_v21  ;;  %v16213_v1 = vld [vmem:[#allocation5 + $0x21c4] ss:$24 sps:$4 sm:$0xff]  }
 0x233   : > { %22308 = vst [vmem:[#allocation88_spill] sm:$0xff] %v19747_v24  ;;  %10143 = vmatprep.subr.bf16.mxu0 %v16183_v38  ;;  %v17817_v36 = vpop.eup %17816  ;;  %10102 = vmatprep.mubr.bf16.mxu0 %v19747_v24  ;;  %v1801_v5 = vadd.f32 1.0, %v17815_v26  ;;  %v663_v25 = vmul.f32 0.5, %v19723_v22  ;;  %v687_v21 = vmul.f32 0.5, %v19726_v58 }
 0x234   : > { %v17819_v46 = vpop.eup %17818  ;;  %v19753_v12 = vpack.c.bf16 %v2077_v43, %v2053_v44  ;;  %v2065_v48 = vmul.f32 %v1777_v60, %v913_v13  ;;  %9586 = vmatpush1.bf16.msra.mxu1 %v16178_v0  ;;  %v1528_v17 = vadd.f32 1.0, %v17817_v36  ;;  %v675_v43 = vmul.f32 0.5, %v19732_v19  ;;  %v424_v60 = vld [vmem:[%s18582_s14 + $0x1c8] sm:$0xff] }
 0x235   : > { %v2089_v23 = vmul.f32 %v1801_v5, %v937_v11  ;;  %v1552_v55 = vadd.f32 1.0, %v17819_v46  ;;  %9648 = vmatprep.subr.bf16.mxu1 %v16186_v4  ;;  %v17821_v38 = vpop.eup %17820  ;;  %v699_v36 = vmul.f32 0.5, %v19735_v53  ;;  %v1000_v5 = vmul.f32 0.70710677, %v424_v60  ;;  %v16184_v46 = vld [vmem:[#allocation5 + $0xf00] ss:$24 sps:$4 sm:$0xff]  }
 0x236   : > { %22309 = vst [vmem:[#allocation89_spill] sm:$0xff] %v19753_v12  ;;  %10144 = vmatpush1.bf16.msra.mxu0 %v16181_v3  ;;  %9545 = vmatmul.mubr.bf16.gmra.mrb[20].mxu1 %v19753_v12  ;;  %v1816_v40 = vmul.f32 %v1528_v17, %v664_v59  ;;  %v1540_v13 = vadd.f32 1.0, %v17821_v38  ;;  %v19768_v59 = vld [vmem:[%s18582_s14 + $0x288] sm:$0xff]  ;;  %v19785_v53 = vld [vmem:[%s18582_s14 + $0x280] sm:$0xff] }
 0x237   : > { %10206 = vmatprep.subr.bf16.mxu0 %v16189_v29  ;;  %v17823_v45 = vpop.eup %17822  ;;  %v19758_v33 = vpack.c.bf16 %v2089_v23, %v2065_v48  ;;  %v1840_v0 = vmul.f32 %v1552_v55, %v688_v16  ;;  %v19773_v16 = vld [vmem:[%s18582_s14 + $0x228] sm:$0xff]  ;;  %v1024_v23 = vmul.f32 0.70710677, %v19768_v59  ;;  %17832 = verf.f32 %v1000_v5 }
 0x238   : > { %v1564_v9 = vadd.f32 1.0, %v17823_v45  ;;  %v17825_v44 = vpop.eup %17824  ;;  %v1828_v11 = vmul.f32 %v1540_v13, %v676_v51  ;;  %v19779_v55 = vld [vmem:[%s18582_s14 + $0x2e8] sm:$0xff]  ;;  %v1012_v13 = vmul.f32 0.70710677, %v19773_v16  ;;  %v735_v12 = vmul.f32 0.5, %v19785_v53 }
 0x239   : > { %22310 = vst [vmem:[#allocation90_spill] sm:$0xff] %v19758_v33  ;;  %10103 = vmatmul.mubr.bf16.gmra.mrb[20].mxu0 %v19758_v33  ;;  %v19762_v62 = vpack.c.bf16 %v1840_v0, %v1816_v40  ;;  %v17827_v3 = vpop.eup %17826  ;;  %v1527_v26 = vadd.f32 1.0, %v17825_v44  ;;  %v19782_v40 = vld [vmem:[%s18582_s14 + $0x1c0] sm:$0xff]  ;;  %v16192_v0 = vld [vmem:[#allocation5 + $0xf34] ss:$24 sps:$4 sm:$0xff]   ;;  %17834 = verf.f32 %v1024_v23  ;;  %v724_v33 = vmul.f32 0.5, %v19773_v16 }
 0x23a   : > { %v1852_v4 = vmul.f32 %v1564_v9, %v700_v7  ;;  %v17829_v29 = vpop.eup %17828  ;;  %v1551_v22 = vadd.f32 1.0, %v17827_v3  ;;  %v16187_v7 = vld [vmem:[#allocation5 + $0x2100] ss:$24 sps:$4 sm:$0xff]   ;;  %17836 = verf.f32 %v1012_v13  ;;  %v999_v3 = vmul.f32 0.70710677, %v19782_v40  ;;  %v19810_v23 = vld [vmem:[%s18582_s14 + $0x408] sm:$0xff] }
 0x23b   : > { %22311 = vst [vmem:[#allocation91_spill] sm:$0xff] %v19762_v62  ;;  %9587 = vmatprep.mubr.bf16.mxu1 %v19762_v62  ;;  %v17831_v58 = vpop.eup %17830  ;;  %v1815_v19 = vmul.f32 %v1527_v26, %v663_v25  ;;  %v1539_v17 = vadd.f32 1.0, %v17829_v29  ;;  %v19790_v9 = vld [vmem:[%s18582_s14 + $0x220] sm:$0xff]  ;;  %v16195_v29 = vld [vmem:[#allocation5 + $0x2134] ss:$24 sps:$4 sm:$0xff]   ;;  %v712_v13 = vmul.f32 0.5, %v424_v60 }
 0x23c   : > { %v19775_v48 = vpack.c.bf16 %v1852_v4, %v1828_v11  ;;  %v1839_v51 = vmul.f32 %v1551_v22, %v687_v21  ;;  %v1563_v38 = vadd.f32 1.0, %v17831_v58  ;;  %v19793_v25 = vld [vmem:[%s18582_s14 + $0x2e0] sm:$0xff]  ;;  %v1036_v21 = vmul.f32 0.70710677, %v19779_v55  ;;  %v16193_v22 = vld [vmem:[#allocation5 + $0x2130] ss:$24 sps:$4 sm:$0xff]  }
 0x23d   : > { %v1827_v45 = vmul.f32 %v1539_v17, %v675_v43  ;;  %v1023_v4 = vmul.f32 0.70710677, %v19785_v53  ;;  %v16190_v43 = vld [vmem:[#allocation5 + $0xf30] ss:$24 sps:$4 sm:$0xff]   ;;  %v1035_v5 = vmul.f32 0.70710677, %v19793_v25 }
 0x23e   : > { %22312 = vst [vmem:[#allocation92_spill] sm:$0xff] %v19775_v48  ;;  %10145 = vmatprep.mubr.bf16.mxu0 %v19775_v48  ;;  %v19795_v44 = vpack.c.bf16 %v1839_v51, %v1815_v19  ;;  %v1851_v11 = vmul.f32 %v1563_v38, %v699_v36  ;;  %17838 = verf.f32 %v1036_v21  ;;  %v1011_v36 = vmul.f32 0.70710677, %v19790_v9  ;;  %v16198_v58 = vld [vmem:[#allocation5 + $0xf64] ss:$24 sps:$4 sm:$0xff]   ;;  %v19814_v38 = vld [vmem:[%s18582_s14 + $0x3a8] sm:$0xff] }
 0x23f   : > { %17840 = verf.f32 %v999_v3  ;;  %v16196_v19 = vld [vmem:[#allocation5 + $0xf60] ss:$24 sps:$4 sm:$0xff]   ;;  %v16201_v17 = vld [vmem:[#allocation5 + $0x2164] ss:$24 sps:$4 sm:$0xff]   ;;  %v16202_v60 = vld [vmem:[#allocation5 + $0xf90] ss:$24 sps:$4 sm:$0xff]  }
 0x240   : > { %22313 = vst [vmem:[#allocation93_spill] sm:$0xff] %v19795_v44  ;;  %9588 = vmatmul.mubr.bf16.vlgmr.msra.gmra.mrb[0].mxu1 %v19795_v44  ;;  %v19801_v26 = vpack.c.bf16 %v1851_v11, %v1827_v45  ;;  %17842 = verf.f32 %v1023_v4  ;;  %v19817_v45 = vld [vmem:[%s18582_s14 + $0x468] sm:$0xff]  ;;  %v1072_v11 = vmul.f32 0.70710677, %v19810_v23  ;;  %v19821_v21 = vld [vmem:[%s18582_s14 + $0x340] sm:$0xff] }
 0x241   : > { %9649 = vmatpush1.bf16.msra.mxu1 %v16184_v46  ;;  %17844 = verf.f32 %v1011_v36  ;;  %v19807_v46 = vld [vmem:[%s18582_s14 + $0x348] sm:$0xff]  ;;  %v17833_v3 = vpop.eup %17832  ;;  %v1060_v36 = vmul.f32 0.70710677, %v19814_v38  ;;  %v19838_v16 = vld [vmem:[%s18582_s14 + $0x460] sm:$0xff] }
 0x242   : > { %22314 = vst [vmem:[#allocation94_spill] sm:$0xff] %v19801_v26  ;;  %10146 = vmatmul.mubr.bf16.vlgmr.msra.gmra.mrb[0].mxu0 %v19801_v26  ;;  %9650 = vmatprep.subr.bf16.mxu1 %v16192_v0  ;;  %17846 = verf.f32 %v1035_v5  ;;  %v1048_v51 = vmul.f32 0.70710677, %v19807_v46  ;;  %v16199_v0 = vld [vmem:[#allocation5 + $0x2160] ss:$24 sps:$4 sm:$0xff]   ;;  %v1576_v48 = vadd.f32 1.0, %v17833_v3 }
 0x243   : > { %10207 = vmatpush1.bf16.msra.mxu0 %v16187_v7  ;;  %v16204_v7 = vld [vmem:[#allocation5 + $0xf94] ss:$24 sps:$4 sm:$0xff]   ;;  %v1084_v5 = vmul.f32 0.70710677, %v19817_v45  ;;  %v19827_v26 = vld [vmem:[%s18582_s14 + $0x400] sm:$0xff]  ;;  %v711_v3 = vmul.f32 0.5, %v19782_v40 }
 0x244   : > { %10208 = vmatprep.subr.bf16.mxu0 %v16195_v29  ;;  %v16207_v4 = vld [vmem:[#allocation5 + $0x2194] ss:$24 sps:$4 sm:$0xff]   ;;  %v736_v29 = vmul.f32 0.5, %v19768_v59  ;;  %17848 = verf.f32 %v1048_v51  ;;  %v748_v51 = vmul.f32 0.5, %v19779_v55  ;;  %v1071_v24 = vmul.f32 0.70710677, %v19827_v26 }
 0x245   : > { %9651 = vmatpush1.bf16.msra.mxu1 %v16190_v43  ;;  %v17835_v43 = vpop.eup %17834  ;;  %17850 = verf.f32 %v1072_v11  ;;  %v1864_v62 = vmul.f32 %v1576_v48, %v712_v13  ;;  %v1059_v11 = vmul.f32 0.70710677, %v19834_v2  ;;  %v723_v48 = vmul.f32 0.5, %v19790_v9 }
 0x246   : > { %9652 = vmatprep.subr.bf16.mxu1 %v16198_v58  ;;  %v1047_v58 = vmul.f32 0.70710677, %v19821_v21  ;;  %v1600_v59 = vadd.f32 1.0, %v17835_v43  ;;  %17852 = verf.f32 %v1060_v36  ;;  %v17837_v44 = vpop.eup %17836  ;;  %v16210_v43 = vld [vmem:[#allocation5 + $0xfc4] ss:$24 sps:$4 sm:$0xff]  }
 0x247   : > { %10209 = vmatpush1.bf16.msra.mxu0 %v16193_v22  ;;  %v16205_v22 = vld [vmem:[#allocation5 + $0x2190] ss:$24 sps:$4 sm:$0xff]   ;;  %17854 = verf.f32 %v1084_v5  ;;  %v1588_v36 = vadd.f32 1.0, %v17837_v44  ;;  %v1083_v40 = vmul.f32 0.70710677, %v19838_v16 }
 0x248   : > { %10210 = vmatprep.subr.bf16.mxu0 %v16201_v17  ;;  %v17839_v17 = vpop.eup %17838  ;;  %v1888_v55 = vmul.f32 %v1600_v59, %v736_v29  ;;  %17856 = verf.f32 %v1047_v58  ;;  %v16208_v5 = vld [vmem:[#allocation5 + $0xfc0] ss:$24 sps:$4 sm:$0xff]  }
 0x249   : > { %9653 = vmatpush1.bf16.msra.mxu1 %v16196_v19  ;;  %v17841_v31 = vpop.eup %17840  ;;  %v1612_v19 = vadd.f32 1.0, %v17839_v17  ;;  %17858 = verf.f32 %v1071_v24  ;;  %v16211_v44 = vld [vmem:[#allocation5 + $0x21c0] ss:$24 sps:$4 sm:$0xff]   ;;  %v747_v24 = vmul.f32 0.5, %v19793_v25  ;;  %v16219_v17 = vld [vmem:[#allocation5 + $0x21f4] ss:$24 sps:$4 sm:$0xff]  }
 0x24a   : > { %9654 = vmatprep.subr.bf16.mxu1 %v16204_v7  ;;  %v17843_v13 = vpop.eup %17842  ;;  %v19844_v10 = vpack.c.bf16 %v1888_v55, %v1864_v62  ;;  %v1876_v7 = vmul.f32 %v1588_v36, %v724_v33  ;;  %v1575_v29 = vadd.f32 1.0, %v17841_v31  ;;  %17860 = verf.f32 %v1059_v11  ;;  %v19851_v11 = vld [vmem:[%s18582_s14 + $0x4c8] sm:$0xff] }
 0x24b   : > { %10211 = vmatpush1.bf16.msra.mxu0 %v16199_v0  ;;  %v17845_v53 = vpop.eup %17844  ;;  %v16216_v0 = vld [vmem:[#allocation5 + $0xff4] ss:$24 sps:$4 sm:$0xff]   ;;  %v1900_v58 = vmul.f32 %v1612_v19, %v748_v51  ;;  %v1599_v9 = vadd.f32 1.0, %v17843_v13  ;;  %17862 = verf.f32 %v1083_v40  ;;  %v760_v31 = vmul.f32 0.5, %v19807_v46  ;;  %v16214_v51 = vld [vmem:[#allocation5 + $0xff0] ss:$24 sps:$4 sm:$0xff]  }
 0x24c   : > { %10212 = vmatprep.subr.bf16.mxu0 %v16207_v4  ;;  %22315 = vst [vmem:[#allocation95_spill] sm:$0xff] %v19844_v10  ;;  %v17847_v59 = vpop.eup %17846  ;;  %9597 = vmatprep.mubr.bf16.mxu1 %v19844_v10  ;;  %v1863_v62 = vmul.f32 %v1575_v29, %v711_v3  ;;  %v1587_v33 = vadd.f32 1.0, %v17845_v53  ;;  %v784_v4 = vmul.f32 0.5, %v19810_v23  ;;  %v19860_v3 = vld [vmem:[%s18582_s14 + $0x528] sm:$0xff]  ;;  %v796_v23 = vmul.f32 0.5, %v19817_v45 }
 0x24d   : > { %9655 = vmatpush1.bf16.msra.mxu1 %v16202_v60  ;;  %v19854_v60 = vld [vmem:[%s18582_s14 + $0x588] sm:$0xff]  ;;  %v19856_v25 = vpack.c.bf16 %v1900_v58, %v1876_v7  ;;  %v1887_v55 = vmul.f32 %v1599_v9, %v735_v12  ;;  %v1611_v36 = vadd.f32 1.0, %v17847_v59  ;;  %v1096_v40 = vmul.f32 0.70710677, %v19851_v11  ;;  %v16222_v45 = vld [vmem:[#allocation5 + $0x1024] ss:$24 sps:$4 sm:$0xff]  }
 0x24e   : > { %9656 = vmatprep.subr.bf16.mxu1 %v16210_v43  ;;  %v772_v43 = vmul.f32 0.5, %v19814_v38  ;;  %v17849_v19 = vpop.eup %17848  ;;  %v1875_v46 = vmul.f32 %v1587_v33, %v723_v48  ;;  %v16217_v7 = vld [vmem:[#allocation5 + $0x21f0] ss:$24 sps:$4 sm:$0xff]   ;;  %v759_v53 = vmul.f32 0.5, %v19821_v21  ;;  %v783_v9 = vmul.f32 0.5, %v19827_v26 }
 0x24f   : > { %10213 = vmatpush1.bf16.msra.mxu0 %v16205_v22  ;;  %22316 = vst [vmem:[#allocation96_spill] sm:$0xff] %v19856_v25  ;;  %v1120_v22 = vmul.f32 0.70710677, %v19854_v60  ;;  %v17851_v13 = vpop.eup %17850  ;;  %10155 = vmatprep.mubr.bf16.mxu0 %v19856_v25  ;;  %v19866_v12 = vpack.c.bf16 %v1887_v55, %v1863_v62  ;;  %v1899_v38 = vmul.f32 %v1611_v36, %v747_v24  ;;  %v1624_v29 = vadd.f32 1.0, %v17849_v19  ;;  %v19870_v58 = vld [vmem:[%s18582_s14 + $0x5e8] sm:$0xff]  ;;  %v19942_v25 = vld [vmem:[%s18582_s14 + $0x760] sm:$0xff] }
 0x250   : > { %10214 = vmatprep.subr.bf16.mxu0 %v16213_v1  ;;  %v17853_v1 = vpop.eup %17852  ;;  %v1648_v48 = vadd.f32 1.0, %v17851_v13  ;;  %17864 = verf.f32 %v1096_v40  ;;  %v16220_v24 = vld [vmem:[#allocation5 + $0x1020] ss:$24 sps:$4 sm:$0xff]   ;;  %v16225_v21 = vld [vmem:[#allocation5 + $0x2224] ss:$24 sps:$4 sm:$0xff]  }
 0x251   : > { %9657 = vmatpush1.bf16.msra.mxu1 %v16208_v5  ;;  %22317 = vst [vmem:[#allocation97_spill] sm:$0xff] %v19866_v12  ;;  %v1108_v5 = vmul.f32 0.70710677, %v19860_v3  ;;  %v17855_v59 = vpop.eup %17854  ;;  %v19875_v62 = vpack.c.bf16 %v1899_v38, %v1875_v46  ;;  %v1912_v33 = vmul.f32 %v1624_v29, %v760_v31  ;;  %v1636_v55 = vadd.f32 1.0, %v17853_v1  ;;  %v19879_v40 = vld [vmem:[%s18582_s14 + $0x4c0] sm:$0xff] }
 0x252   : > { %9658 = vmatprep.subr.bf16.mxu1 %v16216_v0  ;;  %9598 = vmatmul.mubr.bf16.gmra.mrb[4].mxu1 %v19866_v12  ;;  %17866 = verf.f32 %v1120_v22  ;;  %v17857_v0 = vpop.eup %17856  ;;  %v1936_v36 = vmul.f32 %v1648_v48, %v784_v4  ;;  %v1660_v26 = vadd.f32 1.0, %v17855_v59  ;;  %v1132_v19 = vmul.f32 0.70710677, %v19870_v58  ;;  %v19882_v13 = vld [vmem:[%s18582_s14 + $0x580] sm:$0xff]  ;;  %v16228_v46 = vld [vmem:[#allocation5 + $0x1054] ss:$24 sps:$4 sm:$0xff]  }
 0x253   : > { %10215 = vmatpush1.bf16.msra.mxu0 %v16211_v44  ;;  %22318 = vst [vmem:[#allocation98_spill] sm:$0xff] %v19875_v62  ;;  %17868 = verf.f32 %v1108_v5  ;;  %v17859_v44 = vpop.eup %17858  ;;  %v16223_v31 = vld [vmem:[#allocation5 + $0x2220] ss:$24 sps:$4 sm:$0xff]   ;;  %v1924_v22 = vmul.f32 %v1636_v55, %v772_v43  ;;  %v1623_v38 = vadd.f32 1.0, %v17857_v0  ;;  %v771_v4 = vmul.f32 0.5, %v19834_v2 }
 0x254   : > { %10216 = vmatprep.subr.bf16.mxu0 %v16219_v17  ;;  %10156 = vmatmul.mubr.bf16.gmra.mrb[4].mxu0 %v19875_v62  ;;  %v795_v17 = vmul.f32 0.5, %v19838_v16  ;;  %v17861_v29 = vpop.eup %17860  ;;  %v19887_v1 = vpack.c.bf16 %v1936_v36, %v1912_v33  ;;  %v1948_v48 = vmul.f32 %v1660_v26, %v796_v23  ;;  %v1647_v5 = vadd.f32 1.0, %v17859_v44  ;;  %v19890_v59 = vld [vmem:[%s18582_s14 + $0x520] sm:$0xff]  ;;  %v16226_v43 = vld [vmem:[#allocation5 + $0x1050] ss:$24 sps:$4 sm:$0xff]  }
 0x255   : > { %9659 = vmatpush1.bf16.msra.mxu1 %v16214_v51  ;;  %17870 = verf.f32 %v1132_v19  ;;  %v19893_v51 = vld [vmem:[%s18582_s14 + $0x5e0] sm:$0xff]  ;;  %v17863_v62 = vpop.eup %17862  ;;  %v1911_v55 = vmul.f32 %v1623_v38, %v759_v53  ;;  %v1635_v0 = vadd.f32 1.0, %v17861_v29  ;;  %v1095_v2 = vmul.f32 0.70710677, %v19879_v40  ;;  %v19901_v26 = vld [vmem:[%s18582_s14 + $0x648] sm:$0xff] }
 0x256   : > { %9660 = vmatprep.subr.bf16.mxu1 %v16222_v45  ;;  %22319 = vst [vmem:[#allocation99_spill] sm:$0xff] %v19887_v1  ;;  %v1119_v16 = vmul.f32 0.70710677, %v19882_v13  ;;  %v16231_v45 = vld [vmem:[#allocation5 + $0x2254] ss:$24 sps:$4 sm:$0xff]   ;;  %9607 = vmatprep.mubr.bf16.mxu1 %v19887_v1  ;;  %v19898_v23 = vpack.c.bf16 %v1948_v48, %v1924_v22  ;;  %v1935_v33 = vmul.f32 %v1647_v5, %v783_v9  ;;  %v1659_v36 = vadd.f32 1.0, %v17863_v62 }
 0x257   : > { %10217 = vmatpush1.bf16.msra.mxu0 %v16217_v7  ;;  %v16229_v7 = vld [vmem:[#allocation5 + $0x2250] ss:$24 sps:$4 sm:$0xff]   ;;  %v16234_v53 = vld [vmem:[#allocation5 + $0x1084] ss:$24 sps:$4 sm:$0xff]   ;;  %v1923_v19 = vmul.f32 %v1635_v0, %v771_v4  ;;  %v808_v44 = vmul.f32 0.5, %v19851_v11  ;;  %17872 = verf.f32 %v1095_v2  ;;  %v832_v4 = vmul.f32 0.5, %v19854_v60 }
 0x258   : > { %10218 = vmatprep.subr.bf16.mxu0 %v16225_v21  ;;  %22320 = vst [vmem:[#allocation100_spill] sm:$0xff] %v19898_v23  ;;  %v1107_v38 = vmul.f32 0.70710677, %v19890_v59  ;;  %v19906_v21 = vld [vmem:[%s18582_s14 + $0x708] sm:$0xff]  ;;  %10165 = vmatprep.mubr.bf16.mxu0 %v19898_v23  ;;  %v19909_v9 = vpack.c.bf16 %v1935_v33, %v1911_v55  ;;  %v1947_v62 = vmul.f32 %v1659_v36, %v795_v17  ;;  %v16237_v22 = vld [vmem:[#allocation5 + $0x2284] ss:$24 sps:$4 sm:$0xff]   ;;  %17874 = verf.f32 %v1119_v16 }
 0x259   : > { %9661 = vmatpush1.bf16.msra.mxu1 %v16220_v24  ;;  %v1131_v24 = vmul.f32 0.70710677, %v19893_v51  ;;  %v19913_v29 = vld [vmem:[%s18582_s14 + $0x6a8] sm:$0xff]  ;;  %v16232_v11 = vld [vmem:[#allocation5 + $0x1080] ss:$24 sps:$4 sm:$0xff]   ;;  %v820_v48 = vmul.f32 0.5, %v19860_v3 }
 0x25a   : > { %9662 = vmatprep.subr.bf16.mxu1 %v16228_v46  ;;  %22321 = vst [vmem:[#allocation101_spill] sm:$0xff] %v19909_v9  ;;  %17876 = verf.f32 %v1107_v38  ;;  %v1144_v46 = vmul.f32 0.70710677, %v19901_v26  ;;  %v19919_v5 = vld [vmem:[%s18582_s14 + $0x768] sm:$0xff]  ;;  %v17865_v55 = vpop.eup %17864  ;;  %9608 = vmatmul.mubr.bf16.gmra.mrb[8].mxu1 %v19909_v9  ;;  %v19922_v17 = vpack.c.bf16 %v1947_v62, %v1923_v19  ;;  %v1168_v60 = vmul.f32 0.70710677, %v19906_v21 }
 0x25b   : > { %10219 = vmatpush1.bf16.msra.mxu0 %v16223_v31  ;;  %v16240_v0 = vld [vmem:[#allocation5 + $0x10b4] ss:$24 sps:$4 sm:$0xff]   ;;  %v844_v31 = vmul.f32 0.5, %v19870_v58  ;;  %17878 = verf.f32 %v1131_v24  ;;  %v16235_v2 = vld [vmem:[#allocation5 + $0x2280] ss:$24 sps:$4 sm:$0xff]   ;;  %v1672_v16 = vadd.f32 1.0, %v17865_v55 }
 0x25c   : > { %10220 = vmatprep.subr.bf16.mxu0 %v16231_v45  ;;  %22322 = vst [vmem:[#allocation102_spill] sm:$0xff] %v19922_v17  ;;  %v17867_v3 = vpop.eup %17866  ;;  %v19927_v33 = vmul.f32 0.5, %v19879_v40  ;;  %17880 = verf.f32 %v1144_v46  ;;  %v1156_v45 = vmul.f32 0.70710677, %v19913_v29  ;;  %v567_v36 = vld [vmem:[%s18582_s14 + $0x640] sm:$0xff]  ;;  %10166 = vmatmul.mubr.bf16.gmra.mrb[8].mxu0 %v19922_v17  ;;  %v19934_v62 = vmul.f32 0.5, %v19882_v13 }
 0x25d   : > { %9663 = vmatpush1.bf16.msra.mxu1 %v16226_v43  ;;  %v591_v19 = vld [vmem:[%s18582_s14 + $0x700] sm:$0xff]  ;;  %v17869_v38 = vpop.eup %17868  ;;  %v1696_v58 = vadd.f32 1.0, %v17867_v3  ;;  %17882 = verf.f32 %v1168_v60  ;;  %v1180_v43 = vmul.f32 0.70710677, %v19919_v5  ;;  %v16238_v40 = vld [vmem:[#allocation5 + $0x10b0] ss:$24 sps:$4 sm:$0xff]   ;;  %v1960_v46 = vmul.f32 %v1672_v16, %v808_v44 }
 0x25e   : > { %9664 = vmatprep.subr.bf16.mxu1 %v16234_v53  ;;  %v579_v24 = vld [vmem:[%s18582_s14 + $0x6a0] sm:$0xff]  ;;  %v1684_v55 = vadd.f32 1.0, %v17869_v38  ;;  %v19939_v23 = vmul.f32 0.5, %v19890_v59  ;;  %17884 = verf.f32 %v1156_v45  ;;  %v16243_v3 = vld [vmem:[#allocation5 + $0x22b4] ss:$24 sps:$4 sm:$0xff]   ;;  %v843_v44 = vmul.f32 0.5, %v19893_v51 }
 0x25f   : > { %10221 = vmatpush1.bf16.msra.mxu0 %v16229_v7  ;;  %v17871_v53 = vpop.eup %17870  ;;  %v1984_v17 = vmul.f32 %v1696_v58, %v832_v4  ;;  %17886 = verf.f32 %v1180_v43  ;;  %v1143_v13 = vmul.f32 0.70710677, %v567_v36  ;;  %v1167_v60 = vmul.f32 0.70710677, %v591_v19  ;;  %v16241_v9 = vld [vmem:[#allocation5 + $0x22b0] ss:$24 sps:$4 sm:$0xff]  }
 0x260   : > { %10222 = vmatprep.subr.bf16.mxu0 %v16237_v22  ;;  %v1708_v1 = vadd.f32 1.0, %v17871_v53  ;;  %v1972_v7 = vmul.f32 %v1684_v55, %v820_v48  ;;  %v19946_v16 = vmul.f32 0.5, %v19901_v26  ;;  %v16246_v45 = vld [vmem:[#allocation5 + $0x10e4] ss:$24 sps:$4 sm:$0xff]   ;;  %v1155_v22 = vmul.f32 0.70710677, %v579_v24 }
 0x261   : > { %9665 = vmatpush1.bf16.msra.mxu1 %v16232_v11  ;;  %v19948_v59 = vpack.c.bf16 %v1984_v17, %v1960_v46  ;;  %17888 = verf.f32 %v1143_v13  ;;  %v1179_v4 = vmul.f32 0.70710677, %v19942_v25  ;;  %v17873_v38 = vpop.eup %17872  ;;  %v16244_v58 = vld [vmem:[#allocation5 + $0x10e0] ss:$24 sps:$4 sm:$0xff]   ;;  %v16249_v48 = vld [vmem:[#allocation5 + $0x22e4] ss:$24 sps:$4 sm:$0xff]  }
 0x262   : > { %9666 = vmatprep.subr.bf16.mxu1 %v16240_v0  ;;  %v1996_v11 = vmul.f32 %v1708_v1, %v844_v31  ;;  %v880_v51 = vmul.f32 0.5, %v19906_v21  ;;  %v19953_v26 = vmul.f32 0.5, %v19913_v29  ;;  %17890 = verf.f32 %v1167_v60  ;;  %v17875_v17 = vpop.eup %17874  ;;  %v616_v1 = vld [vmem:[%s18582_s14 + $0x7c8] sm:$0xff]  ;;  %v16247_v55 = vld [vmem:[#allocation5 + $0x22e0] ss:$24 sps:$4 sm:$0xff]  }
 0x263   : > { %22323 = vst [vmem:[#allocation103_spill] sm:$0xff] %v19948_v59  ;;  %10223 = vmatpush1.bf16.msra.mxu0 %v16235_v2  ;;  %9617 = vmatprep.mubr.bf16.mxu1 %v19948_v59  ;;  %v1671_v0 = vadd.f32 1.0, %v17873_v38  ;;  %v19957_v43 = vmul.f32 0.5, %v19919_v5  ;;  %v19959_v46 = vmul.f32 0.5, %v567_v36  ;;  %17892 = verf.f32 %v1155_v22  ;;  %v640_v31 = vld [vmem:[%s18582_s14 + $0x888] sm:$0xff]  ;;  %v615_v12 = vld [vmem:[%s18582_s14 + $0x7c0] sm:$0xff] }
 0x264   : > { %10224 = vmatprep.subr.bf16.mxu0 %v16243_v3  ;;  %v17877_v2 = vpop.eup %17876  ;;  %v19963_v21 = vpack.c.bf16 %v1996_v11, %v1972_v7  ;;  %v1695_v29 = vadd.f32 1.0, %v17875_v17  ;;  %v16252_v53 = vld [vmem:[#allocation5 + $0x1114] ss:$24 sps:$4 sm:$0xff]   ;;  %v19965_v3 = vmul.f32 0.5, %v591_v19  ;;  %17894 = verf.f32 %v1179_v4  ;;  %v16250_v11 = vld [vmem:[#allocation5 + $0x1110] ss:$24 sps:$4 sm:$0xff]  }
 0x265   : > { %9667 = vmatpush1.bf16.msra.mxu1 %v16238_v40  ;;  %v17879_v13 = vpop.eup %17878  ;;  %v1959_v5 = vmul.f32 %v1671_v0, %v19927_v33  ;;  %v1683_v36 = vadd.f32 1.0, %v17877_v2  ;;  %v19968_v60 = vmul.f32 0.5, %v579_v24  ;;  %v1192_v22 = vmul.f32 0.70710677, %v616_v1  ;;  %v628_v17 = vld [vmem:[%s18582_s14 + $0x828] sm:$0xff] }
 0x266   : > { %22324 = vst [vmem:[#allocation104_spill] sm:$0xff] %v19963_v21  ;;  %9668 = vmatprep.subr.bf16.mxu1 %v16246_v45  ;;  %v17881_v38 = vpop.eup %17880  ;;  %10175 = vmatprep.mubr.bf16.mxu0 %v19963_v21  ;;  %v1983_v40 = vmul.f32 %v1695_v29, %v19934_v62  ;;  %v1707_v7 = vadd.f32 1.0, %v17879_v13  ;;  %v1216_v19 = vmul.f32 0.70710677, %v640_v31  ;;  %v652_v59 = vld [vmem:[%s18582_s14 + $0x8e8] sm:$0xff]  ;;  %v19976_v2 = vmul.f32 0.5, %v19942_v25 }
 0x267   : > { %10225 = vmatpush1.bf16.msra.mxu0 %v16241_v9  ;;  %v17883_v4 = vpop.eup %17882  ;;  %v1971_v33 = vmul.f32 %v1683_v36, %v19939_v23  ;;  %v16255_v45 = vld [vmem:[#allocation5 + $0x2314] ss:$24 sps:$4 sm:$0xff]   ;;  %v1720_v24 = vadd.f32 1.0, %v17881_v38  ;;  %v16258_v0 = vld [vmem:[#allocation5 + $0x1144] ss:$24 sps:$4 sm:$0xff]   ;;  %17896 = verf.f32 %v1192_v22 }
 0x268   : > { %10226 = vmatprep.subr.bf16.mxu0 %v16249_v48  ;;  %v17885_v9 = vpop.eup %17884  ;;  %v19978_v21 = vpack.c.bf16 %v1983_v40, %v1959_v5  ;;  %v1995_v62 = vmul.f32 %v1707_v7, %v843_v44  ;;  %v16253_v29 = vld [vmem:[#allocation5 + $0x2310] ss:$24 sps:$4 sm:$0xff]   ;;  %v1744_v13 = vadd.f32 1.0, %v17883_v4  ;;  %17898 = verf.f32 %v1216_v19  ;;  %v16261_v22 = vld [vmem:[#allocation5 + $0x2344] ss:$24 sps:$4 sm:$0xff]  }
 0x269   : > { %9669 = vmatpush1.bf16.msra.mxu1 %v16244_v58  ;;  %v17887_v10 = vpop.eup %17886  ;;  %v2008_v23 = vmul.f32 %v1720_v24, %v19946_v16  ;;  %v1732_v48 = vadd.f32 1.0, %v17885_v9  ;;  %v1204_v36 = vmul.f32 0.70710677, %v628_v17  ;;  %v1228_v38 = vmul.f32 0.70710677, %v652_v59  ;;  %v639_v7 = vld [vmem:[%s18582_s14 + $0x880] sm:$0xff] }
 0x26a   : > { %9670 = vmatprep.subr.bf16.mxu1 %v16252_v53  ;;  %9618 = vmatmul.mubr.bf16.gmra.mrb[12].mxu1 %v19978_v21  ;;  %v19983_v25 = vpack.c.bf16 %v1995_v62, %v1971_v33  ;;  %v2032_v5 = vmul.f32 %v1744_v13, %v880_v51  ;;  %v1756_v44 = vadd.f32 1.0, %v17887_v10  ;;  %v16256_v58 = vld [vmem:[#allocation5 + $0x1140] ss:$24 sps:$4 sm:$0xff]   ;;  %v19985_v40 = vmul.f32 0.5, %v616_v1  ;;  %v16264_v53 = vld [vmem:[#allocation5 + $0x1174] ss:$24 sps:$4 sm:$0xff]  }
 0x26b   : > { %10227 = vmatpush1.bf16.msra.mxu0 %v16247_v55  ;;  %v17889_v19 = vpop.eup %17888  ;;  %v2020_v16 = vmul.f32 %v1732_v48, %v19953_v26  ;;  %v19989_v4 = vmul.f32 0.5, %v640_v31  ;;  %17900 = verf.f32 %v1204_v36  ;;  %v1191_v24 = vmul.f32 0.70710677, %v615_v12  ;;  %v16259_v55 = vld [vmem:[#allocation5 + $0x2340] ss:$24 sps:$4 sm:$0xff]  }
 0x26c   : > { %22325 = vst [vmem:[#allocation105_spill] sm:$0xff] %v19983_v25  ;;  %10228 = vmatprep.subr.bf16.mxu0 %v16255_v45  ;;  %v17891_v33 = vpop.eup %17890  ;;  %10176 = vmatmul.mubr.bf16.gmra.mrb[12].mxu0 %v19983_v25  ;;  %v19992_v10 = vpack.c.bf16 %v2032_v5, %v2008_v23  ;;  %v2044_v51 = vmul.f32 %v1756_v44, %v19957_v43  ;;  %v1719_v1 = vadd.f32 1.0, %v17889_v19  ;;  %17902 = verf.f32 %v1228_v38  ;;  %v627_v45 = vld [vmem:[%s18582_s14 + $0x820] sm:$0xff]  ;;  %v16262_v36 = vld [vmem:[#allocation5 + $0x1170] ss:$24 sps:$4 sm:$0xff]  }
 0x26d   : > { %9671 = vmatpush1.bf16.msra.mxu1 %v16250_v11  ;;  %v17893_v9 = vpop.eup %17892  ;;  %v1743_v26 = vadd.f32 1.0, %v17891_v33  ;;  %v19996_v31 = vmul.f32 0.5, %v628_v17  ;;  %v1215_v62 = vmul.f32 0.70710677, %v639_v7  ;;  %17904 = verf.f32 %v1191_v24  ;;  %v651_v13 = vld [vmem:[%s18582_s14 + $0x8e0] sm:$0xff]  ;;  %v378_v17 = vld [vmem:[%s18582_s14 + $0x58] sm:$0xff] }
 0x26e   : > { %22326 = vst [vmem:[#allocation106_spill] sm:$0xff] %v19992_v10  ;;  %9672 = vmatprep.subr.bf16.mxu1 %v16258_v0  ;;  %v17895_v48 = vpop.eup %17894  ;;  %9627 = vmatprep.mubr.bf16.mxu1 %v19992_v10  ;;  %v20000_v11 = vpack.c.bf16 %v2044_v51, %v2020_v16  ;;  %v2007_v43 = vmul.f32 %v1719_v1, %v19959_v46  ;;  %v1731_v23 = vadd.f32 1.0, %v17893_v9  ;;  %v16267_v38 = vld [vmem:[#allocation5 + $0x2374] ss:$24 sps:$4 sm:$0xff]   ;;  %v20003_v5 = vmul.f32 0.5, %v652_v59  ;;  %v402_v24 = vld [vmem:[%s18582_s14 + $0x118] sm:$0xff] }
 0x26f   : > { %10229 = vmatpush1.bf16.msra.mxu0 %v16253_v29  ;;  %v2031_v0 = vmul.f32 %v1743_v26, %v19965_v3  ;;  %v1755_v44 = vadd.f32 1.0, %v17895_v48  ;;  %17906 = verf.f32 %v1215_v62  ;;  %v16270_v19 = vld [vmem:[#allocation5 + $0x11a4] ss:$24 sps:$4 sm:$0xff]   ;;  %v1203_v29 = vmul.f32 0.70710677, %v627_v45 }
 0x270   : > { %22327 = vst [vmem:[#allocation107_spill] sm:$0xff] %v20000_v11  ;;  %10230 = vmatprep.subr.bf16.mxu0 %v16261_v22  ;;  %10185 = vmatprep.mubr.bf16.mxu0 %v20000_v11  ;;  %v2019_v46 = vmul.f32 %v1731_v23, %v19968_v60  ;;  %v16265_v16 = vld [vmem:[#allocation5 + $0x2370] ss:$24 sps:$4 sm:$0xff]   ;;  %v20010_v33 = vmul.f32 0.5, %v615_v12  ;;  %v20012_v59 = vmul.f32 0.5, %v639_v7  ;;  %v390_v1 = vld [vmem:[%s18582_s14 + $0xb8] sm:$0xff] }
 0x271   : > { %9673 = vmatpush1.bf16.msra.mxu1 %v16256_v58  ;;  %v1227_v51 = vmul.f32 0.70710677, %v651_v13  ;;  %v17897_v3 = vpop.eup %17896  ;;  %v20015_v22 = vpack.c.bf16 %v2031_v0, %v2007_v43  ;;  %v2043_v9 = vmul.f32 %v1755_v44, %v19976_v2  ;;  %17908 = verf.f32 %v1203_v29  ;;  %v16273_v26 = vld [vmem:[#allocation5 + $0x23a4] ss:$24 sps:$4 sm:$0xff]   ;;  %v16268_v48 = vld [vmem:[#allocation5 + $0x11a0] ss:$24 sps:$4 sm:$0xff]  }
 0x272   : > { %9674 = vmatprep.subr.bf16.mxu1 %v16264_v53  ;;  %v954_v62 = vmul.f32 0.70710677, %v378_v17  ;;  %v414_v60 = vld [vmem:[%s18582_s14 + $0x178] sm:$0xff]  ;;  %v17899_v58 = vpop.eup %17898  ;;  %v1768_v12 = vadd.f32 1.0, %v17897_v3  ;;  %v20019_v7 = vmul.f32 0.5, %v627_v45  ;;  %v377_v11 = vld [vmem:[%s18582_s14 + $0x50] sm:$0xff] }
 0x273   : > { %22328 = vst [vmem:[#allocation108_spill] sm:$0xff] %v20015_v22  ;;  %10231 = vmatpush1.bf16.msra.mxu0 %v16259_v55  ;;  %17910 = verf.f32 %v1227_v51  ;;  %v978_v23 = vmul.f32 0.70710677, %v402_v24  ;;  %9628 = vmatmul.mubr.bf16.gmra.mrb[16].mxu1 %v20015_v22  ;;  %v20023_v43 = vpack.c.bf16 %v2043_v9, %v2019_v46  ;;  %v1792_v2 = vadd.f32 1.0, %v17899_v58  ;;  %v401_v0 = vld [vmem:[%s18582_s14 + $0x110] sm:$0xff] }
 0x274   : > { %10232 = vmatprep.subr.bf16.mxu0 %v16267_v38  ;;  %v20025_v53 = vmul.f32 0.5, %v651_v13  ;;  %17912 = verf.f32 %v954_v62  ;;  %v2056_v55 = vmul.f32 %v1768_v12, %v19985_v40  ;;  %v16271_v45 = vld [vmem:[#allocation5 + $0x23a0] ss:$24 sps:$4 sm:$0xff]   ;;  %v16276_v44 = vld [vmem:[#allocation5 + $0x11d4] ss:$24 sps:$4 sm:$0xff]   ;;  %v20031_v13 = vmul.f32 0.5, %v378_v17 }
 0x275   : > { %22329 = vst [vmem:[#allocation109_spill] sm:$0xff] %v20023_v43  ;;  %9675 = vmatpush1.bf16.msra.mxu1 %v16262_v36  ;;  %17914 = verf.f32 %v978_v23  ;;  %v966_v29 = vmul.f32 0.70710677, %v390_v1  ;;  %v990_v51 = vmul.f32 0.70710677, %v414_v60  ;;  %v17901_v3 = vpop.eup %17900  ;;  %10186 = vmatmul.mubr.bf16.gmra.mrb[16].mxu0 %v20023_v43  ;;  %v2080_v38 = vmul.f32 %v1792_v2, %v19989_v4  ;;  %v389_v62 = vld [vmem:[%s18582_s14 + $0xb0] sm:$0xff] }
 0x276   : > { %9676 = vmatprep.subr.bf16.mxu1 %v16270_v19  ;;  %v20033_v46 = vmul.f32 0.5, %v402_v24  ;;  %v953_v9 = vmul.f32 0.70710677, %v377_v11  ;;  %v413_v36 = vld [vmem:[%s18582_s14 + $0x170] sm:$0xff]  ;;  %v17903_v58 = vpop.eup %17902  ;;  %v1780_v40 = vadd.f32 1.0, %v17901_v3  ;;  %v20037_v12 = vmul.f32 0.5, %v390_v1 }
 0x277   : > { %10233 = vmatpush1.bf16.msra.mxu0 %v16265_v16  ;;  %17916 = verf.f32 %v966_v29  ;;  %v977_v23 = vmul.f32 0.70710677, %v401_v0  ;;  %v17905_v25 = vpop.eup %17904  ;;  %v20039_v43 = vpack.c.bf16 %v2080_v38, %v2056_v55  ;;  %v1804_v4 = vadd.f32 1.0, %v17903_v58  ;;  %v16274_v17 = vld [vmem:[#allocation5 + $0x11d0] ss:$24 sps:$4 sm:$0xff]   ;;  %v426_v1 = vld [vmem:[%s18582_s14 + $0x1d8] sm:$0xff] }
 0x278   : > { %10234 = vmatprep.subr.bf16.mxu0 %v16273_v26  ;;  %v16279_v19 = vld [vmem:[#allocation5 + $0x23d4] ss:$24 sps:$4 sm:$0xff]   ;;  %v20041_v24 = vmul.f32 0.5, %v414_v60  ;;  %17918 = verf.f32 %v990_v51  ;;  %v2068_v2 = vmul.f32 %v1780_v40, %v19996_v31  ;;  %v1767_v22 = vadd.f32 1.0, %v17905_v25  ;;  %v16277_v31 = vld [vmem:[#allocation5 + $0x23d0] ss:$24 sps:$4 sm:$0xff]  }
 0x279   : > { %22330 = vst [vmem:[#allocation110_spill] sm:$0xff] %v20039_v43  ;;  %9677 = vmatpush1.bf16.msra.mxu1 %v16268_v48  ;;  %17920 = verf.f32 %v953_v9  ;;  %v965_v16 = vmul.f32 0.70710677, %v389_v62  ;;  %v17907_v29 = vpop.eup %17906  ;;  %9637 = vmatprep.mubr.bf16.mxu1 %v20039_v43  ;;  %v2092_v55 = vmul.f32 %v1804_v4, %v20003_v5  ;;  %v20047_v26 = vmul.f32 0.5, %v377_v11  ;;  %v16282_v51 = vld [vmem:[#allocation5 + $0xc] ss:$24 sps:$4 sm:$0xff]  }
 0x27a   : > { %9678 = vmatprep.subr.bf16.mxu1 %v16276_v44  ;;  %17922 = verf.f32 %v977_v23  ;;  %v989_v60 = vmul.f32 0.70710677, %v413_v36  ;;  %v1791_v3 = vadd.f32 1.0, %v17907_v29  ;;  %v2055_v25 = vmul.f32 %v1767_v22, %v20010_v33  ;;  %v450_v38 = vld [vmem:[%s18582_s14 + $0x298] sm:$0xff]  ;;  %v16285_v5 = vld [vmem:[#allocation5 + $0x14] ss:$24 sps:$4 sm:$0xff]  }
 0x27b   : > { %10235 = vmatpush1.bf16.msra.mxu0 %v16271_v45  ;;  %v20050_v48 = vmul.f32 0.5, %v401_v0  ;;  %17924 = verf.f32 %v965_v16  ;;  %v438_v9 = vld [vmem:[%s18582_s14 + $0x238] sm:$0xff]  ;;  %v17909_v58 = vpop.eup %17908  ;;  %v20054_v40 = vpack.c.bf16 %v2092_v55, %v2068_v2  ;;  %v20056_v11 = vmul.f32 0.5, %v389_v62 }
 0x27c   : > { %10236 = vmatprep.subr.bf16.mxu0 %v16279_v19  ;;  %17926 = verf.f32 %v989_v60  ;;  %v1002_v44 = vmul.f32 0.70710677, %v426_v1  ;;  %v2079_v33 = vmul.f32 %v1791_v3, %v20012_v59  ;;  %v1779_v22 = vadd.f32 1.0, %v17909_v58  ;;  %v462_v4 = vld [vmem:[%s18582_s14 + $0x2f8] sm:$0xff]  ;;  %v425_v19 = vld [vmem:[%s18582_s14 + $0x1d0] sm:$0xff] }
 0x27d   : > { %22331 = vst [vmem:[#allocation111_spill] sm:$0xff] %v20054_v40  ;;  %v17911_v23 = vpop.eup %17910  ;;  %9679 = vmatpush1.bf16.msra.mxu1 %v16274_v17  ;;  %v20059_v0 = vmul.f32 0.5, %v413_v36  ;;  %v1026_v45 = vmul.f32 0.70710677, %v450_v38  ;;  %10195 = vmatprep.mubr.bf16.mxu0 %v20054_v40  ;;  %v1014_v62 = vmul.f32 0.70710677, %v438_v9 }
 0x27e   : > { %v17913_v16 = vpop.eup %17912  ;;  %v1803_v2 = vadd.f32 1.0, %v17911_v23  ;;  %10299 = vmatprep.subr.bf16.mxu1 %v16282_v51  ;;  %17928 = verf.f32 %v1002_v44  ;;  %v20064_v55 = vpack.c.bf16 %v2079_v33, %v2055_v25  ;;  %v2067_v59 = vmul.f32 %v1779_v22, %v20019_v7  ;;  %v449_v58 = vld [vmem:[%s18582_s14 + $0x290] sm:$0xff] }
 0x27f   : > { %v17915_v29 = vpop.eup %17914  ;;  %10237 = vmatpush1.bf16.msra.mxu0 %v16277_v31  ;;  %v1530_v17 = vadd.f32 1.0, %v17913_v16  ;;  %17930 = verf.f32 %v1026_v45  ;;  %v1038_v3 = vmul.f32 0.70710677, %v462_v4  ;;  %v20071_v44 = vmul.f32 0.5, %v426_v1  ;;  %v437_v22 = vld [vmem:[%s18582_s14 + $0x230] sm:$0xff] }
 0x280   : > { %22332 = vst [vmem:[#allocation112_spill] sm:$0xff] %v20064_v55  ;;  %v2091_v36 = vmul.f32 %v1803_v2, %v20025_v53  ;;  %v1554_v60 = vadd.f32 1.0, %v17915_v29  ;;  %11415 = vmatprep.subr.bf16.mxu0 %v16285_v5  ;;  %17932 = verf.f32 %v1014_v62  ;;  %9638 = vmatmul.mubr.bf16.gmra.mrb[20].mxu1 %v20064_v55  ;;  %v20073_v7 = vmul.f32 0.5, %v450_v38  ;;  %v461_v62 = vld [vmem:[%s18582_s14 + $0x2f0] sm:$0xff] }
 0x281   : > { %v17917_v51 = vpop.eup %17916  ;;  %v1818_v25 = vmul.f32 %v1530_v17, %v20031_v13  ;;  %v1001_v31 = vmul.f32 0.70710677, %v425_v19  ;;  %17934 = verf.f32 %v1038_v3  ;;  %v1025_v2 = vmul.f32 0.70710677, %v449_v58  ;;  %v474_v3 = vld [vmem:[%s18582_s14 + $0x358] sm:$0xff] }
 0x282   : > { %v17919_v23 = vpop.eup %17918  ;;  %v20075_v33 = vpack.c.bf16 %v2091_v36, %v2067_v59  ;;  %v1842_v53 = vmul.f32 %v1554_v60, %v20033_v46  ;;  %v1542_v5 = vadd.f32 1.0, %v17917_v51  ;;  %v726_v59 = vmul.f32 0.5, %v438_v9 }
 0x283   : > { %v17921_v45 = vpop.eup %17920  ;;  %v1566_v16 = vadd.f32 1.0, %v17919_v23  ;;  %17936 = verf.f32 %v1001_v31  ;;  %v1013_v60 = vmul.f32 0.70710677, %v437_v22 }
 0x284   : > { %22333 = vst [vmem:[#allocation113_spill] sm:$0xff] %v20075_v33  ;;  %v17923_v13 = vpop.eup %17922  ;;  %10196 = vmatmul.mubr.bf16.gmra.mrb[20].mxu0 %v20075_v33  ;;  %v20081_v1 = vpack.c.bf16 %v1842_v53, %v1818_v25  ;;  %v1830_v38 = vmul.f32 %v1542_v5, %v20037_v12  ;;  %v1529_v29 = vadd.f32 1.0, %v17921_v45  ;;  %17938 = verf.f32 %v1025_v2  ;;  %v498_v33 = vld [vmem:[%s18582_s14 + $0x418] sm:$0xff]  ;;  %v16280_v5 = vld [vmem:[#allocation5 + $0x8] ss:$24 sps:$4 sm:$0xff]  }
 0x285   : > { %v17925_v46 = vpop.eup %17924  ;;  %v1854_v17 = vmul.f32 %v1566_v16, %v20041_v24  ;;  %v1553_v36 = vadd.f32 1.0, %v17923_v13  ;;  %v750_v25 = vmul.f32 0.5, %v462_v4  ;;  %v1037_v53 = vmul.f32 0.70710677, %v461_v62  ;;  %v16288_v24 = vld [vmem:[#allocation5 + $0x3c] ss:$24 sps:$4 sm:$0xff]  }
 0x286   : > { %22334 = vst [vmem:[#allocation114_spill] sm:$0xff] %v20081_v1  ;;  %v17927_v51 = vpop.eup %17926  ;;  %9680 = vmatprep.mubr.bf16.mxu1 %v20081_v1  ;;  %v1817_v31 = vmul.f32 %v1529_v29, %v20047_v26  ;;  %v1541_v23 = vadd.f32 1.0, %v17925_v46  ;;  %17940 = verf.f32 %v1013_v60  ;;  %v16283_v2 = vld [vmem:[#allocation5 + $0x10] ss:$24 sps:$4 sm:$0xff]   ;;  %v713_v13 = vmul.f32 0.5, %v425_v19  ;;  %v510_v60 = vld [vmem:[%s18582_s14 + $0x478] sm:$0xff] }
 0x287   : > { %v20089_v40 = vpack.c.bf16 %v1854_v17, %v1830_v38  ;;  %v1841_v12 = vmul.f32 %v1553_v36, %v20050_v48  ;;  %v1565_v9 = vadd.f32 1.0, %v17927_v51  ;;  %17942 = verf.f32 %v1037_v53  ;;  %v16291_v29 = vld [vmem:[#allocation5 + $0x44] ss:$24 sps:$4 sm:$0xff]   ;;  %v473_v1 = vld [vmem:[%s18582_s14 + $0x350] sm:$0xff] }
 0x288   : > { %v17929_v45 = vpop.eup %17928  ;;  %v1829_v16 = vmul.f32 %v1541_v23, %v20056_v11  ;;  %v1050_v26 = vmul.f32 0.70710677, %v474_v3  ;;  %v1074_v17 = vmul.f32 0.70710677, %v498_v33  ;;  %v486_v36 = vld [vmem:[%s18582_s14 + $0x3b8] sm:$0xff]  ;;  %v737_v19 = vmul.f32 0.5, %v449_v58 }
 0x289   : > { %22335 = vst [vmem:[#allocation115_spill] sm:$0xff] %v20089_v40  ;;  %v17931_v4 = vpop.eup %17930  ;;  %10238 = vmatprep.mubr.bf16.mxu0 %v20089_v40  ;;  %v20094_v38 = vpack.c.bf16 %v1841_v12, %v1817_v31  ;;  %v1853_v48 = vmul.f32 %v1565_v9, %v20059_v0  ;;  %v1578_v46 = vadd.f32 1.0, %v17929_v45  ;;  %v16286_v11 = vld [vmem:[#allocation5 + $0x38] ss:$24 sps:$4 sm:$0xff]   ;;  %v20099_v53 = vmul.f32 0.5, %v437_v22 }
 0x28a   : > { %v17933_v51 = vpop.eup %17932  ;;  %v1602_v23 = vadd.f32 1.0, %v17931_v4  ;;  %17944 = verf.f32 %v1050_v26  ;;  %v16294_v9 = vld [vmem:[#allocation5 + $0x6c] ss:$24 sps:$4 sm:$0xff]   ;;  %v20107_v45 = vld [vmem:[%s18582_s14 + $0x410] sm:$0xff]  ;;  %v16289_v4 = vld [vmem:[#allocation5 + $0x40] ss:$24 sps:$4 sm:$0xff]  }
 0x28b   : > { %22336 = vst [vmem:[#allocation116_spill] sm:$0xff] %v20094_v38  ;;  %9681 = vmatmul.mubr.bf16.vlgmr.msra.gmra.mrb[0].mxu1 %v20094_v38  ;;  %v20103_v31 = vpack.c.bf16 %v1853_v48, %v1829_v16  ;;  %v1866_v0 = vmul.f32 %v1578_v46, %v20071_v44  ;;  %v1590_v12 = vadd.f32 1.0, %v17933_v51  ;;  %17946 = verf.f32 %v1074_v17  ;;  %v17935_v40 = vpop.eup %17934  ;;  %v485_v51 = vld [vmem:[%s18582_s14 + $0x3b0] sm:$0xff] }
 0x28c   : > { %10300 = vmatpush1.bf16.msra.mxu1 %v16280_v5  ;;  %v1890_v58 = vmul.f32 %v1602_v23, %v20073_v7  ;;  %v20110_v22 = vmul.f32 0.5, %v461_v62  ;;  %v1062_v26 = vmul.f32 0.70710677, %v486_v36  ;;  %v1086_v38 = vmul.f32 0.70710677, %v510_v60  ;;  %v509_v23 = vld [vmem:[%s18582_s14 + $0x470] sm:$0xff] }
 0x28d   : > { %22337 = vst [vmem:[#allocation117_spill] sm:$0xff] %v20103_v31  ;;  %v17937_v16 = vpop.eup %17936  ;;  %10239 = vmatmul.mubr.bf16.vlgmr.msra.gmra.mrb[0].mxu0 %v20103_v31  ;;  %10301 = vmatprep.subr.bf16.mxu1 %v16288_v24  ;;  %v1614_v44 = vadd.f32 1.0, %v17935_v40  ;;  %v1878_v48 = vmul.f32 %v1590_v12, %v726_v59  ;;  %v20113_v46 = vmul.f32 0.5, %v474_v3  ;;  %v1049_v17 = vmul.f32 0.70710677, %v473_v1  ;;  %v20127_v31 = vld [vmem:[%s18582_s14 + $0x598] sm:$0xff] }
 0x28e   : > { %11416 = vmatpush1.bf16.msra.mxu0 %v16283_v2  ;;  %v20116_v5 = vpack.c.bf16 %v1890_v58, %v1866_v0  ;;  %v1577_v55 = vadd.f32 1.0, %v17937_v16  ;;  %v16292_v7 = vld [vmem:[#allocation5 + $0x68] ss:$24 sps:$4 sm:$0xff]   ;;  %17948 = verf.f32 %v1062_v26  ;;  %v1073_v62 = vmul.f32 0.70710677, %v20107_v45  ;;  %v17939_v43 = vpop.eup %17938  ;;  %v522_v16 = vld [vmem:[%s18582_s14 + $0x4d8] sm:$0xff] }
 0x28f   : > { %11417 = vmatprep.subr.bf16.mxu0 %v16291_v29  ;;  %v1902_v24 = vmul.f32 %v1614_v44, %v750_v25  ;;  %v16297_v40 = vld [vmem:[#allocation5 + $0x74] ss:$24 sps:$4 sm:$0xff]   ;;  %v20120_v3 = vmul.f32 0.5, %v498_v33  ;;  %v20122_v12 = vmul.f32 0.5, %v486_v36  ;;  %17950 = verf.f32 %v1086_v38  ;;  %v16295_v58 = vld [vmem:[#allocation5 + $0x70] ss:$24 sps:$4 sm:$0xff]  }
 0x290   : > { %22338 = vst [vmem:[#allocation118_spill] sm:$0xff] %v20116_v5  ;;  %v16300_v59 = vld [vmem:[#allocation5 + $0x9c] ss:$24 sps:$4 sm:$0xff]   ;;  %10302 = vmatpush1.bf16.msra.mxu1 %v16286_v11  ;;  %9690 = vmatprep.mubr.bf16.mxu1 %v20116_v5  ;;  %v1601_v2 = vadd.f32 1.0, %v17939_v43  ;;  %v1865_v0 = vmul.f32 %v1577_v55, %v713_v13  ;;  %17952 = verf.f32 %v1049_v17  ;;  %v1061_v26 = vmul.f32 0.70710677, %v485_v51  ;;  %v17941_v25 = vpop.eup %17940 }
 0x291   : > { %v20129_v29 = vpack.c.bf16 %v1902_v24, %v1878_v48  ;;  %10303 = vmatprep.subr.bf16.mxu1 %v16294_v9  ;;  %v16303_v33 = vld [vmem:[#allocation5 + $0xa4] ss:$24 sps:$4 sm:$0xff]   ;;  %v20131_v36 = vmul.f32 0.5, %v510_v60  ;;  %17954 = verf.f32 %v1073_v62  ;;  %v1085_v38 = vmul.f32 0.70710677, %v509_v23  ;;  %v17943_v11 = vpop.eup %17942 }
 0x292   : > { %11418 = vmatpush1.bf16.msra.mxu0 %v16289_v4  ;;  %v1889_v43 = vmul.f32 %v1601_v2, %v737_v19  ;;  %v1589_v55 = vadd.f32 1.0, %v17941_v25  ;;  %v16298_v13 = vld [vmem:[#allocation5 + $0x98] ss:$24 sps:$4 sm:$0xff]   ;;  %v20133_v44 = vmul.f32 0.5, %v473_v1  ;;  %17956 = verf.f32 %v1061_v26  ;;  %v16306_v26 = vld [vmem:[#allocation5 + $0xcc] ss:$24 sps:$4 sm:$0xff]  }
 0x293   : > { %22339 = vst [vmem:[#allocation119_spill] sm:$0xff] %v20129_v29  ;;  %v534_v17 = vld [vmem:[%s18582_s14 + $0x538] sm:$0xff]  ;;  %10248 = vmatprep.mubr.bf16.mxu0 %v20129_v29  ;;  %v1613_v9 = vadd.f32 1.0, %v17943_v11  ;;  %11419 = vmatprep.subr.bf16.mxu0 %v16297_v40  ;;  %17958 = verf.f32 %v1085_v38  ;;  %v1098_v60 = vmul.f32 0.70710677, %v522_v16  ;;  %v20145_v24 = vmul.f32 0.5, %v20107_v45 }
 0x294   : > { %v20137_v5 = vld [vmem:[%s18582_s14 + $0x5f8] sm:$0xff]  ;;  %v1122_v48 = vmul.f32 0.70710677, %v20127_v31  ;;  %v17945_v4 = vpop.eup %17944  ;;  %v20141_v19 = vpack.c.bf16 %v1889_v43, %v1865_v0  ;;  %v1877_v1 = vmul.f32 %v1589_v55, %v20099_v53  ;;  %10304 = vmatpush1.bf16.msra.mxu1 %v16292_v7  ;;  %v20147_v2 = vmul.f32 0.5, %v485_v51  ;;  %v521_v25 = vld [vmem:[%s18582_s14 + $0x4d0] sm:$0xff] }
 0x295   : > { %v16301_v62 = vld [vmem:[#allocation5 + $0xa0] ss:$24 sps:$4 sm:$0xff]   ;;  %v20151_v40 = vld [vmem:[%s18582_s14 + $0x590] sm:$0xff]  ;;  %v17947_v38 = vpop.eup %17946  ;;  %v1901_v11 = vmul.f32 %v1613_v9, %v20110_v22  ;;  %10305 = vmatprep.subr.bf16.mxu1 %v16300_v59  ;;  %v1626_v0 = vadd.f32 1.0, %v17945_v4  ;;  %17960 = verf.f32 %v1098_v60  ;;  %v1110_v53 = vmul.f32 0.70710677, %v534_v17 }
 0x296   : > { %22340 = vst [vmem:[#allocation120_spill] sm:$0xff] %v20141_v19  ;;  %9691 = vmatmul.mubr.bf16.gmra.mrb[4].mxu1 %v20141_v19  ;;  %11420 = vmatpush1.bf16.msra.mxu0 %v16295_v58  ;;  %v1650_v45 = vadd.f32 1.0, %v17947_v38  ;;  %v20155_v7 = vmul.f32 0.5, %v509_v23  ;;  %v16304_v51 = vld [vmem:[#allocation5 + $0xc8] ss:$24 sps:$4 sm:$0xff]   ;;  %17962 = verf.f32 %v1122_v48  ;;  %v20159_v55 = vld [vmem:[%s18582_s14 + $0x530] sm:$0xff] }
 0x297   : > { %v1134_v43 = vmul.f32 0.70710677, %v20137_v5  ;;  %v20161_v29 = vpack.c.bf16 %v1901_v11, %v1877_v1  ;;  %11421 = vmatprep.subr.bf16.mxu0 %v16303_v33  ;;  %v1914_v22 = vmul.f32 %v1626_v0, %v20113_v46  ;;  %v16309_v59 = vld [vmem:[#allocation5 + $0xd4] ss:$24 sps:$4 sm:$0xff]   ;;  %v20164_v9 = vmul.f32 0.5, %v522_v16 }
 0x298   : > { %17964 = verf.f32 %v1110_v53  ;;  %v557_v60 = vld [vmem:[%s18582_s14 + $0x5f0] sm:$0xff]  ;;  %v17949_v58 = vpop.eup %17948  ;;  %10306 = vmatpush1.bf16.msra.mxu1 %v16298_v13  ;;  %v1938_v23 = vmul.f32 %v1650_v45, %v20120_v3  ;;  %v1097_v38 = vmul.f32 0.70710677, %v521_v25  ;;  %v1121_v19 = vmul.f32 0.70710677, %v20151_v40 }
 0x299   : > { %22341 = vst [vmem:[#allocation121_spill] sm:$0xff] %v20161_v29  ;;  %v16307_v4 = vld [vmem:[#allocation5 + $0xd0] ss:$24 sps:$4 sm:$0xff]   ;;  %v16312_v48 = vld [vmem:[#allocation5 + $0xfc] ss:$24 sps:$4 sm:$0xff]   ;;  %17966 = verf.f32 %v1134_v43  ;;  %v17951_v1 = vpop.eup %17950  ;;  %10249 = vmatmul.mubr.bf16.gmra.mrb[4].mxu0 %v20161_v29  ;;  %v1638_v33 = vadd.f32 1.0, %v17949_v58  ;;  %10307 = vmatprep.subr.bf16.mxu1 %v16306_v26 }
 0x29a   : > { %v20171_v46 = vmul.f32 0.5, %v20127_v31  ;;  %v20173_v16 = vmul.f32 0.5, %v534_v17  ;;  %v1109_v13 = vmul.f32 0.70710677, %v20159_v55  ;;  %v17953_v3 = vpop.eup %17952  ;;  %11422 = vmatpush1.bf16.msra.mxu0 %v16301_v62  ;;  %v20176_v11 = vpack.c.bf16 %v1938_v23, %v1914_v22  ;;  %v16310_v53 = vld [vmem:[#allocation5 + $0xf8] ss:$24 sps:$4 sm:$0xff]  }
 0x29b   : > { %v1662_v0 = vadd.f32 1.0, %v17951_v1  ;;  %17968 = verf.f32 %v1097_v38  ;;  %v1133_v45 = vmul.f32 0.70710677, %v557_v60  ;;  %v17955_v43 = vpop.eup %17954  ;;  %v1926_v58 = vmul.f32 %v1638_v33, %v20122_v12  ;;  %11423 = vmatprep.subr.bf16.mxu0 %v16309_v59  ;;  %v16315_v31 = vld [vmem:[#allocation5 + $0x104] ss:$24 sps:$4 sm:$0xff]  }
 0x29c   : > { %22342 = vst [vmem:[#allocation122_spill] sm:$0xff] %v20176_v11  ;;  %v1625_v26 = vadd.f32 1.0, %v17953_v3  ;;  %v20180_v17 = vmul.f32 0.5, %v20137_v5  ;;  %17970 = verf.f32 %v1121_v19  ;;  %v570_v29 = vld [vmem:[%s18582_s14 + $0x658] sm:$0xff]  ;;  %v17957_v10 = vpop.eup %17956  ;;  %9700 = vmatprep.mubr.bf16.mxu1 %v20176_v11  ;;  %v1649_v22 = vadd.f32 1.0, %v17955_v43  ;;  %10308 = vmatpush1.bf16.msra.mxu1 %v16304_v51 }
 0x29d   : > { %v1950_v62 = vmul.f32 %v1662_v0, %v20131_v36  ;;  %v16313_v23 = vld [vmem:[#allocation5 + $0x100] ss:$24 sps:$4 sm:$0xff]   ;;  %v20185_v12 = vmul.f32 0.5, %v521_v25  ;;  %17972 = verf.f32 %v1109_v13  ;;  %v16318_v59 = vld [vmem:[#allocation5 + $0x12c] ss:$24 sps:$4 sm:$0xff]   ;;  %v17959_v1 = vpop.eup %17958  ;;  %v1637_v19 = vadd.f32 1.0, %v17957_v10  ;;  %10309 = vmatprep.subr.bf16.mxu1 %v16312_v48 }
 0x29e   : > { %v594_v38 = vld [vmem:[%s18582_s14 + $0x718] sm:$0xff]  ;;  %v1913_v5 = vmul.f32 %v1625_v26, %v20133_v44  ;;  %v20190_v33 = vmul.f32 0.5, %v20151_v40  ;;  %17974 = verf.f32 %v1133_v45  ;;  %v16321_v3 = vld [vmem:[#allocation5 + $0x134] ss:$24 sps:$4 sm:$0xff]   ;;  %v1937_v25 = vmul.f32 %v1649_v22, %v20145_v24  ;;  %11424 = vmatpush1.bf16.msra.mxu0 %v16307_v4  ;;  %v16316_v43 = vld [vmem:[#allocation5 + $0x128] ss:$24 sps:$4 sm:$0xff]  }
 0x29f   : > { %v582_v36 = vld [vmem:[%s18582_s14 + $0x6b8] sm:$0xff]  ;;  %v20196_v51 = vpack.c.bf16 %v1950_v62, %v1926_v58  ;;  %v1661_v13 = vadd.f32 1.0, %v17959_v1  ;;  %v1146_v11 = vmul.f32 0.70710677, %v570_v29  ;;  %v17961_v44 = vpop.eup %17960  ;;  %v1925_v10 = vmul.f32 %v1637_v19, %v20147_v2  ;;  %11425 = vmatprep.subr.bf16.mxu0 %v16315_v31  ;;  %v16319_v22 = vld [vmem:[#allocation5 + $0x130] ss:$24 sps:$4 sm:$0xff]  }
 0x2a0   : > { %v20194_v0 = vld [vmem:[%s18582_s14 + $0x778] sm:$0xff]  ;;  %v20201_v40 = vmul.f32 0.5, %v20159_v55  ;;  %v20203_v48 = vmul.f32 0.5, %v557_v60  ;;  %v1170_v58 = vmul.f32 0.70710677, %v594_v38  ;;  %v17963_v26 = vpop.eup %17962  ;;  %v20206_v24 = vpack.c.bf16 %v1937_v25, %v1913_v5  ;;  %10310 = vmatpush1.bf16.msra.mxu1 %v16310_v53  ;;  %v20210_v2 = vld [vmem:[%s18582_s14 + $0x650] sm:$0xff] }
 0x2a1   : > { %22343 = vst [vmem:[#allocation123_spill] sm:$0xff] %v20196_v51  ;;  %v16324_v45 = vld [vmem:[#allocation5 + $0x15c] ss:$24 sps:$4 sm:$0xff]   ;;  %10258 = vmatprep.mubr.bf16.mxu0 %v20196_v51  ;;  %v1949_v4 = vmul.f32 %v1661_v13, %v20155_v7  ;;  %v1674_v62 = vadd.f32 1.0, %v17961_v44  ;;  %17976 = verf.f32 %v1146_v11  ;;  %v1698_v60 = vadd.f32 1.0, %v17963_v26  ;;  %10311 = vmatprep.subr.bf16.mxu1 %v16318_v59 }
 0x2a2   : > { %v20213_v31 = vld [vmem:[%s18582_s14 + $0x710] sm:$0xff]  ;;  %v17965_v55 = vpop.eup %17964  ;;  %17978 = verf.f32 %v1170_v58  ;;  %v1158_v1 = vmul.f32 0.70710677, %v582_v36  ;;  %v1182_v19 = vmul.f32 0.70710677, %v20194_v0  ;;  %9701 = vmatmul.mubr.bf16.gmra.mrb[8].mxu1 %v20206_v24  ;;  %11426 = vmatpush1.bf16.msra.mxu0 %v16313_v23  ;;  %v20220_v13 = vmul.f32 0.5, %v570_v29 }
 0x2a3   : > { %v17967_v5 = vpop.eup %17966  ;;  %v20217_v7 = vpack.c.bf16 %v1949_v4, %v1925_v10  ;;  %v1962_v11 = vmul.f32 %v1674_v62, %v20164_v9  ;;  %v1686_v53 = vadd.f32 1.0, %v17965_v55  ;;  %v16322_v25 = vld [vmem:[#allocation5 + $0x158] ss:$24 sps:$4 sm:$0xff]   ;;  %v1986_v44 = vmul.f32 %v1698_v60, %v20171_v46  ;;  %11427 = vmatprep.subr.bf16.mxu0 %v16321_v3  ;;  %v16327_v58 = vld [vmem:[#allocation5 + $0x164] ss:$24 sps:$4 sm:$0xff]  }
 0x2a4   : > { %v1710_v59 = vadd.f32 1.0, %v17967_v5  ;;  %v20223_v26 = vmul.f32 0.5, %v594_v38  ;;  %17980 = verf.f32 %v1158_v1  ;;  %v20226_v51 = vld [vmem:[%s18582_s14 + $0x6b0] sm:$0xff]  ;;  %10312 = vmatpush1.bf16.msra.mxu1 %v16316_v43  ;;  %v16325_v23 = vld [vmem:[#allocation5 + $0x160] ss:$24 sps:$4 sm:$0xff]   ;;  %v20235_v55 = vmul.f32 0.5, %v582_v36 }
 0x2a5   : > { %22344 = vst [vmem:[#allocation124_spill] sm:$0xff] %v20217_v7  ;;  %v17969_v10 = vpop.eup %17968  ;;  %10259 = vmatmul.mubr.bf16.gmra.mrb[8].mxu0 %v20217_v7  ;;  %v1974_v9 = vmul.f32 %v1686_v53, %v20173_v16  ;;  %17982 = verf.f32 %v1182_v19  ;;  %v1145_v29 = vmul.f32 0.70710677, %v20210_v2  ;;  %v1169_v46 = vmul.f32 0.70710677, %v20213_v31  ;;  %10313 = vmatprep.subr.bf16.mxu1 %v16324_v45  ;;  %v20238_v60 = vld [vmem:[%s18582_s14 + $0x770] sm:$0xff] }
 0x2a6   : > { %v17971_v3 = vpop.eup %17970  ;;  %v20232_v38 = vpack.c.bf16 %v1986_v44, %v1962_v11  ;;  %v1998_v4 = vmul.f32 %v1710_v59, %v20180_v17  ;;  %v1673_v62 = vadd.f32 1.0, %v17969_v10  ;;  %v16330_v16 = vld [vmem:[#allocation5 + $0x18c] ss:$24 sps:$4 sm:$0xff]   ;;  %11428 = vmatpush1.bf16.msra.mxu0 %v16319_v22  ;;  %v20241_v19 = vmul.f32 0.5, %v20194_v0  ;;  %v20245_v11 = vld [vmem:[%s18582_s14 + $0x7d8] sm:$0xff] }
 0x2a7   : > { %v17973_v43 = vpop.eup %17972  ;;  %v1697_v1 = vadd.f32 1.0, %v17971_v3  ;;  %17984 = verf.f32 %v1145_v29  ;;  %v1157_v5 = vmul.f32 0.70710677, %v20226_v51  ;;  %11429 = vmatprep.subr.bf16.mxu0 %v16327_v58  ;;  %v16333_v22 = vld [vmem:[#allocation5 + $0x194] ss:$24 sps:$4 sm:$0xff]   ;;  %v20252_v44 = vld [vmem:[%s18582_s14 + $0x898] sm:$0xff] }
 0x2a8   : > { %v17975_v17 = vpop.eup %17974  ;;  %9710 = vmatprep.mubr.bf16.mxu1 %v20232_v38  ;;  %v20248_v36 = vpack.c.bf16 %v1998_v4, %v1974_v9  ;;  %v1961_v45 = vmul.f32 %v1673_v62, %v20185_v12  ;;  %v1685_v53 = vadd.f32 1.0, %v17973_v43  ;;  %17986 = verf.f32 %v1169_v46  ;;  %10314 = vmatpush1.bf16.msra.mxu1 %v16322_v25  ;;  %v16328_v29 = vld [vmem:[#allocation5 + $0x188] ss:$24 sps:$4 sm:$0xff]   ;;  %v20263_v3 = vld [vmem:[%s18582_s14 + $0x838] sm:$0xff] }
 0x2a9   : > { %v1985_v0 = vmul.f32 %v1697_v1, %v20190_v33  ;;  %v1709_v59 = vadd.f32 1.0, %v17975_v17  ;;  %v1181_v10 = vmul.f32 0.70710677, %v20238_v60  ;;  %17988 = verf.f32 %v1157_v5  ;;  %10315 = vmatprep.subr.bf16.mxu1 %v16330_v16  ;;  %v16331_v9 = vld [vmem:[#allocation5 + $0x190] ss:$24 sps:$4 sm:$0xff]  }
 0x2aa   : > { %22345 = vst [vmem:[#allocation125_spill] sm:$0xff] %v20248_v36  ;;  %10268 = vmatprep.mubr.bf16.mxu0 %v20248_v36  ;;  %v1973_v12 = vmul.f32 %v1685_v53, %v20201_v40  ;;  %v20259_v58 = vmul.f32 0.5, %v20210_v2  ;;  %v1194_v46 = vmul.f32 0.70710677, %v20245_v11  ;;  %11430 = vmatpush1.bf16.msra.mxu0 %v16325_v23  ;;  %v16336_v62 = vld [vmem:[#allocation5 + $0x1bc] ss:$24 sps:$4 sm:$0xff]  }
 0x2ab   : > { %v17977_v33 = vpop.eup %17976  ;;  %v20265_v25 = vpack.c.bf16 %v1985_v0, %v1961_v45  ;;  %v1997_v4 = vmul.f32 %v1709_v59, %v20203_v48  ;;  %17990 = verf.f32 %v1181_v10  ;;  %v1218_v40 = vmul.f32 0.70710677, %v20252_v44  ;;  %v20270_v2 = vld [vmem:[%s18582_s14 + $0x8f8] sm:$0xff]  ;;  %11431 = vmatprep.subr.bf16.mxu0 %v16333_v22  ;;  %v20274_v45 = vld [vmem:[%s18582_s14 + $0x7d0] sm:$0xff] }
 0x2ac   : > { %v17979_v16 = vpop.eup %17978  ;;  %v1722_v43 = vadd.f32 1.0, %v17977_v33  ;;  %v881_v1 = vmul.f32 0.5, %v20213_v31  ;;  %v16334_v5 = vld [vmem:[#allocation5 + $0x1b8] ss:$24 sps:$4 sm:$0xff]   ;;  %v16339_v17 = vld [vmem:[#allocation5 + $0x1c4] ss:$24 sps:$4 sm:$0xff]   ;;  %17992 = verf.f32 %v1194_v46  ;;  %10316 = vmatpush1.bf16.msra.mxu1 %v16328_v29 }
 0x2ad   : > { %9711 = vmatmul.mubr.bf16.gmra.mrb[12].mxu1 %v20265_v25  ;;  %v20277_v48 = vpack.c.bf16 %v1997_v4, %v1973_v12  ;;  %v1746_v23 = vadd.f32 1.0, %v17979_v16  ;;  %17994 = verf.f32 %v1218_v40  ;;  %v1206_v53 = vmul.f32 0.70710677, %v20263_v3  ;;  %v20281_v0 = vld [vmem:[%s18582_s14 + $0x890] sm:$0xff]  ;;  %10317 = vmatprep.subr.bf16.mxu1 %v16336_v62  ;;  %v16342_v16 = vld [vmem:[#allocation5 + $0x1ec] ss:$24 sps:$4 sm:$0xff]  }
 0x2ae   : > { %v17981_v59 = vpop.eup %17980  ;;  %v2010_v31 = vmul.f32 %v1722_v43, %v20220_v13  ;;  %v869_v22 = vmul.f32 0.5, %v20226_v51  ;;  %v1230_v10 = vmul.f32 0.70710677, %v20270_v2  ;;  %v20287_v46 = vld [vmem:[%s18582_s14 + $0x830] sm:$0xff]  ;;  %v1193_v40 = vmul.f32 0.70710677, %v20274_v45  ;;  %11432 = vmatpush1.bf16.msra.mxu0 %v16331_v9 }
 0x2af   : > { %22346 = vst [vmem:[#allocation126_spill] sm:$0xff] %v20277_v48  ;;  %v17983_v33 = vpop.eup %17982  ;;  %10269 = vmatmul.mubr.bf16.gmra.mrb[12].mxu0 %v20277_v48  ;;  %v2034_v12 = vmul.f32 %v1746_v23, %v20223_v26  ;;  %v1734_v4 = vadd.f32 1.0, %v17981_v59  ;;  %17996 = verf.f32 %v1206_v53  ;;  %v16337_v51 = vld [vmem:[#allocation5 + $0x1c0] ss:$24 sps:$4 sm:$0xff]   ;;  %v1217_v29 = vmul.f32 0.70710677, %v20281_v0  ;;  %11433 = vmatprep.subr.bf16.mxu0 %v16339_v17 }
 0x2b0   : > { %v1758_v13 = vadd.f32 1.0, %v17983_v33  ;;  %17998 = verf.f32 %v1230_v10  ;;  %v20294_v43 = vld [vmem:[%s18582_s14 + $0x8f0] sm:$0xff]  ;;  %v893_v26 = vmul.f32 0.5, %v20238_v60  ;;  %10318 = vmatpush1.bf16.msra.mxu1 %v16334_v5  ;;  %v1205_v59 = vmul.f32 0.70710677, %v20287_v46 }
 0x2b1   : > { %v17985_v36 = vpop.eup %17984  ;;  %v20296_v7 = vpack.c.bf16 %v2034_v12, %v2010_v31  ;;  %v2022_v48 = vmul.f32 %v1734_v4, %v20235_v55  ;;  %18000 = verf.f32 %v1193_v40  ;;  %v16345_v62 = vld [vmem:[#allocation5 + $0x1f4] ss:$24 sps:$4 sm:$0xff]   ;;  %v16340_v10 = vld [vmem:[#allocation5 + $0x1e8] ss:$24 sps:$4 sm:$0xff]   ;;  %v1229_v55 = vmul.f32 0.70710677, %v20294_v43  ;;  %10319 = vmatprep.subr.bf16.mxu1 %v16342_v16 }
 0x2b2   : > { %v17987_v23 = vpop.eup %17986  ;;  %v2046_v53 = vmul.f32 %v1758_v13, %v20241_v19  ;;  %v1721_v9 = vadd.f32 1.0, %v17985_v36  ;;  %18002 = verf.f32 %v1217_v29  ;;  %v16348_v60 = vld [vmem:[#allocation5 + $0x21c] ss:$24 sps:$4 sm:$0xff]   ;;  %11434 = vmatpush1.bf16.msra.mxu0 %v16337_v51  ;;  %v16343_v19 = vld [vmem:[#allocation5 + $0x1f0] ss:$24 sps:$4 sm:$0xff]   ;;  %v906_v40 = vmul.f32 0.5, %v20245_v11 }
 0x2b3   : > { %v17989_v33 = vpop.eup %17988  ;;  %9720 = vmatprep.mubr.bf16.mxu1 %v20296_v7  ;;  %v1745_v31 = vadd.f32 1.0, %v17987_v23  ;;  %18004 = verf.f32 %v1205_v59  ;;  %11435 = vmatprep.subr.bf16.mxu0 %v16345_v62  ;;  %v16351_v13 = vld [vmem:[#allocation5 + $0x224] ss:$24 sps:$4 sm:$0xff]   ;;  %v918_v62 = vmul.f32 0.5, %v20263_v3 }
 0x2b4   : > { %v20304_v17 = vpack.c.bf16 %v2046_v53, %v2022_v48  ;;  %v2009_v12 = vmul.f32 %v1721_v9, %v20259_v58  ;;  %v1733_v4 = vadd.f32 1.0, %v17989_v33  ;;  %18006 = verf.f32 %v1229_v55  ;;  %10320 = vmatpush1.bf16.msra.mxu1 %v16340_v10  ;;  %v16346_v58 = vld [vmem:[#allocation5 + $0x218] ss:$24 sps:$4 sm:$0xff]  }
 0x2b5   : > { %v17991_v36 = vpop.eup %17990  ;;  %v2033_v5 = vmul.f32 %v1745_v31, %v881_v1  ;;  %v930_v48 = vmul.f32 0.5, %v20252_v44  ;;  %10321 = vmatprep.subr.bf16.mxu1 %v16348_v60  ;;  %v16354_v1 = vld [vmem:[#allocation5 + $0x24c] ss:$24 sps:$4 sm:$0xff]   ;;  %v16349_v44 = vld [vmem:[#allocation5 + $0x220] ss:$24 sps:$4 sm:$0xff]   ;;  %v905_v60 = vmul.f32 0.5, %v20274_v45 }
 0x2b6   : > { %v17993_v29 = vpop.eup %17992  ;;  %10278 = vmatprep.mubr.bf16.mxu0 %v20304_v17  ;;  %v1757_v16 = vadd.f32 1.0, %v17991_v36  ;;  %v2021_v23 = vmul.f32 %v1733_v4, %v869_v22  ;;  %11436 = vmatpush1.bf16.msra.mxu0 %v16343_v19  ;;  %v942_v22 = vmul.f32 0.5, %v20270_v2  ;;  %v929_v19 = vmul.f32 0.5, %v20281_v0 }
 0x2b7   : > { %v17995_v53 = vpop.eup %17994  ;;  %v20310_v51 = vpack.c.bf16 %v2033_v5, %v2009_v12  ;;  %v1770_v9 = vadd.f32 1.0, %v17993_v29  ;;  %11437 = vmatprep.subr.bf16.mxu0 %v16351_v13  ;;  %v16352_v5 = vld [vmem:[#allocation5 + $0x248] ss:$24 sps:$4 sm:$0xff]   ;;  %v917_v45 = vmul.f32 0.5, %v20287_v46 }
 0x2b8   : > { %v2045_v59 = vmul.f32 %v1757_v16, %v893_v26  ;;  %v1794_v11 = vadd.f32 1.0, %v17995_v53  ;;  %10322 = vmatpush1.bf16.msra.mxu1 %v16346_v58  ;;  %v16357_v26 = vld [vmem:[#allocation5 + $0x254] ss:$24 sps:$4 sm:$0xff]   ;;  %v16355_v58 = vld [vmem:[#allocation5 + $0x250] ss:$24 sps:$4 sm:$0xff]  }
 0x2b9   : > { %v17997_v33 = vpop.eup %17996  ;;  %9721 = vmatmul.mubr.bf16.gmra.mrb[16].mxu1 %v20310_v51  ;;  %v2058_v31 = vmul.f32 %v1770_v9, %v906_v40  ;;  %10323 = vmatprep.subr.bf16.mxu1 %v16354_v1  ;;  %v16360_v16 = vld [vmem:[#allocation5 + $0x27c] ss:$24 sps:$4 sm:$0xff]   ;;  %v941_v9 = vmul.f32 0.5, %v20294_v43  ;;  %v16361_v46 = vld [vmem:[#allocation5 + $0x280] ss:$24 sps:$4 sm:$0xff]  }
 0x2ba   : > { %v17999_v10 = vpop.eup %17998  ;;  %v20315_v55 = vpack.c.bf16 %v2045_v59, %v2021_v23  ;;  %v2082_v12 = vmul.f32 %v1794_v11, %v930_v48  ;;  %v1782_v4 = vadd.f32 1.0, %v17997_v33  ;;  %11438 = vmatpush1.bf16.msra.mxu0 %v16349_v44  ;;  %v16363_v1 = vld [vmem:[#allocation5 + $0x284] ss:$24 sps:$4 sm:$0xff]  }
 0x2bb   : > { %v18001_v36 = vpop.eup %18000  ;;  %v1806_v3 = vadd.f32 1.0, %v17999_v10  ;;  %11439 = vmatprep.subr.bf16.mxu0 %v16357_v26  ;;  %v16364_v26 = vld [vmem:[#allocation5 + $0x2a8] ss:$24 sps:$4 sm:$0xff]  }
 0x2bc   : > { %v18003_v40 = vpop.eup %18002  ;;  %10279 = vmatmul.mubr.bf16.gmra.mrb[16].mxu0 %v20315_v55  ;;  %v20320_v2 = vpack.c.bf16 %v2082_v12, %v2058_v31  ;;  %v2070_v13 = vmul.f32 %v1782_v4, %v918_v62  ;;  %v1769_v29 = vadd.f32 1.0, %v18001_v36  ;;  %10324 = vmatpush1.bf16.msra.mxu1 %v16352_v5  ;;  %v16366_v12 = vld [vmem:[#allocation5 + $0x2ac] ss:$24 sps:$4 sm:$0xff]   ;;  %v16367_v36 = vld [vmem:[#allocation5 + $0x2b0] ss:$24 sps:$4 sm:$0xff]  }
 0x2bd   : > { %v2094_v23 = vmul.f32 %v1806_v3, %v942_v22  ;;  %v1793_v48 = vadd.f32 1.0, %v18003_v40  ;;  %v18005_v53 = vpop.eup %18004  ;;  %v16358_v22 = vld [vmem:[#allocation5 + $0x278] ss:$24 sps:$4 sm:$0xff]   ;;  %10325 = vmatprep.subr.bf16.mxu1 %v16360_v16  ;;  %v16369_v4 = vld [vmem:[#allocation5 + $0x2b4] ss:$24 sps:$4 sm:$0xff]  }
 0x2be   : > { %9730 = vmatprep.mubr.bf16.mxu1 %v20320_v2  ;;  %v2057_v0 = vmul.f32 %v1769_v29, %v905_v60  ;;  %v18007_v59 = vpop.eup %18006  ;;  %v1781_v33 = vadd.f32 1.0, %v18005_v53  ;;  %11440 = vmatpush1.bf16.msra.mxu0 %v16355_v58  ;;  %v16372_v3 = vld [vmem:[#allocation5 + $0x2dc] ss:$24 sps:$4 sm:$0xff]   ;;  %v16370_v5 = vld [vmem:[#allocation5 + $0x2d8] ss:$24 sps:$4 sm:$0xff]  }
 0x2bf   : > { %v20325_v11 = vpack.c.bf16 %v2094_v23, %v2070_v13  ;;  %v2081_v62 = vmul.f32 %v1793_v48, %v929_v19  ;;  %v1805_v31 = vadd.f32 1.0, %v18007_v59  ;;  %11441 = vmatprep.subr.bf16.mxu0 %v16363_v1  ;;  %v16375_v19 = vld [vmem:[#allocation5 + $0x2e4] ss:$24 sps:$4 sm:$0xff]   ;;  %v16373_v40 = vld [vmem:[#allocation5 + $0x2e0] ss:$24 sps:$4 sm:$0xff]  }
 0x2c0   : > { %v2069_v10 = vmul.f32 %v1781_v33, %v917_v45  ;;  %10326 = vmatpush1.bf16.msra.mxu1 %v16358_v22  ;;  %v16378_v13 = vld [vmem:[#allocation5 + $0x30c] ss:$24 sps:$4 sm:$0xff]   ;;  %v16376_v16 = vld [vmem:[#allocation5 + $0x308] ss:$24 sps:$4 sm:$0xff]   ;;  %v16384_v48 = vld [vmem:[#allocation5 + $0x33c] ss:$24 sps:$4 sm:$0xff]  }
 0x2c1   : > { %10288 = vmatprep.mubr.bf16.mxu0 %v20325_v11  ;;  %v20328_v44 = vpack.c.bf16 %v2081_v62, %v2057_v0  ;;  %v2093_v43 = vmul.f32 %v1805_v31, %v941_v9  ;;  %10327 = vmatprep.subr.bf16.mxu1 %v16366_v12  ;;  %v16381_v29 = vld [vmem:[#allocation5 + $0x314] ss:$24 sps:$4 sm:$0xff]   ;;  %v16379_v23 = vld [vmem:[#allocation5 + $0x310] ss:$24 sps:$4 sm:$0xff]   ;;  %v16387_v45 = vld [vmem:[#allocation5 + $0x344] ss:$24 sps:$4 sm:$0xff]  }
 0x2c2   : > { %11442 = vmatpush1.bf16.msra.mxu0 %v16361_v46  ;;  %v16385_v58 = vld [vmem:[#allocation5 + $0x340] ss:$24 sps:$4 sm:$0xff]   ;;  %v16390_v53 = vld [vmem:[#allocation5 + $0x36c] ss:$24 sps:$4 sm:$0xff]   ;;  %v16391_v1 = vld [vmem:[#allocation5 + $0x370] ss:$24 sps:$4 sm:$0xff]  }
 0x2c3   : > { %9731 = vmatmul.mubr.bf16.gmra.mrb[20].mxu1 %v20328_v44  ;;  %v20331_v60 = vpack.c.bf16 %v2093_v43, %v2069_v10  ;;  %11443 = vmatprep.subr.bf16.mxu0 %v16369_v4  ;;  %v16393_v0 = vld [vmem:[#allocation5 + $0x374] ss:$24 sps:$4 sm:$0xff]   ;;  %v16388_v9 = vld [vmem:[#allocation5 + $0x368] ss:$24 sps:$4 sm:$0xff]   ;;  %v16399_v62 = vld [vmem:[#allocation5 + $0x3a4] ss:$24 sps:$4 sm:$0xff]  }
 0x2c4   : > { %10331 = vmatprep.mubr.bf16.mxu1 %v18618_v35  ;;  %10328 = vmatpush1.bf16.msra.mxu1 %v16364_v26  ;;  %v16396_v59 = vld [vmem:[#allocation5 + $0x39c] ss:$24 sps:$4 sm:$0xff]   ;;  %v16397_v33 = vld [vmem:[#allocation5 + $0x3a0] ss:$24 sps:$4 sm:$0xff]   ;;  %v16402_v31 = vld [vmem:[#allocation5 + $0x3cc] ss:$24 sps:$4 sm:$0xff]  }
 0x2c5   : > { %10289 = vmatmul.mubr.bf16.gmra.mrb[20].mxu0 %v20331_v60  ;;  %10329 = vmatprep.subr.bf16.mxu1 %v16372_v3  ;;  %v16400_v22 = vld [vmem:[#allocation5 + $0x3c8] ss:$24 sps:$4 sm:$0xff]   ;;  %v16408_v10 = vld [vmem:[#allocation5 + $0x3fc] ss:$24 sps:$4 sm:$0xff]   ;;  %v16414_v4 = vld [vmem:[#allocation5 + $0x42c] ss:$24 sps:$4 sm:$0xff]  }
 0x2c6   : > { %11447 = vmatprep.mubr.bf16.mxu0 %v18618_v35  ;;  %11444 = vmatpush1.bf16.msra.mxu0 %v16367_v36  ;;  %v16382_v35 = vld [vmem:[#allocation5 + $0x338] ss:$24 sps:$4 sm:$0xff]   ;;  %v16411_v12 = vld [vmem:[#allocation5 + $0x404] ss:$24 sps:$4 sm:$0xff]   ;;  %v16412_v26 = vld [vmem:[#allocation5 + $0x428] ss:$24 sps:$4 sm:$0xff]  }
 0x2c7   : > { %11445 = vmatprep.subr.bf16.mxu0 %v16375_v19  ;;  %v16403_v46 = vld [vmem:[#allocation5 + $0x3d0] ss:$24 sps:$4 sm:$0xff]   ;;  %v16409_v43 = vld [vmem:[#allocation5 + $0x400] ss:$24 sps:$4 sm:$0xff]   ;;  %v16420_v3 = vld [vmem:[#allocation5 + $0x45c] ss:$24 sps:$4 sm:$0xff]  }
 0x2c8   : > { %10330 = vmatpush1.bf16.msra.mxu1 %v16370_v5  ;;  %v16415_v36 = vld [vmem:[#allocation5 + $0x430] ss:$24 sps:$4 sm:$0xff]   ;;  %v16423_v19 = vld [vmem:[#allocation5 + $0x464] ss:$24 sps:$4 sm:$0xff]   ;;  %v16421_v5 = vld [vmem:[#allocation5 + $0x460] ss:$24 sps:$4 sm:$0xff]  }
 0x2c9   : > { %10392 = vmatprep.subr.bf16.mxu1 %v16378_v13  ;;  %v16424_v13 = vld [vmem:[#allocation5 + $0x488] ss:$24 sps:$4 sm:$0xff]  }
 0x2ca   : > { %11446 = vmatpush1.bf16.msra.mxu0 %v16373_v40  ;;  %v16426_v40 = vld [vmem:[#allocation5 + $0x48c] ss:$24 sps:$4 sm:$0xff]  }
 0x2cb   : > { %11508 = vmatprep.subr.bf16.mxu0 %v16381_v29  ;;  %10332 = vmatmul.mubr.bf16.vlgmr.msra.gmra.mrb[24].mxu1 %v18629_v57  ;;  %v16427_v29 = vld [vmem:[#allocation5 + $0x490] ss:$24 sps:$4 sm:$0xff]  }
 0x2cc   : > { %10393 = vmatpush1.bf16.msra.mxu1 %v16376_v16  ;;  %10341 = vmatprep.mubr.bf16.mxu1 %v18671_v6  ;;  %v16432_v16 = vld [vmem:[#allocation5 + $0x4bc] ss:$24 sps:$4 sm:$0xff]  }
 0x2cd   : > { %11448 = vmatmul.mubr.bf16.vlgmr.msra.gmra.mrb[24].mxu0 %v18629_v57  ;;  %10394 = vmatprep.subr.bf16.mxu1 %v16384_v48  ;;  %v16394_v57 = vld [vmem:[#allocation5 + $0x398] ss:$24 sps:$4 sm:$0xff]  }
 0x2ce   : > { %11509 = vmatpush1.bf16.msra.mxu0 %v16379_v23  ;;  %11457 = vmatprep.mubr.bf16.mxu0 %v18671_v6  ;;  %v16405_v6 = vld [vmem:[#allocation5 + $0x3d4] ss:$24 sps:$4 sm:$0xff]   ;;  %v16435_v23 = vld [vmem:[#allocation5 + $0x4c4] ss:$24 sps:$4 sm:$0xff]   ;;  %v16433_v48 = vld [vmem:[#allocation5 + $0x4c0] ss:$24 sps:$4 sm:$0xff]  }
 0x2cf   : > { %11510 = vmatprep.subr.bf16.mxu0 %v16387_v45  ;;  %v16438_v45 = vld [vmem:[#allocation5 + $0x4ec] ss:$24 sps:$4 sm:$0xff]  }
 0x2d0   : > { %10395 = vmatpush1.bf16.msra.mxu1 %v16382_v35  ;;  %v16436_v35 = vld [vmem:[#allocation5 + $0x4e8] ss:$24 sps:$4 sm:$0xff]  }
 0x2d1   : > { %10396 = vmatprep.subr.bf16.mxu1 %v16390_v53  ;;  %v16444_v53 = vld [vmem:[#allocation5 + $0x51c] ss:$24 sps:$4 sm:$0xff]  }
 0x2d2   : > { %11511 = vmatpush1.bf16.msra.mxu0 %v16385_v58  ;;  %v16439_v58 = vld [vmem:[#allocation5 + $0x4f0] ss:$24 sps:$4 sm:$0xff]  }
 0x2d3   : > { %11512 = vmatprep.subr.bf16.mxu0 %v16393_v0  ;;  %10342 = vmatmul.mubr.bf16.gmra.mrb[28].mxu1 %v18687_v30  ;;  %v16447_v0 = vld [vmem:[#allocation5 + $0x524] ss:$24 sps:$4 sm:$0xff]  }
 0x2d4   : > { %10397 = vmatpush1.bf16.msra.mxu1 %v16388_v9  ;;  %10351 = vmatprep.mubr.bf16.mxu1 %v18717_v63  ;;  %v16445_v9 = vld [vmem:[#allocation5 + $0x520] ss:$24 sps:$4 sm:$0xff]  }
 0x2d5   : > { %11458 = vmatmul.mubr.bf16.gmra.mrb[28].mxu0 %v18687_v30  ;;  %10398 = vmatprep.subr.bf16.mxu1 %v16396_v59  ;;  %v16406_v30 = vld [vmem:[#allocation5 + $0x3f8] ss:$24 sps:$4 sm:$0xff]   ;;  %v16448_v59 = vld [vmem:[#allocation5 + $0x548] ss:$24 sps:$4 sm:$0xff]  }
 0x2d6   : > { %11513 = vmatpush1.bf16.msra.mxu0 %v16391_v1  ;;  %11467 = vmatprep.mubr.bf16.mxu0 %v18717_v63  ;;  %v16417_v63 = vld [vmem:[#allocation5 + $0x434] ss:$24 sps:$4 sm:$0xff]  }
 0x2d7   : > { %11514 = vmatprep.subr.bf16.mxu0 %v16399_v62  ;;  %v16450_v1 = vld [vmem:[#allocation5 + $0x54c] ss:$24 sps:$4 sm:$0xff]   ;;  %v16451_v62 = vld [vmem:[#allocation5 + $0x550] ss:$24 sps:$4 sm:$0xff]  }
 0x2d8   : > { %10399 = vmatpush1.bf16.msra.mxu1 %v16394_v57  ;;  %v16456_v57 = vld [vmem:[#allocation5 + $0x57c] ss:$24 sps:$4 sm:$0xff]  }
 0x2d9   : > { %10400 = vmatprep.subr.bf16.mxu1 %v16402_v31  ;;  %v16454_v31 = vld [vmem:[#allocation5 + $0x578] ss:$24 sps:$4 sm:$0xff]  }
 0x2da   : > { %11515 = vmatpush1.bf16.msra.mxu0 %v16397_v33  ;;  %v16459_v33 = vld [vmem:[#allocation5 + $0x584] ss:$24 sps:$4 sm:$0xff]  }
 0x2db   : > { %11516 = vmatprep.subr.bf16.mxu0 %v16405_v6  ;;  %10352 = vmatmul.mubr.bf16.gmra.mrb[32].mxu1 %v18748_v14  ;;  %v16462_v6 = vld [vmem:[#allocation5 + $0x5ac] ss:$24 sps:$4 sm:$0xff]  }
 0x2dc   : > { %10401 = vmatpush1.bf16.msra.mxu1 %v16400_v22  ;;  %10361 = vmatprep.mubr.bf16.mxu1 %v18782_v15  ;;  %v16465_v22 = vld [vmem:[#allocation5 + $0x5b4] ss:$24 sps:$4 sm:$0xff]  }
 0x2dd   : > { %11468 = vmatmul.mubr.bf16.gmra.mrb[32].mxu0 %v18748_v14  ;;  %10402 = vmatprep.subr.bf16.mxu1 %v16408_v10  ;;  %v16418_v14 = vld [vmem:[#allocation5 + $0x458] ss:$24 sps:$4 sm:$0xff]  }
 0x2de   : > { %11517 = vmatpush1.bf16.msra.mxu0 %v16403_v46  ;;  %11477 = vmatprep.mubr.bf16.mxu0 %v18782_v15  ;;  %v16429_v15 = vld [vmem:[#allocation5 + $0x494] ss:$24 sps:$4 sm:$0xff]   ;;  %v16460_v46 = vld [vmem:[#allocation5 + $0x5a8] ss:$24 sps:$4 sm:$0xff]  }
 0x2df   : > { %11518 = vmatprep.subr.bf16.mxu0 %v16411_v12  ;;  %v16463_v10 = vld [vmem:[#allocation5 + $0x5b0] ss:$24 sps:$4 sm:$0xff]   ;;  %v16471_v12 = vld [vmem:[#allocation5 + $0x5e4] ss:$24 sps:$4 sm:$0xff]  }
 0x2e0   : > { %10403 = vmatpush1.bf16.msra.mxu1 %v16406_v30  ;;  %v16466_v30 = vld [vmem:[#allocation5 + $0x5d8] ss:$24 sps:$4 sm:$0xff]  }
 0x2e1   : > { %10404 = vmatprep.subr.bf16.mxu1 %v16414_v4  ;;  %v16474_v4 = vld [vmem:[#allocation5 + $0x60c] ss:$24 sps:$4 sm:$0xff]  }
 0x2e2   : > { %11519 = vmatpush1.bf16.msra.mxu0 %v16409_v43  ;;  %v16469_v43 = vld [vmem:[#allocation5 + $0x5e0] ss:$24 sps:$4 sm:$0xff]  }
 0x2e3   : > { %11520 = vmatprep.subr.bf16.mxu0 %v16417_v63  ;;  %10362 = vmatmul.mubr.bf16.gmra.mrb[36].mxu1 %v18812_v56  ;;  %v16477_v63 = vld [vmem:[#allocation5 + $0x614] ss:$24 sps:$4 sm:$0xff]  }
 0x2e4   : > { %10405 = vmatpush1.bf16.msra.mxu1 %v16412_v26  ;;  %10371 = vmatprep.mubr.bf16.mxu1 %v18834_v37  ;;  %v16472_v26 = vld [vmem:[#allocation5 + $0x608] ss:$24 sps:$4 sm:$0xff]  }
 0x2e5   : > { %11478 = vmatmul.mubr.bf16.gmra.mrb[36].mxu0 %v18812_v56  ;;  %10406 = vmatprep.subr.bf16.mxu1 %v16420_v3  ;;  %v16430_v56 = vld [vmem:[#allocation5 + $0x4b8] ss:$24 sps:$4 sm:$0xff]   ;;  %v16480_v3 = vld [vmem:[#allocation5 + $0x63c] ss:$24 sps:$4 sm:$0xff]  }
 0x2e6   : > { %11521 = vmatpush1.bf16.msra.mxu0 %v16415_v36  ;;  %11487 = vmatprep.mubr.bf16.mxu0 %v18834_v37  ;;  %v16441_v37 = vld [vmem:[#allocation5 + $0x4f4] ss:$24 sps:$4 sm:$0xff]   ;;  %v16475_v36 = vld [vmem:[#allocation5 + $0x610] ss:$24 sps:$4 sm:$0xff]  }
 0x2e7   : > { %11522 = vmatprep.subr.bf16.mxu0 %v16423_v19  ;;  %v16483_v19 = vld [vmem:[#allocation5 + $0x644] ss:$24 sps:$4 sm:$0xff]  }
 0x2e8   : > { %10407 = vmatpush1.bf16.msra.mxu1 %v16418_v14  ;;  %v16478_v14 = vld [vmem:[#allocation5 + $0x638] ss:$24 sps:$4 sm:$0xff]  }
 0x2e9   : > { %10408 = vmatprep.subr.bf16.mxu1 %v16426_v40  ;;  %v16486_v40 = vld [vmem:[#allocation5 + $0x66c] ss:$24 sps:$4 sm:$0xff]  }
 0x2ea   : > { %11523 = vmatpush1.bf16.msra.mxu0 %v16421_v5  ;;  %v16481_v5 = vld [vmem:[#allocation5 + $0x640] ss:$24 sps:$4 sm:$0xff]  }
 0x2eb   : > { %11524 = vmatprep.subr.bf16.mxu0 %v16429_v15  ;;  %10372 = vmatmul.mubr.bf16.gmra.mrb[40].mxu1 %v18860_v8  ;;  %v16489_v15 = vld [vmem:[#allocation5 + $0x674] ss:$24 sps:$4 sm:$0xff]  }
 0x2ec   : > { %10409 = vmatpush1.bf16.msra.mxu1 %v16424_v13  ;;  %10381 = vmatprep.mubr.bf16.mxu1 %v18889_v27  ;;  %v16484_v13 = vld [vmem:[#allocation5 + $0x668] ss:$24 sps:$4 sm:$0xff]  }
 0x2ed   : > { %11488 = vmatmul.mubr.bf16.gmra.mrb[40].mxu0 %v18860_v8  ;;  %10410 = vmatprep.subr.bf16.mxu1 %v16432_v16  ;;  %v16442_v8 = vld [vmem:[#allocation5 + $0x518] ss:$24 sps:$4 sm:$0xff]   ;;  %v16492_v16 = vld [vmem:[#allocation5 + $0x69c] ss:$24 sps:$4 sm:$0xff]  }
 0x2ee   : > { %11525 = vmatpush1.bf16.msra.mxu0 %v16427_v29  ;;  %11497 = vmatprep.mubr.bf16.mxu0 %v18889_v27  ;;  %v16453_v27 = vld [vmem:[#allocation5 + $0x554] ss:$24 sps:$4 sm:$0xff]   ;;  %v16487_v29 = vld [vmem:[#allocation5 + $0x670] ss:$24 sps:$4 sm:$0xff]  }
 0x2ef   : > { %11526 = vmatprep.subr.bf16.mxu0 %v16435_v23  ;;  %v16495_v23 = vld [vmem:[#allocation5 + $0x6a4] ss:$24 sps:$4 sm:$0xff]  }
 0x2f0   : > { %10411 = vmatpush1.bf16.msra.mxu1 %v16430_v56  ;;  %v16493_v56 = vld [vmem:[#allocation5 + $0x6a0] ss:$24 sps:$4 sm:$0xff]  }
 0x2f1   : > { %10412 = vmatprep.subr.bf16.mxu1 %v16438_v45  ;;  %v16496_v45 = vld [vmem:[#allocation5 + $0x6c8] ss:$24 sps:$4 sm:$0xff]  }
 0x2f2   : > { %11527 = vmatpush1.bf16.msra.mxu0 %v16433_v48  ;;  %v16498_v48 = vld [vmem:[#allocation5 + $0x6cc] ss:$24 sps:$4 sm:$0xff]  }
 0x2f3   : > { %11528 = vmatprep.subr.bf16.mxu0 %v16441_v37  ;;  %10382 = vmatmul.mubr.bf16.gmra.mrb[44].mxu1 %v18900_v20  ;;  %v16499_v37 = vld [vmem:[#allocation5 + $0x6d0] ss:$24 sps:$4 sm:$0xff]  }
 0x2f4   : > { %10413 = vmatpush1.bf16.msra.mxu1 %v16436_v35  ;;  %10424 = vmatprep.mubr.bf16.mxu1 %v18910_v52  ;;  %v16504_v35 = vld [vmem:[#allocation5 + $0x6fc] ss:$24 sps:$4 sm:$0xff]  }
 0x2f5   : > { %11498 = vmatmul.mubr.bf16.gmra.mrb[44].mxu0 %v18900_v20  ;;  %10414 = vmatprep.subr.bf16.mxu1 %v16444_v53  ;;  %v16457_v20 = vld [vmem:[#allocation5 + $0x580] ss:$24 sps:$4 sm:$0xff]  }
 0x2f6   : > { %11529 = vmatpush1.bf16.msra.mxu0 %v16439_v58  ;;  %11540 = vmatprep.mubr.bf16.mxu0 %v18910_v52  ;;  %v16468_v52 = vld [vmem:[#allocation5 + $0x5dc] ss:$24 sps:$4 sm:$0xff]   ;;  %v16505_v53 = vld [vmem:[#allocation5 + $0x700] ss:$24 sps:$4 sm:$0xff]  }
 0x2f7   : > { %11530 = vmatprep.subr.bf16.mxu0 %v16447_v0  ;;  %v16507_v58 = vld [vmem:[#allocation5 + $0x704] ss:$24 sps:$4 sm:$0xff]  }
 0x2f8   : > { %10415 = vmatpush1.bf16.msra.mxu1 %v16442_v8  ;;  %v16510_v0 = vld [vmem:[#allocation5 + $0x72c] ss:$24 sps:$4 sm:$0xff]   ;;  %v16508_v8 = vld [vmem:[#allocation5 + $0x728] ss:$24 sps:$4 sm:$0xff]  }
 0x2f9   : > { %10416 = vmatprep.subr.bf16.mxu1 %v16450_v1  ;;  %v16516_v1 = vld [vmem:[#allocation5 + $0x75c] ss:$24 sps:$4 sm:$0xff]  }
 0x2fa   : > { %11531 = vmatpush1.bf16.msra.mxu0 %v16445_v9  ;;  %v16511_v9 = vld [vmem:[#allocation5 + $0x730] ss:$24 sps:$4 sm:$0xff]  }
 0x2fb   : > { %11532 = vmatprep.subr.bf16.mxu0 %v16453_v27  ;;  %v16519_v27 = vld [vmem:[#allocation5 + $0x764] ss:$24 sps:$4 sm:$0xff]  }
 0x2fc   : > { %10417 = vmatpush1.bf16.msra.mxu1 %v16448_v59  ;;  %v16514_v59 = vld [vmem:[#allocation5 + $0x758] ss:$24 sps:$4 sm:$0xff]  }
 0x2fd   : > { %10418 = vmatprep.subr.bf16.mxu1 %v16456_v57  ;;  %v16525_v57 = vld [vmem:[#allocation5 + $0x794] ss:$24 sps:$4 sm:$0xff]  }
 0x2fe   : > { %11533 = vmatpush1.bf16.msra.mxu0 %v16451_v62  ;;  %v16522_v62 = vld [vmem:[#allocation5 + $0x78c] ss:$24 sps:$4 sm:$0xff]  }
 0x2ff   : > { %11534 = vmatprep.subr.bf16.mxu0 %v16459_v33  ;;  %v16523_v33 = vld [vmem:[#allocation5 + $0x790] ss:$24 sps:$4 sm:$0xff]  }
 0x300   : > { %10419 = vmatpush1.bf16.msra.mxu1 %v16454_v31  ;;  %v16528_v31 = vld [vmem:[#allocation5 + $0x7bc] ss:$24 sps:$4 sm:$0xff]  }
 0x301   : > { %10420 = vmatprep.subr.bf16.mxu1 %v16462_v6  ;;  %v16529_v6 = vld [vmem:[#allocation5 + $0x7c0] ss:$24 sps:$4 sm:$0xff]  }
 0x302   : > { %11535 = vmatpush1.bf16.msra.mxu0 %v16457_v20  ;;  %v16531_v20 = vld [vmem:[#allocation5 + $0x7c4] ss:$24 sps:$4 sm:$0xff]  }
 0x303   : > { %11536 = vmatprep.subr.bf16.mxu0 %v16465_v22  ;;  %v16534_v22 = vld [vmem:[#allocation5 + $0x7ec] ss:$24 sps:$4 sm:$0xff]  }
 0x304   : > { %10421 = vmatpush1.bf16.msra.mxu1 %v16460_v46  ;;  %v16532_v46 = vld [vmem:[#allocation5 + $0x7e8] ss:$24 sps:$4 sm:$0xff]  }
 0x305   : > { %10422 = vmatprep.subr.bf16.mxu1 %v16468_v52  ;;  %v16540_v52 = vld [vmem:[#allocation5 + $0x81c] ss:$24 sps:$4 sm:$0xff]  }
 0x306   : > { %11537 = vmatpush1.bf16.msra.mxu0 %v16463_v10  ;;  %v16535_v10 = vld [vmem:[#allocation5 + $0x7f0] ss:$24 sps:$4 sm:$0xff]  }
 0x307   : > { %11538 = vmatprep.subr.bf16.mxu0 %v16471_v12  ;;  %v16543_v12 = vld [vmem:[#allocation5 + $0x824] ss:$24 sps:$4 sm:$0xff]  }
 0x308   : > { %10423 = vmatpush1.bf16.msra.mxu1 %v16466_v30  ;;  %v16541_v30 = vld [vmem:[#allocation5 + $0x820] ss:$24 sps:$4 sm:$0xff]  }
 0x309   : > { %10485 = vmatprep.subr.bf16.mxu1 %v16474_v4  ;;  %v16544_v4 = vld [vmem:[#allocation5 + $0x848] ss:$24 sps:$4 sm:$0xff]  }
 0x30a   : > { %11539 = vmatpush1.bf16.msra.mxu0 %v16469_v43  ;;  %v16546_v43 = vld [vmem:[#allocation5 + $0x84c] ss:$24 sps:$4 sm:$0xff]  }
 0x30b   : > { %11601 = vmatprep.subr.bf16.mxu0 %v16477_v63  ;;  %10425 = vmatmul.mubr.bf16.vlgmr.msra.gmra.mrb[24].mxu1 %v18925_v54  ;;  %v16547_v63 = vld [vmem:[#allocation5 + $0x850] ss:$24 sps:$4 sm:$0xff]  }
 0x30c   : > { %10486 = vmatpush1.bf16.msra.mxu1 %v16472_v26  ;;  %10434 = vmatprep.mubr.bf16.mxu1 %v18966_v49  ;;  %v16552_v26 = vld [vmem:[#allocation5 + $0x87c] ss:$24 sps:$4 sm:$0xff]  }
 0x30d   : > { %11541 = vmatmul.mubr.bf16.vlgmr.msra.gmra.mrb[24].mxu0 %v18925_v54  ;;  %10487 = vmatprep.subr.bf16.mxu1 %v16480_v3  ;;  %v16490_v54 = vld [vmem:[#allocation5 + $0x698] ss:$24 sps:$4 sm:$0xff]  }
 0x30e   : > { %11602 = vmatpush1.bf16.msra.mxu0 %v16475_v36  ;;  %11550 = vmatprep.mubr.bf16.mxu0 %v18966_v49  ;;  %v16501_v49 = vld [vmem:[#allocation5 + $0x6d4] ss:$24 sps:$4 sm:$0xff]   ;;  %v16555_v36 = vld [vmem:[#allocation5 + $0x884] ss:$24 sps:$4 sm:$0xff]   ;;  %v16553_v3 = vld [vmem:[#allocation5 + $0x880] ss:$24 sps:$4 sm:$0xff]  }
 0x30f   : > { %11603 = vmatprep.subr.bf16.mxu0 %v16483_v19  ;;  %v16558_v19 = vld [vmem:[#allocation5 + $0x8ac] ss:$24 sps:$4 sm:$0xff]  }
 0x310   : > { %10488 = vmatpush1.bf16.msra.mxu1 %v16478_v14  ;;  %v16561_v14 = vld [vmem:[#allocation5 + $0x8b4] ss:$24 sps:$4 sm:$0xff]  }
 0x311   : > { %10489 = vmatprep.subr.bf16.mxu1 %v16486_v40  ;;  %v16564_v40 = vld [vmem:[#allocation5 + $0x8dc] ss:$24 sps:$4 sm:$0xff]  }
 0x312   : > { %11604 = vmatpush1.bf16.msra.mxu0 %v16481_v5  ;;  %v16556_v5 = vld [vmem:[#allocation5 + $0x8a8] ss:$24 sps:$4 sm:$0xff]  }
 0x313   : > { %11605 = vmatprep.subr.bf16.mxu0 %v16489_v15  ;;  %10435 = vmatmul.mubr.bf16.gmra.mrb[28].mxu1 %v18987_v34  ;;  %v16567_v15 = vld [vmem:[#allocation5 + $0x8e4] ss:$24 sps:$4 sm:$0xff]  }
 0x314   : > { %10490 = vmatpush1.bf16.msra.mxu1 %v16484_v13  ;;  %10444 = vmatprep.mubr.bf16.mxu1 %v19010_v28  ;;  %v16562_v13 = vld [vmem:[#allocation5 + $0x8d8] ss:$24 sps:$4 sm:$0xff]  }
 0x315   : > { %11551 = vmatmul.mubr.bf16.gmra.mrb[28].mxu0 %v18987_v34  ;;  %10491 = vmatprep.subr.bf16.mxu1 %v16492_v16  ;;  %v16502_v34 = vld [vmem:[#allocation5 + $0x6f8] ss:$24 sps:$4 sm:$0xff]   ;;  %v16570_v16 = vld [vmem:[#allocation5 + $0x90c] ss:$24 sps:$4 sm:$0xff]  }
 0x316   : > { %11606 = vmatpush1.bf16.msra.mxu0 %v16487_v29  ;;  %11560 = vmatprep.mubr.bf16.mxu0 %v19010_v28  ;;  %v16513_v28 = vld [vmem:[#allocation5 + $0x734] ss:$24 sps:$4 sm:$0xff]   ;;  %v16565_v29 = vld [vmem:[#allocation5 + $0x8e0] ss:$24 sps:$4 sm:$0xff]  }
 0x317   : > { %11607 = vmatprep.subr.bf16.mxu0 %v16495_v23  ;;  %v16573_v23 = vld [vmem:[#allocation5 + $0x914] ss:$24 sps:$4 sm:$0xff]  }
 0x318   : > { %10492 = vmatpush1.bf16.msra.mxu1 %v16490_v54  ;;  %v16568_v54 = vld [vmem:[#allocation5 + $0x908] ss:$24 sps:$4 sm:$0xff]  }
 0x319   : > { %10493 = vmatprep.subr.bf16.mxu1 %v16498_v48  ;;  %v16576_v48 = vld [vmem:[#allocation5 + $0x93c] ss:$24 sps:$4 sm:$0xff]  }
 0x31a   : > { %11608 = vmatpush1.bf16.msra.mxu0 %v16493_v56  ;;  %v16571_v56 = vld [vmem:[#allocation5 + $0x910] ss:$24 sps:$4 sm:$0xff]  }
 0x31b   : > { %11609 = vmatprep.subr.bf16.mxu0 %v16501_v49  ;;  %10445 = vmatmul.mubr.bf16.gmra.mrb[32].mxu1 %v19039_v39  ;;  %v16579_v49 = vld [vmem:[#allocation5 + $0x944] ss:$24 sps:$4 sm:$0xff]  }
 0x31c   : > { %10494 = vmatpush1.bf16.msra.mxu1 %v16496_v45  ;;  %10454 = vmatprep.mubr.bf16.mxu1 %v19070_v50  ;;  %v22347_v45 = vld [vmem:[#allocation45_spill] sm:$0xff] }
 0x31d   : > { %11561 = vmatmul.mubr.bf16.gmra.mrb[32].mxu0 %v19039_v39  ;;  %10495 = vmatprep.subr.bf16.mxu1 %v16504_v35  ;;  %v16517_v39 = vld [vmem:[#allocation5 + $0x760] ss:$24 sps:$4 sm:$0xff]   ;;  %v3393_v35 = vlaneseq }
 0x31e   : > { %11610 = vmatpush1.bf16.msra.mxu0 %v16499_v37  ;;  %11570 = vmatprep.mubr.bf16.mxu0 %v19070_v50  ;;  %v16520_v50 = vld [vmem:[#allocation5 + $0x788] ss:$24 sps:$4 sm:$0xff]   ;;  %v16574_v37 = vld [vmem:[#allocation5 + $0x938] ss:$24 sps:$4 sm:$0xff]  }
 0x31f   : > { %11611 = vmatprep.subr.bf16.mxu0 %v16507_v58  ;;  %v16577_v58 = vld [vmem:[#allocation5 + $0x940] ss:$24 sps:$4 sm:$0xff]  }
 0x320   : > { %10496 = vmatpush1.bf16.msra.mxu1 %v16502_v34  ;;  %v16582_v34 = vld [vmem:[#allocation5 + $0x96c] ss:$24 sps:$4 sm:$0xff]  }
 0x321   : > { %10497 = vmatprep.subr.bf16.mxu1 %v16510_v0  ;;  %v22348_v0 = vld [vmem:[#allocation47_spill] sm:$0xff] }
 0x322   : > { %11612 = vmatpush1.bf16.msra.mxu0 %v16505_v53  ;;  %v16585_v53 = vld [vmem:[#allocation5 + $0x974] ss:$24 sps:$4 sm:$0xff]  }
 0x323   : > { %11613 = vmatprep.subr.bf16.mxu0 %v16513_v28  ;;  %10455 = vmatmul.mubr.bf16.gmra.mrb[36].mxu1 %v19092_v18  ;;  %v16580_v28 = vld [vmem:[#allocation5 + $0x968] ss:$24 sps:$4 sm:$0xff]  }
 0x324   : > { %10498 = vmatpush1.bf16.msra.mxu1 %v16508_v8  ;;  %10464 = vmatprep.mubr.bf16.mxu1 %v19123_v47  ;;  %v20388_v8 = vshrl.u32 %v3393_v35, 7  ;;  %v16610_v35 = vld [vmem:[#allocation5 + $0xa58] ss:$24 sps:$4 sm:$0xff]  }
 0x325   : > { %11571 = vmatmul.mubr.bf16.gmra.mrb[36].mxu0 %v19092_v18  ;;  %10499 = vmatprep.subr.bf16.mxu1 %v16516_v1  ;;  %v16526_v18 = vld [vmem:[#allocation5 + $0x7b8] ss:$24 sps:$4 sm:$0xff]   ;;  %v16588_v1 = vld [vmem:[#allocation5 + $0x99c] ss:$24 sps:$4 sm:$0xff]  }
 0x326   : > { %11614 = vmatpush1.bf16.msra.mxu0 %v16511_v9  ;;  %11580 = vmatprep.mubr.bf16.mxu0 %v19123_v47  ;;  %v16537_v47 = vld [vmem:[#allocation5 + $0x7f4] ss:$24 sps:$4 sm:$0xff]   ;;  %v16583_v9 = vld [vmem:[#allocation5 + $0x970] ss:$24 sps:$4 sm:$0xff]  }
 0x327   : > { %11615 = vmatprep.subr.bf16.mxu0 %v16519_v27  ;;  %v16591_v27 = vld [vmem:[#allocation5 + $0x9a4] ss:$24 sps:$4 sm:$0xff]  }
 0x328   : > { %10500 = vmatpush1.bf16.msra.mxu1 %v16514_v59  ;;  %v22349_v59 = vld [vmem:[#allocation49_spill] sm:$0xff] }
 0x329   : > { %10501 = vmatprep.subr.bf16.mxu1 %v16522_v62  ;;  %v16589_v62 = vld [vmem:[#allocation5 + $0x9a0] ss:$24 sps:$4 sm:$0xff]  }
 0x32a   : > { %11616 = vmatpush1.bf16.msra.mxu0 %v16517_v39  ;;  %v16586_v39 = vld [vmem:[#allocation5 + $0x998] ss:$24 sps:$4 sm:$0xff]  }
 0x32b   : > { %11617 = vmatprep.subr.bf16.mxu0 %v16525_v57  ;;  %10465 = vmatmul.mubr.bf16.gmra.mrb[40].mxu1 %v19146_v42  ;;  %v20392_v57 = vsub.s32 0, %v20388_v8 }
 0x32c   : > { %10502 = vmatpush1.bf16.msra.mxu1 %v16520_v50  ;;  %10474 = vmatprep.mubr.bf16.mxu1 %v19174_v32  ;;  %v16594_v50 = vld [vmem:[#allocation5 + $0x9cc] ss:$24 sps:$4 sm:$0xff]  }
 0x32d   : > { %11581 = vmatmul.mubr.bf16.gmra.mrb[40].mxu0 %v19146_v42  ;;  %10503 = vmatprep.subr.bf16.mxu1 %v16528_v31  ;;  %v16538_v42 = vld [vmem:[#allocation5 + $0x818] ss:$24 sps:$4 sm:$0xff]   ;;  %v20396_v31 = vsub.s32 1, %v20388_v8 }
 0x32e   : > { %11618 = vmatpush1.bf16.msra.mxu0 %v16523_v33  ;;  %11590 = vmatprep.mubr.bf16.mxu0 %v19174_v32  ;;  %v16549_v32 = vld [vmem:[#allocation5 + $0x854] ss:$24 sps:$4 sm:$0xff]   ;;  %v3391_v33 = vld [vmem:[#allocation7] sm:$0x3f] }
 0x32f   : > { %11619 = vmatprep.subr.bf16.mxu0 %v16531_v20  ;;  %v16597_v20 = vld [vmem:[#allocation5 + $0x9d4] ss:$24 sps:$4 sm:$0xff]  }
 0x330   : > { %10504 = vmatpush1.bf16.msra.mxu1 %v16526_v18  ;;  %v22350_v18 = vld [vmem:[#allocation51_spill] sm:$0xff] }
 0x331   : > { %10505 = vmatprep.subr.bf16.mxu1 %v16534_v22  ;;  %v20401_v22 = vrot.slane %v3391_v33, %v20392_v57 }
 0x332   : > { %11620 = vmatpush1.bf16.msra.mxu0 %v16529_v6  ;;  %v16592_v6 = vld [vmem:[#allocation5 + $0x9c8] ss:$24 sps:$4 sm:$0xff]  }
 0x333   : > { %11621 = vmatprep.subr.bf16.mxu0 %v16537_v47  ;;  %10475 = vmatmul.mubr.bf16.gmra.mrb[44].mxu1 %v19187_v61  ;;  %v16595_v47 = vld [vmem:[#allocation5 + $0x9d0] ss:$24 sps:$4 sm:$0xff]  }
 0x334   : > { %10506 = vmatpush1.bf16.msra.mxu1 %v16532_v46  ;;  %10517 = vmatprep.mubr.bf16.mxu1 %v19196_v41  ;;  %v20404_v46 = vrot.slane %v3391_v33, %v20396_v31 }
 0x335   : > { %11591 = vmatmul.mubr.bf16.gmra.mrb[44].mxu0 %v19187_v61  ;;  %10507 = vmatprep.subr.bf16.mxu1 %v16540_v52  ;;  %v16550_v61 = vld [vmem:[#allocation5 + $0x878] ss:$24 sps:$4 sm:$0xff]   ;;  %v16603_v52 = vld [vmem:[#allocation5 + $0xa04] ss:$24 sps:$4 sm:$0xff]  }
 0x336   : > { %11622 = vmatpush1.bf16.msra.mxu0 %v16535_v10  ;;  %11633 = vmatprep.mubr.bf16.mxu0 %v19196_v41  ;;  %v16559_v41 = vld [vmem:[#allocation5 + $0x8b0] ss:$24 sps:$4 sm:$0xff]   ;;  %v16600_v10 = vld [vmem:[#allocation5 + $0x9fc] ss:$24 sps:$4 sm:$0xff]  }
 0x337   : > { %11623 = vmatprep.subr.bf16.mxu0 %v16543_v12 }
 0x338   : > { %10508 = vmatpush1.bf16.msra.mxu1 %v16538_v42  ;;  %v22351_v42 = vld [vmem:[#allocation53_spill] sm:$0xff] }
 0x339   : > { %10509 = vmatprep.subr.bf16.mxu1 %v16546_v43 }
 0x33a   : > { %11624 = vmatpush1.bf16.msra.mxu0 %v16541_v30 }
 0x33b   : > { %11625 = vmatprep.subr.bf16.mxu0 %v16549_v32  ;;  %v16598_v32 = vld [vmem:[#allocation5 + $0x9f8] ss:$24 sps:$4 sm:$0xff]  }
 0x33c   : > { %10510 = vmatpush1.bf16.msra.mxu1 %v16544_v4  ;;  %v16601_v4 = vld [vmem:[#allocation5 + $0xa00] ss:$24 sps:$4 sm:$0xff]  }
 0x33d   : > { %10511 = vmatprep.subr.bf16.mxu1 %v16552_v26 }
 0x33e   : > { %11626 = vmatpush1.bf16.msra.mxu0 %v16547_v63 }
 0x33f   : > { %11627 = vmatprep.subr.bf16.mxu0 %v16555_v36 }
 0x340   : > { %10512 = vmatpush1.bf16.msra.mxu1 %v16550_v61  ;;  %v16606_v61 = vld [vmem:[#allocation5 + $0xa2c] ss:$24 sps:$4 sm:$0xff]  }
 0x341   : > { %10513 = vmatprep.subr.bf16.mxu1 %v16558_v19 }
 0x342   : > { %11628 = vmatpush1.bf16.msra.mxu0 %v16553_v3 }
 0x343   : > { %11629 = vmatprep.subr.bf16.mxu0 %v16561_v14 }
 0x344   : > { %10514 = vmatpush1.bf16.msra.mxu1 %v16556_v5 }
 0x345   : > { %10515 = vmatprep.subr.bf16.mxu1 %v16564_v40  ;;  %v22352_v40 = vld [vmem:[#allocation55_spill] sm:$0xff] }
 0x346   : > { %11630 = vmatpush1.bf16.msra.mxu0 %v16559_v41  ;;  %v16609_v41 = vld [vmem:[#allocation5 + $0xa34] ss:$24 sps:$4 sm:$0xff]  }
 0x347   : > { %11631 = vmatprep.subr.bf16.mxu0 %v16567_v15 }
 0x348   : > { %10516 = vmatpush1.bf16.msra.mxu1 %v16562_v13 }
 0x349   : > { %10578 = vmatprep.subr.bf16.mxu1 %v16570_v16 }
 0x34a   : > { %11632 = vmatpush1.bf16.msra.mxu0 %v16565_v29 }
 0x34b   : > { %11694 = vmatprep.subr.bf16.mxu0 %v16573_v23  ;;  %10518 = vmatmul.mubr.bf16.vlgmr.msra.gmra.mrb[24].mxu1 %v22347_v45 }
 0x34c   : > { %10579 = vmatpush1.bf16.msra.mxu1 %v16568_v54  ;;  %10527 = vmatprep.mubr.bf16.mxu1 %v22348_v0  ;;  %v16604_v54 = vld [vmem:[#allocation5 + $0xa28] ss:$24 sps:$4 sm:$0xff]  }
 0x34d   : > { %11634 = vmatmul.mubr.bf16.vlgmr.msra.gmra.mrb[24].mxu0 %v22347_v45  ;;  %10580 = vmatprep.subr.bf16.mxu1 %v16576_v48  ;;  %v16607_v48 = vld [vmem:[#allocation5 + $0xa30] ss:$24 sps:$4 sm:$0xff]   ;;  %v16615_v45 = vld [vmem:[#allocation5 + $0xa64] ss:$24 sps:$4 sm:$0xff]  }
 0x34e   : > { %11695 = vmatpush1.bf16.msra.mxu0 %v16571_v56  ;;  %11643 = vmatprep.mubr.bf16.mxu0 %v22348_v0  ;;  %v16621_v0 = vld [vmem:[#allocation5 + $0xa94] ss:$24 sps:$4 sm:$0xff]  }
 0x34f   : > { %11696 = vmatprep.subr.bf16.mxu0 %v16579_v49  ;;  %v16612_v49 = vld [vmem:[#allocation5 + $0xa5c] ss:$24 sps:$4 sm:$0xff]  }
 0x350   : > { %10581 = vmatpush1.bf16.msra.mxu1 %v16574_v37  ;;  %v22353_v37 = vld [vmem:[#allocation57_spill] sm:$0xff] }
 0x351   : > { %10582 = vmatprep.subr.bf16.mxu1 %v16582_v34  ;;  %v16618_v34 = vld [vmem:[#allocation5 + $0xa8c] ss:$24 sps:$4 sm:$0xff]  }
 0x352   : > { %11697 = vmatpush1.bf16.msra.mxu0 %v16577_v58  ;;  %v16613_v58 = vld [vmem:[#allocation5 + $0xa60] ss:$24 sps:$4 sm:$0xff]  }
 0x353   : > { %11698 = vmatprep.subr.bf16.mxu0 %v16585_v53  ;;  %10528 = vmatmul.mubr.bf16.gmra.mrb[28].mxu1 %v22349_v59 }
 0x354   : > { %10583 = vmatpush1.bf16.msra.mxu1 %v16580_v28  ;;  %10537 = vmatprep.mubr.bf16.mxu1 %v22350_v18  ;;  %v22354_v28 = vld [vmem:[#allocation59_spill] sm:$0xff] }
 0x355   : > { %11644 = vmatmul.mubr.bf16.gmra.mrb[28].mxu0 %v22349_v59  ;;  %10584 = vmatprep.subr.bf16.mxu1 %v16588_v1 }
 0x356   : > { %11699 = vmatpush1.bf16.msra.mxu0 %v16583_v9  ;;  %11653 = vmatprep.mubr.bf16.mxu0 %v22350_v18  ;;  %v16624_v18 = vld [vmem:[#allocation5 + $0xabc] ss:$24 sps:$4 sm:$0xff]  }
 0x357   : > { %11700 = vmatprep.subr.bf16.mxu0 %v16591_v27 }
 0x358   : > { %10585 = vmatpush1.bf16.msra.mxu1 %v16586_v39  ;;  %v16616_v39 = vld [vmem:[#allocation5 + $0xa88] ss:$24 sps:$4 sm:$0xff]  }
 0x359   : > { %10586 = vmatprep.subr.bf16.mxu1 %v16594_v50 }
 0x35a   : > { %11701 = vmatpush1.bf16.msra.mxu0 %v16589_v62  ;;  %v16619_v62 = vld [vmem:[#allocation5 + $0xa90] ss:$24 sps:$4 sm:$0xff]  }
 0x35b   : > { %11702 = vmatprep.subr.bf16.mxu0 %v16597_v20  ;;  %10538 = vmatmul.mubr.bf16.gmra.mrb[32].mxu1 %v22351_v42 }
 0x35c   : > { %10587 = vmatpush1.bf16.msra.mxu1 %v16592_v6  ;;  %10547 = vmatprep.mubr.bf16.mxu1 %v22352_v40 }
 0x35d   : > { %11654 = vmatmul.mubr.bf16.gmra.mrb[32].mxu0 %v22351_v42  ;;  %10588 = vmatprep.subr.bf16.mxu1 %v16600_v10 }
 0x35e   : > { %v9682_v12 = vpop.f32.mrb[0].mxu1  ;;  %11703 = vmatpush1.bf16.msra.mxu0 %v16595_v47  ;;  %11663 = vmatprep.mubr.bf16.mxu0 %v22352_v40 }
 0x35f   : > { %v14730_v30 = vadd.f32 %v9682_v12, %v20401_v22  ;;  %v9684_v43 = vpop.f32.mrb[1].mxu1  ;;  %11704 = vmatprep.subr.bf16.mxu0 %v16603_v52  ;;  %v16627_v52 = vld [vmem:[#allocation5 + $0xac4] ss:$24 sps:$4 sm:$0xff]  }
 0x360   : > { %v10240_v63 = vpop.f32.mrb[0].mxu0  ;;  %v14732_v26 = vadd.f32 %v9684_v43, %v20404_v46  ;;  %v9686_v36 = vpop.f32.mrb[2].mxu1  ;;  %10589 = vmatpush1.bf16.msra.mxu1 %v16598_v32 }
 0x361   : > { %v20410_v3 = vadd.f32 %v14730_v30, %v10240_v63  ;;  %v10242_v19 = vpop.f32.mrb[1].mxu0  ;;  %v14734_v14 = vadd.f32 %v9686_v36, %v20401_v22  ;;  %v9688_v5 = vpop.f32.mrb[3].mxu1  ;;  %10590 = vmatprep.subr.bf16.mxu1 %v16606_v61  ;;  %v22355_v30 = vld [vmem:[#allocation61_spill] sm:$0xff]  ;;  %v16630_v36 = vld [vmem:[#allocation5 + $0xaec] ss:$24 sps:$4 sm:$0xff]  }
 0x362   : > { %v20414_v15 = vadd.f32 %v14732_v26, %v10242_v19  ;;  %v10244_v13 = vpop.f32.mrb[2].mxu0  ;;  %v14736_v29 = vadd.f32 %v9688_v5, %v20404_v46  ;;  %11705 = vmatpush1.bf16.msra.mxu0 %v16601_v4  ;;  %v16622_v4 = vld [vmem:[#allocation5 + $0xab8] ss:$24 sps:$4 sm:$0xff]   ;;  %v16633_v61 = vld [vmem:[#allocation5 + $0xaf4] ss:$24 sps:$4 sm:$0xff]  }
 0x363   : > { %v20418_v16 = vadd.f32 %v14734_v14, %v10244_v13  ;;  %v10246_v23 = vpop.f32.mrb[3].mxu0  ;;  %11706 = vmatprep.subr.bf16.mxu0 %v16609_v41  ;;  %10548 = vmatmul.mubr.bf16.gmra.mrb[36].mxu1 %v22353_v37  ;;  %v16625_v26 = vld [vmem:[#allocation5 + $0xac0] ss:$24 sps:$4 sm:$0xff]   ;;  %v22356_v19 = vld [vmem:[#allocation63_spill] sm:$0xff]  ;;  %v16636_v41 = vld [vmem:[#allocation5 + $0xb1c] ss:$24 sps:$4 sm:$0xff]  }
 0x364   : > { %v20420_v56 = vadd.f32 %v14736_v29, %v10246_v23  ;;  %10591 = vmatpush1.bf16.msra.mxu1 %v16604_v54  ;;  %10557 = vmatprep.mubr.bf16.mxu1 %v22354_v28  ;;  %v16628_v14 = vld [vmem:[#allocation5 + $0xae8] ss:$24 sps:$4 sm:$0xff]   ;;  %v16639_v13 = vld [vmem:[#allocation5 + $0xb24] ss:$24 sps:$4 sm:$0xff]  }
 0x365   : > { %11664 = vmatmul.mubr.bf16.gmra.mrb[36].mxu0 %v22353_v37  ;;  %10592 = vmatprep.subr.bf16.mxu1 %v16612_v49  ;;  %v16631_v5 = vld [vmem:[#allocation5 + $0xaf0] ss:$24 sps:$4 sm:$0xff]   ;;  %v22357_v54 = vld [vmem:[#allocation65_spill] sm:$0xff] }
 0x366   : > { %11707 = vmatpush1.bf16.msra.mxu0 %v16607_v48  ;;  %11673 = vmatprep.mubr.bf16.mxu0 %v22354_v28  ;;  %v16634_v37 = vld [vmem:[#allocation5 + $0xb18] ss:$24 sps:$4 sm:$0xff]   ;;  %v16642_v28 = vld [vmem:[#allocation5 + $0xb4c] ss:$24 sps:$4 sm:$0xff]  }
 0x367   : > { %11708 = vmatprep.subr.bf16.mxu0 %v16615_v45 }
 0x368   : > { %10593 = vmatpush1.bf16.msra.mxu1 %v16610_v35  ;;  %v16637_v35 = vld [vmem:[#allocation5 + $0xb20] ss:$24 sps:$4 sm:$0xff]  }
 0x369   : > { %v9692_v53 = vpop.f32.mrb[4].mxu1  ;;  %10594 = vmatprep.subr.bf16.mxu1 %v16618_v34 }
 0x36a   : > { %v14738_v9 = vadd.f32 %v9692_v53, %v20401_v22  ;;  %v9694_v1 = vpop.f32.mrb[5].mxu1  ;;  %11709 = vmatpush1.bf16.msra.mxu0 %v16613_v58 }
 0x36b   : > { %v14740_v27 = vadd.f32 %v9694_v1, %v20404_v46  ;;  %v9696_v59 = vpop.f32.mrb[6].mxu1  ;;  %11710 = vmatprep.subr.bf16.mxu0 %v16621_v0  ;;  %10558 = vmatmul.mubr.bf16.gmra.mrb[40].mxu1 %v22355_v30 }
 0x36c   : > { %v10250_v50 = vpop.f32.mrb[4].mxu0  ;;  %v14742_v33 = vadd.f32 %v9696_v59, %v20401_v22  ;;  %v9698_v20 = vpop.f32.mrb[7].mxu1  ;;  %10595 = vmatpush1.bf16.msra.mxu1 %v16616_v39  ;;  %10567 = vmatprep.mubr.bf16.mxu1 %v22356_v19  ;;  %v16645_v59 = vld [vmem:[#allocation5 + $0xb54] ss:$24 sps:$4 sm:$0xff]  }
 0x36d   : > { %v20429_v6 = vadd.f32 %v14738_v9, %v10250_v50  ;;  %v10252_v47 = vpop.f32.mrb[5].mxu0  ;;  %v14744_v10 = vadd.f32 %v9698_v20, %v20404_v46  ;;  %11674 = vmatmul.mubr.bf16.gmra.mrb[40].mxu0 %v22355_v30  ;;  %10596 = vmatprep.subr.bf16.mxu1 %v16624_v18  ;;  %v22358_v39 = vld [vmem:[#allocation67_spill] sm:$0xff]  ;;  %v16649_v30 = vld [vmem:[#allocation5 + $0xb80] ss:$24 sps:$4 sm:$0xff]  }
 0x36e   : > { %v20432_v12 = vadd.f32 %v14740_v27, %v10252_v47  ;;  %v10254_v42 = vpop.f32.mrb[6].mxu0  ;;  %11711 = vmatpush1.bf16.msra.mxu0 %v16619_v62  ;;  %11683 = vmatprep.mubr.bf16.mxu0 %v22356_v19  ;;  %v16640_v20 = vld [vmem:[#allocation5 + $0xb48] ss:$24 sps:$4 sm:$0xff]   ;;  %v16648_v47 = vld [vmem:[#allocation5 + $0xb7c] ss:$24 sps:$4 sm:$0xff]  }
 0x36f   : > { %v20435_v43 = vadd.f32 %v14742_v33, %v10254_v42  ;;  %v10256_v32 = vpop.f32.mrb[7].mxu0  ;;  %11712 = vmatprep.subr.bf16.mxu0 %v16627_v52  ;;  %v16643_v18 = vld [vmem:[#allocation5 + $0xb50] ss:$24 sps:$4 sm:$0xff]  }
 0x370   : > { %v20438_v63 = vadd.f32 %v14744_v10, %v10256_v32  ;;  %10597 = vmatpush1.bf16.msra.mxu1 %v16622_v4  ;;  %v16651_v10 = vld [vmem:[#allocation5 + $0xb84] ss:$24 sps:$4 sm:$0xff]   ;;  %v16646_v42 = vld [vmem:[#allocation5 + $0xb78] ss:$24 sps:$4 sm:$0xff]  }
 0x371   : > { %10598 = vmatprep.subr.bf16.mxu1 %v16630_v36 }
 0x372   : > { %11713 = vmatpush1.bf16.msra.mxu0 %v16625_v26  ;;  %v16654_v26 = vld [vmem:[#allocation5 + $0xbac] ss:$24 sps:$4 sm:$0xff]  }
 0x373   : > { %11714 = vmatprep.subr.bf16.mxu0 %v16633_v61  ;;  %10568 = vmatmul.mubr.bf16.gmra.mrb[44].mxu1 %v22357_v54 }
 0x374   : > { %10599 = vmatpush1.bf16.msra.mxu1 %v16628_v14  ;;  %10610 = vmatprep.mubr.bf16.mxu1 %v22358_v39  ;;  %v16657_v14 = vld [vmem:[#allocation5 + $0xbb4] ss:$24 sps:$4 sm:$0xff]  }
 0x375   : > { %v9702_v40 = vpop.f32.mrb[8].mxu1  ;;  %11684 = vmatmul.mubr.bf16.gmra.mrb[44].mxu0 %v22357_v54  ;;  %10600 = vmatprep.subr.bf16.mxu1 %v16636_v41 }
 0x376   : > { %v14746_v29 = vadd.f32 %v9702_v40, %v20401_v22  ;;  %v9704_v23 = vpop.f32.mrb[9].mxu1  ;;  %11715 = vmatpush1.bf16.msra.mxu0 %v16631_v5  ;;  %11726 = vmatprep.mubr.bf16.mxu0 %v22358_v39 }
 0x377   : > { %v14748_v49 = vadd.f32 %v9704_v23, %v20404_v46  ;;  %v9706_v45 = vpop.f32.mrb[10].mxu1  ;;  %11716 = vmatprep.subr.bf16.mxu0 %v16639_v13 }
 0x378   : > { %v10260_v48 = vpop.f32.mrb[8].mxu0  ;;  %v14750_v53 = vadd.f32 %v9706_v45, %v20401_v22  ;;  %v9708_v0 = vpop.f32.mrb[11].mxu1  ;;  %10601 = vmatpush1.bf16.msra.mxu1 %v16634_v37 }
 0x379   : > { %v20446_v58 = vadd.f32 %v14746_v29, %v10260_v48  ;;  %v10262_v34 = vpop.f32.mrb[9].mxu0  ;;  %v14752_v27 = vadd.f32 %v9708_v0, %v20404_v46  ;;  %10602 = vmatprep.subr.bf16.mxu1 %v16642_v28  ;;  %v16652_v29 = vld [vmem:[#allocation5 + $0xba8] ss:$24 sps:$4 sm:$0xff]   ;;  %v16658_v0 = vld [vmem:[#allocation5 + $0xbd8] ss:$24 sps:$4 sm:$0xff]  }
 0x37a   : > { %v20449_v9 = vadd.f32 %v14748_v49, %v10262_v34  ;;  %v10264_v1 = vpop.f32.mrb[10].mxu0  ;;  %11717 = vmatpush1.bf16.msra.mxu0 %v16637_v35  ;;  %v16655_v49 = vld [vmem:[#allocation5 + $0xbb0] ss:$24 sps:$4 sm:$0xff]   ;;  %v16660_v35 = vld [vmem:[#allocation5 + $0xbdc] ss:$24 sps:$4 sm:$0xff]  }
 0x37b   : > { %v20453_v62 = vadd.f32 %v14750_v53, %v10264_v1  ;;  %v10266_v50 = vpop.f32.mrb[11].mxu0  ;;  %11718 = vmatprep.subr.bf16.mxu0 %v16645_v59  ;;  %v16663_v53 = vld [vmem:[#allocation5 + $0xbe4] ss:$24 sps:$4 sm:$0xff]   ;;  %v16661_v28 = vld [vmem:[#allocation5 + $0xbe0] ss:$24 sps:$4 sm:$0xff]  }
 0x37c   : > { %v20456_v33 = vadd.f32 %v14752_v27, %v10266_v50  ;;  %10603 = vmatpush1.bf16.msra.mxu1 %v16640_v20  ;;  %v16666_v1 = vld [vmem:[#allocation5 + $0xc0c] ss:$24 sps:$4 sm:$0xff]   ;;  %v16664_v59 = vld [vmem:[#allocation5 + $0xc08] ss:$24 sps:$4 sm:$0xff]  }
 0x37d   : > { %10604 = vmatprep.subr.bf16.mxu1 %v16648_v47  ;;  %v16669_v27 = vld [vmem:[#allocation5 + $0xc14] ss:$24 sps:$4 sm:$0xff]   ;;  %v16667_v50 = vld [vmem:[#allocation5 + $0xc10] ss:$24 sps:$4 sm:$0xff]  }
 0x37e   : > { %11719 = vmatpush1.bf16.msra.mxu0 %v16643_v18  ;;  %v16672_v47 = vld [vmem:[#allocation5 + $0xc3c] ss:$24 sps:$4 sm:$0xff]  }
 0x37f   : > { %11720 = vmatprep.subr.bf16.mxu0 %v16651_v10 }
 0x380   : > { %v9712_v52 = vpop.f32.mrb[12].mxu1  ;;  %10605 = vmatpush1.bf16.msra.mxu1 %v16646_v42  ;;  %v16675_v42 = vld [vmem:[#allocation5 + $0xc44] ss:$24 sps:$4 sm:$0xff]  }
 0x381   : > { %v14754_v32 = vadd.f32 %v9712_v52, %v20401_v22  ;;  %v9714_v4 = vpop.f32.mrb[13].mxu1  ;;  %10606 = vmatprep.subr.bf16.mxu1 %v16654_v26  ;;  %v22359_v26 = vld [vmem:[#allocation69_spill] sm:$0xff] }
 0x382   : > { %v10270_v36 = vpop.f32.mrb[12].mxu0  ;;  %v14756_v61 = vadd.f32 %v9714_v4, %v20404_v46  ;;  %v9716_v19 = vpop.f32.mrb[14].mxu1  ;;  %11721 = vmatpush1.bf16.msra.mxu0 %v16649_v30 }
 0x383   : > { %v20460_v5 = vadd.f32 %v14754_v32, %v10270_v36  ;;  %v10272_v41 = vpop.f32.mrb[13].mxu0  ;;  %v14758_v40 = vadd.f32 %v9716_v19, %v20401_v22  ;;  %v9718_v13 = vpop.f32.mrb[15].mxu1  ;;  %11722 = vmatprep.subr.bf16.mxu0 %v16657_v14  ;;  %v16670_v14 = vld [vmem:[#allocation5 + $0xc38] ss:$24 sps:$4 sm:$0xff]  }
 0x384   : > { %v20463_v23 = vadd.f32 %v14756_v61, %v10272_v41  ;;  %v10274_v54 = vpop.f32.mrb[14].mxu0  ;;  %v14760_v48 = vadd.f32 %v9718_v13, %v20404_v46  ;;  %10607 = vmatpush1.bf16.msra.mxu1 %v16652_v29  ;;  %v16673_v41 = vld [vmem:[#allocation5 + $0xc40] ss:$24 sps:$4 sm:$0xff]   ;;  %v16678_v29 = vld [vmem:[#allocation5 + $0xc6c] ss:$24 sps:$4 sm:$0xff]  }
 0x385   : > { %v20466_v45 = vadd.f32 %v14758_v40, %v10274_v54  ;;  %v10276_v37 = vpop.f32.mrb[15].mxu0  ;;  %10608 = vmatprep.subr.bf16.mxu1 %v16660_v35 }
 0x386   : > { %v20468_v34 = vadd.f32 %v14760_v48, %v10276_v37  ;;  %11723 = vmatpush1.bf16.msra.mxu0 %v16655_v49  ;;  %v16681_v49 = vld [vmem:[#allocation5 + $0xc74] ss:$24 sps:$4 sm:$0xff]  }
 0x387   : > { %11724 = vmatprep.subr.bf16.mxu0 %v16663_v53  ;;  %v22360_v37 = vld [vmem:[#allocation71_spill] sm:$0xff] }
 0x388   : > { %10609 = vmatpush1.bf16.msra.mxu1 %v16658_v0  ;;  %v16676_v53 = vld [vmem:[#allocation5 + $0xc68] ss:$24 sps:$4 sm:$0xff]  }
 0x389   : > { %10671 = vmatprep.subr.bf16.mxu1 %v16666_v1  ;;  %v16679_v0 = vld [vmem:[#allocation5 + $0xc70] ss:$24 sps:$4 sm:$0xff]  }
 0x38a   : > { %11725 = vmatpush1.bf16.msra.mxu0 %v16661_v28  ;;  %v16684_v28 = vld [vmem:[#allocation5 + $0xc9c] ss:$24 sps:$4 sm:$0xff]  }
 0x38b   : > { %11787 = vmatprep.subr.bf16.mxu0 %v16669_v27  ;;  %10611 = vmatmul.mubr.bf16.vlgmr.msra.gmra.mrb[24].mxu1 %v22359_v26  ;;  %v16687_v27 = vld [vmem:[#allocation5 + $0xca4] ss:$24 sps:$4 sm:$0xff]  }
 0x38c   : > { %v9722_v39 = vpop.f32.mrb[16].mxu1  ;;  %10672 = vmatpush1.bf16.msra.mxu1 %v16664_v59  ;;  %10620 = vmatprep.mubr.bf16.mxu1 %v22360_v37 }
 0x38d   : > { %v14762_v20 = vadd.f32 %v9722_v39, %v20401_v22  ;;  %v9724_v18 = vpop.f32.mrb[17].mxu1  ;;  %11727 = vmatmul.mubr.bf16.vlgmr.msra.gmra.mrb[24].mxu0 %v22359_v26  ;;  %10673 = vmatprep.subr.bf16.mxu1 %v16672_v47 }
 0x38e   : > { %v14764_v10 = vadd.f32 %v9724_v18, %v20404_v46  ;;  %v9726_v52 = vpop.f32.mrb[18].mxu1  ;;  %11788 = vmatpush1.bf16.msra.mxu0 %v16667_v50  ;;  %11736 = vmatprep.mubr.bf16.mxu0 %v22360_v37  ;;  %v16682_v50 = vld [vmem:[#allocation5 + $0xc98] ss:$24 sps:$4 sm:$0xff]  }
 0x38f   : > { %v10280_v30 = vpop.f32.mrb[16].mxu0  ;;  %v14766_v32 = vadd.f32 %v9726_v52, %v20401_v22  ;;  %v9728_v4 = vpop.f32.mrb[19].mxu1  ;;  %11789 = vmatprep.subr.bf16.mxu0 %v16675_v42 }
 0x390   : > { %v20474_v36 = vadd.f32 %v14762_v20, %v10280_v30  ;;  %v10282_v61 = vpop.f32.mrb[17].mxu0  ;;  %v14768_v19 = vadd.f32 %v9728_v4, %v20404_v46  ;;  %10674 = vmatpush1.bf16.msra.mxu1 %v16670_v14  ;;  %v22361_v20 = vld [vmem:[#allocation73_spill] sm:$0xff]  ;;  %v22362_v14 = vld [vmem:[#allocation75_spill] sm:$0xff] }
 0x391   : > { %v20478_v40 = vadd.f32 %v14764_v10, %v10282_v61  ;;  %v10284_v13 = vpop.f32.mrb[18].mxu0  ;;  %10675 = vmatprep.subr.bf16.mxu1 %v16678_v29  ;;  %v16685_v10 = vld [vmem:[#allocation5 + $0xca0] ss:$24 sps:$4 sm:$0xff]  }
 0x392   : > { %v20480_v54 = vadd.f32 %v14766_v32, %v10284_v13  ;;  %v10286_v48 = vpop.f32.mrb[19].mxu0  ;;  %11790 = vmatpush1.bf16.msra.mxu0 %v16673_v41  ;;  %v16690_v32 = vld [vmem:[#allocation5 + $0xccc] ss:$24 sps:$4 sm:$0xff]   ;;  %v16688_v29 = vld [vmem:[#allocation5 + $0xcc8] ss:$24 sps:$4 sm:$0xff]  }
 0x393   : > { %v20483_v35 = vadd.f32 %v14768_v19, %v10286_v48  ;;  %11791 = vmatprep.subr.bf16.mxu0 %v16681_v49  ;;  %10621 = vmatmul.mubr.bf16.gmra.mrb[28].mxu1 %v22361_v20  ;;  %v16693_v19 = vld [vmem:[#allocation5 + $0xcd4] ss:$24 sps:$4 sm:$0xff]   ;;  %v16691_v49 = vld [vmem:[#allocation5 + $0xcd0] ss:$24 sps:$4 sm:$0xff]  }
 0x394   : > { %10676 = vmatpush1.bf16.msra.mxu1 %v16676_v53  ;;  %10630 = vmatprep.mubr.bf16.mxu1 %v22362_v14  ;;  %v16699_v53 = vld [vmem:[#allocation5 + $0xd04] ss:$24 sps:$4 sm:$0xff]  }
 0x395   : > { %11737 = vmatmul.mubr.bf16.gmra.mrb[28].mxu0 %v22361_v20  ;;  %10677 = vmatprep.subr.bf16.mxu1 %v16684_v28  ;;  %v22363_v28 = vld [vmem:[#allocation77_spill] sm:$0xff]  ;;  %v16703_v20 = vld [vmem:[#allocation5 + $0xd30] ss:$24 sps:$4 sm:$0xff]  }
 0x396   : > { %v9732_v1 = vpop.f32.mrb[20].mxu1  ;;  %11792 = vmatpush1.bf16.msra.mxu0 %v16679_v0  ;;  %11746 = vmatprep.mubr.bf16.mxu0 %v22362_v14  ;;  %v16694_v0 = vld [vmem:[#allocation5 + $0xcf8] ss:$24 sps:$4 sm:$0xff]   ;;  %v16720_v14 = vld [vmem:[#allocation5 + $0xdbc] ss:$24 sps:$4 sm:$0xff]  }
 0x397   : > { %v14770_v59 = vadd.f32 %v9732_v1, %v20401_v22  ;;  %v9734_v39 = vpop.f32.mrb[21].mxu1  ;;  %11793 = vmatprep.subr.bf16.mxu0 %v16687_v27  ;;  %v16697_v1 = vld [vmem:[#allocation5 + $0xd00] ss:$24 sps:$4 sm:$0xff]   ;;  %v16702_v27 = vld [vmem:[#allocation5 + $0xd2c] ss:$24 sps:$4 sm:$0xff]  }
 0x398   : > { %v14772_v18 = vadd.f32 %v9734_v39, %v20404_v46  ;;  %v9736_v47 = vpop.f32.mrb[22].mxu1  ;;  %v10290_v52 = vpop.f32.mrb[20].mxu0  ;;  %10678 = vmatpush1.bf16.msra.mxu1 %v16682_v50  ;;  %v22364_v39 = vld [vmem:[#allocation79_spill] sm:$0xff] }
 0x399   : > { %v14774_v42 = vadd.f32 %v9736_v47, %v20401_v22  ;;  %v9738_v30 = vpop.f32.mrb[23].mxu1  ;;  %v20491_v4 = vadd.f32 %v14770_v59, %v10290_v52  ;;  %v10292_v26 = vpop.f32.mrb[21].mxu0  ;;  %10679 = vmatprep.subr.bf16.mxu1 %v16690_v32  ;;  %v16705_v59 = vld [vmem:[#allocation5 + $0xd34] ss:$24 sps:$4 sm:$0xff]   ;;  %v16700_v50 = vld [vmem:[#allocation5 + $0xd28] ss:$24 sps:$4 sm:$0xff]  }
 0x39a   : > { %v14776_v61 = vadd.f32 %v9738_v30, %v20404_v46  ;;  %v20495_v41 = vadd.f32 %v14772_v18, %v10292_v26  ;;  %v10294_v13 = vpop.f32.mrb[22].mxu0  ;;  %11794 = vmatpush1.bf16.msra.mxu0 %v16685_v10  ;;  %v16696_v46 = vld [vmem:[#allocation5 + $0xcfc] ss:$24 sps:$4 sm:$0xff]   ;;  %v16706_v10 = vld [vmem:[#allocation5 + $0xd58] ss:$24 sps:$4 sm:$0xff]  }
 0x39b   : > { %v20498_v22 = vadd.f32 %v14774_v42, %v10294_v13  ;;  %v10296_v48 = vpop.f32.mrb[23].mxu0  ;;  %11795 = vmatprep.subr.bf16.mxu0 %v16693_v19  ;;  %10631 = vmatmul.mubr.bf16.gmra.mrb[32].mxu1 %v22363_v28  ;;  %v16708_v18 = vld [vmem:[#allocation5 + $0xd5c] ss:$24 sps:$4 sm:$0xff]   ;;  %v16709_v42 = vld [vmem:[#allocation5 + $0xd60] ss:$24 sps:$4 sm:$0xff]   ;;  %v22366_v26 = vld [vmem:[#allocation83_spill] sm:$0xff] }
 0x39c   : > { %v20500_v37 = vadd.f32 %v14776_v61, %v10296_v48  ;;  %10680 = vmatpush1.bf16.msra.mxu1 %v16688_v29  ;;  %10640 = vmatprep.mubr.bf16.mxu1 %v22364_v39  ;;  %v16711_v47 = vld [vmem:[#allocation5 + $0xd64] ss:$24 sps:$4 sm:$0xff]   ;;  %v16717_v32 = vld [vmem:[#allocation5 + $0xd94] ss:$24 sps:$4 sm:$0xff]   ;;  %v16712_v61 = vld [vmem:[#allocation5 + $0xd88] ss:$24 sps:$4 sm:$0xff]  }
 0x39d   : > { %11747 = vmatmul.mubr.bf16.gmra.mrb[32].mxu0 %v22363_v28  ;;  %10681 = vmatprep.subr.bf16.mxu1 %v16696_v46  ;;  %v22365_v52 = vld [vmem:[#allocation81_spill] sm:$0xff]  ;;  %v16714_v30 = vld [vmem:[#allocation5 + $0xd8c] ss:$24 sps:$4 sm:$0xff]   ;;  %v16715_v19 = vld [vmem:[#allocation5 + $0xd90] ss:$24 sps:$4 sm:$0xff]  }
 0x39e   : > { %11796 = vmatpush1.bf16.msra.mxu0 %v16691_v49  ;;  %11756 = vmatprep.mubr.bf16.mxu0 %v22364_v39  ;;  %v16723_v13 = vld [vmem:[#allocation5 + $0xdc4] ss:$24 sps:$4 sm:$0xff]   ;;  %v16718_v29 = vld [vmem:[#allocation5 + $0xdb8] ss:$24 sps:$4 sm:$0xff]   ;;  %v16724_v28 = vld [vmem:[#allocation5 + $0xde8] ss:$24 sps:$4 sm:$0xff]  }
 0x39f   : > { %11797 = vmatprep.subr.bf16.mxu0 %v16699_v53  ;;  %v22367_v48 = vld [vmem:[#allocation85_spill] sm:$0xff]  ;;  %v16726_v46 = vld [vmem:[#allocation5 + $0xdec] ss:$24 sps:$4 sm:$0xff]  }
 0x3a0   : > { %10682 = vmatpush1.bf16.msra.mxu1 %v16694_v0  ;;  %v16721_v49 = vld [vmem:[#allocation5 + $0xdc0] ss:$24 sps:$4 sm:$0xff]   ;;  %v16729_v53 = vld [vmem:[#allocation5 + $0xdf4] ss:$24 sps:$4 sm:$0xff]  }
 0x3a1   : > { %10683 = vmatprep.subr.bf16.mxu1 %v16702_v27  ;;  %v22368_v0 = vld [vmem:[#allocation87_spill] sm:$0xff]  ;;  %v16732_v27 = vld [vmem:[#allocation5 + $0xe1c] ss:$24 sps:$4 sm:$0xff]  }
 0x3a2   : > { %11798 = vmatpush1.bf16.msra.mxu0 %v16697_v1  ;;  %v16727_v1 = vld [vmem:[#allocation5 + $0xdf0] ss:$24 sps:$4 sm:$0xff]  }
 0x3a3   : > { %11799 = vmatprep.subr.bf16.mxu0 %v16705_v59  ;;  %10641 = vmatmul.mubr.bf16.gmra.mrb[36].mxu1 %v22365_v52  ;;  %v16735_v59 = vld [vmem:[#allocation5 + $0xe24] ss:$24 sps:$4 sm:$0xff]   ;;  %v16730_v39 = vld [vmem:[#allocation5 + $0xe18] ss:$24 sps:$4 sm:$0xff]  }
 0x3a4   : > { %10684 = vmatpush1.bf16.msra.mxu1 %v16700_v50  ;;  %10650 = vmatprep.mubr.bf16.mxu1 %v22366_v26  ;;  %v22369_v50 = vld [vmem:[#allocation89_spill] sm:$0xff] }
 0x3a5   : > { %11757 = vmatmul.mubr.bf16.gmra.mrb[36].mxu0 %v22365_v52  ;;  %10685 = vmatprep.subr.bf16.mxu1 %v16708_v18  ;;  %v16738_v18 = vld [vmem:[#allocation5 + $0xe4c] ss:$24 sps:$4 sm:$0xff]   ;;  %v16736_v52 = vld [vmem:[#allocation5 + $0xe48] ss:$24 sps:$4 sm:$0xff]  }
 0x3a6   : > { %11800 = vmatpush1.bf16.msra.mxu0 %v16703_v20  ;;  %11766 = vmatprep.mubr.bf16.mxu0 %v22366_v26  ;;  %v16733_v20 = vld [vmem:[#allocation5 + $0xe20] ss:$24 sps:$4 sm:$0xff]   ;;  %v16747_v26 = vld [vmem:[#allocation5 + $0xe84] ss:$24 sps:$4 sm:$0xff]  }
 0x3a7   : > { %11801 = vmatprep.subr.bf16.mxu0 %v16711_v47  ;;  %v16741_v47 = vld [vmem:[#allocation5 + $0xe54] ss:$24 sps:$4 sm:$0xff]  }
 0x3a8   : > { %10686 = vmatpush1.bf16.msra.mxu1 %v16706_v10  ;;  %v22370_v10 = vld [vmem:[#allocation91_spill] sm:$0xff] }
 0x3a9   : > { %10687 = vmatprep.subr.bf16.mxu1 %v16714_v30  ;;  %v16744_v30 = vld [vmem:[#allocation5 + $0xe7c] ss:$24 sps:$4 sm:$0xff]  }
 0x3aa   : > { %11802 = vmatpush1.bf16.msra.mxu0 %v16709_v42  ;;  %v16739_v42 = vld [vmem:[#allocation5 + $0xe50] ss:$24 sps:$4 sm:$0xff]  }
 0x3ab   : > { %11803 = vmatprep.subr.bf16.mxu0 %v16717_v32  ;;  %10651 = vmatmul.mubr.bf16.gmra.mrb[40].mxu1 %v22367_v48  ;;  %v16742_v32 = vld [vmem:[#allocation5 + $0xe78] ss:$24 sps:$4 sm:$0xff]  }
 0x3ac   : > { %10688 = vmatpush1.bf16.msra.mxu1 %v16712_v61  ;;  %10660 = vmatprep.mubr.bf16.mxu1 %v22368_v0  ;;  %v16745_v61 = vld [vmem:[#allocation5 + $0xe80] ss:$24 sps:$4 sm:$0xff]  }
 0x3ad   : > { %11767 = vmatmul.mubr.bf16.gmra.mrb[40].mxu0 %v22367_v48  ;;  %10689 = vmatprep.subr.bf16.mxu1 %v16720_v14  ;;  %v16748_v14 = vld [vmem:[#allocation5 + $0xea8] ss:$24 sps:$4 sm:$0xff]   ;;  %v16756_v48 = vld [vmem:[#allocation5 + $0xedc] ss:$24 sps:$4 sm:$0xff]  }
 0x3ae   : > { %11804 = vmatpush1.bf16.msra.mxu0 %v16715_v19  ;;  %11776 = vmatprep.mubr.bf16.mxu0 %v22368_v0  ;;  %v16750_v19 = vld [vmem:[#allocation5 + $0xeac] ss:$24 sps:$4 sm:$0xff]  }
 0x3af   : > { %11805 = vmatprep.subr.bf16.mxu0 %v16723_v13  ;;  %v16753_v13 = vld [vmem:[#allocation5 + $0xeb4] ss:$24 sps:$4 sm:$0xff]  }
 0x3b0   : > { %10690 = vmatpush1.bf16.msra.mxu1 %v16718_v29  ;;  %v16751_v29 = vld [vmem:[#allocation5 + $0xeb0] ss:$24 sps:$4 sm:$0xff]   ;;  %v16762_v0 = vld [vmem:[#allocation5 + $0xf0c] ss:$24 sps:$4 sm:$0xff]  }
 0x3b1   : > { %10691 = vmatprep.subr.bf16.mxu1 %v16726_v46  ;;  %v16759_v46 = vld [vmem:[#allocation5 + $0xee4] ss:$24 sps:$4 sm:$0xff]  }
 0x3b2   : > { %11806 = vmatpush1.bf16.msra.mxu0 %v16721_v49  ;;  %v16754_v49 = vld [vmem:[#allocation5 + $0xed8] ss:$24 sps:$4 sm:$0xff]  }
 0x3b3   : > { %11807 = vmatprep.subr.bf16.mxu0 %v16729_v53  ;;  %10661 = vmatmul.mubr.bf16.gmra.mrb[44].mxu1 %v22369_v50  ;;  %v16757_v53 = vld [vmem:[#allocation5 + $0xee0] ss:$24 sps:$4 sm:$0xff]  }
 0x3b4   : > { %10692 = vmatpush1.bf16.msra.mxu1 %v16724_v28  ;;  %10703 = vmatprep.mubr.bf16.mxu1 %v22370_v10  ;;  %v16760_v28 = vld [vmem:[#allocation5 + $0xf08] ss:$24 sps:$4 sm:$0xff]  }
 0x3b5   : > { %11777 = vmatmul.mubr.bf16.gmra.mrb[44].mxu0 %v22369_v50  ;;  %10693 = vmatprep.subr.bf16.mxu1 %v16732_v27  ;;  %v16763_v27 = vld [vmem:[#allocation5 + $0xf10] ss:$24 sps:$4 sm:$0xff]   ;;  %v16771_v50 = vld [vmem:[#allocation5 + $0xf44] ss:$24 sps:$4 sm:$0xff]  }
 0x3b6   : > { %11808 = vmatpush1.bf16.msra.mxu0 %v16727_v1  ;;  %11819 = vmatprep.mubr.bf16.mxu0 %v22370_v10  ;;  %v16765_v1 = vld [vmem:[#allocation5 + $0xf14] ss:$24 sps:$4 sm:$0xff]   ;;  %v16772_v10 = vld [vmem:[#allocation5 + $0xf68] ss:$24 sps:$4 sm:$0xff]  }
 0x3b7   : > { %11809 = vmatprep.subr.bf16.mxu0 %v16735_v59  ;;  %v16768_v59 = vld [vmem:[#allocation5 + $0xf3c] ss:$24 sps:$4 sm:$0xff]  }
 0x3b8   : > { %10694 = vmatpush1.bf16.msra.mxu1 %v16730_v39  ;;  %v16766_v39 = vld [vmem:[#allocation5 + $0xf38] ss:$24 sps:$4 sm:$0xff]  }
 0x3b9   : > { %10695 = vmatprep.subr.bf16.mxu1 %v16738_v18  ;;  %v16769_v18 = vld [vmem:[#allocation5 + $0xf40] ss:$24 sps:$4 sm:$0xff]  }
 0x3ba   : > { %11810 = vmatpush1.bf16.msra.mxu0 %v16733_v20  ;;  %v22371_v20 = vld [vmem:[#allocation93_spill] sm:$0xff] }
 0x3bb   : > { %11811 = vmatprep.subr.bf16.mxu0 %v16741_v47  ;;  %v16774_v47 = vld [vmem:[#allocation5 + $0xf6c] ss:$24 sps:$4 sm:$0xff]  }
 0x3bc   : > { %10696 = vmatpush1.bf16.msra.mxu1 %v16736_v52  ;;  %v16777_v52 = vld [vmem:[#allocation5 + $0xf74] ss:$24 sps:$4 sm:$0xff]  }
 0x3bd   : > { %10697 = vmatprep.subr.bf16.mxu1 %v16744_v30  ;;  %v16775_v30 = vld [vmem:[#allocation5 + $0xf70] ss:$24 sps:$4 sm:$0xff]  }
 0x3be   : > { %11812 = vmatpush1.bf16.msra.mxu0 %v16739_v42  ;;  %v22372_v42 = vld [vmem:[#allocation95_spill] sm:$0xff] }
 0x3bf   : > { %11813 = vmatprep.subr.bf16.mxu0 %v16747_v26  ;;  %v16778_v26 = vld [vmem:[#allocation5 + $0xf98] ss:$24 sps:$4 sm:$0xff]  }
 0x3c0   : > { %10698 = vmatpush1.bf16.msra.mxu1 %v16742_v32  ;;  %v16780_v32 = vld [vmem:[#allocation5 + $0xf9c] ss:$24 sps:$4 sm:$0xff]  }
 0x3c1   : > { %10699 = vmatprep.subr.bf16.mxu1 %v16750_v19  ;;  %v22373_v19 = vld [vmem:[#allocation97_spill] sm:$0xff] }
 0x3c2   : > { %11814 = vmatpush1.bf16.msra.mxu0 %v16745_v61  ;;  %v16783_v61 = vld [vmem:[#allocation5 + $0xfa4] ss:$24 sps:$4 sm:$0xff]  }
 0x3c3   : > { %11815 = vmatprep.subr.bf16.mxu0 %v16753_v13  ;;  %v16786_v13 = vld [vmem:[#allocation5 + $0xfcc] ss:$24 sps:$4 sm:$0xff]  }
 0x3c4   : > { %10700 = vmatpush1.bf16.msra.mxu1 %v16748_v14  ;;  %v16781_v14 = vld [vmem:[#allocation5 + $0xfa0] ss:$24 sps:$4 sm:$0xff]  }
 0x3c5   : > { %10701 = vmatprep.subr.bf16.mxu1 %v16756_v48  ;;  %v16789_v48 = vld [vmem:[#allocation5 + $0xfd4] ss:$24 sps:$4 sm:$0xff]  }
 0x3c6   : > { %11816 = vmatpush1.bf16.msra.mxu0 %v16751_v29  ;;  %v16784_v29 = vld [vmem:[#allocation5 + $0xfc8] ss:$24 sps:$4 sm:$0xff]  }
 0x3c7   : > { %11817 = vmatprep.subr.bf16.mxu0 %v16759_v46  ;;  %v16787_v46 = vld [vmem:[#allocation5 + $0xfd0] ss:$24 sps:$4 sm:$0xff]  }
 0x3c8   : > { %10702 = vmatpush1.bf16.msra.mxu1 %v16754_v49  ;;  %v22374_v49 = vld [vmem:[#allocation99_spill] sm:$0xff] }
 0x3c9   : > { %10764 = vmatprep.subr.bf16.mxu1 %v16762_v0  ;;  %v16790_v0 = vld [vmem:[#allocation5 + $0xff8] ss:$24 sps:$4 sm:$0xff]  }
 0x3ca   : > { %11818 = vmatpush1.bf16.msra.mxu0 %v16757_v53  ;;  %v16792_v53 = vld [vmem:[#allocation5 + $0xffc] ss:$24 sps:$4 sm:$0xff]  }
 0x3cb   : > { %11880 = vmatprep.subr.bf16.mxu0 %v16765_v1  ;;  %10704 = vmatmul.mubr.bf16.vlgmr.msra.gmra.mrb[24].mxu1 %v22371_v20  ;;  %v22375_v1 = vld [vmem:[#allocation101_spill] sm:$0xff] }
 0x3cc   : > { %10765 = vmatpush1.bf16.msra.mxu1 %v16760_v28  ;;  %10713 = vmatprep.mubr.bf16.mxu1 %v22372_v42  ;;  %v16795_v28 = vld [vmem:[#allocation5 + $0x1004] ss:$24 sps:$4 sm:$0xff]  }
 0x3cd   : > { %11820 = vmatmul.mubr.bf16.vlgmr.msra.gmra.mrb[24].mxu0 %v22371_v20  ;;  %10766 = vmatprep.subr.bf16.mxu1 %v16768_v59  ;;  %v16798_v59 = vld [vmem:[#allocation5 + $0x102c] ss:$24 sps:$4 sm:$0xff]  }
 0x3ce   : > { %11881 = vmatpush1.bf16.msra.mxu0 %v16763_v27  ;;  %11829 = vmatprep.mubr.bf16.mxu0 %v22372_v42  ;;  %v16793_v27 = vld [vmem:[#allocation5 + $0x1000] ss:$24 sps:$4 sm:$0xff]   ;;  %v22376_v20 = vld [vmem:[#allocation103_spill] sm:$0xff] }
 0x3cf   : > { %11882 = vmatprep.subr.bf16.mxu0 %v16771_v50  ;;  %v16801_v50 = vld [vmem:[#allocation5 + $0x1034] ss:$24 sps:$4 sm:$0xff]   ;;  %v16805_v42 = vld [vmem:[#allocation5 + $0x1060] ss:$24 sps:$4 sm:$0xff]  }
 0x3d0   : > { %10767 = vmatpush1.bf16.msra.mxu1 %v16766_v39  ;;  %v16796_v39 = vld [vmem:[#allocation5 + $0x1028] ss:$24 sps:$4 sm:$0xff]  }
 0x3d1   : > { %10768 = vmatprep.subr.bf16.mxu1 %v16774_v47  ;;  %v16804_v47 = vld [vmem:[#allocation5 + $0x105c] ss:$24 sps:$4 sm:$0xff]  }
 0x3d2   : > { %11883 = vmatpush1.bf16.msra.mxu0 %v16769_v18  ;;  %v16799_v18 = vld [vmem:[#allocation5 + $0x1030] ss:$24 sps:$4 sm:$0xff]  }
 0x3d3   : > { %11884 = vmatprep.subr.bf16.mxu0 %v16777_v52  ;;  %10714 = vmatmul.mubr.bf16.gmra.mrb[28].mxu1 %v22373_v19  ;;  %v16807_v52 = vld [vmem:[#allocation5 + $0x1064] ss:$24 sps:$4 sm:$0xff]  }
 0x3d4   : > { %10769 = vmatpush1.bf16.msra.mxu1 %v16772_v10  ;;  %10723 = vmatprep.mubr.bf16.mxu1 %v22374_v49  ;;  %v16802_v10 = vld [vmem:[#allocation5 + $0x1058] ss:$24 sps:$4 sm:$0xff]  }
 0x3d5   : > { %11830 = vmatmul.mubr.bf16.gmra.mrb[28].mxu0 %v22373_v19  ;;  %10770 = vmatprep.subr.bf16.mxu1 %v16780_v32  ;;  %v16808_v32 = vld [vmem:[#allocation5 + $0x1088] ss:$24 sps:$4 sm:$0xff]  }
 0x3d6   : > { %11885 = vmatpush1.bf16.msra.mxu0 %v16775_v30  ;;  %11839 = vmatprep.mubr.bf16.mxu0 %v22374_v49  ;;  %v16810_v30 = vld [vmem:[#allocation5 + $0x108c] ss:$24 sps:$4 sm:$0xff]   ;;  %v16811_v19 = vld [vmem:[#allocation5 + $0x1090] ss:$24 sps:$4 sm:$0xff]  }
 0x3d7   : > { %11886 = vmatprep.subr.bf16.mxu0 %v16783_v61  ;;  %v22377_v61 = vld [vmem:[#allocation106_spill] sm:$0xff] }
 0x3d8   : > { %10771 = vmatpush1.bf16.msra.mxu1 %v16778_v26  ;;  %v16813_v26 = vld [vmem:[#allocation5 + $0x1094] ss:$24 sps:$4 sm:$0xff]  }
 0x3d9   : > { %10772 = vmatprep.subr.bf16.mxu1 %v16786_v13  ;;  %v16814_v13 = vld [vmem:[#allocation5 + $0x10b8] ss:$24 sps:$4 sm:$0xff]   ;;  %v16822_v49 = vld [vmem:[#allocation5 + $0x10ec] ss:$24 sps:$4 sm:$0xff]  }
 0x3da   : > { %11887 = vmatpush1.bf16.msra.mxu0 %v16781_v14  ;;  %v16816_v14 = vld [vmem:[#allocation5 + $0x10bc] ss:$24 sps:$4 sm:$0xff]  }
 0x3db   : > { %11888 = vmatprep.subr.bf16.mxu0 %v16789_v48  ;;  %10724 = vmatmul.mubr.bf16.gmra.mrb[32].mxu1 %v22375_v1  ;;  %v16817_v48 = vld [vmem:[#allocation5 + $0x10c0] ss:$24 sps:$4 sm:$0xff]  }
 0x3dc   : > { %10773 = vmatpush1.bf16.msra.mxu1 %v16784_v29  ;;  %10733 = vmatprep.mubr.bf16.mxu1 %v22376_v20  ;;  %v16819_v29 = vld [vmem:[#allocation5 + $0x10c4] ss:$24 sps:$4 sm:$0xff]  }
 0x3dd   : > { %11840 = vmatmul.mubr.bf16.gmra.mrb[32].mxu0 %v22375_v1  ;;  %10774 = vmatprep.subr.bf16.mxu1 %v16792_v53  ;;  %v16825_v53 = vld [vmem:[#allocation5 + $0x10f4] ss:$24 sps:$4 sm:$0xff]  }
 0x3de   : > { %11889 = vmatpush1.bf16.msra.mxu0 %v16787_v46  ;;  %11849 = vmatprep.mubr.bf16.mxu0 %v22376_v20  ;;  %v16820_v46 = vld [vmem:[#allocation5 + $0x10e8] ss:$24 sps:$4 sm:$0xff]   ;;  %v16828_v1 = vld [vmem:[#allocation5 + $0x111c] ss:$24 sps:$4 sm:$0xff]   ;;  %v16834_v20 = vld [vmem:[#allocation5 + $0x114c] ss:$24 sps:$4 sm:$0xff]  }
 0x3df   : > { %11890 = vmatprep.subr.bf16.mxu0 %v16795_v28  ;;  %v16823_v28 = vld [vmem:[#allocation5 + $0x10f0] ss:$24 sps:$4 sm:$0xff]  }
 0x3e0   : > { %10775 = vmatpush1.bf16.msra.mxu1 %v16790_v0  ;;  %v22379_v0 = vld [vmem:[#allocation110_spill] sm:$0xff] }
 0x3e1   : > { %10776 = vmatprep.subr.bf16.mxu1 %v16798_v59  ;;  %v16831_v59 = vld [vmem:[#allocation5 + $0x1124] ss:$24 sps:$4 sm:$0xff]  }
 0x3e2   : > { %11891 = vmatpush1.bf16.msra.mxu0 %v16793_v27  ;;  %v16826_v27 = vld [vmem:[#allocation5 + $0x1118] ss:$24 sps:$4 sm:$0xff]  }
 0x3e3   : > { %11892 = vmatprep.subr.bf16.mxu0 %v16801_v50  ;;  %10734 = vmatmul.mubr.bf16.gmra.mrb[36].mxu1 %v19978_v21  ;;  %v16829_v50 = vld [vmem:[#allocation5 + $0x1120] ss:$24 sps:$4 sm:$0xff]  }
 0x3e4   : > { %10777 = vmatpush1.bf16.msra.mxu1 %v16796_v39  ;;  %10743 = vmatprep.mubr.bf16.mxu1 %v22377_v61  ;;  %v22380_v39 = vld [vmem:[#allocation112_spill] sm:$0xff] }
 0x3e5   : > { %11850 = vmatmul.mubr.bf16.gmra.mrb[36].mxu0 %v19978_v21  ;;  %10778 = vmatprep.subr.bf16.mxu1 %v16804_v47  ;;  %v22378_v21 = vld [vmem:[#allocation108_spill] sm:$0xff] }
 0x3e6   : > { %11893 = vmatpush1.bf16.msra.mxu0 %v16799_v18  ;;  %11859 = vmatprep.mubr.bf16.mxu0 %v22377_v61  ;;  %v16832_v18 = vld [vmem:[#allocation5 + $0x1148] ss:$24 sps:$4 sm:$0xff]   ;;  %v16837_v47 = vld [vmem:[#allocation5 + $0x1154] ss:$24 sps:$4 sm:$0xff]  }
 0x3e7   : > { %11894 = vmatprep.subr.bf16.mxu0 %v16807_v52  ;;  %v16835_v52 = vld [vmem:[#allocation5 + $0x1150] ss:$24 sps:$4 sm:$0xff]   ;;  %v16846_v61 = vld [vmem:[#allocation5 + $0x11ac] ss:$24 sps:$4 sm:$0xff]  }
 0x3e8   : > { %10779 = vmatpush1.bf16.msra.mxu1 %v16802_v10  ;;  %v22381_v10 = vld [vmem:[#allocation114_spill] sm:$0xff] }
 0x3e9   : > { %10780 = vmatprep.subr.bf16.mxu1 %v16810_v30  ;;  %v16838_v30 = vld [vmem:[#allocation5 + $0x1178] ss:$24 sps:$4 sm:$0xff]  }
 0x3ea   : > { %11895 = vmatpush1.bf16.msra.mxu0 %v16805_v42  ;;  %v16840_v42 = vld [vmem:[#allocation5 + $0x117c] ss:$24 sps:$4 sm:$0xff]  }
 0x3eb   : > { %11896 = vmatprep.subr.bf16.mxu0 %v16813_v26  ;;  %10744 = vmatmul.mubr.bf16.gmra.mrb[40].mxu1 %v22378_v21  ;;  %v16841_v26 = vld [vmem:[#allocation5 + $0x1180] ss:$24 sps:$4 sm:$0xff]  }
 0x3ec   : > { %10781 = vmatpush1.bf16.msra.mxu1 %v16808_v32  ;;  %10753 = vmatprep.mubr.bf16.mxu1 %v22379_v0  ;;  %v16843_v32 = vld [vmem:[#allocation5 + $0x1184] ss:$24 sps:$4 sm:$0xff]  }
 0x3ed   : > { %11860 = vmatmul.mubr.bf16.gmra.mrb[40].mxu0 %v22378_v21  ;;  %10782 = vmatprep.subr.bf16.mxu1 %v16816_v14  ;;  %v16849_v14 = vld [vmem:[#allocation5 + $0x11b4] ss:$24 sps:$4 sm:$0xff]   ;;  %v16850_v21 = vld [vmem:[#allocation5 + $0x11d8] ss:$24 sps:$4 sm:$0xff]  }
 0x3ee   : > { %11897 = vmatpush1.bf16.msra.mxu0 %v16811_v19  ;;  %11869 = vmatprep.mubr.bf16.mxu0 %v22379_v0  ;;  %v16844_v19 = vld [vmem:[#allocation5 + $0x11a8] ss:$24 sps:$4 sm:$0xff]   ;;  %v16861_v0 = vld [vmem:[#allocation5 + $0x1214] ss:$24 sps:$4 sm:$0xff]  }
 0x3ef   : > { %11898 = vmatprep.subr.bf16.mxu0 %v16819_v29  ;;  %v16852_v29 = vld [vmem:[#allocation5 + $0x11dc] ss:$24 sps:$4 sm:$0xff]  }
 0x3f0   : > { %10783 = vmatpush1.bf16.msra.mxu1 %v16814_v13  ;;  %v16847_v13 = vld [vmem:[#allocation5 + $0x11b0] ss:$24 sps:$4 sm:$0xff]  }
 0x3f1   : > { %10784 = vmatprep.subr.bf16.mxu1 %v16822_v49  ;;  %v16853_v49 = vld [vmem:[#allocation5 + $0x11e0] ss:$24 sps:$4 sm:$0xff]  }
 0x3f2   : > { %11899 = vmatpush1.bf16.msra.mxu0 %v16817_v48  ;;  %v16855_v48 = vld [vmem:[#allocation5 + $0x11e4] ss:$24 sps:$4 sm:$0xff]  }
 0x3f3   : > { %11900 = vmatprep.subr.bf16.mxu0 %v16825_v53  ;;  %10754 = vmatmul.mubr.bf16.gmra.mrb[44].mxu1 %v22380_v39  ;;  %v16856_v53 = vld [vmem:[#allocation5 + $0x1208] ss:$24 sps:$4 sm:$0xff]  }
 0x3f4   : > { %10785 = vmatpush1.bf16.msra.mxu1 %v16820_v46  ;;  %10796 = vmatprep.mubr.bf16.mxu1 %v22381_v10  ;;  %v16858_v46 = vld [vmem:[#allocation5 + $0x120c] ss:$24 sps:$4 sm:$0xff]  }
 0x3f5   : > { %11870 = vmatmul.mubr.bf16.gmra.mrb[44].mxu0 %v22380_v39  ;;  %10786 = vmatprep.subr.bf16.mxu1 %v16828_v1  ;;  %v16864_v1 = vld [vmem:[#allocation5 + $0x123c] ss:$24 sps:$4 sm:$0xff]  }
 0x3f6   : > { %11901 = vmatpush1.bf16.msra.mxu0 %v16823_v28  ;;  %11912 = vmatprep.mubr.bf16.mxu0 %v22381_v10  ;;  %v16859_v28 = vld [vmem:[#allocation5 + $0x1210] ss:$24 sps:$4 sm:$0xff]  }
 0x3f7   : > { %11902 = vmatprep.subr.bf16.mxu0 %v16831_v59  ;;  %v16867_v59 = vld [vmem:[#allocation5 + $0x1244] ss:$24 sps:$4 sm:$0xff]   ;;  %v22382_v39 = vld [vmem:[#allocation116_spill] sm:$0xff] }
 0x3f8   : > { %10787 = vmatpush1.bf16.msra.mxu1 %v16826_v27  ;;  %v16862_v27 = vld [vmem:[#allocation5 + $0x1238] ss:$24 sps:$4 sm:$0xff]   ;;  %v22383_v10 = vld [vmem:[#allocation118_spill] sm:$0xff] }
 0x3f9   : > { %10788 = vmatprep.subr.bf16.mxu1 %v16834_v20  ;;  %v16870_v20 = vld [vmem:[#allocation5 + $0x126c] ss:$24 sps:$4 sm:$0xff]  }
 0x3fa   : > { %11903 = vmatpush1.bf16.msra.mxu0 %v16829_v50  ;;  %v16865_v50 = vld [vmem:[#allocation5 + $0x1240] ss:$24 sps:$4 sm:$0xff]  }
 0x3fb   : > { %11904 = vmatprep.subr.bf16.mxu0 %v16837_v47  ;;  %v16873_v47 = vld [vmem:[#allocation5 + $0x1274] ss:$24 sps:$4 sm:$0xff]  }
 0x3fc   : > { %10789 = vmatpush1.bf16.msra.mxu1 %v16832_v18  ;;  %v16868_v18 = vld [vmem:[#allocation5 + $0x1268] ss:$24 sps:$4 sm:$0xff]  }
 0x3fd   : > { %10790 = vmatprep.subr.bf16.mxu1 %v16840_v42  ;;  %v16876_v42 = vld [vmem:[#allocation5 + $0x129c] ss:$24 sps:$4 sm:$0xff]  }
 0x3fe   : > { %11905 = vmatpush1.bf16.msra.mxu0 %v16835_v52  ;;  %v16871_v52 = vld [vmem:[#allocation5 + $0x1270] ss:$24 sps:$4 sm:$0xff]  }
 0x3ff   : > { %11906 = vmatprep.subr.bf16.mxu0 %v16843_v32  ;;  %v16879_v32 = vld [vmem:[#allocation5 + $0x12a4] ss:$24 sps:$4 sm:$0xff]  }
 0x400   : > { %10791 = vmatpush1.bf16.msra.mxu1 %v16838_v30  ;;  %v16874_v30 = vld [vmem:[#allocation5 + $0x1298] ss:$24 sps:$4 sm:$0xff]  }
 0x401   : > { %10792 = vmatprep.subr.bf16.mxu1 %v16846_v61  ;;  %v16877_v61 = vld [vmem:[#allocation5 + $0x12a0] ss:$24 sps:$4 sm:$0xff]  }
 0x402   : > { %11907 = vmatpush1.bf16.msra.mxu0 %v16841_v26  ;;  %v22384_v26 = vld [vmem:[#allocation120_spill] sm:$0xff] }
 0x403   : > { %11908 = vmatprep.subr.bf16.mxu0 %v16849_v14  ;;  %v16880_v14 = vld [vmem:[#allocation5 + $0x12c8] ss:$24 sps:$4 sm:$0xff]  }
 0x404   : > { %10793 = vmatpush1.bf16.msra.mxu1 %v16844_v19  ;;  %v16882_v19 = vld [vmem:[#allocation5 + $0x12cc] ss:$24 sps:$4 sm:$0xff]  }
 0x405   : > { %10794 = vmatprep.subr.bf16.mxu1 %v16852_v29  ;;  %v22385_v29 = vld [vmem:[#allocation122_spill] sm:$0xff] }
 0x406   : > { %11909 = vmatpush1.bf16.msra.mxu0 %v16847_v13  ;;  %v16885_v13 = vld [vmem:[#allocation5 + $0x12d4] ss:$24 sps:$4 sm:$0xff]  }
 0x407   : > { %11910 = vmatprep.subr.bf16.mxu0 %v16855_v48  ;;  %v16888_v48 = vld [vmem:[#allocation5 + $0x12fc] ss:$24 sps:$4 sm:$0xff]  }
 0x408   : > { %10795 = vmatpush1.bf16.msra.mxu1 %v16850_v21  ;;  %v16883_v21 = vld [vmem:[#allocation5 + $0x12d0] ss:$24 sps:$4 sm:$0xff]  }
 0x409   : > { %10857 = vmatprep.subr.bf16.mxu1 %v16858_v46  ;;  %v16891_v46 = vld [vmem:[#allocation5 + $0x1304] ss:$24 sps:$4 sm:$0xff]  }
 0x40a   : > { %11911 = vmatpush1.bf16.msra.mxu0 %v16853_v49  ;;  %v16886_v49 = vld [vmem:[#allocation5 + $0x12f8] ss:$24 sps:$4 sm:$0xff]  }
 0x40b   : > { %11973 = vmatprep.subr.bf16.mxu0 %v16861_v0  ;;  %10797 = vmatmul.mubr.bf16.vlgmr.msra.gmra.mrb[24].mxu1 %v22382_v39  ;;  %v16894_v0 = vld [vmem:[#allocation5 + $0x132c] ss:$24 sps:$4 sm:$0xff]  }
 0x40c   : > { %10858 = vmatpush1.bf16.msra.mxu1 %v16856_v53  ;;  %10806 = vmatprep.mubr.bf16.mxu1 %v22383_v10  ;;  %v16889_v53 = vld [vmem:[#allocation5 + $0x1300] ss:$24 sps:$4 sm:$0xff]  }
 0x40d   : > { %11913 = vmatmul.mubr.bf16.vlgmr.msra.gmra.mrb[24].mxu0 %v22382_v39  ;;  %10859 = vmatprep.subr.bf16.mxu1 %v16864_v1  ;;  %v16897_v1 = vld [vmem:[#allocation5 + $0x1334] ss:$24 sps:$4 sm:$0xff]   ;;  %v16898_v39 = vld [vmem:[#allocation5 + $0x1358] ss:$24 sps:$4 sm:$0xff]  }
 0x40e   : > { %11974 = vmatpush1.bf16.msra.mxu0 %v16859_v28  ;;  %11922 = vmatprep.mubr.bf16.mxu0 %v22383_v10  ;;  %v16892_v28 = vld [vmem:[#allocation5 + $0x1328] ss:$24 sps:$4 sm:$0xff]   ;;  %v16912_v10 = vld [vmem:[#allocation5 + $0x13bc] ss:$24 sps:$4 sm:$0xff]  }
 0x40f   : > { %11975 = vmatprep.subr.bf16.mxu0 %v16867_v59  ;;  %v16900_v59 = vld [vmem:[#allocation5 + $0x135c] ss:$24 sps:$4 sm:$0xff]  }
 0x410   : > { %10860 = vmatpush1.bf16.msra.mxu1 %v16862_v27  ;;  %v16895_v27 = vld [vmem:[#allocation5 + $0x1330] ss:$24 sps:$4 sm:$0xff]  }
 0x411   : > { %10861 = vmatprep.subr.bf16.mxu1 %v16870_v20  ;;  %v16906_v20 = vld [vmem:[#allocation5 + $0x138c] ss:$24 sps:$4 sm:$0xff]  }
 0x412   : > { %11976 = vmatpush1.bf16.msra.mxu0 %v16865_v50  ;;  %v16903_v50 = vld [vmem:[#allocation5 + $0x1364] ss:$24 sps:$4 sm:$0xff]  }
 0x413   : > { %11977 = vmatprep.subr.bf16.mxu0 %v16873_v47  ;;  %10807 = vmatmul.mubr.bf16.gmra.mrb[28].mxu1 %v22384_v26  ;;  %v16907_v47 = vld [vmem:[#allocation5 + $0x1390] ss:$24 sps:$4 sm:$0xff]  }
 0x414   : > { %10862 = vmatpush1.bf16.msra.mxu1 %v16868_v18  ;;  %10816 = vmatprep.mubr.bf16.mxu1 %v22385_v29  ;;  %v16904_v18 = vld [vmem:[#allocation5 + $0x1388] ss:$24 sps:$4 sm:$0xff]  }
 0x415   : > { %11923 = vmatmul.mubr.bf16.gmra.mrb[28].mxu0 %v22384_v26  ;;  %10863 = vmatprep.subr.bf16.mxu1 %v16876_v42  ;;  %v16915_v42 = vld [vmem:[#allocation5 + $0x13c4] ss:$24 sps:$4 sm:$0xff]   ;;  %v16919_v26 = vld [vmem:[#allocation5 + $0x13f0] ss:$24 sps:$4 sm:$0xff]  }
 0x416   : > { %11978 = vmatpush1.bf16.msra.mxu0 %v16871_v52  ;;  %11932 = vmatprep.mubr.bf16.mxu0 %v22385_v29  ;;  %v16910_v52 = vld [vmem:[#allocation5 + $0x13b8] ss:$24 sps:$4 sm:$0xff]   ;;  %v16928_v29 = vld [vmem:[#allocation5 + $0x1448] ss:$24 sps:$4 sm:$0xff]  }
 0x417   : > { %11979 = vmatprep.subr.bf16.mxu0 %v16879_v32  ;;  %v16916_v32 = vld [vmem:[#allocation5 + $0x13e8] ss:$24 sps:$4 sm:$0xff]  }
 0x418   : > { %10864 = vmatpush1.bf16.msra.mxu1 %v16874_v30  ;;  %v16918_v30 = vld [vmem:[#allocation5 + $0x13ec] ss:$24 sps:$4 sm:$0xff]  }
 0x419   : > { %10865 = vmatprep.subr.bf16.mxu1 %v16882_v19  ;;  %v16922_v19 = vld [vmem:[#allocation5 + $0x1418] ss:$24 sps:$4 sm:$0xff]  }
 0x41a   : > { %11980 = vmatpush1.bf16.msra.mxu0 %v16877_v61  ;;  %v16924_v61 = vld [vmem:[#allocation5 + $0x141c] ss:$24 sps:$4 sm:$0xff]  }
 0x41b   : > { %11981 = vmatprep.subr.bf16.mxu0 %v16885_v13  ;;  %10817 = vmatmul.mubr.bf16.gmra.mrb[32].mxu1 %v20206_v24  ;;  %v16930_v13 = vld [vmem:[#allocation5 + $0x144c] ss:$24 sps:$4 sm:$0xff]  }
 0x41c   : > { %10866 = vmatpush1.bf16.msra.mxu1 %v16880_v14  ;;  %10826 = vmatprep.mubr.bf16.mxu1 %v20232_v38  ;;  %v16927_v14 = vld [vmem:[#allocation5 + $0x1424] ss:$24 sps:$4 sm:$0xff]  }
 0x41d   : > { %11933 = vmatmul.mubr.bf16.gmra.mrb[32].mxu0 %v20206_v24  ;;  %10867 = vmatprep.subr.bf16.mxu1 %v16888_v48  ;;  %v16901_v24 = vld [vmem:[#allocation5 + $0x1360] ss:$24 sps:$4 sm:$0xff]   ;;  %v16931_v48 = vld [vmem:[#allocation5 + $0x1450] ss:$24 sps:$4 sm:$0xff]  }
 0x41e   : > { %11982 = vmatpush1.bf16.msra.mxu0 %v16883_v21  ;;  %11942 = vmatprep.mubr.bf16.mxu0 %v20232_v38  ;;  %v16909_v38 = vld [vmem:[#allocation5 + $0x1394] ss:$24 sps:$4 sm:$0xff]  }
 0x41f   : > { %11983 = vmatprep.subr.bf16.mxu0 %v16891_v46  ;;  %v22386_v21 = vld [vmem:[#allocation20_spill] sm:$0xff] }
 0x420   : > { %10868 = vmatpush1.bf16.msra.mxu1 %v16886_v49  ;;  %v16936_v49 = vld [vmem:[#allocation5 + $0x147c] ss:$24 sps:$4 sm:$0xff]   ;;  %v16934_v46 = vld [vmem:[#allocation5 + $0x1478] ss:$24 sps:$4 sm:$0xff]  }
 0x421   : > { %10869 = vmatprep.subr.bf16.mxu1 %v16894_v0  ;;  %v16942_v0 = vld [vmem:[#allocation5 + $0x14ac] ss:$24 sps:$4 sm:$0xff]  }
 0x422   : > { %11984 = vmatpush1.bf16.msra.mxu0 %v16889_v53  ;;  %v16939_v53 = vld [vmem:[#allocation5 + $0x1484] ss:$24 sps:$4 sm:$0xff]  }
 0x423   : > { %11985 = vmatprep.subr.bf16.mxu0 %v16897_v1  ;;  %10827 = vmatmul.mubr.bf16.gmra.mrb[36].mxu1 %v20265_v25  ;;  %v16945_v1 = vld [vmem:[#allocation5 + $0x14b4] ss:$24 sps:$4 sm:$0xff]  }
 0x424   : > { %10870 = vmatpush1.bf16.msra.mxu1 %v16892_v28  ;;  %10836 = vmatprep.mubr.bf16.mxu1 %v20296_v7  ;;  %v16940_v28 = vld [vmem:[#allocation5 + $0x14a8] ss:$24 sps:$4 sm:$0xff]  }
 0x425   : > { %11943 = vmatmul.mubr.bf16.gmra.mrb[36].mxu0 %v20265_v25  ;;  %10871 = vmatprep.subr.bf16.mxu1 %v16900_v59  ;;  %v16913_v25 = vld [vmem:[#allocation5 + $0x13c0] ss:$24 sps:$4 sm:$0xff]   ;;  %v16948_v59 = vld [vmem:[#allocation5 + $0x14dc] ss:$24 sps:$4 sm:$0xff]  }
 0x426   : > { %11986 = vmatpush1.bf16.msra.mxu0 %v16895_v27  ;;  %11952 = vmatprep.mubr.bf16.mxu0 %v20296_v7  ;;  %v16921_v7 = vld [vmem:[#allocation5 + $0x13f4] ss:$24 sps:$4 sm:$0xff]   ;;  %v16943_v27 = vld [vmem:[#allocation5 + $0x14b0] ss:$24 sps:$4 sm:$0xff]  }
 0x427   : > { %11987 = vmatprep.subr.bf16.mxu0 %v16903_v50  ;;  %v16951_v50 = vld [vmem:[#allocation5 + $0x14e4] ss:$24 sps:$4 sm:$0xff]  }
 0x428   : > { %10872 = vmatpush1.bf16.msra.mxu1 %v16898_v39  ;;  %v16946_v39 = vld [vmem:[#allocation5 + $0x14d8] ss:$24 sps:$4 sm:$0xff]  }
 0x429   : > { %10873 = vmatprep.subr.bf16.mxu1 %v16906_v20  ;;  %v16954_v20 = vld [vmem:[#allocation5 + $0x150c] ss:$24 sps:$4 sm:$0xff]  }
 0x42a   : > { %11988 = vmatpush1.bf16.msra.mxu0 %v16901_v24  ;;  %v16949_v24 = vld [vmem:[#allocation5 + $0x14e0] ss:$24 sps:$4 sm:$0xff]  }
 0x42b   : > { %11989 = vmatprep.subr.bf16.mxu0 %v16909_v38  ;;  %10837 = vmatmul.mubr.bf16.gmra.mrb[40].mxu1 %v20310_v51  ;;  %v16957_v38 = vld [vmem:[#allocation5 + $0x1514] ss:$24 sps:$4 sm:$0xff]  }
 0x42c   : > { %10874 = vmatpush1.bf16.msra.mxu1 %v16904_v18  ;;  %10846 = vmatprep.mubr.bf16.mxu1 %v20320_v2  ;;  %v16952_v18 = vld [vmem:[#allocation5 + $0x1508] ss:$24 sps:$4 sm:$0xff]  }
 0x42d   : > { %11953 = vmatmul.mubr.bf16.gmra.mrb[40].mxu0 %v20310_v51  ;;  %10875 = vmatprep.subr.bf16.mxu1 %v16912_v10  ;;  %v16925_v51 = vld [vmem:[#allocation5 + $0x1420] ss:$24 sps:$4 sm:$0xff]   ;;  %v16960_v10 = vld [vmem:[#allocation5 + $0x153c] ss:$24 sps:$4 sm:$0xff]  }
 0x42e   : > { %11990 = vmatpush1.bf16.msra.mxu0 %v16907_v47  ;;  %11962 = vmatprep.mubr.bf16.mxu0 %v20320_v2  ;;  %v16933_v2 = vld [vmem:[#allocation5 + $0x1454] ss:$24 sps:$4 sm:$0xff]   ;;  %v16955_v47 = vld [vmem:[#allocation5 + $0x1510] ss:$24 sps:$4 sm:$0xff]  }
 0x42f   : > { %11991 = vmatprep.subr.bf16.mxu0 %v16915_v42  ;;  %v16963_v42 = vld [vmem:[#allocation5 + $0x1544] ss:$24 sps:$4 sm:$0xff]  }
 0x430   : > { %10876 = vmatpush1.bf16.msra.mxu1 %v16910_v52  ;;  %v16958_v52 = vld [vmem:[#allocation5 + $0x1538] ss:$24 sps:$4 sm:$0xff]  }
 0x431   : > { %10877 = vmatprep.subr.bf16.mxu1 %v16918_v30  ;;  %v16961_v30 = vld [vmem:[#allocation5 + $0x1540] ss:$24 sps:$4 sm:$0xff]  }
 0x432   : > { %11992 = vmatpush1.bf16.msra.mxu0 %v16913_v25  ;;  %v22387_v25 = vld [vmem:[#allocation21_spill] sm:$0xff] }
 0x433   : > { %11993 = vmatprep.subr.bf16.mxu0 %v16921_v7  ;;  %10847 = vmatmul.mubr.bf16.gmra.mrb[44].mxu1 %v20328_v44  ;;  %v16964_v7 = vld [vmem:[#allocation5 + $0x1568] ss:$24 sps:$4 sm:$0xff]  }
 0x434   : > { %10878 = vmatpush1.bf16.msra.mxu1 %v16916_v32  ;;  %10889 = vmatprep.mubr.bf16.mxu1 %v22386_v21  ;;  %v16966_v32 = vld [vmem:[#allocation5 + $0x156c] ss:$24 sps:$4 sm:$0xff]  }
 0x435   : > { %11963 = vmatmul.mubr.bf16.gmra.mrb[44].mxu0 %v20328_v44  ;;  %10879 = vmatprep.subr.bf16.mxu1 %v16924_v61  ;;  %v16937_v44 = vld [vmem:[#allocation5 + $0x1480] ss:$24 sps:$4 sm:$0xff]  }
 0x436   : > { %11994 = vmatpush1.bf16.msra.mxu0 %v16919_v26  ;;  %12005 = vmatprep.mubr.bf16.mxu0 %v22386_v21  ;;  %v16969_v26 = vld [vmem:[#allocation5 + $0x1574] ss:$24 sps:$4 sm:$0xff]   ;;  %v22388_v61 = vld [vmem:[#allocation22_spill] sm:$0xff] }
 0x437   : > { %11995 = vmatprep.subr.bf16.mxu0 %v16927_v14  ;;  %v16972_v14 = vld [vmem:[#allocation5 + $0x159c] ss:$24 sps:$4 sm:$0xff]   ;;  %v16978_v21 = vld [vmem:[#allocation5 + $0x15cc] ss:$24 sps:$4 sm:$0xff]  }
 0x438   : > { %10880 = vmatpush1.bf16.msra.mxu1 %v16922_v19  ;;  %v16967_v19 = vld [vmem:[#allocation5 + $0x1570] ss:$24 sps:$4 sm:$0xff]  }
 0x439   : > { %10881 = vmatprep.subr.bf16.mxu1 %v16930_v13  ;;  %v16975_v13 = vld [vmem:[#allocation5 + $0x15a4] ss:$24 sps:$4 sm:$0xff]  }
 0x43a   : > { %11996 = vmatpush1.bf16.msra.mxu0 %v16925_v51  ;;  %v16970_v51 = vld [vmem:[#allocation5 + $0x1598] ss:$24 sps:$4 sm:$0xff]  }
 0x43b   : > { %11997 = vmatprep.subr.bf16.mxu0 %v16933_v2  ;;  %v16973_v2 = vld [vmem:[#allocation5 + $0x15a0] ss:$24 sps:$4 sm:$0xff]  }
 0x43c   : > { %10882 = vmatpush1.bf16.msra.mxu1 %v16928_v29  ;;  %v22389_v29 = vld [vmem:[#allocation23_spill] sm:$0xff] }
 0x43d   : > { %10883 = vmatprep.subr.bf16.mxu1 %v16936_v49  ;;  %v16981_v49 = vld [vmem:[#allocation5 + $0x15d4] ss:$24 sps:$4 sm:$0xff]  }
 0x43e   : > { %11998 = vmatpush1.bf16.msra.mxu0 %v16931_v48  ;;  %v16976_v48 = vld [vmem:[#allocation5 + $0x15c8] ss:$24 sps:$4 sm:$0xff]  }
 0x43f   : > { %11999 = vmatprep.subr.bf16.mxu0 %v16939_v53  ;;  %v16979_v53 = vld [vmem:[#allocation5 + $0x15d0] ss:$24 sps:$4 sm:$0xff]  }
 0x440   : > { %10884 = vmatpush1.bf16.msra.mxu1 %v16934_v46  ;;  %v22390_v46 = vld [vmem:[#allocation24_spill] sm:$0xff] }
 0x441   : > { %10885 = vmatprep.subr.bf16.mxu1 %v16942_v0  ;;  %v16982_v0 = vld [vmem:[#allocation5 + $0x15f8] ss:$24 sps:$4 sm:$0xff]  }
 0x442   : > { %12000 = vmatpush1.bf16.msra.mxu0 %v16937_v44  ;;  %v16984_v44 = vld [vmem:[#allocation5 + $0x15fc] ss:$24 sps:$4 sm:$0xff]  }
 0x443   : > { %12001 = vmatprep.subr.bf16.mxu0 %v16945_v1  ;;  %v22391_v1 = vld [vmem:[#allocation25_spill] sm:$0xff] }
 0x444   : > { %10886 = vmatpush1.bf16.msra.mxu1 %v16940_v28  ;;  %v16987_v28 = vld [vmem:[#allocation5 + $0x1604] ss:$24 sps:$4 sm:$0xff]  }
 0x445   : > { %10887 = vmatprep.subr.bf16.mxu1 %v16948_v59  ;;  %v16990_v59 = vld [vmem:[#allocation5 + $0x162c] ss:$24 sps:$4 sm:$0xff]  }
 0x446   : > { %12002 = vmatpush1.bf16.msra.mxu0 %v16943_v27  ;;  %v16985_v27 = vld [vmem:[#allocation5 + $0x1600] ss:$24 sps:$4 sm:$0xff]  }
 0x447   : > { %12003 = vmatprep.subr.bf16.mxu0 %v16951_v50  ;;  %v22392_v50 = vld [vmem:[#allocation26_spill] sm:$0xff] }
 0x448   : > { %10888 = vmatpush1.bf16.msra.mxu1 %v16946_v39  ;;  %v16993_v39 = vld [vmem:[#allocation5 + $0x1634] ss:$24 sps:$4 sm:$0xff]  }
 0x449   : > { %10950 = vmatprep.subr.bf16.mxu1 %v16954_v20  ;;  %v16991_v20 = vld [vmem:[#allocation5 + $0x1630] ss:$24 sps:$4 sm:$0xff]  }
 0x44a   : > { %12004 = vmatpush1.bf16.msra.mxu0 %v16949_v24  ;;  %v16988_v24 = vld [vmem:[#allocation5 + $0x1628] ss:$24 sps:$4 sm:$0xff]  }
 0x44b   : > { %12066 = vmatprep.subr.bf16.mxu0 %v16957_v38  ;;  %10890 = vmatmul.mubr.bf16.vlgmr.msra.gmra.mrb[24].mxu1 %v22387_v25  ;;  %v16999_v38 = vld [vmem:[#allocation5 + $0x1664] ss:$24 sps:$4 sm:$0xff]  }
 0x44c   : > { %10951 = vmatpush1.bf16.msra.mxu1 %v16952_v18  ;;  %10899 = vmatprep.mubr.bf16.mxu1 %v22388_v61  ;;  %v16996_v18 = vld [vmem:[#allocation5 + $0x165c] ss:$24 sps:$4 sm:$0xff]  }
 0x44d   : > { %12006 = vmatmul.mubr.bf16.vlgmr.msra.gmra.mrb[24].mxu0 %v22387_v25  ;;  %10952 = vmatprep.subr.bf16.mxu1 %v16960_v10  ;;  %v16994_v10 = vld [vmem:[#allocation5 + $0x1658] ss:$24 sps:$4 sm:$0xff]   ;;  %v17005_v25 = vld [vmem:[#allocation5 + $0x1694] ss:$24 sps:$4 sm:$0xff]  }
 0x44e   : > { %12067 = vmatpush1.bf16.msra.mxu0 %v16955_v47  ;;  %12015 = vmatprep.mubr.bf16.mxu0 %v22388_v61  ;;  %v22393_v47 = vld [vmem:[#allocation27_spill] sm:$0xff]  ;;  %v17011_v61 = vld [vmem:[#allocation5 + $0x16c4] ss:$24 sps:$4 sm:$0xff]  }
 0x44f   : > { %12068 = vmatprep.subr.bf16.mxu0 %v16963_v42  ;;  %v17002_v42 = vld [vmem:[#allocation5 + $0x168c] ss:$24 sps:$4 sm:$0xff]  }
 0x450   : > { %10953 = vmatpush1.bf16.msra.mxu1 %v16958_v52  ;;  %v16997_v52 = vld [vmem:[#allocation5 + $0x1660] ss:$24 sps:$4 sm:$0xff]  }
 0x451   : > { %10954 = vmatprep.subr.bf16.mxu1 %v16966_v32  ;;  %v17000_v32 = vld [vmem:[#allocation5 + $0x1688] ss:$24 sps:$4 sm:$0xff]  }
 0x452   : > { %12069 = vmatpush1.bf16.msra.mxu0 %v16961_v30  ;;  %v22394_v30 = vld [vmem:[#allocation28_spill] sm:$0xff] }
 0x453   : > { %12070 = vmatprep.subr.bf16.mxu0 %v16969_v26  ;;  %10900 = vmatmul.mubr.bf16.gmra.mrb[28].mxu1 %v22389_v29  ;;  %v17008_v26 = vld [vmem:[#allocation5 + $0x16bc] ss:$24 sps:$4 sm:$0xff]  }
 0x454   : > { %10955 = vmatpush1.bf16.msra.mxu1 %v16964_v7  ;;  %10909 = vmatprep.mubr.bf16.mxu1 %v22390_v46  ;;  %v17003_v7 = vld [vmem:[#allocation5 + $0x1690] ss:$24 sps:$4 sm:$0xff]  }
 0x455   : > { %12016 = vmatmul.mubr.bf16.gmra.mrb[28].mxu0 %v22389_v29  ;;  %10956 = vmatprep.subr.bf16.mxu1 %v16972_v14  ;;  %v17006_v14 = vld [vmem:[#allocation5 + $0x16b8] ss:$24 sps:$4 sm:$0xff]   ;;  %v17017_v29 = vld [vmem:[#allocation5 + $0x16f4] ss:$24 sps:$4 sm:$0xff]  }
 0x456   : > { %12071 = vmatpush1.bf16.msra.mxu0 %v16967_v19  ;;  %12025 = vmatprep.mubr.bf16.mxu0 %v22390_v46  ;;  %v22395_v19 = vld [vmem:[#allocation29_spill] sm:$0xff] }
 0x457   : > { %12072 = vmatprep.subr.bf16.mxu0 %v16975_v13  ;;  %v17014_v13 = vld [vmem:[#allocation5 + $0x16ec] ss:$24 sps:$4 sm:$0xff]  }
 0x458   : > { %10957 = vmatpush1.bf16.msra.mxu1 %v16970_v51  ;;  %v17009_v51 = vld [vmem:[#allocation5 + $0x16c0] ss:$24 sps:$4 sm:$0xff]   ;;  %v17023_v46 = vld [vmem:[#allocation5 + $0x1724] ss:$24 sps:$4 sm:$0xff]  }
 0x459   : > { %10958 = vmatprep.subr.bf16.mxu1 %v16978_v21  ;;  %v17012_v21 = vld [vmem:[#allocation5 + $0x16e8] ss:$24 sps:$4 sm:$0xff]  }
 0x45a   : > { %12073 = vmatpush1.bf16.msra.mxu0 %v16973_v2  ;;  %v22396_v2 = vld [vmem:[#allocation30_spill] sm:$0xff] }
 0x45b   : > { %12074 = vmatprep.subr.bf16.mxu0 %v16981_v49  ;;  %10910 = vmatmul.mubr.bf16.gmra.mrb[32].mxu1 %v22391_v1  ;;  %v17020_v49 = vld [vmem:[#allocation5 + $0x171c] ss:$24 sps:$4 sm:$0xff]  }
 0x45c   : > { %10959 = vmatpush1.bf16.msra.mxu1 %v16976_v48  ;;  %10919 = vmatprep.mubr.bf16.mxu1 %v22392_v50  ;;  %v17015_v48 = vld [vmem:[#allocation5 + $0x16f0] ss:$24 sps:$4 sm:$0xff]  }
 0x45d   : > { %12026 = vmatmul.mubr.bf16.gmra.mrb[32].mxu0 %v22391_v1  ;;  %10960 = vmatprep.subr.bf16.mxu1 %v16984_v44  ;;  %v17018_v44 = vld [vmem:[#allocation5 + $0x1718] ss:$24 sps:$4 sm:$0xff]   ;;  %v17029_v1 = vld [vmem:[#allocation5 + $0x1754] ss:$24 sps:$4 sm:$0xff]  }
 0x45e   : > { %12075 = vmatpush1.bf16.msra.mxu0 %v16979_v53  ;;  %12035 = vmatprep.mubr.bf16.mxu0 %v22392_v50  ;;  %v22397_v53 = vld [vmem:[#allocation31_spill] sm:$0xff]  ;;  %v17032_v50 = vld [vmem:[#allocation5 + $0x177c] ss:$24 sps:$4 sm:$0xff]  }
 0x45f   : > { %12076 = vmatprep.subr.bf16.mxu0 %v16987_v28  ;;  %v17026_v28 = vld [vmem:[#allocation5 + $0x174c] ss:$24 sps:$4 sm:$0xff]  }
 0x460   : > { %10961 = vmatpush1.bf16.msra.mxu1 %v16982_v0  ;;  %v17021_v0 = vld [vmem:[#allocation5 + $0x1720] ss:$24 sps:$4 sm:$0xff]  }
 0x461   : > { %10962 = vmatprep.subr.bf16.mxu1 %v16990_v59  ;;  %v17024_v59 = vld [vmem:[#allocation5 + $0x1748] ss:$24 sps:$4 sm:$0xff]  }
 0x462   : > { %12077 = vmatpush1.bf16.msra.mxu0 %v16985_v27  ;;  %v22398_v27 = vld [vmem:[#allocation32_spill] sm:$0xff] }
 0x463   : > { %12078 = vmatprep.subr.bf16.mxu0 %v16993_v39  ;;  %10920 = vmatmul.mubr.bf16.gmra.mrb[36].mxu1 %v22393_v47  ;;  %v17027_v39 = vld [vmem:[#allocation5 + $0x1750] ss:$24 sps:$4 sm:$0xff]  }
 0x464   : > { %10963 = vmatpush1.bf16.msra.mxu1 %v16988_v24  ;;  %10929 = vmatprep.mubr.bf16.mxu1 %v22394_v30  ;;  %v17035_v24 = vld [vmem:[#allocation5 + $0x1784] ss:$24 sps:$4 sm:$0xff]  }
 0x465   : > { %12036 = vmatmul.mubr.bf16.gmra.mrb[36].mxu0 %v22393_v47  ;;  %10964 = vmatprep.subr.bf16.mxu1 %v16996_v18  ;;  %v17033_v18 = vld [vmem:[#allocation5 + $0x1780] ss:$24 sps:$4 sm:$0xff]   ;;  %v17041_v47 = vld [vmem:[#allocation5 + $0x17b4] ss:$24 sps:$4 sm:$0xff]  }
 0x466   : > { %12079 = vmatpush1.bf16.msra.mxu0 %v16991_v20  ;;  %12045 = vmatprep.mubr.bf16.mxu0 %v22394_v30  ;;  %v17030_v20 = vld [vmem:[#allocation5 + $0x1778] ss:$24 sps:$4 sm:$0xff]  }
 0x467   : > { %12080 = vmatprep.subr.bf16.mxu0 %v16999_v38  ;;  %v17038_v38 = vld [vmem:[#allocation5 + $0x17ac] ss:$24 sps:$4 sm:$0xff]   ;;  %v17042_v30 = vld [vmem:[#allocation5 + $0x17d8] ss:$24 sps:$4 sm:$0xff]  }
 0x468   : > { %10965 = vmatpush1.bf16.msra.mxu1 %v16994_v10  ;;  %v17036_v10 = vld [vmem:[#allocation5 + $0x17a8] ss:$24 sps:$4 sm:$0xff]  }
 0x469   : > { %10966 = vmatprep.subr.bf16.mxu1 %v17002_v42  ;;  %v17044_v42 = vld [vmem:[#allocation5 + $0x17dc] ss:$24 sps:$4 sm:$0xff]  }
 0x46a   : > { %12081 = vmatpush1.bf16.msra.mxu0 %v16997_v52  ;;  %v17039_v52 = vld [vmem:[#allocation5 + $0x17b0] ss:$24 sps:$4 sm:$0xff]  }
 0x46b   : > { %12082 = vmatprep.subr.bf16.mxu0 %v17005_v25  ;;  %10930 = vmatmul.mubr.bf16.gmra.mrb[40].mxu1 %v22395_v19  ;;  %v17047_v25 = vld [vmem:[#allocation5 + $0x17e4] ss:$24 sps:$4 sm:$0xff]  }
 0x46c   : > { %10967 = vmatpush1.bf16.msra.mxu1 %v17000_v32  ;;  %10939 = vmatprep.mubr.bf16.mxu1 %v22396_v2  ;;  %v17045_v32 = vld [vmem:[#allocation5 + $0x17e0] ss:$24 sps:$4 sm:$0xff]  }
 0x46d   : > { %12046 = vmatmul.mubr.bf16.gmra.mrb[40].mxu0 %v22395_v19  ;;  %10968 = vmatprep.subr.bf16.mxu1 %v17008_v26  ;;  %v17053_v26 = vld [vmem:[#allocation5 + $0x1814] ss:$24 sps:$4 sm:$0xff]   ;;  %v17051_v19 = vld [vmem:[#allocation5 + $0x1810] ss:$24 sps:$4 sm:$0xff]  }
 0x46e   : > { %12083 = vmatpush1.bf16.msra.mxu0 %v17003_v7  ;;  %12055 = vmatprep.mubr.bf16.mxu0 %v22396_v2  ;;  %v17050_v7 = vld [vmem:[#allocation5 + $0x180c] ss:$24 sps:$4 sm:$0xff]   ;;  %v17057_v2 = vld [vmem:[#allocation5 + $0x1840] ss:$24 sps:$4 sm:$0xff]  }
 0x46f   : > { %12084 = vmatprep.subr.bf16.mxu0 %v17011_v61  ;;  %v17048_v61 = vld [vmem:[#allocation5 + $0x1808] ss:$24 sps:$4 sm:$0xff]  }
 0x470   : > { %10969 = vmatpush1.bf16.msra.mxu1 %v17006_v14  ;;  %v17056_v14 = vld [vmem:[#allocation5 + $0x183c] ss:$24 sps:$4 sm:$0xff]  }
 0x471   : > { %10970 = vmatprep.subr.bf16.mxu1 %v17014_v13  ;;  %v22399_v13 = vld [vmem:[#allocation33_spill] sm:$0xff] }
 0x472   : > { %12085 = vmatpush1.bf16.msra.mxu0 %v17009_v51  ;;  %v17059_v51 = vld [vmem:[#allocation5 + $0x1844] ss:$24 sps:$4 sm:$0xff]  }
 0x473   : > { %12086 = vmatprep.subr.bf16.mxu0 %v17017_v29  ;;  %10940 = vmatmul.mubr.bf16.gmra.mrb[44].mxu1 %v22397_v53  ;;  %v17054_v29 = vld [vmem:[#allocation5 + $0x1838] ss:$24 sps:$4 sm:$0xff]  }
 0x474   : > { %10971 = vmatpush1.bf16.msra.mxu1 %v17012_v21  ;;  %10982 = vmatprep.mubr.bf16.mxu1 %v22398_v27  ;;  %v17062_v21 = vld [vmem:[#allocation5 + $0x186c] ss:$24 sps:$4 sm:$0xff]  }
 0x475   : > { %12056 = vmatmul.mubr.bf16.gmra.mrb[44].mxu0 %v22397_v53  ;;  %10972 = vmatprep.subr.bf16.mxu1 %v17020_v49  ;;  %v22400_v49 = vld [vmem:[#allocation34_spill] sm:$0xff] }
 0x476   : > { %12087 = vmatpush1.bf16.msra.mxu0 %v17015_v48  ;;  %12098 = vmatprep.mubr.bf16.mxu0 %v22398_v27  ;;  %v17065_v48 = vld [vmem:[#allocation5 + $0x1874] ss:$24 sps:$4 sm:$0xff]   ;;  %v17063_v53 = vld [vmem:[#allocation5 + $0x1870] ss:$24 sps:$4 sm:$0xff]   ;;  %v17069_v27 = vld [vmem:[#allocation5 + $0x18a0] ss:$24 sps:$4 sm:$0xff]  }
 0x477   : > { %12088 = vmatprep.subr.bf16.mxu0 %v17023_v46  ;;  %v17060_v46 = vld [vmem:[#allocation5 + $0x1868] ss:$24 sps:$4 sm:$0xff]  }
 0x478   : > { %10973 = vmatpush1.bf16.msra.mxu1 %v17018_v44  ;;  %v17068_v44 = vld [vmem:[#allocation5 + $0x189c] ss:$24 sps:$4 sm:$0xff]  }
 0x479   : > { %10974 = vmatprep.subr.bf16.mxu1 %v17026_v28  ;;  %v22401_v28 = vld [vmem:[#allocation35_spill] sm:$0xff] }
 0x47a   : > { %12089 = vmatpush1.bf16.msra.mxu0 %v17021_v0  ;;  %v17071_v0 = vld [vmem:[#allocation5 + $0x18a4] ss:$24 sps:$4 sm:$0xff]  }
 0x47b   : > { %12090 = vmatprep.subr.bf16.mxu0 %v17029_v1  ;;  %v17066_v1 = vld [vmem:[#allocation5 + $0x1898] ss:$24 sps:$4 sm:$0xff]  }
 0x47c   : > { %10975 = vmatpush1.bf16.msra.mxu1 %v17024_v59  ;;  %v17074_v59 = vld [vmem:[#allocation5 + $0x18cc] ss:$24 sps:$4 sm:$0xff]  }
 0x47d   : > { %10976 = vmatprep.subr.bf16.mxu1 %v17032_v50  ;;  %v22402_v50 = vld [vmem:[#allocation36_spill] sm:$0xff] }
 0x47e   : > { %12091 = vmatpush1.bf16.msra.mxu0 %v17027_v39  ;;  %v17077_v39 = vld [vmem:[#allocation5 + $0x18d4] ss:$24 sps:$4 sm:$0xff]  }
 0x47f   : > { %12092 = vmatprep.subr.bf16.mxu0 %v17035_v24  ;;  %v17072_v24 = vld [vmem:[#allocation5 + $0x18c8] ss:$24 sps:$4 sm:$0xff]  }
 0x480   : > { %10977 = vmatpush1.bf16.msra.mxu1 %v17030_v20  ;;  %v17075_v20 = vld [vmem:[#allocation5 + $0x18d0] ss:$24 sps:$4 sm:$0xff]  }
 0x481   : > { %10978 = vmatprep.subr.bf16.mxu1 %v17038_v38  ;;  %v17083_v38 = vld [vmem:[#allocation5 + $0x1904] ss:$24 sps:$4 sm:$0xff]  }
 0x482   : > { %12093 = vmatpush1.bf16.msra.mxu0 %v17033_v18  ;;  %v17080_v18 = vld [vmem:[#allocation5 + $0x18fc] ss:$24 sps:$4 sm:$0xff]  }
 0x483   : > { %12094 = vmatprep.subr.bf16.mxu0 %v17041_v47  ;;  %v22403_v47 = vld [vmem:[#allocation37_spill] sm:$0xff] }
 0x484   : > { %10979 = vmatpush1.bf16.msra.mxu1 %v17036_v10  ;;  %v17078_v10 = vld [vmem:[#allocation5 + $0x18f8] ss:$24 sps:$4 sm:$0xff]  }
 0x485   : > { %10980 = vmatprep.subr.bf16.mxu1 %v17044_v42  ;;  %v17086_v42 = vld [vmem:[#allocation5 + $0x192c] ss:$24 sps:$4 sm:$0xff]  }
 0x486   : > { %12095 = vmatpush1.bf16.msra.mxu0 %v17039_v52  ;;  %v17081_v52 = vld [vmem:[#allocation5 + $0x1900] ss:$24 sps:$4 sm:$0xff]  }
 0x487   : > { %12096 = vmatprep.subr.bf16.mxu0 %v17047_v25  ;;  %v17089_v25 = vld [vmem:[#allocation5 + $0x1934] ss:$24 sps:$4 sm:$0xff]  }
 0x488   : > { %10981 = vmatpush1.bf16.msra.mxu1 %v17042_v30  ;;  %v22404_v30 = vld [vmem:[#allocation38_spill] sm:$0xff] }
 0x489   : > { %11043 = vmatprep.subr.bf16.mxu1 %v17050_v7  ;;  %v17087_v7 = vld [vmem:[#allocation5 + $0x1930] ss:$24 sps:$4 sm:$0xff]  }
 0x48a   : > { %12097 = vmatpush1.bf16.msra.mxu0 %v17045_v32  ;;  %v17084_v32 = vld [vmem:[#allocation5 + $0x1928] ss:$24 sps:$4 sm:$0xff]  }
 0x48b   : > { %12159 = vmatprep.subr.bf16.mxu0 %v17053_v26  ;;  %10983 = vmatmul.mubr.bf16.vlgmr.msra.gmra.mrb[24].mxu1 %v22399_v13  ;;  %v17092_v26 = vld [vmem:[#allocation5 + $0x195c] ss:$24 sps:$4 sm:$0xff]  }
 0x48c   : > { %11044 = vmatpush1.bf16.msra.mxu1 %v17048_v61  ;;  %10992 = vmatprep.mubr.bf16.mxu1 %v22400_v49  ;;  %v17095_v61 = vld [vmem:[#allocation5 + $0x1964] ss:$24 sps:$4 sm:$0xff]  }
 0x48d   : > { %12099 = vmatmul.mubr.bf16.vlgmr.msra.gmra.mrb[24].mxu0 %v22399_v13  ;;  %11045 = vmatprep.subr.bf16.mxu1 %v17056_v14  ;;  %v17090_v14 = vld [vmem:[#allocation5 + $0x1958] ss:$24 sps:$4 sm:$0xff]   ;;  %v17098_v13 = vld [vmem:[#allocation5 + $0x198c] ss:$24 sps:$4 sm:$0xff]  }
 0x48e   : > { %12160 = vmatpush1.bf16.msra.mxu0 %v17051_v19  ;;  %12108 = vmatprep.mubr.bf16.mxu0 %v22400_v49  ;;  %v22405_v19 = vld [vmem:[#allocation39_spill] sm:$0xff]  ;;  %v17104_v49 = vld [vmem:[#allocation5 + $0x19bc] ss:$24 sps:$4 sm:$0xff]  }
 0x48f   : > { %12161 = vmatprep.subr.bf16.mxu0 %v17059_v51  ;;  %v17093_v51 = vld [vmem:[#allocation5 + $0x1960] ss:$24 sps:$4 sm:$0xff]  }
 0x490   : > { %11046 = vmatpush1.bf16.msra.mxu1 %v17054_v29  ;;  %v17101_v29 = vld [vmem:[#allocation5 + $0x1994] ss:$24 sps:$4 sm:$0xff]  }
 0x491   : > { %11047 = vmatprep.subr.bf16.mxu1 %v17062_v21  ;;  %v17096_v21 = vld [vmem:[#allocation5 + $0x1988] ss:$24 sps:$4 sm:$0xff]  }
 0x492   : > { %12162 = vmatpush1.bf16.msra.mxu0 %v17057_v2  ;;  %v22406_v2 = vld [vmem:[#allocation40_spill] sm:$0xff] }
 0x493   : > { %12163 = vmatprep.subr.bf16.mxu0 %v17065_v48  ;;  %10993 = vmatmul.mubr.bf16.gmra.mrb[28].mxu1 %v22401_v28  ;;  %v17099_v48 = vld [vmem:[#allocation5 + $0x1990] ss:$24 sps:$4 sm:$0xff]  }
 0x494   : > { %11048 = vmatpush1.bf16.msra.mxu1 %v17060_v46  ;;  %11002 = vmatprep.mubr.bf16.mxu1 %v22402_v50  ;;  %v17107_v46 = vld [vmem:[#allocation5 + $0x19c4] ss:$24 sps:$4 sm:$0xff]  }
 0x495   : > { %12109 = vmatmul.mubr.bf16.gmra.mrb[28].mxu0 %v22401_v28  ;;  %11049 = vmatprep.subr.bf16.mxu1 %v17068_v44  ;;  %v17102_v44 = vld [vmem:[#allocation5 + $0x19b8] ss:$24 sps:$4 sm:$0xff]   ;;  %v17110_v28 = vld [vmem:[#allocation5 + $0x19ec] ss:$24 sps:$4 sm:$0xff]  }
 0x496   : > { %12164 = vmatpush1.bf16.msra.mxu0 %v17063_v53  ;;  %12118 = vmatprep.mubr.bf16.mxu0 %v22402_v50  ;;  %v22407_v53 = vld [vmem:[#allocation41_spill] sm:$0xff] }
 0x497   : > { %12165 = vmatprep.subr.bf16.mxu0 %v17071_v0  ;;  %v17105_v0 = vld [vmem:[#allocation5 + $0x19c0] ss:$24 sps:$4 sm:$0xff]   ;;  %v17116_v50 = vld [vmem:[#allocation5 + $0x1a1c] ss:$24 sps:$4 sm:$0xff]  }
 0x498   : > { %11050 = vmatpush1.bf16.msra.mxu1 %v17066_v1  ;;  %v17113_v1 = vld [vmem:[#allocation5 + $0x19f4] ss:$24 sps:$4 sm:$0xff]  }
 0x499   : > { %11051 = vmatprep.subr.bf16.mxu1 %v17074_v59  ;;  %v17108_v59 = vld [vmem:[#allocation5 + $0x19e8] ss:$24 sps:$4 sm:$0xff]  }
 0x49a   : > { %12166 = vmatpush1.bf16.msra.mxu0 %v17069_v27  ;;  %v22408_v27 = vld [vmem:[#allocation42_spill] sm:$0xff] }
 0x49b   : > { %12167 = vmatprep.subr.bf16.mxu0 %v17077_v39  ;;  %11003 = vmatmul.mubr.bf16.gmra.mrb[32].mxu1 %v22403_v47  ;;  %v17111_v39 = vld [vmem:[#allocation5 + $0x19f0] ss:$24 sps:$4 sm:$0xff]  }
 0x49c   : > { %11052 = vmatpush1.bf16.msra.mxu1 %v17072_v24  ;;  %11012 = vmatprep.mubr.bf16.mxu1 %v22404_v30  ;;  %v17119_v24 = vld [vmem:[#allocation5 + $0x1a24] ss:$24 sps:$4 sm:$0xff]  }
 0x49d   : > { %12119 = vmatmul.mubr.bf16.gmra.mrb[32].mxu0 %v22403_v47  ;;  %11053 = vmatprep.subr.bf16.mxu1 %v17080_v18  ;;  %v17114_v18 = vld [vmem:[#allocation5 + $0x1a18] ss:$24 sps:$4 sm:$0xff]   ;;  %v17122_v47 = vld [vmem:[#allocation5 + $0x1a4c] ss:$24 sps:$4 sm:$0xff]  }
 0x49e   : > { %12168 = vmatpush1.bf16.msra.mxu0 %v17075_v20  ;;  %12128 = vmatprep.mubr.bf16.mxu0 %v22404_v30  ;;  %v22409_v20 = vld [vmem:[#allocation43_spill] sm:$0xff]  ;;  %v17128_v30 = vld [vmem:[#allocation5 + $0x1a7c] ss:$24 sps:$4 sm:$0xff]  }
 0x49f   : > { %12169 = vmatprep.subr.bf16.mxu0 %v17083_v38  ;;  %v17117_v38 = vld [vmem:[#allocation5 + $0x1a20] ss:$24 sps:$4 sm:$0xff]  }
 0x4a0   : > { %11054 = vmatpush1.bf16.msra.mxu1 %v17078_v10  ;;  %v17125_v10 = vld [vmem:[#allocation5 + $0x1a54] ss:$24 sps:$4 sm:$0xff]  }
 0x4a1   : > { %11055 = vmatprep.subr.bf16.mxu1 %v17086_v42  ;;  %v17120_v42 = vld [vmem:[#allocation5 + $0x1a48] ss:$24 sps:$4 sm:$0xff]  }
 0x4a2   : > { %12170 = vmatpush1.bf16.msra.mxu0 %v17081_v52  ;;  %v22410_v52 = vld [vmem:[#allocation44_spill] sm:$0xff] }
 0x4a3   : > { %12171 = vmatprep.subr.bf16.mxu0 %v17089_v25  ;;  %11013 = vmatmul.mubr.bf16.gmra.mrb[36].mxu1 %v22405_v19  ;;  %v17123_v25 = vld [vmem:[#allocation5 + $0x1a50] ss:$24 sps:$4 sm:$0xff]  }
 0x4a4   : > { %11056 = vmatpush1.bf16.msra.mxu1 %v17084_v32  ;;  %11022 = vmatprep.mubr.bf16.mxu1 %v22406_v2  ;;  %v17131_v32 = vld [vmem:[#allocation5 + $0x1a84] ss:$24 sps:$4 sm:$0xff]  }
 0x4a5   : > { %12129 = vmatmul.mubr.bf16.gmra.mrb[36].mxu0 %v22405_v19  ;;  %11057 = vmatprep.subr.bf16.mxu1 %v17092_v26  ;;  %v17129_v26 = vld [vmem:[#allocation5 + $0x1a80] ss:$24 sps:$4 sm:$0xff]   ;;  %v17137_v19 = vld [vmem:[#allocation5 + $0x1ab4] ss:$24 sps:$4 sm:$0xff]  }
 0x4a6   : > { %12172 = vmatpush1.bf16.msra.mxu0 %v17087_v7  ;;  %12138 = vmatprep.mubr.bf16.mxu0 %v22406_v2  ;;  %v17126_v7 = vld [vmem:[#allocation5 + $0x1a78] ss:$24 sps:$4 sm:$0xff]  }
 0x4a7   : > { %12173 = vmatprep.subr.bf16.mxu0 %v17095_v61  ;;  %v17134_v61 = vld [vmem:[#allocation5 + $0x1aac] ss:$24 sps:$4 sm:$0xff]   ;;  %v17138_v2 = vld [vmem:[#allocation5 + $0x1ad8] ss:$24 sps:$4 sm:$0xff]  }
 0x4a8   : > { %11058 = vmatpush1.bf16.msra.mxu1 %v17090_v14  ;;  %v17132_v14 = vld [vmem:[#allocation5 + $0x1aa8] ss:$24 sps:$4 sm:$0xff]  }
 0x4a9   : > { %11059 = vmatprep.subr.bf16.mxu1 %v17098_v13  ;;  %v17140_v13 = vld [vmem:[#allocation5 + $0x1adc] ss:$24 sps:$4 sm:$0xff]  }
 0x4aa   : > { %12174 = vmatpush1.bf16.msra.mxu0 %v17093_v51  ;;  %v17135_v51 = vld [vmem:[#allocation5 + $0x1ab0] ss:$24 sps:$4 sm:$0xff]  }
 0x4ab   : > { %12175 = vmatprep.subr.bf16.mxu0 %v17101_v29  ;;  %11023 = vmatmul.mubr.bf16.gmra.mrb[40].mxu1 %v22407_v53  ;;  %v17143_v29 = vld [vmem:[#allocation5 + $0x1ae4] ss:$24 sps:$4 sm:$0xff]  }
 0x4ac   : > { %11060 = vmatpush1.bf16.msra.mxu1 %v17096_v21  ;;  %11032 = vmatprep.mubr.bf16.mxu1 %v22408_v27  ;;  %v17141_v21 = vld [vmem:[#allocation5 + $0x1ae0] ss:$24 sps:$4 sm:$0xff]  }
 0x4ad   : > { %12139 = vmatmul.mubr.bf16.gmra.mrb[40].mxu0 %v22407_v53  ;;  %11061 = vmatprep.subr.bf16.mxu1 %v17104_v49  ;;  %v17149_v49 = vld [vmem:[#allocation5 + $0x1b14] ss:$24 sps:$4 sm:$0xff]   ;;  %v17147_v53 = vld [vmem:[#allocation5 + $0x1b10] ss:$24 sps:$4 sm:$0xff]  }
 0x4ae   : > { %12176 = vmatpush1.bf16.msra.mxu0 %v17099_v48  ;;  %12148 = vmatprep.mubr.bf16.mxu0 %v22408_v27  ;;  %v17146_v48 = vld [vmem:[#allocation5 + $0x1b0c] ss:$24 sps:$4 sm:$0xff]   ;;  %v17153_v27 = vld [vmem:[#allocation5 + $0x1b40] ss:$24 sps:$4 sm:$0xff]  }
 0x4af   : > { %12177 = vmatprep.subr.bf16.mxu0 %v17107_v46  ;;  %v17144_v46 = vld [vmem:[#allocation5 + $0x1b08] ss:$24 sps:$4 sm:$0xff]  }
 0x4b0   : > { %11062 = vmatpush1.bf16.msra.mxu1 %v17102_v44  ;;  %v17152_v44 = vld [vmem:[#allocation5 + $0x1b3c] ss:$24 sps:$4 sm:$0xff]  }
 0x4b1   : > { %11063 = vmatprep.subr.bf16.mxu1 %v17110_v28  ;;  %v22411_v28 = vld [vmem:[#allocation46_spill] sm:$0xff] }
 0x4b2   : > { %12178 = vmatpush1.bf16.msra.mxu0 %v17105_v0  ;;  %v17155_v0 = vld [vmem:[#allocation5 + $0x1b44] ss:$24 sps:$4 sm:$0xff]  }
 0x4b3   : > { %12179 = vmatprep.subr.bf16.mxu0 %v17113_v1  ;;  %11033 = vmatmul.mubr.bf16.gmra.mrb[44].mxu1 %v22409_v20  ;;  %v17150_v1 = vld [vmem:[#allocation5 + $0x1b38] ss:$24 sps:$4 sm:$0xff]  }
 0x4b4   : > { %11064 = vmatpush1.bf16.msra.mxu1 %v17108_v59  ;;  %11075 = vmatprep.mubr.bf16.mxu1 %v22410_v52  ;;  %v17158_v59 = vld [vmem:[#allocation5 + $0x1b6c] ss:$24 sps:$4 sm:$0xff]  }
 0x4b5   : > { %12149 = vmatmul.mubr.bf16.gmra.mrb[44].mxu0 %v22409_v20  ;;  %11065 = vmatprep.subr.bf16.mxu1 %v17116_v50  ;;  %v22412_v50 = vld [vmem:[#allocation48_spill] sm:$0xff] }
 0x4b6   : > { %12180 = vmatpush1.bf16.msra.mxu0 %v17111_v39  ;;  %12191 = vmatprep.mubr.bf16.mxu0 %v22410_v52  ;;  %v17161_v39 = vld [vmem:[#allocation5 + $0x1b74] ss:$24 sps:$4 sm:$0xff]   ;;  %v17159_v20 = vld [vmem:[#allocation5 + $0x1b70] ss:$24 sps:$4 sm:$0xff]   ;;  %v17165_v52 = vld [vmem:[#allocation5 + $0x1ba0] ss:$24 sps:$4 sm:$0xff]  }
 0x4b7   : > { %12181 = vmatprep.subr.bf16.mxu0 %v17119_v24  ;;  %v17156_v24 = vld [vmem:[#allocation5 + $0x1b68] ss:$24 sps:$4 sm:$0xff]  }
 0x4b8   : > { %11066 = vmatpush1.bf16.msra.mxu1 %v17114_v18  ;;  %v17164_v18 = vld [vmem:[#allocation5 + $0x1b9c] ss:$24 sps:$4 sm:$0xff]  }
 0x4b9   : > { %11067 = vmatprep.subr.bf16.mxu1 %v17122_v47  ;;  %v22413_v47 = vld [vmem:[#allocation50_spill] sm:$0xff] }
 0x4ba   : > { %12182 = vmatpush1.bf16.msra.mxu0 %v17117_v38  ;;  %v17167_v38 = vld [vmem:[#allocation5 + $0x1ba4] ss:$24 sps:$4 sm:$0xff]  }
 0x4bb   : > { %12183 = vmatprep.subr.bf16.mxu0 %v17125_v10  ;;  %v17162_v10 = vld [vmem:[#allocation5 + $0x1b98] ss:$24 sps:$4 sm:$0xff]  }
 0x4bc   : > { %11068 = vmatpush1.bf16.msra.mxu1 %v17120_v42  ;;  %v17170_v42 = vld [vmem:[#allocation5 + $0x1bcc] ss:$24 sps:$4 sm:$0xff]  }
 0x4bd   : > { %11069 = vmatprep.subr.bf16.mxu1 %v17128_v30  ;;  %v22414_v30 = vld [vmem:[#allocation52_spill] sm:$0xff] }
 0x4be   : > { %12184 = vmatpush1.bf16.msra.mxu0 %v17123_v25  ;;  %v17173_v25 = vld [vmem:[#allocation5 + $0x1bd4] ss:$24 sps:$4 sm:$0xff]  }
 0x4bf   : > { %12185 = vmatprep.subr.bf16.mxu0 %v17131_v32  ;;  %v17168_v32 = vld [vmem:[#allocation5 + $0x1bc8] ss:$24 sps:$4 sm:$0xff]  }
 0x4c0   : > { %11070 = vmatpush1.bf16.msra.mxu1 %v17126_v7  ;;  %v17171_v7 = vld [vmem:[#allocation5 + $0x1bd0] ss:$24 sps:$4 sm:$0xff]  }
 0x4c1   : > { %11071 = vmatprep.subr.bf16.mxu1 %v17134_v61  ;;  %v17179_v61 = vld [vmem:[#allocation5 + $0x1c04] ss:$24 sps:$4 sm:$0xff]  }
 0x4c2   : > { %12186 = vmatpush1.bf16.msra.mxu0 %v17129_v26  ;;  %v17176_v26 = vld [vmem:[#allocation5 + $0x1bfc] ss:$24 sps:$4 sm:$0xff]  }
 0x4c3   : > { %12187 = vmatprep.subr.bf16.mxu0 %v17137_v19  ;;  %v22415_v19 = vld [vmem:[#allocation54_spill] sm:$0xff] }
 0x4c4   : > { %11072 = vmatpush1.bf16.msra.mxu1 %v17132_v14  ;;  %v17174_v14 = vld [vmem:[#allocation5 + $0x1bf8] ss:$24 sps:$4 sm:$0xff]  }
 0x4c5   : > { %11073 = vmatprep.subr.bf16.mxu1 %v17140_v13  ;;  %v17182_v13 = vld [vmem:[#allocation5 + $0x1c2c] ss:$24 sps:$4 sm:$0xff]  }
 0x4c6   : > { %12188 = vmatpush1.bf16.msra.mxu0 %v17135_v51  ;;  %v17177_v51 = vld [vmem:[#allocation5 + $0x1c00] ss:$24 sps:$4 sm:$0xff]  }
 0x4c7   : > { %12189 = vmatprep.subr.bf16.mxu0 %v17143_v29  ;;  %v17185_v29 = vld [vmem:[#allocation5 + $0x1c34] ss:$24 sps:$4 sm:$0xff]  }
 0x4c8   : > { %11074 = vmatpush1.bf16.msra.mxu1 %v17138_v2  ;;  %v22416_v2 = vld [vmem:[#allocation56_spill] sm:$0xff] }
 0x4c9   : > { %11136 = vmatprep.subr.bf16.mxu1 %v17146_v48  ;;  %v17183_v48 = vld [vmem:[#allocation5 + $0x1c30] ss:$24 sps:$4 sm:$0xff]  }
 0x4ca   : > { %12190 = vmatpush1.bf16.msra.mxu0 %v17141_v21  ;;  %v17180_v21 = vld [vmem:[#allocation5 + $0x1c28] ss:$24 sps:$4 sm:$0xff]  }
 0x4cb   : > { %12252 = vmatprep.subr.bf16.mxu0 %v17149_v49  ;;  %11076 = vmatmul.mubr.bf16.vlgmr.msra.gmra.mrb[24].mxu1 %v22411_v28  ;;  %v17188_v49 = vld [vmem:[#allocation5 + $0x1c5c] ss:$24 sps:$4 sm:$0xff]  }
 0x4cc   : > { %11137 = vmatpush1.bf16.msra.mxu1 %v17144_v46  ;;  %11085 = vmatprep.mubr.bf16.mxu1 %v22412_v50  ;;  %v17191_v46 = vld [vmem:[#allocation5 + $0x1c64] ss:$24 sps:$4 sm:$0xff]  }
 0x4cd   : > { %12192 = vmatmul.mubr.bf16.vlgmr.msra.gmra.mrb[24].mxu0 %v22411_v28  ;;  %11138 = vmatprep.subr.bf16.mxu1 %v17152_v44  ;;  %v17186_v44 = vld [vmem:[#allocation5 + $0x1c58] ss:$24 sps:$4 sm:$0xff]   ;;  %v17194_v28 = vld [vmem:[#allocation5 + $0x1c8c] ss:$24 sps:$4 sm:$0xff]  }
 0x4ce   : > { %12253 = vmatpush1.bf16.msra.mxu0 %v17147_v53  ;;  %12201 = vmatprep.mubr.bf16.mxu0 %v22412_v50  ;;  %v22417_v53 = vld [vmem:[#allocation58_spill] sm:$0xff]  ;;  %v17200_v50 = vld [vmem:[#allocation5 + $0x1cbc] ss:$24 sps:$4 sm:$0xff]  }
 0x4cf   : > { %12254 = vmatprep.subr.bf16.mxu0 %v17155_v0  ;;  %v17189_v0 = vld [vmem:[#allocation5 + $0x1c60] ss:$24 sps:$4 sm:$0xff]  }
 0x4d0   : > { %11139 = vmatpush1.bf16.msra.mxu1 %v17150_v1  ;;  %v17197_v1 = vld [vmem:[#allocation5 + $0x1c94] ss:$24 sps:$4 sm:$0xff]  }
 0x4d1   : > { %11140 = vmatprep.subr.bf16.mxu1 %v17158_v59  ;;  %v17192_v59 = vld [vmem:[#allocation5 + $0x1c88] ss:$24 sps:$4 sm:$0xff]  }
 0x4d2   : > { %12255 = vmatpush1.bf16.msra.mxu0 %v17153_v27  ;;  %v22418_v27 = vld [vmem:[#allocation60_spill] sm:$0xff] }
 0x4d3   : > { %12256 = vmatprep.subr.bf16.mxu0 %v17161_v39  ;;  %11086 = vmatmul.mubr.bf16.gmra.mrb[28].mxu1 %v22413_v47  ;;  %v17195_v39 = vld [vmem:[#allocation5 + $0x1c90] ss:$24 sps:$4 sm:$0xff]  }
 0x4d4   : > { %11141 = vmatpush1.bf16.msra.mxu1 %v17156_v24  ;;  %11095 = vmatprep.mubr.bf16.mxu1 %v22414_v30  ;;  %v17203_v24 = vld [vmem:[#allocation5 + $0x1cc4] ss:$24 sps:$4 sm:$0xff]  }
 0x4d5   : > { %12202 = vmatmul.mubr.bf16.gmra.mrb[28].mxu0 %v22413_v47  ;;  %11142 = vmatprep.subr.bf16.mxu1 %v17164_v18  ;;  %v17198_v18 = vld [vmem:[#allocation5 + $0x1cb8] ss:$24 sps:$4 sm:$0xff]   ;;  %v17206_v47 = vld [vmem:[#allocation5 + $0x1cec] ss:$24 sps:$4 sm:$0xff]  }
 0x4d6   : > { %12257 = vmatpush1.bf16.msra.mxu0 %v17159_v20  ;;  %12211 = vmatprep.mubr.bf16.mxu0 %v22414_v30  ;;  %v22419_v20 = vld [vmem:[#allocation62_spill] sm:$0xff]  ;;  %v17212_v30 = vld [vmem:[#allocation5 + $0x1d1c] ss:$24 sps:$4 sm:$0xff]  }
 0x4d7   : > { %12258 = vmatprep.subr.bf16.mxu0 %v17167_v38  ;;  %v17201_v38 = vld [vmem:[#allocation5 + $0x1cc0] ss:$24 sps:$4 sm:$0xff]  }
 0x4d8   : > { %11143 = vmatpush1.bf16.msra.mxu1 %v17162_v10  ;;  %v17209_v10 = vld [vmem:[#allocation5 + $0x1cf4] ss:$24 sps:$4 sm:$0xff]  }
 0x4d9   : > { %11144 = vmatprep.subr.bf16.mxu1 %v17170_v42  ;;  %v17204_v42 = vld [vmem:[#allocation5 + $0x1ce8] ss:$24 sps:$4 sm:$0xff]  }
 0x4da   : > { %12259 = vmatpush1.bf16.msra.mxu0 %v17165_v52  ;;  %v22420_v52 = vld [vmem:[#allocation64_spill] sm:$0xff] }
 0x4db   : > { %12260 = vmatprep.subr.bf16.mxu0 %v17173_v25  ;;  %11096 = vmatmul.mubr.bf16.gmra.mrb[32].mxu1 %v22415_v19  ;;  %v17207_v25 = vld [vmem:[#allocation5 + $0x1cf0] ss:$24 sps:$4 sm:$0xff]  }
 0x4dc   : > { %11145 = vmatpush1.bf16.msra.mxu1 %v17168_v32  ;;  %11105 = vmatprep.mubr.bf16.mxu1 %v22416_v2  ;;  %v17215_v32 = vld [vmem:[#allocation5 + $0x1d24] ss:$24 sps:$4 sm:$0xff]  }
 0x4dd   : > { %12212 = vmatmul.mubr.bf16.gmra.mrb[32].mxu0 %v22415_v19  ;;  %11146 = vmatprep.subr.bf16.mxu1 %v17176_v26  ;;  %v17210_v26 = vld [vmem:[#allocation5 + $0x1d18] ss:$24 sps:$4 sm:$0xff]   ;;  %v17218_v19 = vld [vmem:[#allocation5 + $0x1d4c] ss:$24 sps:$4 sm:$0xff]  }
 0x4de   : > { %12261 = vmatpush1.bf16.msra.mxu0 %v17171_v7  ;;  %12221 = vmatprep.mubr.bf16.mxu0 %v22416_v2  ;;  %v22421_v7 = vld [vmem:[#allocation66_spill] sm:$0xff]  ;;  %v17224_v2 = vld [vmem:[#allocation5 + $0x1d7c] ss:$24 sps:$4 sm:$0xff]  }
 0x4df   : > { %12262 = vmatprep.subr.bf16.mxu0 %v17179_v61  ;;  %v17213_v61 = vld [vmem:[#allocation5 + $0x1d20] ss:$24 sps:$4 sm:$0xff]  }
 0x4e0   : > { %11147 = vmatpush1.bf16.msra.mxu1 %v17174_v14  ;;  %v17221_v14 = vld [vmem:[#allocation5 + $0x1d54] ss:$24 sps:$4 sm:$0xff]  }
 0x4e1   : > { %11148 = vmatprep.subr.bf16.mxu1 %v17182_v13  ;;  %v17216_v13 = vld [vmem:[#allocation5 + $0x1d48] ss:$24 sps:$4 sm:$0xff]  }
 0x4e2   : > { %12263 = vmatpush1.bf16.msra.mxu0 %v17177_v51  ;;  %v22422_v51 = vld [vmem:[#allocation68_spill] sm:$0xff] }
 0x4e3   : > { %12264 = vmatprep.subr.bf16.mxu0 %v17185_v29  ;;  %11106 = vmatmul.mubr.bf16.gmra.mrb[36].mxu1 %v22417_v53  ;;  %v17219_v29 = vld [vmem:[#allocation5 + $0x1d50] ss:$24 sps:$4 sm:$0xff]  }
 0x4e4   : > { %11149 = vmatpush1.bf16.msra.mxu1 %v17180_v21  ;;  %11115 = vmatprep.mubr.bf16.mxu1 %v22418_v27  ;;  %v17227_v21 = vld [vmem:[#allocation5 + $0x1d84] ss:$24 sps:$4 sm:$0xff]  }
 0x4e5   : > { %12222 = vmatmul.mubr.bf16.gmra.mrb[36].mxu0 %v22417_v53  ;;  %11150 = vmatprep.subr.bf16.mxu1 %v17188_v49  ;;  %v17225_v49 = vld [vmem:[#allocation5 + $0x1d80] ss:$24 sps:$4 sm:$0xff]   ;;  %v17233_v53 = vld [vmem:[#allocation5 + $0x1db4] ss:$24 sps:$4 sm:$0xff]  }
 0x4e6   : > { %12265 = vmatpush1.bf16.msra.mxu0 %v17183_v48  ;;  %12231 = vmatprep.mubr.bf16.mxu0 %v22418_v27  ;;  %v17222_v48 = vld [vmem:[#allocation5 + $0x1d78] ss:$24 sps:$4 sm:$0xff]  }
 0x4e7   : > { %12266 = vmatprep.subr.bf16.mxu0 %v17191_v46  ;;  %v17230_v46 = vld [vmem:[#allocation5 + $0x1dac] ss:$24 sps:$4 sm:$0xff]   ;;  %v17234_v27 = vld [vmem:[#allocation5 + $0x1dd8] ss:$24 sps:$4 sm:$0xff]  }
 0x4e8   : > { %11151 = vmatpush1.bf16.msra.mxu1 %v17186_v44  ;;  %v17228_v44 = vld [vmem:[#allocation5 + $0x1da8] ss:$24 sps:$4 sm:$0xff]  }
 0x4e9   : > { %11152 = vmatprep.subr.bf16.mxu1 %v17194_v28  ;;  %v17236_v28 = vld [vmem:[#allocation5 + $0x1ddc] ss:$24 sps:$4 sm:$0xff]  }
 0x4ea   : > { %12267 = vmatpush1.bf16.msra.mxu0 %v17189_v0  ;;  %v17231_v0 = vld [vmem:[#allocation5 + $0x1db0] ss:$24 sps:$4 sm:$0xff]  }
 0x4eb   : > { %12268 = vmatprep.subr.bf16.mxu0 %v17197_v1  ;;  %11116 = vmatmul.mubr.bf16.gmra.mrb[40].mxu1 %v22419_v20  ;;  %v17239_v1 = vld [vmem:[#allocation5 + $0x1de4] ss:$24 sps:$4 sm:$0xff]  }
 0x4ec   : > { %11153 = vmatpush1.bf16.msra.mxu1 %v17192_v59  ;;  %11125 = vmatprep.mubr.bf16.mxu1 %v22420_v52  ;;  %v17237_v59 = vld [vmem:[#allocation5 + $0x1de0] ss:$24 sps:$4 sm:$0xff]  }
 0x4ed   : > { %12232 = vmatmul.mubr.bf16.gmra.mrb[40].mxu0 %v22419_v20  ;;  %11154 = vmatprep.subr.bf16.mxu1 %v17200_v50  ;;  %v17245_v50 = vld [vmem:[#allocation5 + $0x1e14] ss:$24 sps:$4 sm:$0xff]   ;;  %v17243_v20 = vld [vmem:[#allocation5 + $0x1e10] ss:$24 sps:$4 sm:$0xff]  }
 0x4ee   : > { %12269 = vmatpush1.bf16.msra.mxu0 %v17195_v39  ;;  %12241 = vmatprep.mubr.bf16.mxu0 %v22420_v52  ;;  %v17242_v39 = vld [vmem:[#allocation5 + $0x1e0c] ss:$24 sps:$4 sm:$0xff]   ;;  %v17249_v52 = vld [vmem:[#allocation5 + $0x1e40] ss:$24 sps:$4 sm:$0xff]  }
 0x4ef   : > { %12270 = vmatprep.subr.bf16.mxu0 %v17203_v24  ;;  %v17240_v24 = vld [vmem:[#allocation5 + $0x1e08] ss:$24 sps:$4 sm:$0xff]  }
 0x4f0   : > { %11155 = vmatpush1.bf16.msra.mxu1 %v17198_v18  ;;  %v17248_v18 = vld [vmem:[#allocation5 + $0x1e3c] ss:$24 sps:$4 sm:$0xff]  }
 0x4f1   : > { %11156 = vmatprep.subr.bf16.mxu1 %v17206_v47  ;;  %v22423_v47 = vld [vmem:[#allocation70_spill] sm:$0xff] }
 0x4f2   : > { %12271 = vmatpush1.bf16.msra.mxu0 %v17201_v38  ;;  %v17251_v38 = vld [vmem:[#allocation5 + $0x1e44] ss:$24 sps:$4 sm:$0xff]  }
 0x4f3   : > { %12272 = vmatprep.subr.bf16.mxu0 %v17209_v10  ;;  %11126 = vmatmul.mubr.bf16.gmra.mrb[44].mxu1 %v22421_v7  ;;  %v17246_v10 = vld [vmem:[#allocation5 + $0x1e38] ss:$24 sps:$4 sm:$0xff]  }
 0x4f4   : > { %11157 = vmatpush1.bf16.msra.mxu1 %v17204_v42  ;;  %11168 = vmatprep.mubr.bf16.mxu1 %v22422_v51  ;;  %v17254_v42 = vld [vmem:[#allocation5 + $0x1e6c] ss:$24 sps:$4 sm:$0xff]  }
 0x4f5   : > { %12242 = vmatmul.mubr.bf16.gmra.mrb[44].mxu0 %v22421_v7  ;;  %11158 = vmatprep.subr.bf16.mxu1 %v17212_v30  ;;  %v22424_v30 = vld [vmem:[#allocation72_spill] sm:$0xff] }
 0x4f6   : > { %12273 = vmatpush1.bf16.msra.mxu0 %v17207_v25  ;;  %12284 = vmatprep.mubr.bf16.mxu0 %v22422_v51  ;;  %v17257_v25 = vld [vmem:[#allocation5 + $0x1e74] ss:$24 sps:$4 sm:$0xff]   ;;  %v17255_v7 = vld [vmem:[#allocation5 + $0x1e70] ss:$24 sps:$4 sm:$0xff]   ;;  %v17261_v51 = vld [vmem:[#allocation5 + $0x1ea0] ss:$24 sps:$4 sm:$0xff]  }
 0x4f7   : > { %12274 = vmatprep.subr.bf16.mxu0 %v17215_v32  ;;  %v17252_v32 = vld [vmem:[#allocation5 + $0x1e68] ss:$24 sps:$4 sm:$0xff]  }
 0x4f8   : > { %11159 = vmatpush1.bf16.msra.mxu1 %v17210_v26  ;;  %v17260_v26 = vld [vmem:[#allocation5 + $0x1e9c] ss:$24 sps:$4 sm:$0xff]  }
 0x4f9   : > { %11160 = vmatprep.subr.bf16.mxu1 %v17218_v19  ;;  %v22425_v19 = vld [vmem:[#allocation74_spill] sm:$0xff] }
 0x4fa   : > { %12275 = vmatpush1.bf16.msra.mxu0 %v17213_v61  ;;  %v17263_v61 = vld [vmem:[#allocation5 + $0x1ea4] ss:$24 sps:$4 sm:$0xff]  }
 0x4fb   : > { %12276 = vmatprep.subr.bf16.mxu0 %v17221_v14  ;;  %v17258_v14 = vld [vmem:[#allocation5 + $0x1e98] ss:$24 sps:$4 sm:$0xff]  }
 0x4fc   : > { %11161 = vmatpush1.bf16.msra.mxu1 %v17216_v13  ;;  %v17266_v13 = vld [vmem:[#allocation5 + $0x1ecc] ss:$24 sps:$4 sm:$0xff]  }
 0x4fd   : > { %11162 = vmatprep.subr.bf16.mxu1 %v17224_v2  ;;  %v22426_v2 = vld [vmem:[#allocation76_spill] sm:$0xff] }
 0x4fe   : > { %12277 = vmatpush1.bf16.msra.mxu0 %v17219_v29  ;;  %v17269_v29 = vld [vmem:[#allocation5 + $0x1ed4] ss:$24 sps:$4 sm:$0xff]  }
 0x4ff   : > { %12278 = vmatprep.subr.bf16.mxu0 %v17227_v21  ;;  %v17264_v21 = vld [vmem:[#allocation5 + $0x1ec8] ss:$24 sps:$4 sm:$0xff]  }
 0x500   : > { %11163 = vmatpush1.bf16.msra.mxu1 %v17222_v48  ;;  %v17267_v48 = vld [vmem:[#allocation5 + $0x1ed0] ss:$24 sps:$4 sm:$0xff]  }
 0x501   : > { %11164 = vmatprep.subr.bf16.mxu1 %v17230_v46  ;;  %v17275_v46 = vld [vmem:[#allocation5 + $0x1f04] ss:$24 sps:$4 sm:$0xff]  }
 0x502   : > { %12279 = vmatpush1.bf16.msra.mxu0 %v17225_v49  ;;  %v17272_v49 = vld [vmem:[#allocation5 + $0x1efc] ss:$24 sps:$4 sm:$0xff]  }
 0x503   : > { %12280 = vmatprep.subr.bf16.mxu0 %v17233_v53  ;;  %v22427_v53 = vld [vmem:[#allocation78_spill] sm:$0xff] }
 0x504   : > { %11165 = vmatpush1.bf16.msra.mxu1 %v17228_v44  ;;  %v17270_v44 = vld [vmem:[#allocation5 + $0x1ef8] ss:$24 sps:$4 sm:$0xff]  }
 0x505   : > { %11166 = vmatprep.subr.bf16.mxu1 %v17236_v28  ;;  %v17278_v28 = vld [vmem:[#allocation5 + $0x1f2c] ss:$24 sps:$4 sm:$0xff]  }
 0x506   : > { %12281 = vmatpush1.bf16.msra.mxu0 %v17231_v0  ;;  %v17273_v0 = vld [vmem:[#allocation5 + $0x1f00] ss:$24 sps:$4 sm:$0xff]  }
 0x507   : > { %12282 = vmatprep.subr.bf16.mxu0 %v17239_v1  ;;  %v17281_v1 = vld [vmem:[#allocation5 + $0x1f34] ss:$24 sps:$4 sm:$0xff]  }
 0x508   : > { %11167 = vmatpush1.bf16.msra.mxu1 %v17234_v27  ;;  %v22428_v27 = vld [vmem:[#allocation80_spill] sm:$0xff] }
 0x509   : > { %11229 = vmatprep.subr.bf16.mxu1 %v17242_v39  ;;  %v17279_v39 = vld [vmem:[#allocation5 + $0x1f30] ss:$24 sps:$4 sm:$0xff]  }
 0x50a   : > { %12283 = vmatpush1.bf16.msra.mxu0 %v17237_v59  ;;  %v17276_v59 = vld [vmem:[#allocation5 + $0x1f28] ss:$24 sps:$4 sm:$0xff]  }
 0x50b   : > { %12345 = vmatprep.subr.bf16.mxu0 %v17245_v50  ;;  %11169 = vmatmul.mubr.bf16.vlgmr.msra.gmra.mrb[24].mxu1 %v22423_v47  ;;  %v17284_v50 = vld [vmem:[#allocation5 + $0x1f5c] ss:$24 sps:$4 sm:$0xff]  }
 0x50c   : > { %11230 = vmatpush1.bf16.msra.mxu1 %v17240_v24  ;;  %11178 = vmatprep.mubr.bf16.mxu1 %v22424_v30  ;;  %v17287_v24 = vld [vmem:[#allocation5 + $0x1f64] ss:$24 sps:$4 sm:$0xff]  }
 0x50d   : > { %12285 = vmatmul.mubr.bf16.vlgmr.msra.gmra.mrb[24].mxu0 %v22423_v47  ;;  %11231 = vmatprep.subr.bf16.mxu1 %v17248_v18  ;;  %v17282_v18 = vld [vmem:[#allocation5 + $0x1f58] ss:$24 sps:$4 sm:$0xff]   ;;  %v17290_v47 = vld [vmem:[#allocation5 + $0x1f8c] ss:$24 sps:$4 sm:$0xff]  }
 0x50e   : > { %12346 = vmatpush1.bf16.msra.mxu0 %v17243_v20  ;;  %12294 = vmatprep.mubr.bf16.mxu0 %v22424_v30  ;;  %v22429_v20 = vld [vmem:[#allocation82_spill] sm:$0xff]  ;;  %v17296_v30 = vld [vmem:[#allocation5 + $0x1fbc] ss:$24 sps:$4 sm:$0xff]  }
 0x50f   : > { %12347 = vmatprep.subr.bf16.mxu0 %v17251_v38  ;;  %v17285_v38 = vld [vmem:[#allocation5 + $0x1f60] ss:$24 sps:$4 sm:$0xff]  }
 0x510   : > { %11232 = vmatpush1.bf16.msra.mxu1 %v17246_v10  ;;  %v17293_v10 = vld [vmem:[#allocation5 + $0x1f94] ss:$24 sps:$4 sm:$0xff]  }
 0x511   : > { %11233 = vmatprep.subr.bf16.mxu1 %v17254_v42  ;;  %v17288_v42 = vld [vmem:[#allocation5 + $0x1f88] ss:$24 sps:$4 sm:$0xff]  }
 0x512   : > { %12348 = vmatpush1.bf16.msra.mxu0 %v17249_v52  ;;  %v22430_v52 = vld [vmem:[#allocation84_spill] sm:$0xff] }
 0x513   : > { %12349 = vmatprep.subr.bf16.mxu0 %v17257_v25  ;;  %11179 = vmatmul.mubr.bf16.gmra.mrb[28].mxu1 %v22425_v19  ;;  %v17291_v25 = vld [vmem:[#allocation5 + $0x1f90] ss:$24 sps:$4 sm:$0xff]  }
 0x514   : > { %11234 = vmatpush1.bf16.msra.mxu1 %v17252_v32  ;;  %11188 = vmatprep.mubr.bf16.mxu1 %v22426_v2  ;;  %v17299_v32 = vld [vmem:[#allocation5 + $0x1fc4] ss:$24 sps:$4 sm:$0xff]  }
 0x515   : > { %12295 = vmatmul.mubr.bf16.gmra.mrb[28].mxu0 %v22425_v19  ;;  %11235 = vmatprep.subr.bf16.mxu1 %v17260_v26  ;;  %v17294_v26 = vld [vmem:[#allocation5 + $0x1fb8] ss:$24 sps:$4 sm:$0xff]   ;;  %v17302_v19 = vld [vmem:[#allocation5 + $0x1fec] ss:$24 sps:$4 sm:$0xff]  }
 0x516   : > { %12350 = vmatpush1.bf16.msra.mxu0 %v17255_v7  ;;  %12304 = vmatprep.mubr.bf16.mxu0 %v22426_v2  ;;  %v22431_v7 = vld [vmem:[#allocation86_spill] sm:$0xff]  ;;  %v17308_v2 = vld [vmem:[#allocation5 + $0x201c] ss:$24 sps:$4 sm:$0xff]  }
 0x517   : > { %12351 = vmatprep.subr.bf16.mxu0 %v17263_v61  ;;  %v17297_v61 = vld [vmem:[#allocation5 + $0x1fc0] ss:$24 sps:$4 sm:$0xff]  }
 0x518   : > { %11236 = vmatpush1.bf16.msra.mxu1 %v17258_v14  ;;  %v17305_v14 = vld [vmem:[#allocation5 + $0x1ff4] ss:$24 sps:$4 sm:$0xff]  }
 0x519   : > { %11237 = vmatprep.subr.bf16.mxu1 %v17266_v13  ;;  %v17300_v13 = vld [vmem:[#allocation5 + $0x1fe8] ss:$24 sps:$4 sm:$0xff]  }
 0x51a   : > { %12352 = vmatpush1.bf16.msra.mxu0 %v17261_v51  ;;  %v22432_v51 = vld [vmem:[#allocation88_spill] sm:$0xff] }
 0x51b   : > { %12353 = vmatprep.subr.bf16.mxu0 %v17269_v29  ;;  %11189 = vmatmul.mubr.bf16.gmra.mrb[32].mxu1 %v22427_v53  ;;  %v17303_v29 = vld [vmem:[#allocation5 + $0x1ff0] ss:$24 sps:$4 sm:$0xff]  }
 0x51c   : > { %11238 = vmatpush1.bf16.msra.mxu1 %v17264_v21  ;;  %11198 = vmatprep.mubr.bf16.mxu1 %v22428_v27  ;;  %v17311_v21 = vld [vmem:[#allocation5 + $0x2024] ss:$24 sps:$4 sm:$0xff]  }
 0x51d   : > { %12305 = vmatmul.mubr.bf16.gmra.mrb[32].mxu0 %v22427_v53  ;;  %11239 = vmatprep.subr.bf16.mxu1 %v17272_v49  ;;  %v17306_v49 = vld [vmem:[#allocation5 + $0x2018] ss:$24 sps:$4 sm:$0xff]   ;;  %v17314_v53 = vld [vmem:[#allocation5 + $0x204c] ss:$24 sps:$4 sm:$0xff]  }
 0x51e   : > { %12354 = vmatpush1.bf16.msra.mxu0 %v17267_v48  ;;  %12314 = vmatprep.mubr.bf16.mxu0 %v22428_v27  ;;  %v22433_v48 = vld [vmem:[#allocation90_spill] sm:$0xff]  ;;  %v17320_v27 = vld [vmem:[#allocation5 + $0x207c] ss:$24 sps:$4 sm:$0xff]  }
 0x51f   : > { %12355 = vmatprep.subr.bf16.mxu0 %v17275_v46  ;;  %v17309_v46 = vld [vmem:[#allocation5 + $0x2020] ss:$24 sps:$4 sm:$0xff]  }
 0x520   : > { %11240 = vmatpush1.bf16.msra.mxu1 %v17270_v44  ;;  %v17317_v44 = vld [vmem:[#allocation5 + $0x2054] ss:$24 sps:$4 sm:$0xff]  }
 0x521   : > { %11241 = vmatprep.subr.bf16.mxu1 %v17278_v28  ;;  %v17312_v28 = vld [vmem:[#allocation5 + $0x2048] ss:$24 sps:$4 sm:$0xff]  }
 0x522   : > { %12356 = vmatpush1.bf16.msra.mxu0 %v17273_v0  ;;  %v22434_v0 = vld [vmem:[#allocation92_spill] sm:$0xff] }
 0x523   : > { %12357 = vmatprep.subr.bf16.mxu0 %v17281_v1  ;;  %11199 = vmatmul.mubr.bf16.gmra.mrb[36].mxu1 %v22429_v20  ;;  %v17315_v1 = vld [vmem:[#allocation5 + $0x2050] ss:$24 sps:$4 sm:$0xff]  }
 0x524   : > { %11242 = vmatpush1.bf16.msra.mxu1 %v17276_v59  ;;  %11208 = vmatprep.mubr.bf16.mxu1 %v22430_v52  ;;  %v17323_v59 = vld [vmem:[#allocation5 + $0x2084] ss:$24 sps:$4 sm:$0xff]  }
 0x525   : > { %12315 = vmatmul.mubr.bf16.gmra.mrb[36].mxu0 %v22429_v20  ;;  %11243 = vmatprep.subr.bf16.mxu1 %v17284_v50  ;;  %v17321_v50 = vld [vmem:[#allocation5 + $0x2080] ss:$24 sps:$4 sm:$0xff]   ;;  %v17329_v20 = vld [vmem:[#allocation5 + $0x20b4] ss:$24 sps:$4 sm:$0xff]  }
 0x526   : > { %12358 = vmatpush1.bf16.msra.mxu0 %v17279_v39  ;;  %12324 = vmatprep.mubr.bf16.mxu0 %v22430_v52  ;;  %v17318_v39 = vld [vmem:[#allocation5 + $0x2078] ss:$24 sps:$4 sm:$0xff]  }
 0x527   : > { %12359 = vmatprep.subr.bf16.mxu0 %v17287_v24  ;;  %v17326_v24 = vld [vmem:[#allocation5 + $0x20ac] ss:$24 sps:$4 sm:$0xff]   ;;  %v17330_v52 = vld [vmem:[#allocation5 + $0x20d8] ss:$24 sps:$4 sm:$0xff]  }
 0x528   : > { %11244 = vmatpush1.bf16.msra.mxu1 %v17282_v18  ;;  %v17324_v18 = vld [vmem:[#allocation5 + $0x20a8] ss:$24 sps:$4 sm:$0xff]  }
 0x529   : > { %11245 = vmatprep.subr.bf16.mxu1 %v17290_v47  ;;  %v17332_v47 = vld [vmem:[#allocation5 + $0x20dc] ss:$24 sps:$4 sm:$0xff]  }
 0x52a   : > { %12360 = vmatpush1.bf16.msra.mxu0 %v17285_v38  ;;  %v17327_v38 = vld [vmem:[#allocation5 + $0x20b0] ss:$24 sps:$4 sm:$0xff]  }
 0x52b   : > { %12361 = vmatprep.subr.bf16.mxu0 %v17293_v10  ;;  %11209 = vmatmul.mubr.bf16.gmra.mrb[40].mxu1 %v22431_v7  ;;  %v17335_v10 = vld [vmem:[#allocation5 + $0x20e4] ss:$24 sps:$4 sm:$0xff]  }
 0x52c   : > { %11246 = vmatpush1.bf16.msra.mxu1 %v17288_v42  ;;  %11218 = vmatprep.mubr.bf16.mxu1 %v22432_v51  ;;  %v17333_v42 = vld [vmem:[#allocation5 + $0x20e0] ss:$24 sps:$4 sm:$0xff]  }
 0x52d   : > { %12325 = vmatmul.mubr.bf16.gmra.mrb[40].mxu0 %v22431_v7  ;;  %11247 = vmatprep.subr.bf16.mxu1 %v17296_v30  ;;  %v17341_v30 = vld [vmem:[#allocation5 + $0x2114] ss:$24 sps:$4 sm:$0xff]   ;;  %v17339_v7 = vld [vmem:[#allocation5 + $0x2110] ss:$24 sps:$4 sm:$0xff]  }
 0x52e   : > { %12362 = vmatpush1.bf16.msra.mxu0 %v17291_v25  ;;  %12334 = vmatprep.mubr.bf16.mxu0 %v22432_v51  ;;  %v17338_v25 = vld [vmem:[#allocation5 + $0x210c] ss:$24 sps:$4 sm:$0xff]   ;;  %v17345_v51 = vld [vmem:[#allocation5 + $0x2140] ss:$24 sps:$4 sm:$0xff]  }
 0x52f   : > { %12363 = vmatprep.subr.bf16.mxu0 %v17299_v32  ;;  %v17336_v32 = vld [vmem:[#allocation5 + $0x2108] ss:$24 sps:$4 sm:$0xff]  }
 0x530   : > { %11248 = vmatpush1.bf16.msra.mxu1 %v17294_v26  ;;  %v17344_v26 = vld [vmem:[#allocation5 + $0x213c] ss:$24 sps:$4 sm:$0xff]  }
 0x531   : > { %11249 = vmatprep.subr.bf16.mxu1 %v17302_v19  ;;  %v22435_v19 = vld [vmem:[#allocation94_spill] sm:$0xff] }
 0x532   : > { %12364 = vmatpush1.bf16.msra.mxu0 %v17297_v61  ;;  %v17347_v61 = vld [vmem:[#allocation5 + $0x2144] ss:$24 sps:$4 sm:$0xff]  }
 0x533   : > { %12365 = vmatprep.subr.bf16.mxu0 %v17305_v14  ;;  %11219 = vmatmul.mubr.bf16.gmra.mrb[44].mxu1 %v22433_v48  ;;  %v17342_v14 = vld [vmem:[#allocation5 + $0x2138] ss:$24 sps:$4 sm:$0xff]  }
 0x534   : > { %11250 = vmatpush1.bf16.msra.mxu1 %v17300_v13  ;;  %11261 = vmatprep.mubr.bf16.mxu1 %v22434_v0  ;;  %v17350_v13 = vld [vmem:[#allocation5 + $0x216c] ss:$24 sps:$4 sm:$0xff]  }
 0x535   : > { %12335 = vmatmul.mubr.bf16.gmra.mrb[44].mxu0 %v22433_v48  ;;  %11251 = vmatprep.subr.bf16.mxu1 %v17308_v2  ;;  %v22436_v2 = vld [vmem:[#allocation96_spill] sm:$0xff] }
 0x536   : > { %12366 = vmatpush1.bf16.msra.mxu0 %v17303_v29  ;;  %12377 = vmatprep.mubr.bf16.mxu0 %v22434_v0  ;;  %v17353_v29 = vld [vmem:[#allocation5 + $0x2174] ss:$24 sps:$4 sm:$0xff]   ;;  %v17351_v48 = vld [vmem:[#allocation5 + $0x2170] ss:$24 sps:$4 sm:$0xff]   ;;  %v17357_v0 = vld [vmem:[#allocation5 + $0x21a0] ss:$24 sps:$4 sm:$0xff]  }
 0x537   : > { %12367 = vmatprep.subr.bf16.mxu0 %v17311_v21  ;;  %v17348_v21 = vld [vmem:[#allocation5 + $0x2168] ss:$24 sps:$4 sm:$0xff]  }
 0x538   : > { %11252 = vmatpush1.bf16.msra.mxu1 %v17306_v49  ;;  %v17356_v49 = vld [vmem:[#allocation5 + $0x219c] ss:$24 sps:$4 sm:$0xff]  }
 0x539   : > { %11253 = vmatprep.subr.bf16.mxu1 %v17314_v53  ;;  %v22437_v53 = vld [vmem:[#allocation98_spill] sm:$0xff] }
 0x53a   : > { %12368 = vmatpush1.bf16.msra.mxu0 %v17309_v46  ;;  %v17359_v46 = vld [vmem:[#allocation5 + $0x21a4] ss:$24 sps:$4 sm:$0xff]  }
 0x53b   : > { %12369 = vmatprep.subr.bf16.mxu0 %v17317_v44  ;;  %v17354_v44 = vld [vmem:[#allocation5 + $0x2198] ss:$24 sps:$4 sm:$0xff]  }
 0x53c   : > { %11254 = vmatpush1.bf16.msra.mxu1 %v17312_v28  ;;  %v17362_v28 = vld [vmem:[#allocation5 + $0x21cc] ss:$24 sps:$4 sm:$0xff]  }
 0x53d   : > { %11255 = vmatprep.subr.bf16.mxu1 %v17320_v27  ;;  %v22438_v27 = vld [vmem:[#allocation100_spill] sm:$0xff] }
 0x53e   : > { %12370 = vmatpush1.bf16.msra.mxu0 %v17315_v1  ;;  %v17365_v1 = vld [vmem:[#allocation5 + $0x21d4] ss:$24 sps:$4 sm:$0xff]  }
 0x53f   : > { %12371 = vmatprep.subr.bf16.mxu0 %v17323_v59  ;;  %v17360_v59 = vld [vmem:[#allocation5 + $0x21c8] ss:$24 sps:$4 sm:$0xff]  }
 0x540   : > { %11256 = vmatpush1.bf16.msra.mxu1 %v17318_v39  ;;  %v17363_v39 = vld [vmem:[#allocation5 + $0x21d0] ss:$24 sps:$4 sm:$0xff]  }
 0x541   : > { %11257 = vmatprep.subr.bf16.mxu1 %v17326_v24  ;;  %v17371_v24 = vld [vmem:[#allocation5 + $0x2204] ss:$24 sps:$4 sm:$0xff]  }
 0x542   : > { %12372 = vmatpush1.bf16.msra.mxu0 %v17321_v50  ;;  %v17368_v50 = vld [vmem:[#allocation5 + $0x21fc] ss:$24 sps:$4 sm:$0xff]  }
 0x543   : > { %12373 = vmatprep.subr.bf16.mxu0 %v17329_v20  ;;  %v22439_v20 = vld [vmem:[#allocation102_spill] sm:$0xff] }
 0x544   : > { %11258 = vmatpush1.bf16.msra.mxu1 %v17324_v18  ;;  %v17366_v18 = vld [vmem:[#allocation5 + $0x21f8] ss:$24 sps:$4 sm:$0xff]  }
 0x545   : > { %11259 = vmatprep.subr.bf16.mxu1 %v17332_v47  ;;  %v17374_v47 = vld [vmem:[#allocation5 + $0x222c] ss:$24 sps:$4 sm:$0xff]  }
 0x546   : > { %12374 = vmatpush1.bf16.msra.mxu0 %v17327_v38  ;;  %v17369_v38 = vld [vmem:[#allocation5 + $0x2200] ss:$24 sps:$4 sm:$0xff]  }
 0x547   : > { %12375 = vmatprep.subr.bf16.mxu0 %v17335_v10  ;;  %v17377_v10 = vld [vmem:[#allocation5 + $0x2234] ss:$24 sps:$4 sm:$0xff]  }
 0x548   : > { %11260 = vmatpush1.bf16.msra.mxu1 %v17330_v52  ;;  %v22440_v52 = vld [vmem:[#allocation104_spill] sm:$0xff] }
 0x549   : > { %11322 = vmatprep.subr.bf16.mxu1 %v17338_v25  ;;  %v17375_v25 = vld [vmem:[#allocation5 + $0x2230] ss:$24 sps:$4 sm:$0xff]  }
 0x54a   : > { %12376 = vmatpush1.bf16.msra.mxu0 %v17333_v42  ;;  %v17372_v42 = vld [vmem:[#allocation5 + $0x2228] ss:$24 sps:$4 sm:$0xff]  }
 0x54b   : > { %12438 = vmatprep.subr.bf16.mxu0 %v17341_v30  ;;  %11262 = vmatmul.mubr.bf16.vlgmr.msra.gmra.mrb[24].mxu1 %v22435_v19  ;;  %v17380_v30 = vld [vmem:[#allocation5 + $0x225c] ss:$24 sps:$4 sm:$0xff]  }
 0x54c   : > { %11323 = vmatpush1.bf16.msra.mxu1 %v17336_v32  ;;  %11271 = vmatprep.mubr.bf16.mxu1 %v22436_v2  ;;  %v17383_v32 = vld [vmem:[#allocation5 + $0x2264] ss:$24 sps:$4 sm:$0xff]  }
 0x54d   : > { %12378 = vmatmul.mubr.bf16.vlgmr.msra.gmra.mrb[24].mxu0 %v22435_v19  ;;  %11324 = vmatprep.subr.bf16.mxu1 %v17344_v26  ;;  %v17378_v26 = vld [vmem:[#allocation5 + $0x2258] ss:$24 sps:$4 sm:$0xff]   ;;  %v17386_v19 = vld [vmem:[#allocation5 + $0x228c] ss:$24 sps:$4 sm:$0xff]  }
 0x54e   : > { %12439 = vmatpush1.bf16.msra.mxu0 %v17339_v7  ;;  %12387 = vmatprep.mubr.bf16.mxu0 %v22436_v2  ;;  %v22441_v7 = vld [vmem:[#allocation105_spill] sm:$0xff] }
 0x54f   : > { %12440 = vmatprep.subr.bf16.mxu0 %v17347_v61  ;;  %v17381_v61 = vld [vmem:[#allocation5 + $0x2260] ss:$24 sps:$4 sm:$0xff]   ;;  %v17392_v2 = vld [vmem:[#allocation5 + $0x22bc] ss:$24 sps:$4 sm:$0xff]  }
 0x550   : > { %11325 = vmatpush1.bf16.msra.mxu1 %v17342_v14  ;;  %v17389_v14 = vld [vmem:[#allocation5 + $0x2294] ss:$24 sps:$4 sm:$0xff]  }
 0x551   : > { %11326 = vmatprep.subr.bf16.mxu1 %v17350_v13  ;;  %v17384_v13 = vld [vmem:[#allocation5 + $0x2288] ss:$24 sps:$4 sm:$0xff]  }
 0x552   : > { %12441 = vmatpush1.bf16.msra.mxu0 %v17345_v51  ;;  %v22442_v51 = vld [vmem:[#allocation107_spill] sm:$0xff] }
 0x553   : > { %12442 = vmatprep.subr.bf16.mxu0 %v17353_v29  ;;  %11272 = vmatmul.mubr.bf16.gmra.mrb[28].mxu1 %v22437_v53  ;;  %v17387_v29 = vld [vmem:[#allocation5 + $0x2290] ss:$24 sps:$4 sm:$0xff]  }
 0x554   : > { %11327 = vmatpush1.bf16.msra.mxu1 %v17348_v21  ;;  %11281 = vmatprep.mubr.bf16.mxu1 %v22438_v27  ;;  %v17395_v21 = vld [vmem:[#allocation5 + $0x22c4] ss:$24 sps:$4 sm:$0xff]  }
 0x555   : > { %12388 = vmatmul.mubr.bf16.gmra.mrb[28].mxu0 %v22437_v53  ;;  %11328 = vmatprep.subr.bf16.mxu1 %v17356_v49  ;;  %v17390_v49 = vld [vmem:[#allocation5 + $0x22b8] ss:$24 sps:$4 sm:$0xff]   ;;  %v17398_v53 = vld [vmem:[#allocation5 + $0x22ec] ss:$24 sps:$4 sm:$0xff]  }
 0x556   : > { %12443 = vmatpush1.bf16.msra.mxu0 %v17351_v48  ;;  %12397 = vmatprep.mubr.bf16.mxu0 %v22438_v27  ;;  %v22443_v48 = vld [vmem:[#allocation109_spill] sm:$0xff] }
 0x557   : > { %12444 = vmatprep.subr.bf16.mxu0 %v17359_v46  ;;  %v17393_v46 = vld [vmem:[#allocation5 + $0x22c0] ss:$24 sps:$4 sm:$0xff]   ;;  %v17404_v27 = vld [vmem:[#allocation5 + $0x231c] ss:$24 sps:$4 sm:$0xff]  }
 0x558   : > { %11329 = vmatpush1.bf16.msra.mxu1 %v17354_v44  ;;  %v17401_v44 = vld [vmem:[#allocation5 + $0x22f4] ss:$24 sps:$4 sm:$0xff]  }
 0x559   : > { %11330 = vmatprep.subr.bf16.mxu1 %v17362_v28  ;;  %v17396_v28 = vld [vmem:[#allocation5 + $0x22e8] ss:$24 sps:$4 sm:$0xff]  }
 0x55a   : > { %12445 = vmatpush1.bf16.msra.mxu0 %v17357_v0  ;;  %v22444_v0 = vld [vmem:[#allocation111_spill] sm:$0xff] }
 0x55b   : > { %12446 = vmatprep.subr.bf16.mxu0 %v17365_v1  ;;  %11282 = vmatmul.mubr.bf16.gmra.mrb[32].mxu1 %v22439_v20  ;;  %v17399_v1 = vld [vmem:[#allocation5 + $0x22f0] ss:$24 sps:$4 sm:$0xff]  }
 0x55c   : > { %11331 = vmatpush1.bf16.msra.mxu1 %v17360_v59  ;;  %11291 = vmatprep.mubr.bf16.mxu1 %v22440_v52  ;;  %v17407_v59 = vld [vmem:[#allocation5 + $0x2324] ss:$24 sps:$4 sm:$0xff]  }
 0x55d   : > { %12398 = vmatmul.mubr.bf16.gmra.mrb[32].mxu0 %v22439_v20  ;;  %11332 = vmatprep.subr.bf16.mxu1 %v17368_v50  ;;  %v17402_v50 = vld [vmem:[#allocation5 + $0x2318] ss:$24 sps:$4 sm:$0xff]   ;;  %v17410_v20 = vld [vmem:[#allocation5 + $0x234c] ss:$24 sps:$4 sm:$0xff]  }
 0x55e   : > { %12447 = vmatpush1.bf16.msra.mxu0 %v17363_v39  ;;  %12407 = vmatprep.mubr.bf16.mxu0 %v22440_v52  ;;  %v22445_v39 = vld [vmem:[#allocation113_spill] sm:$0xff] }
 0x55f   : > { %12448 = vmatprep.subr.bf16.mxu0 %v17371_v24  ;;  %v17405_v24 = vld [vmem:[#allocation5 + $0x2320] ss:$24 sps:$4 sm:$0xff]   ;;  %v17416_v52 = vld [vmem:[#allocation5 + $0x237c] ss:$24 sps:$4 sm:$0xff]  }
 0x560   : > { %11333 = vmatpush1.bf16.msra.mxu1 %v17366_v18  ;;  %v17413_v18 = vld [vmem:[#allocation5 + $0x2354] ss:$24 sps:$4 sm:$0xff]  }
 0x561   : > { %11334 = vmatprep.subr.bf16.mxu1 %v17374_v47  ;;  %v17408_v47 = vld [vmem:[#allocation5 + $0x2348] ss:$24 sps:$4 sm:$0xff]  }
 0x562   : > { %12449 = vmatpush1.bf16.msra.mxu0 %v17369_v38  ;;  %v22446_v38 = vld [vmem:[#allocation115_spill] sm:$0xff] }
 0x563   : > { %12450 = vmatprep.subr.bf16.mxu0 %v17377_v10  ;;  %11292 = vmatmul.mubr.bf16.gmra.mrb[36].mxu1 %v22441_v7  ;;  %v17411_v10 = vld [vmem:[#allocation5 + $0x2350] ss:$24 sps:$4 sm:$0xff]  }
 0x564   : > { %11335 = vmatpush1.bf16.msra.mxu1 %v17372_v42  ;;  %11301 = vmatprep.mubr.bf16.mxu1 %v22442_v51  ;;  %v17419_v42 = vld [vmem:[#allocation5 + $0x2384] ss:$24 sps:$4 sm:$0xff]  }
 0x565   : > { %12408 = vmatmul.mubr.bf16.gmra.mrb[36].mxu0 %v22441_v7  ;;  %11336 = vmatprep.subr.bf16.mxu1 %v17380_v30  ;;  %v17417_v30 = vld [vmem:[#allocation5 + $0x2380] ss:$24 sps:$4 sm:$0xff]   ;;  %v17425_v7 = vld [vmem:[#allocation5 + $0x23b4] ss:$24 sps:$4 sm:$0xff]  }
 0x566   : > { %12451 = vmatpush1.bf16.msra.mxu0 %v17375_v25  ;;  %12417 = vmatprep.mubr.bf16.mxu0 %v22442_v51  ;;  %v17414_v25 = vld [vmem:[#allocation5 + $0x2378] ss:$24 sps:$4 sm:$0xff]  }
 0x567   : > { %12452 = vmatprep.subr.bf16.mxu0 %v17383_v32  ;;  %v17422_v32 = vld [vmem:[#allocation5 + $0x23ac] ss:$24 sps:$4 sm:$0xff]   ;;  %v17426_v51 = vld [vmem:[#allocation5 + $0x23d8] ss:$24 sps:$4 sm:$0xff]  }
 0x568   : > { %11337 = vmatpush1.bf16.msra.mxu1 %v17378_v26  ;;  %v17420_v26 = vld [vmem:[#allocation5 + $0x23a8] ss:$24 sps:$4 sm:$0xff]  }
 0x569   : > { %11338 = vmatprep.subr.bf16.mxu1 %v17386_v19  ;;  %v17428_v19 = vld [vmem:[#allocation5 + $0x23dc] ss:$24 sps:$4 sm:$0xff]  }
 0x56a   : > { %12453 = vmatpush1.bf16.msra.mxu0 %v17381_v61  ;;  %v17423_v61 = vld [vmem:[#allocation5 + $0x23b0] ss:$24 sps:$4 sm:$0xff]  }
 0x56b   : > { %12454 = vmatprep.subr.bf16.mxu0 %v17389_v14  ;;  %11302 = vmatmul.mubr.bf16.gmra.mrb[40].mxu1 %v22443_v48  ;;  %v17431_v14 = vld [vmem:[#allocation5 + $0x23e4] ss:$24 sps:$4 sm:$0xff]  }
 0x56c   : > { %11339 = vmatpush1.bf16.msra.mxu1 %v17384_v13  ;;  %11311 = vmatprep.mubr.bf16.mxu1 %v22444_v0  ;;  %v17429_v13 = vld [vmem:[#allocation5 + $0x23e0] ss:$24 sps:$4 sm:$0xff]  }
 0x56d   : > { %12418 = vmatmul.mubr.bf16.gmra.mrb[40].mxu0 %v22443_v48  ;;  %11340 = vmatprep.subr.bf16.mxu1 %v17392_v2  ;;  %v22448_v2 = vld [vmem:[#allocation119_spill] sm:$0xff] }
 0x56e   : > { %12455 = vmatpush1.bf16.msra.mxu0 %v17387_v29  ;;  %12427 = vmatprep.mubr.bf16.mxu0 %v22444_v0  ;;  %v22447_v29 = vld [vmem:[#allocation117_spill] sm:$0xff]  ;;  %v22450_v48 = vld [vmem:[#allocation123_spill] sm:$0xff] }
 0x56f   : > { %12456 = vmatprep.subr.bf16.mxu0 %v17395_v21  ;;  %v22449_v21 = vld [vmem:[#allocation121_spill] sm:$0xff]  ;;  %v12532_v0 = vld [vmem:[%s18596_s15 + $0x8] sm:$0xff] }
 0x570   : > { %11341 = vmatpush1.bf16.msra.mxu1 %v17390_v49  ;;  %v22451_v49 = vld [vmem:[#allocation124_spill] sm:$0xff] }
 0x571   : > { %11342 = vmatprep.subr.bf16.mxu1 %v17398_v53  ;;  %v22453_v53 = vld [vmem:[#allocation126_spill] sm:$0xff] }
 0x572   : > { %12457 = vmatpush1.bf16.msra.mxu0 %v17393_v46  ;;  %v22452_v46 = vld [vmem:[#allocation125_spill] sm:$0xff] }
 0x573   : > { %12458 = vmatprep.subr.bf16.mxu0 %v17401_v44  ;;  %11312 = vmatmul.mubr.bf16.gmra.mrb[44].mxu1 %v22445_v39  ;;  %v12531_v44 = vld [vmem:[%s18596_s15] sm:$0xff] }
 0x574   : > { %11343 = vmatpush1.bf16.msra.mxu1 %v17396_v28  ;;  %11354 = vmatprep.mubr.bf16.mxu1 %v22446_v38  ;;  %v12537_v28 = vld [vmem:[%s18596_s15 + $0x30] sm:$0xff] }
 0x575   : > { %12428 = vmatmul.mubr.bf16.gmra.mrb[44].mxu0 %v22445_v39  ;;  %11344 = vmatprep.subr.bf16.mxu1 %v17404_v27  ;;  %v20716_v27 = vadd.f32 %v20414_v15, %v12532_v0  ;;  %v12550_v39 = vld [vmem:[%s18596_s15 + $0x98] sm:$0xff] }
 0x576   : > { %12459 = vmatpush1.bf16.msra.mxu0 %v17399_v1  ;;  %12470 = vmatprep.mubr.bf16.mxu0 %v22446_v38  ;;  %v12538_v1 = vld [vmem:[%s18596_s15 + $0x38] sm:$0xff]  ;;  %v12556_v38 = vld [vmem:[%s18596_s15 + $0xc8] sm:$0xff] }
 0x577   : > { %12460 = vmatprep.subr.bf16.mxu0 %v17407_v59  ;;  %22455 = vst [vmem:[#allocation47_spill] sm:$0xff] %v20716_v27  ;;  %v12544_v59 = vld [vmem:[%s18596_s15 + $0x68] sm:$0xff]  ;;  %v12586_v0 = vld [vmem:[%s18596_s15 + $0x1b8] sm:$0xff] }
 0x578   : > { %11345 = vmatpush1.bf16.msra.mxu1 %v17402_v50  ;;  %v20726_v50 = vadd.f32 %v20420_v56, %v12538_v1  ;;  %v20732_v15 = vadd.f32 %v20432_v12, %v12544_v59  ;;  %v12555_v56 = vld [vmem:[%s18596_s15 + $0xc0] sm:$0xff] }
 0x579   : > { %11346 = vmatprep.subr.bf16.mxu1 %v17410_v20  ;;  %v12773_v20 = vmul.f32 %v20716_v27, %v20716_v27 }
 0x57a   : > { %12461 = vmatpush1.bf16.msra.mxu0 %v17405_v24  ;;  %22457 = vst [vmem:[#allocation51_spill] sm:$0xff] %v20726_v50  ;;  %22459 = vst [vmem:[#allocation55_spill] sm:$0xff] %v20732_v15  ;;  %v12779_v12 = vmul.f32 %v20726_v50, %v20726_v50 }
 0x57b   : > { %12462 = vmatprep.subr.bf16.mxu0 %v17413_v18  ;;  %v20742_v18 = vadd.f32 %v20438_v63, %v12550_v39  ;;  %v12567_v63 = vld [vmem:[%s18596_s15 + $0x120] sm:$0xff] }
 0x57c   : > { %11347 = vmatpush1.bf16.msra.mxu1 %v17408_v47  ;;  %v12561_v47 = vld [vmem:[%s18596_s15 + $0xf0] sm:$0xff] }
 0x57d   : > { %11348 = vmatprep.subr.bf16.mxu1 %v17416_v52  ;;  %22461 = vst [vmem:[#allocation59_spill] sm:$0xff] %v20742_v18 }
 0x57e   : > { %12463 = vmatpush1.bf16.msra.mxu0 %v17411_v10  ;;  %v12562_v10 = vld [vmem:[%s18596_s15 + $0xf8] sm:$0xff] }
 0x57f   : > { %12464 = vmatprep.subr.bf16.mxu0 %v17419_v42  ;;  %v12568_v42 = vld [vmem:[%s18596_s15 + $0x128] sm:$0xff] }
 0x580   : > { %11349 = vmatpush1.bf16.msra.mxu1 %v17414_v25 }
 0x581   : > { %11350 = vmatprep.subr.bf16.mxu1 %v17422_v32 }
 0x582   : > { %12465 = vmatpush1.bf16.msra.mxu0 %v17417_v30 }
 0x583   : > { %12466 = vmatprep.subr.bf16.mxu0 %v17425_v7  ;;  %v12791_v7 = vmul.f32 %v20742_v18, %v20742_v18 }
 0x584   : > { %11351 = vmatpush1.bf16.msra.mxu1 %v17420_v26  ;;  %v20769_v26 = vadd.f32 %v20446_v58, %v12555_v56  ;;  %v20787_v58 = vadd.f32 %v20460_v5, %v12567_v63  ;;  %v20807_v5 = vsub.s32 2, %v20388_v8  ;;  %v20844_v56 = vadd.f32 %v20483_v35, %v12586_v0 }
 0x585   : > { %11352 = vmatprep.subr.bf16.mxu1 %v17428_v19  ;;  %v20775_v19 = vadd.f32 %v20453_v62, %v12561_v47  ;;  %v20860_v35 = vsub.s32 5, %v20388_v8 }
 0x586   : > { %12467 = vmatpush1.bf16.msra.mxu0 %v17423_v61  ;;  %22462 = vst [vmem:[#allocation61_spill] sm:$0xff] %v20769_v26  ;;  %v20772_v61 = vadd.f32 %v20449_v9, %v12556_v38  ;;  %22466 = vst [vmem:[#allocation69_spill] sm:$0xff] %v20787_v58  ;;  %v20790_v9 = vadd.f32 %v20463_v23, %v12568_v42  ;;  %v12796_v1 = vmul.f32 %v20769_v26, %v20769_v26 }
 0x587   : > { %12468 = vmatprep.subr.bf16.mxu0 %v17431_v14  ;;  %22464 = vst [vmem:[#allocation65_spill] sm:$0xff] %v20775_v19  ;;  %v20778_v14 = vadd.f32 %v20456_v33, %v12562_v10  ;;  %v12802_v59 = vmul.f32 %v20775_v19, %v20775_v19  ;;  %22474 = vst [vmem:[#allocation85_spill] sm:$0xff] %v20844_v56  ;;  %v20850_v38 = vsub.s32 4, %v20388_v8 }
 0x588   : > { %11353 = vmatpush1.bf16.msra.mxu1 %v17426_v51  ;;  %22463 = vst [vmem:[#allocation63_spill] sm:$0xff] %v20772_v61  ;;  %v12573_v51 = vld [vmem:[%s18596_s15 + $0x150] sm:$0xff]  ;;  %22467 = vst [vmem:[#allocation71_spill] sm:$0xff] %v20790_v9  ;;  %v20864_v47 = vadd.f32 %v20772_v61, %v20769_v26  ;;  %v20876_v63 = vadd.f32 %v20790_v9, %v20787_v58  ;;  %v12592_v26 = vld [vmem:[%s18596_s15 + $0x1e8] sm:$0xff] }
 0x589   : > { %22465 = vst [vmem:[#allocation67_spill] sm:$0xff] %v20778_v14  ;;  %v20812_v23 = vadd.f32 %v20466_v45, %v12573_v51  ;;  %v12803_v45 = vmul.f32 %v20778_v14, %v20778_v14  ;;  %22475 = vst [vmem:[#allocation87_spill] sm:$0xff] %v20850_v38 }
 0x58a   : > { %12469 = vmatpush1.bf16.msra.mxu0 %v17429_v13  ;;  %v12574_v13 = vld [vmem:[%s18596_s15 + $0x158] sm:$0xff]  ;;  %22476 = vst [vmem:[#allocation89_spill] sm:$0xff] %v20860_v35 }
 0x58b   : > { %11355 = vmatmul.mubr.bf16.vlgmr.msra.gmra.mrb[24].mxu1 %v22447_v29  ;;  %22468 = vst [vmem:[#allocation73_spill] sm:$0xff] %v20812_v23 }
 0x58c   : > { %11364 = vmatprep.mubr.bf16.mxu1 %v22448_v2 }
 0x58d   : > { %12471 = vmatmul.mubr.bf16.vlgmr.msra.gmra.mrb[24].mxu0 %v22447_v29 }
 0x58e   : > { %12480 = vmatprep.mubr.bf16.mxu0 %v22448_v2 }
 0x593   : > { %11365 = vmatmul.mubr.bf16.gmra.mrb[28].mxu1 %v22449_v21 }
 0x594   : > { %11374 = vmatprep.mubr.bf16.mxu1 %v22450_v48 }
 0x595   : > { %12481 = vmatmul.mubr.bf16.gmra.mrb[28].mxu0 %v22449_v21 }
 0x596   : > { %12490 = vmatprep.mubr.bf16.mxu0 %v22450_v48  ;;  %v12579_v48 = vld [vmem:[%s18596_s15 + $0x180] sm:$0xff] }
 0x597   : > { %v20835_v39 = vadd.f32 %v20474_v36, %v12579_v48  ;;  %v12814_v36 = vmul.f32 %v20812_v23, %v20812_v23 }
 0x599   : > { %22471 = vst [vmem:[#allocation79_spill] sm:$0xff] %v20835_v39 }
 0x59b   : > { %11375 = vmatmul.mubr.bf16.gmra.mrb[32].mxu1 %v22451_v49 }
 0x59c   : > { %11384 = vmatprep.mubr.bf16.mxu1 %v22452_v46 }
 0x59d   : > { %12491 = vmatmul.mubr.bf16.gmra.mrb[32].mxu0 %v22451_v49  ;;  %v12580_v49 = vld [vmem:[%s18596_s15 + $0x188] sm:$0xff] }
 0x59e   : > { %12500 = vmatprep.mubr.bf16.mxu0 %v22452_v46 }
 0x5a3   : > { %11385 = vmatmul.mubr.bf16.gmra.mrb[36].mxu1 %v22453_v53 }
 0x5a4   : > { %11394 = vmatprep.mubr.bf16.mxu1 %v20304_v17 }
 0x5a5   : > { %12501 = vmatmul.mubr.bf16.gmra.mrb[36].mxu0 %v22453_v53  ;;  %v20815_v53 = vadd.f32 %v20468_v34, %v12574_v13  ;;  %v12808_v34 = vmul.f32 %v20787_v58, %v20787_v58  ;;  %v12533_v13 = vld [vmem:[%s18596_s15 + $0x10] sm:$0xff] }
 0x5a6   : > { %12510 = vmatprep.mubr.bf16.mxu0 %v20304_v17  ;;  %v20713_v17 = vadd.f32 %v20410_v3, %v12531_v44  ;;  %v12585_v44 = vld [vmem:[%s18596_s15 + $0x1b0] sm:$0xff] }
 0x5a7   : > { %22469 = vst [vmem:[#allocation75_spill] sm:$0xff] %v20815_v53 }
 0x5a8   : > { %22454 = vst [vmem:[#allocation45_spill] sm:$0xff] %v20713_v17  ;;  %v12772_v24 = vmul.f32 %v20713_v17, %v20713_v17  ;;  %v20760_v25 = vadd.f32 %v20716_v27, %v20713_v17 }
 0x5aa   : > { %v20762_v30 = vadd.f32 %v12773_v20, %v12772_v24  ;;  %v20838_v24 = vadd.f32 %v20478_v40, %v12580_v49  ;;  %v20841_v20 = vadd.f32 %v20480_v54, %v12585_v44  ;;  %v12815_v40 = vmul.f32 %v20815_v53, %v20815_v53 }
 0x5ab   : > { %11395 = vmatmul.mubr.bf16.gmra.mrb[40].mxu1 %v20315_v55  ;;  %v12827_v49 = vmul.f32 %v20844_v56, %v20844_v56 }
 0x5ac   : > { %11404 = vmatprep.mubr.bf16.mxu1 %v20325_v11  ;;  %22472 = vst [vmem:[#allocation81_spill] sm:$0xff] %v20838_v24  ;;  %22473 = vst [vmem:[#allocation83_spill] sm:$0xff] %v20841_v20  ;;  %v12826_v48 = vmul.f32 %v20841_v20, %v20841_v20 }
 0x5ad   : > { %12511 = vmatmul.mubr.bf16.gmra.mrb[40].mxu0 %v20315_v55  ;;  %v12543_v55 = vld [vmem:[%s18596_s15 + $0x60] sm:$0xff] }
 0x5ae   : > { %12520 = vmatprep.mubr.bf16.mxu0 %v20325_v11  ;;  %v12549_v11 = vld [vmem:[%s18596_s15 + $0x90] sm:$0xff]  ;;  %v20729_v3 = vadd.f32 %v20429_v6, %v12543_v55  ;;  %v12797_v55 = vmul.f32 %v20772_v61, %v20772_v61 }
 0x5b0   : > { %22458 = vst [vmem:[#allocation53_spill] sm:$0xff] %v20729_v3  ;;  %v12784_v52 = vmul.f32 %v20729_v3, %v20729_v3  ;;  %v20796_v62 = vadd.f32 %v20732_v15, %v20729_v3  ;;  %v20866_v10 = vadd.f32 %v12797_v55, %v12796_v1 }
 0x5b3   : > { %11405 = vmatmul.mubr.bf16.gmra.mrb[44].mxu1 %v20331_v60 }
 0x5b5   : > { %12521 = vmatmul.mubr.bf16.gmra.mrb[44].mxu0 %v20331_v60  ;;  %v20723_v60 = vadd.f32 %v20418_v16, %v12537_v28  ;;  %v20739_v16 = vadd.f32 %v20435_v43, %v12549_v11  ;;  %v12785_v43 = vmul.f32 %v20732_v15, %v20732_v15  ;;  %v20820_v28 = vsub.s32 3, %v20388_v8 }
 0x5b6   : > { %v12809_v11 = vmul.f32 %v20790_v9, %v20790_v9  ;;  %v12820_v8 = vmul.f32 %v20835_v39, %v20835_v39 }
 0x5b7   : > { %22456 = vst [vmem:[#allocation49_spill] sm:$0xff] %v20723_v60  ;;  %22460 = vst [vmem:[#allocation57_spill] sm:$0xff] %v20739_v16  ;;  %v12778_v6 = vmul.f32 %v20723_v60, %v20723_v60  ;;  %v12790_v32 = vmul.f32 %v20739_v16, %v20739_v16  ;;  %v20784_v29 = vadd.f32 %v20726_v50, %v20723_v60 }
 0x5b8   : > { %v20798_v33 = vadd.f32 %v12785_v43, %v12784_v52  ;;  %v20802_v21 = vadd.f32 %v20742_v18, %v20739_v16  ;;  %22470 = vst [vmem:[#allocation77_spill] sm:$0xff] %v20820_v28  ;;  %v20870_v52 = vadd.f32 %v20778_v14, %v20775_v19  ;;  %v20872_v43 = vadd.f32 %v12803_v45, %v12802_v59  ;;  %v12534_v59 = vld [vmem:[%s18596_s15 + $0x18] sm:$0xff]  ;;  %v12539_v14 = vld [vmem:[%s18596_s15 + $0x40] sm:$0xff]  ;;  %v12597_v18 = vld [vmem:[%s18596_s15 + $0x210] sm:$0xff] }
 0x5b9   : > { %v20792_v2 = vadd.f32 %v12779_v12, %v12778_v6  ;;  %v20809_v46 = vadd.f32 %v12791_v7, %v12790_v32  ;;  %v18032_v6 = vld [vmem:[#allocation7] sm:$0x3f]  ;;  %v20878_v42 = vadd.f32 %v12809_v11, %v12808_v34  ;;  %v12821_v32 = vmul.f32 %v20838_v24, %v20838_v24  ;;  %v12591_v7 = vld [vmem:[%s18596_s15 + $0x1e0] sm:$0xff] }
 0x5ba   : > { %v20847_v12 = vrot.slane %v18032_v6, %v20807_v5  ;;  %v20857_v54 = vrot.slane %v18032_v6, %v20820_v28  ;;  %v20892_v0 = vrot.slane %v18032_v6, %v20850_v38  ;;  %v20897_v45 = vadd.f32 %v20815_v53, %v20812_v23 }
 0x5bb   : > { %v20899_v34 = vadd.f32 %v12815_v40, %v12814_v36  ;;  %v20903_v9 = vrot.slane %v18032_v6, %v20860_v35  ;;  %v20908_v19 = vadd.f32 %v20838_v24, %v20835_v39  ;;  %v20911_v61 = vadd.f32 %v20491_v4, %v12591_v7  ;;  %v12540_v6 = vld [vmem:[%s18596_s15 + $0x48] sm:$0xff] }
 0x5bc   : > { %v20917_v23 = vadd.f32 %v12821_v32, %v12820_v8 }
 0x5bd   : > { %22477 = vst [vmem:[#allocation91_spill] sm:$0xff] %v20911_v61 }
 0x65e   : > { %v11356_v51 = vpop.f32.mrb[24].mxu1 }
 0x65f   : > { %v14778_v44 = vadd.f32 %v11356_v51, %v20847_v12  ;;  %v11358_v55 = vpop.f32.mrb[25].mxu1 }
 0x660   : > { %v12472_v1 = vpop.f32.mrb[24].mxu0  ;;  %v14779_v11 = vadd.f32 %v11358_v55, %v20857_v54  ;;  %v11360_v58 = vpop.f32.mrb[26].mxu1 }
 0x661   : > { %v12474_v51 = vpop.f32.mrb[25].mxu0  ;;  %v20913_v53 = vadd.f32 %v14778_v44, %v12533_v13  ;;  %v14780_v36 = vadd.f32 %v11360_v58, %v20847_v12  ;;  %v11362_v55 = vpop.f32.mrb[27].mxu1  ;;  %v20927_v58 = vadd.f32 %v20844_v56, %v20841_v20  ;;  %v20929_v13 = vadd.f32 %v12827_v49, %v12826_v48  ;;  %v12541_v44 = vld [vmem:[%s18596_s15 + $0x50] sm:$0xff] }
 0x662   : > { %v12476_v40 = vpop.f32.mrb[26].mxu0  ;;  %v20921_v16 = vadd.f32 %v14779_v11, %v12534_v59  ;;  %v14781_v4 = vadd.f32 %v11362_v55, %v20857_v54  ;;  %v14802_v8 = vadd.f32 %v12472_v1, %v20892_v0  ;;  %v12535_v59 = vld [vmem:[%s18596_s15 + $0x20] sm:$0xff]  ;;  %v14803_v11 = vadd.f32 %v12474_v51, %v20903_v9  ;;  %v12536_v1 = vld [vmem:[%s18596_s15 + $0x28] sm:$0xff] }
 0x663   : > { %22478 = vst [vmem:[#allocation93_spill] sm:$0xff] %v20913_v53  ;;  %v14804_v24 = vadd.f32 %v12476_v40, %v20892_v0  ;;  %v12478_v7 = vpop.f32.mrb[27].mxu0  ;;  %v20932_v32 = vadd.f32 %v14780_v36, %v12539_v14  ;;  %v12676_v39 = vadd.f32 %v20760_v25, %v20913_v53  ;;  %v20944_v48 = vmul.f32 %v20911_v61, %v20911_v61  ;;  %v12542_v36 = vld [vmem:[%s18596_s15 + $0x58] sm:$0xff] }
 0x664   : > { %22479 = vst [vmem:[#allocation95_spill] sm:$0xff] %v20921_v16  ;;  %v20937_v40 = vadd.f32 %v14781_v4, %v12540_v6  ;;  %v14805_v55 = vadd.f32 %v12478_v7, %v20903_v9  ;;  %v20947_v49 = vadd.f32 %v20495_v41, %v12592_v26  ;;  %v20950_v14 = vadd.f32 %v20498_v22, %v12597_v18  ;;  %v12545_v7 = vld [vmem:[%s18596_s15 + $0x70] sm:$0xff] }
 0x665   : > { %22480 = vst [vmem:[#allocation97_spill] sm:$0xff] %v20932_v32  ;;  %v12780_v51 = vmul.f32 %v20932_v32, %v20932_v32  ;;  %v12683_v6 = vadd.f32 %v20784_v29, %v20932_v32  ;;  %v20958_v25 = vadd.f32 %v14804_v24, %v12541_v44  ;;  %v12677_v41 = vadd.f32 %v12676_v39, %v20921_v16  ;;  %v12546_v24 = vld [vmem:[%s18596_s15 + $0x78] sm:$0xff] }
 0x666   : > { %22481 = vst [vmem:[#allocation99_spill] sm:$0xff] %v20937_v40  ;;  %22482 = vst [vmem:[#allocation101_spill] sm:$0xff] %v20947_v49  ;;  %v11366_v4 = vpop.f32.mrb[28].mxu1  ;;  %v12781_v22 = vmul.f32 %v20937_v40, %v20937_v40  ;;  %v12774_v18 = vmul.f32 %v20913_v53, %v20913_v53  ;;  %v20966_v26 = vadd.f32 %v14802_v8, %v12535_v59  ;;  %v12551_v8 = vld [vmem:[%s18596_s15 + $0xa0] sm:$0xff]  ;;  %v12598_v59 = vld [vmem:[%s18596_s15 + $0x218] sm:$0xff] }
 0x667   : > { %22483 = vst [vmem:[#allocation103_spill] sm:$0xff] %v20950_v14  ;;  %22484 = vst [vmem:[#allocation106_spill] sm:$0xff] %v20958_v25  ;;  %v14782_v56 = vadd.f32 %v11366_v4, %v20847_v12  ;;  %v11368_v29 = vpop.f32.mrb[29].mxu1  ;;  %v12852_v44 = vadd.f32 %v20792_v2, %v12780_v51  ;;  %v12775_v15 = vmul.f32 %v20921_v16, %v20921_v16 }
 0x668   : > { %22485 = vst [vmem:[#allocation108_spill] sm:$0xff] %v20966_v26  ;;  %v12482_v20 = vpop.f32.mrb[28].mxu0  ;;  %v20973_v39 = vadd.f32 %v14803_v11, %v12536_v1  ;;  %v20975_v3 = vadd.f32 %v14805_v55, %v12542_v36  ;;  %v14783_v32 = vadd.f32 %v11368_v29, %v20857_v54  ;;  %v11370_v60 = vpop.f32.mrb[30].mxu1  ;;  %v12678_v51 = vadd.f32 %v12677_v41, %v20966_v26  ;;  %v12552_v41 = vld [vmem:[%s18596_s15 + $0xa8] sm:$0xff] }
 0x669   : > { %v12484_v50 = vpop.f32.mrb[29].mxu0  ;;  %v20980_v4 = vadd.f32 %v14782_v56, %v12545_v7  ;;  %v14784_v53 = vadd.f32 %v11370_v60, %v20847_v12  ;;  %v11372_v2 = vpop.f32.mrb[31].mxu1  ;;  %v12853_v11 = vadd.f32 %v12852_v44, %v12781_v22  ;;  %v12782_v29 = vmul.f32 %v20958_v25, %v20958_v25 }
 0x66a   : > { %22486 = vst [vmem:[#allocation110_spill] sm:$0xff] %v20973_v39  ;;  %22487 = vst [vmem:[#allocation112_spill] sm:$0xff] %v20975_v3  ;;  %v12486_v27 = vpop.f32.mrb[30].mxu0  ;;  %v20984_v1 = vadd.f32 %v14783_v32, %v12546_v24  ;;  %v14785_v55 = vadd.f32 %v11372_v2, %v20857_v54  ;;  %v12684_v16 = vadd.f32 %v12683_v6, %v20937_v40 }
 0x66b   : > { %22488 = vst [vmem:[#allocation114_spill] sm:$0xff] %v20980_v4  ;;  %v12488_v36 = vpop.f32.mrb[31].mxu0  ;;  %v12690_v56 = vadd.f32 %v20796_v62, %v20980_v4  ;;  %v14806_v60 = vadd.f32 %v12482_v20, %v20892_v0  ;;  %v20993_v7 = vadd.f32 %v14784_v53, %v12551_v8  ;;  %v12845_v22 = vadd.f32 %v20762_v30, %v12774_v18  ;;  %v12547_v20 = vld [vmem:[%s18596_s15 + $0x80] sm:$0xff] }
 0x66c   : > { %22489 = vst [vmem:[#allocation116_spill] sm:$0xff] %v20984_v1  ;;  %v20999_v32 = vadd.f32 %v20947_v49, %v20911_v61  ;;  %v12833_v24 = vmul.f32 %v20947_v49, %v20947_v49  ;;  %v21005_v6 = vmul.f32 %v20950_v14, %v20950_v14  ;;  %v21008_v62 = vadd.f32 %v20500_v37, %v12598_v59 }
 0x66d   : > { %22490 = vst [vmem:[#allocation118_spill] sm:$0xff] %v20993_v7  ;;  %v12679_v53 = vadd.f32 %v12678_v51, %v20973_v39  ;;  %v12783_v30 = vmul.f32 %v20975_v3, %v20975_v3  ;;  %v12854_v18 = vadd.f32 %v12853_v11, %v12782_v29  ;;  %v12776_v44 = vmul.f32 %v20966_v26, %v20966_v26 }
 0x66e   : > { %22491 = vst [vmem:[#allocation120_spill] sm:$0xff] %v21008_v62  ;;  %v12697_v8 = vadd.f32 %v20802_v21, %v20993_v7  ;;  %v21018_v2 = vadd.f32 %v14785_v55, %v12552_v41  ;;  %v11376_v49 = vpop.f32.mrb[32].mxu1  ;;  %v12685_v37 = vadd.f32 %v12684_v16, %v20958_v25  ;;  %v12691_v59 = vadd.f32 %v12690_v56, %v20984_v1  ;;  %v12548_v16 = vld [vmem:[%s18596_s15 + $0x88] sm:$0xff] }
 0x66f   : > { %v21022_v51 = vadd.f32 %v14806_v60, %v12547_v20  ;;  %v14807_v11 = vadd.f32 %v12484_v50, %v20903_v9  ;;  %12680 = vadd.xlane.f32.xlu0 %v12679_v53  ;;  %v11378_v61 = vpop.f32.mrb[33].mxu1  ;;  %v12855_v40 = vadd.f32 %v12854_v18, %v12783_v30  ;;  %v12846_v26 = vadd.f32 %v12845_v22, %v12775_v15  ;;  %v12553_v53 = vld [vmem:[%s18596_s15 + $0xb0] sm:$0xff] }
 0x670   : > { %22492 = vst [vmem:[#allocation122_spill] sm:$0xff] %v21018_v2  ;;  %v12492_v29 = vpop.f32.mrb[32].mxu0  ;;  %v21026_v21 = vadd.f32 %v12833_v24, %v20944_v48  ;;  %v21030_v55 = vadd.f32 %v21008_v62, %v20950_v14  ;;  %v14808_v56 = vadd.f32 %v12486_v27, %v20892_v0  ;;  %v14786_v60 = vadd.f32 %v11376_v49, %v20847_v12  ;;  %v11380_v20 = vpop.f32.mrb[34].mxu1  ;;  %v12557_v15 = vld [vmem:[%s18596_s15 + $0xd0] sm:$0xff] }
 0x671   : > { %22493 = vst [vmem:[#allocation20_spill] sm:$0xff] %v21022_v51  ;;  %v12494_v41 = vpop.f32.mrb[33].mxu0  ;;  %v21037_v50 = vmul.f32 %v21008_v62, %v21008_v62  ;;  %12856 = vadd.xlane.f32.xlu1 %v12855_v40  ;;  %v12686_v48 = vadd.f32 %v12685_v37, %v20975_v3  ;;  %v11382_v24 = vpop.f32.mrb[35].mxu1  ;;  %v12692_v30 = vadd.f32 %v12691_v59, %v21022_v51 }
 0x672   : > { %v12496_v22 = vpop.f32.mrb[34].mxu0  ;;  %v12847_v27 = vadd.f32 %v12846_v26, %v12776_v44  ;;  %v12786_v49 = vmul.f32 %v20980_v4, %v20980_v4  ;;  %v14787_v18 = vadd.f32 %v11378_v61, %v20857_v54  ;;  %v12777_v14 = vmul.f32 %v20973_v39, %v20973_v39  ;;  %v12558_v44 = vld [vmem:[%s18596_s15 + $0xd8] sm:$0xff]  ;;  %v12563_v39 = vld [vmem:[%s18596_s15 + $0x100] sm:$0xff] }
 0x673   : > { %v12498_v62 = vpop.f32.mrb[35].mxu0  ;;  %v12698_v40 = vadd.f32 %v12697_v8, %v21018_v2  ;;  %v12787_v37 = vmul.f32 %v20984_v1, %v20984_v1  ;;  %v21051_v3 = vadd.f32 %v14807_v11, %v12548_v16  ;;  %v14809_v26 = vadd.f32 %v12488_v36, %v20903_v9  ;;  %12687 = vadd.xlane.f32.xlu0 %v12686_v48  ;;  %v12554_v4 = vld [vmem:[%s18596_s15 + $0xb8] sm:$0xff]  ;;  %v12559_v16 = vld [vmem:[%s18596_s15 + $0xe0] sm:$0xff] }
 0x674   : > { %v14788_v59 = vadd.f32 %v11380_v20, %v20847_v12  ;;  %v21056_v61 = vadd.f32 %v14808_v56, %v12553_v53  ;;  %v21059_v25 = vadd.f32 %v14786_v60, %v12557_v15  ;;  %v14810_v8 = vadd.f32 %v12492_v29, %v20892_v0  ;;  %v12564_v56 = vld [vmem:[%s18596_s15 + $0x108] sm:$0xff] }
 0x675   : > { %22494 = vst [vmem:[#allocation21_spill] sm:$0xff] %v21051_v3  ;;  %v14789_v1 = vadd.f32 %v11382_v24, %v20857_v54  ;;  %v12792_v11 = vmul.f32 %v20993_v7, %v20993_v7  ;;  %v21068_v36 = vmul.f32 %v21018_v2, %v21018_v2  ;;  %v12693_v20 = vadd.f32 %v12692_v30, %v21051_v3  ;;  %v12560_v7 = vld [vmem:[%s18596_s15 + $0xe8] sm:$0xff]  ;;  %v12565_v2 = vld [vmem:[%s18596_s15 + $0x110] sm:$0xff] }
 0x676   : > { %22495 = vst [vmem:[#allocation22_spill] sm:$0xff] %v21059_v25  ;;  %v12848_v60 = vadd.f32 %v12847_v27, %v12777_v14  ;;  %v21073_v53 = vadd.f32 %v14787_v18, %v12558_v44  ;;  %v14811_v29 = vadd.f32 %v12494_v41, %v20903_v9  ;;  %v14812_v15 = vadd.f32 %v12496_v22, %v20892_v0  ;;  %v11386_v48 = vpop.f32.mrb[36].mxu1 }
 0x677   : > { %v12699_v24 = vadd.f32 %v12698_v40, %v21056_v61  ;;  %v21078_v17 = vadd.f32 %v14809_v26, %v12554_v4  ;;  %v21081_v35 = vadd.f32 %v14788_v59, %v12563_v39  ;;  %12694 = vadd.xlane.f32.xlu1 %v12693_v20  ;;  %v11388_v30 = vpop.f32.mrb[37].mxu1  ;;  %v12859_v14 = vadd.f32 %v20798_v33, %v12786_v49 }
 0x678   : > { %22496 = vst [vmem:[#allocation23_spill] sm:$0xff] %v21073_v53  ;;  %12849 = vadd.xlane.f32.xlu0 %v12848_v60  ;;  %v12502_v28 = vpop.f32.mrb[36].mxu0  ;;  %v12704_v41 = vadd.f32 %v20864_v47, %v21059_v25  ;;  %v21089_v22 = vmul.f32 %v21059_v25, %v21059_v25  ;;  %v21091_v4 = vadd.f32 %v14810_v8, %v12559_v16  ;;  %v11390_v18 = vpop.f32.mrb[38].mxu1  ;;  %v12566_v60 = vld [vmem:[%s18596_s15 + $0x118] sm:$0xff]  ;;  %v12576_v25 = vld [vmem:[%s18596_s15 + $0x168] sm:$0xff] }
 0x679   : > { %22497 = vst [vmem:[#allocation24_spill] sm:$0xff] %v21081_v35  ;;  %v21093_v27 = vadd.f32 %v14789_v1, %v12564_v56  ;;  %v12504_v39 = vpop.f32.mrb[37].mxu0  ;;  %v14790_v40 = vadd.f32 %v11386_v48, %v20847_v12  ;;  %v12700_v26 = vadd.f32 %v12699_v24, %v21078_v17  ;;  %v12788_v33 = vmul.f32 %v21022_v51, %v21022_v51  ;;  %v11392_v44 = vpop.f32.mrb[39].mxu1  ;;  %v12569_v56 = vld [vmem:[%s18596_s15 + $0x130] sm:$0xff] }
 0x67a   : > { %22498 = vst [vmem:[#allocation25_spill] sm:$0xff] %v21091_v4  ;;  %v12860_v47 = vadd.f32 %v12859_v14, %v12787_v37  ;;  %v12506_v49 = vpop.f32.mrb[38].mxu0  ;;  %v21101_v59 = vmul.f32 %v21073_v53, %v21073_v53  ;;  %v21103_v1 = vadd.f32 %v14811_v29, %v12560_v7  ;;  %v21105_v8 = vadd.f32 %v14812_v15, %v12565_v2  ;;  %v12570_v15 = vld [vmem:[%s18596_s15 + $0x138] sm:$0xff] }
 0x67b   : > { %22499 = vst [vmem:[#allocation26_spill] sm:$0xff] %v21093_v27  ;;  %v14813_v16 = vadd.f32 %v12498_v62, %v20903_v9  ;;  %v12508_v20 = vpop.f32.mrb[39].mxu0  ;;  %v12711_v37 = vadd.f32 %v20870_v52, %v21081_v35  ;;  %v14791_v48 = vadd.f32 %v11388_v30, %v20857_v54  ;;  %12701 = vadd.xlane.f32.xlu1 %v12700_v26  ;;  %v12571_v26 = vld [vmem:[%s18596_s15 + $0x140] sm:$0xff] }
 0x67c   : > { %22500 = vst [vmem:[#allocation27_spill] sm:$0xff] %v21103_v1  ;;  %22501 = vst [vmem:[#allocation28_spill] sm:$0xff] %v21105_v8  ;;  %v12789_v7 = vmul.f32 %v21051_v3, %v21051_v3  ;;  %v12861_v29 = vadd.f32 %v12860_v47, %v12788_v33  ;;  %v21117_v2 = vmul.f32 %v21081_v35, %v21081_v35  ;;  %v12575_v47 = vld [vmem:[%s18596_s15 + $0x160] sm:$0xff] }
 0x67d   : > { %v14814_v62 = vadd.f32 %v12502_v28, %v20892_v0  ;;  %v14792_v24 = vadd.f32 %v11390_v18, %v20847_v12  ;;  %v14793_v52 = vadd.f32 %v11392_v44, %v20857_v54  ;;  %v21125_v30 = vmul.f32 %v21093_v27, %v21093_v27 }
 0x67e   : > { %v21127_v14 = vadd.f32 %v14790_v40, %v12569_v56  ;;  %v12862_v33 = vadd.f32 %v12861_v29, %v12789_v7  ;;  %v12866_v35 = vadd.f32 %v20809_v46, %v12792_v11  ;;  %v21133_v28 = vadd.f32 %v14813_v16, %v12566_v60  ;;  %v11396_v51 = vpop.f32.mrb[40].mxu1  ;;  %v12572_v40 = vld [vmem:[%s18596_s15 + $0x148] sm:$0xff]  ;;  %v12577_v29 = vld [vmem:[%s18596_s15 + $0x170] sm:$0xff] }
 0x67f   : > { %v14815_v3 = vadd.f32 %v12504_v39, %v20903_v9  ;;  %v12794_v18 = vmul.f32 %v21056_v61, %v21056_v61  ;;  %v12705_v44 = vadd.f32 %v12704_v41, %v21073_v53  ;;  %v21139_v38 = vadd.f32 %v14791_v48, %v12570_v15  ;;  %v11398_v11 = vpop.f32.mrb[41].mxu1 }
 0x680   : > { %22502 = vst [vmem:[#allocation29_spill] sm:$0xff] %v21127_v14  ;;  %12863 = vadd.xlane.f32.xlu0 %v12862_v33  ;;  %v14816_v56 = vadd.f32 %v12506_v49, %v20892_v0  ;;  %v12867_v7 = vadd.f32 %v12866_v35, %v21068_v36  ;;  %v12512_v46 = vpop.f32.mrb[40].mxu0  ;;  %v12712_v16 = vadd.f32 %v12711_v37, %v21093_v27  ;;  %v11400_v33 = vpop.f32.mrb[42].mxu1  ;;  %v12581_v27 = vld [vmem:[%s18596_s15 + $0x190] sm:$0xff] }
 0x681   : > { %22503 = vst [vmem:[#allocation30_spill] sm:$0xff] %v21139_v38  ;;  %v21145_v39 = vadd.f32 %v14814_v62, %v12571_v26  ;;  %v21147_v60 = vadd.f32 %v14792_v24, %v12575_v47  ;;  %v21150_v41 = vadd.f32 %v14793_v52, %v12576_v25  ;;  %v12706_v48 = vadd.f32 %v12705_v44, %v21091_v4  ;;  %v12514_v15 = vpop.f32.mrb[41].mxu0  ;;  %v11402_v24 = vpop.f32.mrb[43].mxu1  ;;  %v12578_v26 = vld [vmem:[%s18596_s15 + $0x178] sm:$0xff] }
 0x682   : > { %v12718_v35 = vadd.f32 %v20876_v63, %v21127_v14  ;;  %v14817_v36 = vadd.f32 %v12508_v20, %v20903_v9  ;;  %v12795_v49 = vmul.f32 %v21078_v17, %v21078_v17  ;;  %v12868_v37 = vadd.f32 %v12867_v7, %v12794_v18  ;;  %v12516_v62 = vpop.f32.mrb[42].mxu0 }
 0x683   : > { %22504 = vst [vmem:[#allocation31_spill] sm:$0xff] %v21147_v60  ;;  %v21160_v25 = vmul.f32 %v21127_v14, %v21127_v14  ;;  %v21162_v52 = vadd.f32 %v14815_v3, %v12572_v40  ;;  %v12707_v47 = vadd.f32 %v12706_v48, %v21103_v1  ;;  %v14794_v44 = vadd.f32 %v11396_v51, %v20847_v12  ;;  %v12518_v63 = vpop.f32.mrb[43].mxu0 }
 0x684   : > { %v21169_v20 = vmul.f32 %v21139_v38, %v21139_v38  ;;  %v21171_v18 = vadd.f32 %v14816_v56, %v12577_v29  ;;  %v12869_v7 = vadd.f32 %v12868_v37, %v12795_v49  ;;  %v12713_v14 = vadd.f32 %v12712_v16, %v21105_v8  ;;  %v12582_v37 = vld [vmem:[%s18596_s15 + $0x198] sm:$0xff] }
 0x685   : > { %v12725_v3 = vadd.f32 %v20897_v45, %v21147_v60  ;;  %v21179_v40 = vmul.f32 %v21147_v60, %v21147_v60  ;;  %v21183_v51 = vmul.f32 %v21150_v41, %v21150_v41  ;;  %12708 = vadd.xlane.f32.xlu0 %v12707_v47  ;;  %v12873_v56 = vadd.f32 %v20866_v10, %v21089_v22  ;;  %v12587_v10 = vld [vmem:[%s18596_s15 + $0x1c0] sm:$0xff] }
 0x686   : > { %v21187_v29 = vadd.f32 %v14817_v36, %v12578_v26  ;;  %12870 = vadd.xlane.f32.xlu1 %v12869_v7  ;;  %v14818_v16 = vadd.f32 %v12512_v46, %v20892_v0  ;;  %v14795_v45 = vadd.f32 %v11398_v11, %v20857_v54  ;;  %v14796_v48 = vadd.f32 %v11400_v33, %v20847_v12  ;;  %v11406_v36 = vpop.f32.mrb[44].mxu1  ;;  %v12583_v7 = vld [vmem:[%s18596_s15 + $0x1a0] sm:$0xff] }
 0x687   : > { %v21192_v49 = vadd.f32 %v14794_v44, %v12581_v27  ;;  %v12800_v47 = vmul.f32 %v21091_v4, %v21091_v4  ;;  %v12874_v60 = vadd.f32 %v12873_v56, %v21101_v59  ;;  %v12880_v22 = vadd.f32 %v20872_v43, %v21117_v2  ;;  %v11408_v44 = vpop.f32.mrb[45].mxu1  ;;  %v12588_v4 = vld [vmem:[%s18596_s15 + $0x1c8] sm:$0xff] }
 0x688   : > { %v14819_v46 = vadd.f32 %v12514_v15, %v20903_v9  ;;  %v12714_v11 = vadd.f32 %v12713_v14, %v21133_v28  ;;  %v14797_v27 = vadd.f32 %v11402_v24, %v20857_v54  ;;  %v12719_v33 = vadd.f32 %v12718_v35, %v21139_v38  ;;  %v12522_v26 = vpop.f32.mrb[44].mxu0  ;;  %v11410_v53 = vpop.f32.mrb[46].mxu1  ;;  %v12584_v24 = vld [vmem:[%s18596_s15 + $0x1a8] sm:$0xff] }
 0x689   : > { %v12801_v59 = vmul.f32 %v21103_v1, %v21103_v1  ;;  %v12875_v56 = vadd.f32 %v12874_v60, %v12800_v47  ;;  %v12806_v43 = vmul.f32 %v21105_v8, %v21105_v8  ;;  %v12881_v2 = vadd.f32 %v12880_v22, %v21125_v30  ;;  %v12524_v15 = vpop.f32.mrb[45].mxu0  ;;  %v11412_v1 = vpop.f32.mrb[47].mxu1 }
 0x68a   : > { %v21212_v14 = vadd.f32 %v14795_v45, %v12582_v37  ;;  %12715 = vadd.xlane.f32.xlu1 %v12714_v11  ;;  %v21215_v35 = vadd.f32 %v14796_v48, %v12587_v10  ;;  %v14820_v38 = vadd.f32 %v12516_v62, %v20892_v0  ;;  %v12720_v60 = vadd.f32 %v12719_v33, %v21145_v39  ;;  %v21219_v47 = vpop.f32.mrb[46].mxu0  ;;  %v12589_v62 = vld [vmem:[%s18596_s15 + $0x1d0] sm:$0xff] }
 0x68b   : > { %v12876_v8 = vadd.f32 %v12875_v56, %v12801_v59  ;;  %v12807_v30 = vmul.f32 %v21133_v28, %v21133_v28  ;;  %v12882_v22 = vadd.f32 %v12881_v2, %v12806_v43  ;;  %v14798_v45 = vadd.f32 %v11406_v36, %v20847_v12  ;;  %v21224_v37 = vpop.f32.mrb[47].mxu0  ;;  %v12593_v33 = vld [vmem:[%s18596_s15 + $0x1f0] sm:$0xff] }
 0x68c   : > { %v12732_v48 = vadd.f32 %v20908_v19, %v21192_v49  ;;  %v21228_v10 = vadd.f32 %v14818_v16, %v12583_v7  ;;  %v21231_v11 = vadd.f32 %v14797_v27, %v12588_v4  ;;  %v12726_v59 = vadd.f32 %v12725_v3, %v21150_v41  ;;  %v12594_v7 = vld [vmem:[%s18596_s15 + $0x1f8] sm:$0xff] }
 0x68d   : > { %v12822_v56 = vmul.f32 %v21192_v49, %v21192_v49  ;;  %v21237_v43 = vadd.f32 %v14819_v46, %v12584_v24  ;;  %12877 = vadd.xlane.f32.xlu0 %v12876_v8  ;;  %v12883_v36 = vadd.f32 %v12882_v22, %v12807_v30  ;;  %v12721_v2 = vadd.f32 %v12720_v60, %v21162_v52 }
 0x68e   : > { %v12823_v19 = vmul.f32 %v21212_v14, %v21212_v14  ;;  %v14821_v16 = vadd.f32 %v12518_v63, %v20903_v9  ;;  %v14799_v4 = vadd.f32 %v11408_v44, %v20857_v54  ;;  %v12727_v27 = vadd.f32 %v12726_v59, %v21171_v18  ;;  %v12600_v59 = vld [vmem:[%s18596_s15 + $0x228] sm:$0xff] }
 0x68f   : > { %v12739_v3 = vadd.f32 %v20927_v58, %v21215_v35  ;;  %v21247_v46 = vadd.f32 %v14820_v38, %v12589_v62  ;;  %12884 = vadd.xlane.f32.xlu1 %v12883_v36  ;;  %v21249_v8 = vadd.f32 %v14798_v45, %v12593_v33  ;;  %v12887_v24 = vadd.f32 %v20878_v42, %v21160_v25  ;;  %v12599_v25 = vld [vmem:[%s18596_s15 + $0x220] sm:$0xff] }
 0x690   : > { %v12828_v63 = vmul.f32 %v21215_v35, %v21215_v35  ;;  %v12829_v44 = vmul.f32 %v21231_v11, %v21231_v11  ;;  %v14822_v60 = vadd.f32 %v12522_v26, %v20892_v0  ;;  %v14800_v58 = vadd.f32 %v11410_v53, %v20847_v12  ;;  %v12595_v45 = vld [vmem:[%s18596_s15 + $0x200] sm:$0xff] }
 0x691   : > { %22505 = vst [vmem:[#allocation32_spill] sm:$0xff] %v21247_v46  ;;  %22506 = vst [vmem:[#allocation33_spill] sm:$0xff] %v21249_v8  ;;  %12722 = vadd.xlane.f32.xlu0 %v12721_v2  ;;  %v14823_v38 = vadd.f32 %v12524_v15, %v20903_v9  ;;  %v12728_v30 = vadd.f32 %v12727_v27, %v21187_v29  ;;  %v12812_v22 = vmul.f32 %v21145_v39, %v21145_v39 }
 0x692   : > { %v12888_v42 = vadd.f32 %v12887_v24, %v21169_v20  ;;  %v21267_v62 = vadd.f32 %v14799_v4, %v12594_v7  ;;  %v14801_v33 = vadd.f32 %v11412_v1, %v20857_v54  ;;  %v12894_v12 = vadd.f32 %v20899_v34, %v21179_v40 }
 0x693   : > { %v12733_v53 = vadd.f32 %v12732_v48, %v21212_v14  ;;  %v12746_v26 = vadd.f32 %v20999_v32, %v21249_v8  ;;  %12729 = vadd.xlane.f32.xlu1 %v12728_v30  ;;  %v12813_v15 = vmul.f32 %v21162_v52, %v21162_v52  ;;  %v12818_v36 = vmul.f32 %v21171_v18, %v21171_v18 }
 0x694   : > { %22507 = vst [vmem:[#allocation34_spill] sm:$0xff] %v21267_v62  ;;  %v12889_v20 = vadd.f32 %v12888_v42, %v12812_v22  ;;  %v21280_v2 = vadd.f32 %v14800_v58, %v12599_v25  ;;  %v12895_v54 = vadd.f32 %v12894_v12, %v21183_v51  ;;  %v12740_v1 = vadd.f32 %v12739_v3, %v21231_v11  ;;  %v12590_v58 = vld [vmem:[%s18596_s15 + $0x1d8] sm:$0xff] }
 0x695   : > { %v12734_v34 = vadd.f32 %v12733_v53, %v21228_v10  ;;  %v12834_v32 = vmul.f32 %v21249_v8, %v21249_v8  ;;  %v21287_v40 = vadd.f32 %v14822_v60, %v12595_v45  ;;  %v12901_v4 = vadd.f32 %v20917_v23, %v12822_v56  ;;  %v12596_v53 = vld [vmem:[%s18596_s15 + $0x208] sm:$0xff] }
 0x696   : > { %22508 = vst [vmem:[#allocation35_spill] sm:$0xff] %v21280_v2  ;;  %v12890_v48 = vadd.f32 %v12889_v20, %v12813_v15  ;;  %v21290_v27 = vadd.f32 %v14801_v33, %v12600_v59  ;;  %v12819_v7 = vmul.f32 %v21187_v29, %v21187_v29  ;;  %v12896_v24 = vadd.f32 %v12895_v54, %v12818_v36  ;;  %v12601_v15 = vld [vmem:[%s18596_s15 + $0x230] sm:$0xff] }
 0x697   : > { %22509 = vst [vmem:[#allocation36_spill] sm:$0xff] %v21287_v40  ;;  %v12824_v51 = vmul.f32 %v21228_v10, %v21228_v10  ;;  %v12735_v3 = vadd.f32 %v12734_v34, %v21237_v43  ;;  %v12902_v30 = vadd.f32 %v12901_v4, %v12823_v19  ;;  %v12908_v60 = vadd.f32 %v20929_v13, %v12828_v63 }
 0x698   : > { %22510 = vst [vmem:[#allocation37_spill] sm:$0xff] %v21290_v27  ;;  %12891 = vadd.xlane.f32.xlu0 %v12890_v48  ;;  %v12747_v23 = vadd.f32 %v12746_v26, %v21267_v62  ;;  %v12753_v56 = vadd.f32 %v21030_v55, %v21280_v2  ;;  %v12840_v22 = vmul.f32 %v21280_v2, %v21280_v2 }
 0x699   : > { %v12897_v42 = vadd.f32 %v12896_v24, %v12819_v7  ;;  %v12741_v25 = vadd.f32 %v12740_v1, %v21247_v46  ;;  %v12835_v45 = vmul.f32 %v21267_v62, %v21267_v62  ;;  %v12903_v33 = vadd.f32 %v12902_v30, %v12824_v51 }
 0x69a   : > { %v12909_v12 = vadd.f32 %v12908_v60, %v12829_v44  ;;  %v12915_v19 = vadd.f32 %v21026_v21, %v12834_v32  ;;  %v12921_v13 = vadd.f32 %v21037_v50, %v21005_v6  ;;  %v21310_v63 = vadd.f32 %v14821_v16, %v12590_v58  ;;  %v12602_v32 = vld [vmem:[%s18596_s15 + $0x238] sm:$0xff] }
 0x69b   : > { %v14824_v55 = vadd.f32 %v21219_v47, %v20892_v0  ;;  %12898 = vadd.xlane.f32.xlu1 %v12897_v42  ;;  %v12830_v26 = vmul.f32 %v21247_v46, %v21247_v46  ;;  %v12841_v44 = vmul.f32 %v21290_v27, %v21290_v27  ;;  %v12825_v21 = vmul.f32 %v21237_v43, %v21237_v43 }
 0x69c   : > { %22511 = vst [vmem:[#allocation38_spill] sm:$0xff] %v21310_v63  ;;  %12736 = vadd.xlane.f32.xlu0 %v12735_v3  ;;  %v12748_v6 = vadd.f32 %v12747_v23, %v21287_v40  ;;  %v12742_v50 = vadd.f32 %v12741_v25, %v21310_v63  ;;  %v12754_v0 = vadd.f32 %v12753_v56, %v21290_v27 }
 0x69d   : > { %v12910_v16 = vadd.f32 %v12909_v12, %v12830_v26  ;;  %v12922_v47 = vadd.f32 %v12921_v13, %v12840_v22  ;;  %v21325_v20 = vadd.f32 %v14823_v38, %v12596_v53  ;;  %v12904_v59 = vadd.f32 %v12903_v33, %v12825_v21  ;;  %v13132_v21 = vld [vmem:[#allocation10] sm:$0x3f] }
 0x69e   : > { %v12916_v36 = vadd.f32 %v12915_v19, %v12835_v45  ;;  %v21327_v54 = vadd.f32 %v14824_v55, %v12601_v15  ;;  %v14825_v34 = vadd.f32 %v21224_v37, %v20903_v9  ;;  %v12831_v1 = vmul.f32 %v21310_v63, %v21310_v63 }
 0x69f   : > { %22512 = vst [vmem:[#allocation39_spill] sm:$0xff] %v21325_v20  ;;  %12743 = vadd.xlane.f32.xlu1 %v12742_v50  ;;  %v12749_v48 = vadd.f32 %v12748_v6, %v21325_v20  ;;  %v12836_v4 = vmul.f32 %v21287_v40, %v21287_v40  ;;  %v12923_v24 = vadd.f32 %v12922_v47, %v12841_v44  ;;  %v13236_v6 = vld [vmem:[#allocation11] sm:$0x3f] }
 0x6a0   : > { %22513 = vst [vmem:[#allocation40_spill] sm:$0xff] %v21327_v54  ;;  %12905 = vadd.xlane.f32.xlu0 %v12904_v59  ;;  %v12911_v38 = vadd.f32 %v12910_v16, %v12831_v1  ;;  %v12755_v7 = vadd.f32 %v12754_v0, %v21327_v54  ;;  %v21338_v58 = vadd.f32 %v14825_v34, %v12602_v32 }
 0x6a1   : > { %v12917_v51 = vadd.f32 %v12916_v36, %v12836_v4  ;;  %v12842_v9 = vmul.f32 %v21327_v54, %v21327_v54  ;;  %v12837_v37 = vmul.f32 %v21325_v20, %v21325_v20  ;;  %v21358_v47 = vrot.slane %v13132_v21, %v20392_v57 }
 0x6a2   : > { %22514 = vst [vmem:[#allocation41_spill] sm:$0xff] %v21338_v58  ;;  %v12756_v3 = vadd.f32 %v12755_v7, %v21338_v58  ;;  %v12843_v23 = vmul.f32 %v21338_v58, %v21338_v58  ;;  %v21361_v59 = vrot.slane %v13236_v6, %v20392_v57  ;;  %v21364_v36 = vrot.slane %v13132_v21, %v20396_v31 }
 0x6a3   : > { %12912 = vadd.xlane.f32.xlu1 %v12911_v38  ;;  %v12924_v30 = vadd.f32 %v12923_v24, %v12842_v9  ;;  %v12918_v60 = vadd.f32 %v12917_v51, %v12837_v37  ;;  %v21367_v34 = vrot.slane %v13236_v6, %v20396_v31  ;;  %v21370_v1 = vrot.slane %v13132_v21, %v20807_v5  ;;  %v22516_v24 = vld [vmem:[#allocation77_spill] sm:$0xff] }
 0x6a4   : > { %12750 = vadd.xlane.f32.xlu0 %v12749_v48  ;;  %v21373_v32 = vrot.slane %v13236_v6, %v20807_v5  ;;  %v22515_v48 = vld [vmem:[#allocation87_spill] sm:$0xff]  ;;  %v21382_v51 = vrot.slane %v13132_v21, %v22516_v24  ;;  %v21387_v37 = vrot.slane %v13236_v6, %v22516_v24  ;;  %v22517_v5 = vld [vmem:[#allocation89_spill] sm:$0xff] }
 0x6a5   : > { %v12925_v56 = vadd.f32 %v12924_v30, %v12843_v23  ;;  %v21376_v4 = vrot.slane %v13132_v21, %v22515_v48  ;;  %v21379_v57 = vrot.slane %v13236_v6, %v22515_v48  ;;  %v21393_v30 = vrot.slane %v13236_v6, %v22517_v5  ;;  %v22526_v48 = vld [vmem:[#allocation97_spill] sm:$0xff] }
 0x6a7   : > { %12757 = vadd.xlane.f32.xlu1 %v12756_v3  ;;  %v21390_v3 = vrot.slane %v13132_v21, %v22517_v5  ;;  %v22524_v21 = vld [vmem:[#allocation49_spill] sm:$0xff] }
 0x6a8   : > { %12919 = vadd.xlane.f32.xlu0 %v12918_v60  ;;  %v22518_v60 = vld [vmem:[#allocation45_spill] sm:$0xff] }
 0x6ab   : > { %12926 = vadd.xlane.f32.xlu1 %v12925_v56  ;;  %v22519_v56 = vld [vmem:[#allocation47_spill] sm:$0xff] }
 0x6fc   : > { %v12681_v22 = vpop.xlane.xlu0 %12680 }
 0x6fd   : > { %v21349_v33 = vmul.f32 0.0013020834, %v12681_v22 }
 0x6fe   : > { %v12857_v42 = vpop.xlane.xlu1 %12856 }
 0x6ff   : > { %v12929_v12 = vmul.f32 0.0013020834, %v12857_v42  ;;  %v12940_v15 = vmul.f32 %v21349_v33, %v21349_v33  ;;  %v12988_v23 = vsub.f32 %v22518_v60, %v21349_v33  ;;  %v12989_v22 = vsub.f32 %v22519_v56, %v21349_v33  ;;  %v22520_v42 = vld [vmem:[#allocation93_spill] sm:$0xff]  ;;  %v22529_v60 = vld [vmem:[#allocation112_spill] sm:$0xff] }
 0x700   : > { %v12688_v25 = vpop.xlane.xlu0 %12687 }
 0x701   : > { %v21347_v45 = vmul.f32 0.0013020834, %v12688_v25  ;;  %v12990_v25 = vsub.f32 %v22520_v42, %v21349_v33 }
 0x703   : > { %v12941_v19 = vmul.f32 %v21347_v45, %v21347_v45  ;;  %v12994_v6 = vsub.f32 %v22524_v21, %v21347_v45  ;;  %v12999_v56 = vsub.f32 %v22529_v60, %v21347_v45 }
 0x704   : > { %v12695_v26 = vpop.xlane.xlu1 %12694 }
 0x705   : > { %v12850_v13 = vpop.xlane.xlu0 %12849  ;;  %v12953_v53 = vsub.f32 %v12929_v12, %v12941_v19  ;;  %v21355_v16 = vmul.f32 0.0013020834, %v12695_v26 }
 0x706   : > { %v12928_v55 = vmul.f32 0.0013020834, %v12850_v13  ;;  %v22521_v13 = vld [vmem:[#allocation95_spill] sm:$0xff] }
 0x707   : > { %v12965_v44 = vadd.f32 1e-12, %v12953_v53  ;;  %v12942_v31 = vmul.f32 %v21355_v16, %v21355_v16  ;;  %v12991_v53 = vsub.f32 %v22521_v13, %v21349_v33  ;;  %v22531_v13 = vld [vmem:[#allocation55_spill] sm:$0xff] }
 0x708   : > { %v12952_v50 = vsub.f32 %v12928_v55, %v12940_v15  ;;  %v12702_v38 = vpop.xlane.xlu1 %12701  ;;  %v22522_v55 = vld [vmem:[#allocation108_spill] sm:$0xff]  ;;  %v22523_v15 = vld [vmem:[#allocation110_spill] sm:$0xff] }
 0x709   : > { %18008 = vrsqrt.f32 %v12965_v44  ;;  %v21401_v12 = vmul.f32 0.0013020834, %v12702_v38  ;;  %v12992_v26 = vsub.f32 %v22522_v55, %v21349_v33  ;;  %v12993_v44 = vsub.f32 %v22523_v15, %v21349_v33  ;;  %v22530_v33 = vld [vmem:[#allocation53_spill] sm:$0xff]  ;;  %v22533_v55 = vld [vmem:[#allocation116_spill] sm:$0xff] }
 0x70a   : > { %v12964_v0 = vadd.f32 1e-12, %v12952_v50  ;;  %v22525_v50 = vld [vmem:[#allocation51_spill] sm:$0xff]  ;;  %v12996_v38 = vsub.f32 %v22526_v48, %v21347_v45  ;;  %v13003_v2 = vsub.f32 %v22533_v55, %v21355_v16 }
 0x70c   : > { %18010 = vrsqrt.f32 %v12964_v0  ;;  %v12995_v0 = vsub.f32 %v22525_v50, %v21347_v45  ;;  %v22532_v50 = vld [vmem:[#allocation114_spill] sm:$0xff] }
 0x70d   : > { %v12864_v7 = vpop.xlane.xlu0 %12863 }
 0x70e   : > { %v12930_v9 = vmul.f32 0.0013020834, %v12864_v7  ;;  %v22527_v7 = vld [vmem:[#allocation99_spill] sm:$0xff] }
 0x70f   : > { %v12997_v24 = vsub.f32 %v22527_v7, %v21347_v45 }
 0x710   : > { %v12954_v19 = vsub.f32 %v12930_v9, %v12942_v31  ;;  %v22528_v9 = vld [vmem:[#allocation106_spill] sm:$0xff] }
 0x711   : > { %v12998_v5 = vsub.f32 %v22528_v9, %v21347_v45 }
 0x712   : > { %v12966_v31 = vadd.f32 1e-12, %v12954_v19  ;;  %v12943_v19 = vmul.f32 %v21401_v12, %v21401_v12  ;;  %v21429_v60 = vpop.xlane.xlu0 %12708 }
 0x713   : > { %v12871_v15 = vpop.xlane.xlu1 %12870  ;;  %v18009_v21 = vpop.eup %18008 }
 0x714   : > { %18012 = vrsqrt.f32 %v12966_v31  ;;  %v12931_v7 = vmul.f32 0.0013020834, %v12871_v15  ;;  %v13066_v9 = vmul.f32 %v18009_v21, %v12994_v6  ;;  %v13067_v58 = vmul.f32 %v18009_v21, %v12995_v0 }
 0x715   : > { %v13068_v54 = vmul.f32 %v18009_v21, %v12996_v38  ;;  %v13069_v45 = vmul.f32 %v18009_v21, %v12997_v24  ;;  %v13070_v42 = vmul.f32 %v18009_v21, %v12998_v5  ;;  %v13071_v27 = vmul.f32 %v18009_v21, %v12999_v56 }
 0x716   : > { %v12955_v20 = vsub.f32 %v12931_v7, %v12943_v19  ;;  %v18011_v40 = vpop.eup %18010  ;;  %v13170_v48 = vmul.f32 %v21358_v47, %v13066_v9  ;;  %v13171_v31 = vmul.f32 %v21364_v36, %v13067_v58 }
 0x717   : > { %v13172_v15 = vmul.f32 %v21370_v1, %v13068_v54  ;;  %v13173_v6 = vmul.f32 %v21382_v51, %v13069_v45  ;;  %v13174_v0 = vmul.f32 %v21376_v4, %v13070_v42  ;;  %v13175_v38 = vmul.f32 %v21390_v3, %v13071_v27 }
 0x718   : > { %v13060_v24 = vmul.f32 %v18011_v40, %v12988_v23  ;;  %v13061_v5 = vmul.f32 %v18011_v40, %v12989_v22  ;;  %v13274_v56 = vadd.f32 %v21361_v59, %v13170_v48  ;;  %v13275_v55 = vadd.f32 %v21367_v34, %v13171_v31  ;;  %v22534_v48 = vld [vmem:[#allocation20_spill] sm:$0xff] }
 0x719   : > { %v13276_v21 = vadd.f32 %v21373_v32, %v13172_v15  ;;  %v13277_v19 = vadd.f32 %v21387_v37, %v13173_v6  ;;  %v13278_v58 = vadd.f32 %v21379_v57, %v13174_v0  ;;  %v13279_v54 = vadd.f32 %v21393_v30, %v13175_v38 }
 0x71a   : > { %v13062_v7 = vmul.f32 %v18011_v40, %v12990_v25  ;;  %v13063_v9 = vmul.f32 %v18011_v40, %v12991_v53  ;;  %13346 = vst [vmem:[%s21447_s27 + $0x30] sm:$0xff] %v13274_v56  ;;  %13347 = vst [vmem:[%s21447_s27 + $0x38] sm:$0xff] %v13275_v55  ;;  %v13064_v27 = vmul.f32 %v18011_v40, %v12992_v26  ;;  %v12716_v53 = vpop.xlane.xlu1 %12715  ;;  %v12878_v42 = vpop.xlane.xlu0 %12877  ;;  %v12967_v6 = vadd.f32 1e-12, %v12955_v20 }
 0x71b   : > { %13348 = vst [vmem:[%s21447_s27 + $0x40] sm:$0xff] %v13276_v21  ;;  %13349 = vst [vmem:[%s21447_s27 + $0x48] sm:$0xff] %v13277_v19  ;;  %v13065_v23 = vmul.f32 %v18011_v40, %v12993_v44  ;;  %v13164_v22 = vmul.f32 %v21358_v47, %v13060_v24  ;;  %v13165_v25 = vmul.f32 %v21364_v36, %v13061_v5  ;;  %v22535_v24 = vld [vmem:[#allocation21_spill] sm:$0xff] }
 0x71c   : > { %13350 = vst [vmem:[%s21447_s27 + $0x50] sm:$0xff] %v13278_v58  ;;  %13351 = vst [vmem:[%s21447_s27 + $0x58] sm:$0xff] %v13279_v54  ;;  %v13004_v45 = vsub.f32 %v22534_v48, %v21355_v16  ;;  %v13166_v31 = vmul.f32 %v21370_v1, %v13062_v7  ;;  %v13167_v15 = vmul.f32 %v21382_v51, %v13063_v9  ;;  %18014 = vrsqrt.f32 %v12967_v6 }
 0x71d   : > { %v13168_v40 = vmul.f32 %v21376_v4, %v13064_v27  ;;  %v13169_v26 = vmul.f32 %v21390_v3, %v13065_v23  ;;  %v13268_v44 = vadd.f32 %v21361_v59, %v13164_v22  ;;  %v13269_v0 = vadd.f32 %v21367_v34, %v13165_v25 }
 0x71e   : > { %v18013_v38 = vpop.eup %18012  ;;  %v13005_v5 = vsub.f32 %v22535_v24, %v21355_v16  ;;  %v13270_v56 = vadd.f32 %v21373_v32, %v13166_v31  ;;  %v13271_v20 = vadd.f32 %v21387_v37, %v13167_v15  ;;  %v22536_v19 = vsub.f32 %v22530_v33, %v21355_v16  ;;  %v12723_v15 = vpop.xlane.xlu0 %12722  ;;  %v22539_v24 = vld [vmem:[#allocation57_spill] sm:$0xff] }
 0x71f   : > { %v13272_v55 = vadd.f32 %v21379_v57, %v13168_v40  ;;  %v13273_v21 = vadd.f32 %v21393_v30, %v13169_v26  ;;  %13340 = vst [vmem:[%s21447_s27] sm:$0xff] %v13268_v44  ;;  %13341 = vst [vmem:[%s21447_s27 + $0x8] sm:$0xff] %v13269_v0  ;;  %v22537_v54 = vsub.f32 %v22531_v13, %v21355_v16  ;;  %v21489_v31 = vmul.f32 0.0013020834, %v21429_v60  ;;  %v12885_v13 = vpop.xlane.xlu1 %12884 }
 0x720   : > { %v13072_v58 = vmul.f32 %v18013_v38, %v22536_v19  ;;  %13342 = vst [vmem:[%s21447_s27 + $0x10] sm:$0xff] %v13270_v56  ;;  %13343 = vst [vmem:[%s21447_s27 + $0x18] sm:$0xff] %v13271_v20  ;;  %v22538_v9 = vsub.f32 %v22532_v50, %v21355_v16  ;;  %v13075_v23 = vmul.f32 %v18013_v38, %v13003_v2  ;;  %v21497_v40 = vmul.f32 0.0013020834, %v12716_v53  ;;  %v22540_v56 = vld [vmem:[#allocation59_spill] sm:$0xff] }
 0x721   : > { %v13073_v7 = vmul.f32 %v18013_v38, %v22537_v54  ;;  %v13076_v22 = vmul.f32 %v18013_v38, %v13004_v45  ;;  %v13077_v25 = vmul.f32 %v18013_v38, %v13005_v5  ;;  %13344 = vst [vmem:[%s21447_s27 + $0x20] sm:$0xff] %v13272_v55  ;;  %13345 = vst [vmem:[%s21447_s27 + $0x28] sm:$0xff] %v13273_v21  ;;  %v22541_v55 = vld [vmem:[#allocation118_spill] sm:$0xff]  ;;  %v12932_v54 = vmul.f32 0.0013020834, %v12878_v42 }
 0x722   : > { %v13074_v27 = vmul.f32 %v18013_v38, %v22538_v9  ;;  %v13176_v48 = vmul.f32 %v21358_v47, %v13072_v58  ;;  %v13179_v16 = vmul.f32 %v21382_v51, %v13075_v23  ;;  %v13006_v5 = vsub.f32 %v22539_v24, %v21401_v12  ;;  %v22542_v21 = vld [vmem:[#allocation122_spill] sm:$0xff] }
 0x723   : > { %v13177_v33 = vmul.f32 %v21364_v36, %v13073_v7  ;;  %v13180_v2 = vmul.f32 %v21376_v4, %v13076_v22  ;;  %v13181_v50 = vmul.f32 %v21390_v3, %v13077_v25  ;;  %v13007_v20 = vsub.f32 %v22540_v56, %v21401_v12  ;;  %v12730_v25 = vpop.xlane.xlu1 %12729 }
 0x724   : > { %v13178_v6 = vmul.f32 %v21370_v1, %v13074_v27  ;;  %v13280_v45 = vadd.f32 %v21361_v59, %v13176_v48  ;;  %v13283_v44 = vadd.f32 %v21387_v37, %v13179_v16  ;;  %v13008_v53 = vsub.f32 %v22541_v55, %v21401_v12  ;;  %v22543_v27 = vld [vmem:[#allocation61_spill] sm:$0xff] }
 0x725   : > { %v13281_v60 = vadd.f32 %v21367_v34, %v13177_v33  ;;  %v13284_v0 = vadd.f32 %v21379_v57, %v13180_v2  ;;  %v13285_v38 = vadd.f32 %v21393_v30, %v13181_v50  ;;  %v13009_v19 = vsub.f32 %v22542_v21, %v21401_v12  ;;  %v12892_v48 = vpop.xlane.xlu0 %12891 }
 0x726   : > { %v13282_v26 = vadd.f32 %v21373_v32, %v13178_v6  ;;  %13352 = vst [vmem:[%s21447_s27 + $0x60] sm:$0xff] %v13280_v45  ;;  %13355 = vst [vmem:[%s21447_s27 + $0x78] sm:$0xff] %v13283_v44  ;;  %v12944_v58 = vmul.f32 %v21489_v31, %v21489_v31  ;;  %v13010_v7 = vsub.f32 %v21056_v61, %v21401_v12  ;;  %v12933_v22 = vmul.f32 0.0013020834, %v12885_v13  ;;  %v18015_v33 = vpop.eup %18014  ;;  %v22544_v6 = vld [vmem:[#allocation63_spill] sm:$0xff] }
 0x727   : > { %13353 = vst [vmem:[%s21447_s27 + $0x68] sm:$0xff] %v13281_v60  ;;  %13356 = vst [vmem:[%s21447_s27 + $0x80] sm:$0xff] %v13284_v0  ;;  %v13011_v9 = vsub.f32 %v21078_v17, %v21401_v12  ;;  %v12945_v42 = vmul.f32 %v21497_v40, %v21497_v40  ;;  %v21529_v50 = vmul.f32 0.0013020834, %v12723_v15  ;;  %v13078_v61 = vmul.f32 %v18015_v33, %v13006_v5 }
 0x728   : > { %13354 = vst [vmem:[%s21447_s27 + $0x70] sm:$0xff] %v13282_v26  ;;  %13357 = vst [vmem:[%s21447_s27 + $0x88] sm:$0xff] %v13285_v38  ;;  %v12956_v2 = vsub.f32 %v12932_v54, %v12944_v58  ;;  %v13079_v45 = vmul.f32 %v18015_v33, %v13007_v20  ;;  %v13080_v60 = vmul.f32 %v18015_v33, %v13008_v53  ;;  %v12899_v58 = vpop.xlane.xlu1 %12898 }
 0x729   : > { %v13081_v17 = vmul.f32 %v18015_v33, %v13009_v19  ;;  %v13082_v12 = vmul.f32 %v18015_v33, %v13010_v7  ;;  %v13083_v26 = vmul.f32 %v18015_v33, %v13011_v9  ;;  %v12957_v13 = vsub.f32 %v12933_v22, %v12945_v42  ;;  %v12737_v54 = vpop.xlane.xlu0 %12736  ;;  %v22545_v33 = vld [vmem:[#allocation22_spill] sm:$0xff]  ;;  %v22546_v42 = vld [vmem:[#allocation23_spill] sm:$0xff] }
 0x72a   : > { %v12968_v44 = vadd.f32 1e-12, %v12956_v2  ;;  %v13182_v0 = vmul.f32 %v21358_v47, %v13078_v61  ;;  %v13183_v38 = vmul.f32 %v21364_v36, %v13079_v45  ;;  %v13184_v24 = vmul.f32 %v21370_v1, %v13080_v60  ;;  %v22547_v45 = vld [vmem:[#allocation25_spill] sm:$0xff] }
 0x72b   : > { %v13185_v56 = vmul.f32 %v21382_v51, %v13081_v17  ;;  %v13186_v15 = vmul.f32 %v21376_v4, %v13082_v12  ;;  %v13187_v5 = vmul.f32 %v21390_v3, %v13083_v26  ;;  %v12969_v20 = vadd.f32 1e-12, %v12957_v13  ;;  %v22548_v12 = vld [vmem:[#allocation27_spill] sm:$0xff]  ;;  %v22549_v26 = vld [vmem:[#allocation65_spill] sm:$0xff] }
 0x72c   : > { %18016 = vrsqrt.f32 %v12968_v44  ;;  %v13286_v55 = vadd.f32 %v21361_v59, %v13182_v0  ;;  %v13287_v53 = vadd.f32 %v21367_v34, %v13183_v38  ;;  %v13288_v21 = vadd.f32 %v21373_v32, %v13184_v24  ;;  %v22550_v13 = vld [vmem:[#allocation67_spill] sm:$0xff]  ;;  %v22551_v24 = vld [vmem:[#allocation24_spill] sm:$0xff] }
 0x72d   : > { %v13289_v19 = vadd.f32 %v21387_v37, %v13185_v56  ;;  %v13290_v7 = vadd.f32 %v21379_v57, %v13186_v15  ;;  %v13291_v9 = vadd.f32 %v21393_v30, %v13187_v5  ;;  %18018 = vrsqrt.f32 %v12969_v20  ;;  %v22552_v15 = vld [vmem:[#allocation26_spill] sm:$0xff] }
 0x72e   : > { %v21543_v22 = vmul.f32 0.0013020834, %v12730_v25  ;;  %13358 = vst [vmem:[%s21447_s27 + $0x90] sm:$0xff] %v13286_v55  ;;  %13359 = vst [vmem:[%s21447_s27 + $0x98] sm:$0xff] %v13287_v53  ;;  %v13014_v2 = vsub.f32 %v22545_v33, %v21489_v31  ;;  %v13015_v61 = vsub.f32 %v22546_v42, %v21489_v31  ;;  %v13016_v60 = vsub.f32 %v22547_v45, %v21489_v31  ;;  %v22556_v33 = vld [vmem:[#allocation29_spill] sm:$0xff]  ;;  %v22557_v45 = vld [vmem:[#allocation30_spill] sm:$0xff] }
 0x72f   : > { %13360 = vst [vmem:[%s21447_s27 + $0xa0] sm:$0xff] %v13288_v21  ;;  %13361 = vst [vmem:[%s21447_s27 + $0xa8] sm:$0xff] %v13289_v19  ;;  %v12934_v17 = vmul.f32 0.0013020834, %v12892_v48  ;;  %v13017_v25 = vsub.f32 %v22548_v12, %v21489_v31  ;;  %v13018_v44 = vsub.f32 %v22549_v26, %v21497_v40  ;;  %v13019_v0 = vsub.f32 %v22550_v13, %v21497_v40  ;;  %v22553_v48 = vld [vmem:[#allocation28_spill] sm:$0xff]  ;;  %v22554_v21 = vld [vmem:[#allocation69_spill] sm:$0xff] }
 0x730   : > { %13362 = vst [vmem:[%s21447_s27 + $0xb0] sm:$0xff] %v13290_v7  ;;  %13363 = vst [vmem:[%s21447_s27 + $0xb8] sm:$0xff] %v13291_v9  ;;  %v12935_v38 = vmul.f32 0.0013020834, %v12899_v58  ;;  %v13020_v56 = vsub.f32 %v22551_v24, %v21497_v40  ;;  %v13021_v5 = vsub.f32 %v22552_v15, %v21497_v40  ;;  %v13022_v20 = vsub.f32 %v22553_v48, %v21497_v40  ;;  %v22555_v58 = vld [vmem:[#allocation71_spill] sm:$0xff]  ;;  %v22558_v15 = vld [vmem:[#allocation73_spill] sm:$0xff] }
 0x731   : > { %v12946_v55 = vmul.f32 %v21529_v50, %v21529_v50  ;;  %v13023_v53 = vsub.f32 %v21133_v28, %v21497_v40  ;;  %v12947_v9 = vmul.f32 %v21543_v22, %v21543_v22  ;;  %v12744_v28 = vpop.xlane.xlu1 %12743  ;;  %v12906_v40 = vpop.xlane.xlu0 %12905  ;;  %v22559_v7 = vld [vmem:[#allocation75_spill] sm:$0xff]  ;;  %v21599_v62 = vmul.f32 0.0013020834, %v12737_v54 }
 0x732   : > { %v22560_v42 = vld [vmem:[#allocation31_spill] sm:$0xff]  ;;  %v21601_v48 = vmul.f32 0.0013020834, %v12744_v28  ;;  %v21603_v19 = vmul.f32 0.0013020834, %v12906_v40  ;;  %v22562_v12 = vsub.f32 %v22544_v6, %v21489_v31 }
 0x733   : > { %v12958_v13 = vsub.f32 %v12934_v17, %v12946_v55  ;;  %v12959_v16 = vsub.f32 %v12935_v38, %v12947_v9  ;;  %v22561_v38 = vsub.f32 %v22543_v27, %v21489_v31 }
 0x735   : > { %v12970_v55 = vadd.f32 1e-12, %v12958_v13  ;;  %v12971_v54 = vadd.f32 1e-12, %v12959_v16 }
 0x736   : > { %v18017_v26 = vpop.eup %18016 }
 0x737   : > { %v13084_v9 = vmul.f32 %v18017_v26, %v22561_v38  ;;  %v13085_v23 = vmul.f32 %v18017_v26, %v22562_v12  ;;  %v13086_v17 = vmul.f32 %v18017_v26, %v13014_v2  ;;  %v13087_v13 = vmul.f32 %v18017_v26, %v13015_v61  ;;  %v18019_v8 = vpop.eup %18018  ;;  %v12913_v12 = vpop.xlane.xlu1 %12912 }
 0x738   : > { %v13088_v63 = vmul.f32 %v18017_v26, %v13016_v60  ;;  %v13089_v46 = vmul.f32 %v18017_v26, %v13017_v25  ;;  %18020 = vrsqrt.f32 %v12970_v55  ;;  %v13090_v2 = vmul.f32 %v18019_v8, %v13018_v44  ;;  %v12751_v38 = vpop.xlane.xlu0 %12750 }
 0x739   : > { %v13188_v28 = vmul.f32 %v21358_v47, %v13084_v9  ;;  %v13189_v40 = vmul.f32 %v21364_v36, %v13085_v23  ;;  %v13190_v24 = vmul.f32 %v21370_v1, %v13086_v17  ;;  %v13191_v27 = vmul.f32 %v21382_v51, %v13087_v13 }
 0x73a   : > { %v13192_v31 = vmul.f32 %v21376_v4, %v13088_v63  ;;  %v13193_v6 = vmul.f32 %v21390_v3, %v13089_v46  ;;  %v13091_v61 = vmul.f32 %v18019_v8, %v13019_v0  ;;  %v13092_v17 = vmul.f32 %v18019_v8, %v13020_v56 }
 0x73b   : > { %v13292_v16 = vadd.f32 %v21361_v59, %v13188_v28  ;;  %v13293_v60 = vadd.f32 %v21367_v34, %v13189_v40  ;;  %v13294_v23 = vadd.f32 %v21373_v32, %v13190_v24  ;;  %v13295_v25 = vadd.f32 %v21387_v37, %v13191_v27 }
 0x73c   : > { %v13296_v26 = vadd.f32 %v21379_v57, %v13192_v31  ;;  %v13297_v63 = vadd.f32 %v21393_v30, %v13193_v6  ;;  %v13093_v55 = vmul.f32 %v18019_v8, %v13021_v5  ;;  %v13094_v46 = vmul.f32 %v18019_v8, %v13022_v20 }
 0x73d   : > { %13364 = vst [vmem:[%s21447_s27 + $0xc0] sm:$0xff] %v13292_v16  ;;  %13365 = vst [vmem:[%s21447_s27 + $0xc8] sm:$0xff] %v13293_v60  ;;  %v13095_v44 = vmul.f32 %v18019_v8, %v13023_v53  ;;  %v13194_v0 = vmul.f32 %v21358_v47, %v13090_v2  ;;  %v13195_v24 = vmul.f32 %v21364_v36, %v13091_v61  ;;  %18022 = vrsqrt.f32 %v12971_v54  ;;  %v22563_v2 = vld [vmem:[#allocation79_spill] sm:$0xff]  ;;  %v22564_v16 = vld [vmem:[#allocation81_spill] sm:$0xff] }
 0x73e   : > { %13366 = vst [vmem:[%s21447_s27 + $0xd0] sm:$0xff] %v13294_v23  ;;  %13367 = vst [vmem:[%s21447_s27 + $0xd8] sm:$0xff] %v13295_v25  ;;  %v13196_v9 = vmul.f32 %v21370_v1, %v13092_v17  ;;  %v13197_v56 = vmul.f32 %v21382_v51, %v13093_v55  ;;  %v12937_v5 = vmul.f32 0.0013020834, %v12913_v12  ;;  %v13198_v13 = vmul.f32 %v21376_v4, %v13094_v46 }
 0x73f   : > { %13368 = vst [vmem:[%s21447_s27 + $0xe0] sm:$0xff] %v13296_v26  ;;  %13369 = vst [vmem:[%s21447_s27 + $0xe8] sm:$0xff] %v13297_v63  ;;  %v13199_v8 = vmul.f32 %v21390_v3, %v13095_v44  ;;  %v13298_v20 = vadd.f32 %v21361_v59, %v13194_v0  ;;  %v13299_v53 = vadd.f32 %v21367_v34, %v13195_v24  ;;  %v21641_v54 = vmul.f32 0.0013020834, %v12751_v38 }
 0x740   : > { %v13300_v28 = vadd.f32 %v21373_v32, %v13196_v9  ;;  %v13301_v40 = vadd.f32 %v21387_v37, %v13197_v56  ;;  %v12948_v27 = vmul.f32 %v21599_v62, %v21599_v62  ;;  %v13302_v31 = vadd.f32 %v21379_v57, %v13198_v13 }
 0x741   : > { %v13303_v6 = vadd.f32 %v21393_v30, %v13199_v8  ;;  %13370 = vst [vmem:[%s21447_s27 + $0xf0] sm:$0xff] %v13298_v20  ;;  %13371 = vst [vmem:[%s21447_s27 + $0xf8] sm:$0xff] %v13299_v53  ;;  %v13036_v61 = vsub.f32 %v22563_v2, %v21599_v62  ;;  %v13037_v60 = vsub.f32 %v22564_v16, %v21599_v62 }
 0x742   : > { %v18021_v23 = vpop.eup %18020  ;;  %13372 = vst [vmem:[%s21447_s27 + $0x100] sm:$0xff] %v13300_v28  ;;  %13373 = vst [vmem:[%s21447_s27 + $0x108] sm:$0xff] %v13301_v40  ;;  %v13038_v25 = vsub.f32 %v21192_v49, %v21599_v62  ;;  %v13039_v12 = vsub.f32 %v21212_v14, %v21599_v62  ;;  %v12960_v26 = vsub.f32 %v21603_v19, %v12948_v27 }
 0x743   : > { %v12949_v63 = vmul.f32 %v21601_v48, %v21601_v48  ;;  %13374 = vst [vmem:[%s21447_s27 + $0x110] sm:$0xff] %v13302_v31  ;;  %13375 = vst [vmem:[%s21447_s27 + $0x118] sm:$0xff] %v13303_v6  ;;  %v22565_v17 = vsub.f32 %v22554_v21, %v21529_v50  ;;  %v22566_v46 = vsub.f32 %v22555_v58, %v21529_v50  ;;  %v12758_v31 = vpop.xlane.xlu1 %12757 }
 0x744   : > { %v22567_v0 = vsub.f32 %v22556_v33, %v21529_v50  ;;  %v22568_v19 = vsub.f32 %v22557_v45, %v21529_v50  ;;  %v22569_v9 = vsub.f32 %v21145_v39, %v21529_v50  ;;  %v22570_v21 = vsub.f32 %v21162_v52, %v21529_v50 }
 0x745   : > { %v13096_v55 = vmul.f32 %v18021_v23, %v22565_v17  ;;  %v13097_v44 = vmul.f32 %v18021_v23, %v22566_v46  ;;  %v12972_v8 = vadd.f32 1e-12, %v12960_v26  ;;  %v12961_v20 = vsub.f32 %v12937_v5, %v12949_v63 }
 0x746   : > { %v13098_v24 = vmul.f32 %v18021_v23, %v22567_v0  ;;  %v13099_v38 = vmul.f32 %v18021_v23, %v22568_v19  ;;  %v13100_v56 = vmul.f32 %v18021_v23, %v22569_v9  ;;  %v13101_v13 = vmul.f32 %v18021_v23, %v22570_v21 }
 0x747   : > { %v13200_v58 = vmul.f32 %v21358_v47, %v13096_v55  ;;  %v13201_v53 = vmul.f32 %v21364_v36, %v13097_v44  ;;  %18024 = vrsqrt.f32 %v12972_v8  ;;  %v12973_v52 = vadd.f32 1e-12, %v12961_v20  ;;  %v18023_v6 = vpop.eup %18022 }
 0x748   : > { %v13202_v33 = vmul.f32 %v21370_v1, %v13098_v24  ;;  %v13203_v45 = vmul.f32 %v21382_v51, %v13099_v38  ;;  %v13204_v28 = vmul.f32 %v21376_v4, %v13100_v56  ;;  %v13205_v39 = vmul.f32 %v21390_v3, %v13101_v13  ;;  %v12920_v38 = vpop.xlane.xlu0 %12919 }
 0x749   : > { %v13304_v50 = vadd.f32 %v21361_v59, %v13200_v58  ;;  %v13305_v5 = vadd.f32 %v21367_v34, %v13201_v53  ;;  %v13040_v63 = vsub.f32 %v21228_v10, %v21599_v62  ;;  %18026 = vrsqrt.f32 %v12973_v52 }
 0x74a   : > { %v13306_v40 = vadd.f32 %v21373_v32, %v13202_v33  ;;  %v13307_v27 = vadd.f32 %v21387_v37, %v13203_v45  ;;  %v13308_v23 = vadd.f32 %v21379_v57, %v13204_v28  ;;  %v13309_v26 = vadd.f32 %v21393_v30, %v13205_v39  ;;  %v12927_v28 = vpop.xlane.xlu1 %12926 }
 0x74b   : > { %13376 = vst [vmem:[%s21447_s27 + $0x120] sm:$0xff] %v13304_v50  ;;  %13377 = vst [vmem:[%s21447_s27 + $0x128] sm:$0xff] %v13305_v5  ;;  %v22571_v17 = vsub.f32 %v22558_v15, %v21543_v22  ;;  %v22572_v46 = vsub.f32 %v22559_v7, %v21543_v22  ;;  %v22573_v0 = vsub.f32 %v22560_v42, %v21543_v22  ;;  %v21728_v20 = vmul.f32 0.0013020834, %v12758_v31  ;;  %v22577_v50 = vld [vmem:[#allocation83_spill] sm:$0xff] }
 0x74c   : > { %13378 = vst [vmem:[%s21447_s27 + $0x130] sm:$0xff] %v13306_v40  ;;  %13379 = vst [vmem:[%s21447_s27 + $0x138] sm:$0xff] %v13307_v27  ;;  %v22574_v10 = vsub.f32 %v21150_v41, %v21543_v22  ;;  %v22575_v9 = vsub.f32 %v21171_v18, %v21543_v22  ;;  %v22576_v56 = vsub.f32 %v21187_v29, %v21543_v22  ;;  %v22578_v27 = vld [vmem:[#allocation85_spill] sm:$0xff] }
 0x74d   : > { %v13102_v55 = vmul.f32 %v18023_v6, %v22571_v17  ;;  %v13103_v44 = vmul.f32 %v18023_v6, %v22572_v46  ;;  %v13104_v24 = vmul.f32 %v18023_v6, %v22573_v0  ;;  %13380 = vst [vmem:[%s21447_s27 + $0x140] sm:$0xff] %v13308_v23  ;;  %13381 = vst [vmem:[%s21447_s27 + $0x148] sm:$0xff] %v13309_v26  ;;  %v22579_v26 = vld [vmem:[#allocation32_spill] sm:$0xff]  ;;  %v22580_v46 = vld [vmem:[#allocation38_spill] sm:$0xff] }
 0x74e   : > { %v13105_v19 = vmul.f32 %v18023_v6, %v22574_v10  ;;  %v13106_v15 = vmul.f32 %v18023_v6, %v22575_v9  ;;  %v13107_v7 = vmul.f32 %v18023_v6, %v22576_v56  ;;  %v13041_v21 = vsub.f32 %v21237_v43, %v21599_v62 }
 0x74f   : > { %v12950_v42 = vmul.f32 %v21641_v54, %v21641_v54  ;;  %v13206_v41 = vmul.f32 %v21358_v47, %v13102_v55  ;;  %v13207_v13 = vmul.f32 %v21364_v36, %v13103_v44  ;;  %v13208_v8 = vmul.f32 %v21370_v1, %v13104_v24 }
 0x750   : > { %v13209_v18 = vmul.f32 %v21382_v51, %v13105_v19  ;;  %v13210_v29 = vmul.f32 %v21376_v4, %v13106_v15  ;;  %v13211_v22 = vmul.f32 %v21390_v3, %v13107_v7  ;;  %v12938_v43 = vmul.f32 0.0013020834, %v12920_v38 }
 0x751   : > { %v13310_v58 = vadd.f32 %v21361_v59, %v13206_v41  ;;  %v13311_v53 = vadd.f32 %v21367_v34, %v13207_v13  ;;  %v13312_v33 = vadd.f32 %v21373_v32, %v13208_v8  ;;  %v13042_v5 = vsub.f32 %v22577_v50, %v21601_v48  ;;  %v18025_v55 = vpop.eup %18024 }
 0x752   : > { %v13313_v45 = vadd.f32 %v21387_v37, %v13209_v18  ;;  %v13314_v39 = vadd.f32 %v21379_v57, %v13210_v29  ;;  %v13315_v52 = vadd.f32 %v21393_v30, %v13211_v22  ;;  %v12962_v40 = vsub.f32 %v12938_v43, %v12950_v42 }
 0x753   : > { %13382 = vst [vmem:[%s21447_s27 + $0x150] sm:$0xff] %v13310_v58  ;;  %13383 = vst [vmem:[%s21447_s27 + $0x158] sm:$0xff] %v13311_v53  ;;  %v13043_v31 = vsub.f32 %v22578_v27, %v21601_v48  ;;  %v13044_v6 = vsub.f32 %v21215_v35, %v21601_v48  ;;  %v13045_v23 = vsub.f32 %v21231_v11, %v21601_v48  ;;  %v12939_v10 = vmul.f32 0.0013020834, %v12927_v28  ;;  %v18027_v38 = vpop.eup %18026 }
 0x754   : > { %13384 = vst [vmem:[%s21447_s27 + $0x160] sm:$0xff] %v13312_v33  ;;  %13385 = vst [vmem:[%s21447_s27 + $0x168] sm:$0xff] %v13313_v45  ;;  %v13046_v17 = vsub.f32 %v22579_v26, %v21601_v48  ;;  %v13047_v44 = vsub.f32 %v22580_v46, %v21601_v48  ;;  %v12974_v0 = vadd.f32 1e-12, %v12962_v40  ;;  %v12951_v24 = vmul.f32 %v21728_v20, %v21728_v20  ;;  %v22581_v33 = vld [vmem:[#allocation91_spill] sm:$0xff]  ;;  %v22584_v46 = vld [vmem:[#allocation34_spill] sm:$0xff] }
 0x755   : > { %13386 = vst [vmem:[%s21447_s27 + $0x170] sm:$0xff] %v13314_v39  ;;  %13387 = vst [vmem:[%s21447_s27 + $0x178] sm:$0xff] %v13315_v52  ;;  %v13108_v35 = vmul.f32 %v18025_v55, %v13036_v61  ;;  %v13109_v11 = vmul.f32 %v18025_v55, %v13037_v60  ;;  %v13110_v19 = vmul.f32 %v18025_v55, %v13038_v25 }
 0x756   : > { %v13111_v48 = vmul.f32 %v18025_v55, %v13039_v12  ;;  %v13112_v9 = vmul.f32 %v18025_v55, %v13040_v63  ;;  %v13113_v15 = vmul.f32 %v18025_v55, %v13041_v21  ;;  %18028 = vrsqrt.f32 %v12974_v0 }
 0x757   : > { %v12963_v56 = vsub.f32 %v12939_v10, %v12951_v24  ;;  %v13212_v2 = vmul.f32 %v21358_v47, %v13108_v35  ;;  %v13213_v61 = vmul.f32 %v21364_v36, %v13109_v11  ;;  %v13214_v16 = vmul.f32 %v21370_v1, %v13110_v19  ;;  %v22585_v24 = vld [vmem:[#allocation36_spill] sm:$0xff]  ;;  %v22586_v35 = vld [vmem:[#allocation39_spill] sm:$0xff] }
 0x758   : > { %v13215_v49 = vmul.f32 %v21382_v51, %v13111_v48  ;;  %v13216_v14 = vmul.f32 %v21376_v4, %v13112_v9  ;;  %v13217_v62 = vmul.f32 %v21390_v3, %v13113_v15  ;;  %v13114_v60 = vmul.f32 %v18027_v38, %v13042_v5 }
 0x759   : > { %v13115_v25 = vmul.f32 %v18027_v38, %v13043_v31  ;;  %v13316_v12 = vadd.f32 %v21361_v59, %v13212_v2  ;;  %v13317_v63 = vadd.f32 %v21367_v34, %v13213_v61  ;;  %v13318_v7 = vadd.f32 %v21373_v32, %v13214_v16  ;;  %v22582_v31 = vld [vmem:[#allocation101_spill] sm:$0xff] }
 0x75a   : > { %v13319_v21 = vadd.f32 %v21387_v37, %v13215_v49  ;;  %v13320_v42 = vadd.f32 %v21379_v57, %v13216_v14  ;;  %v13321_v41 = vadd.f32 %v21393_v30, %v13217_v62  ;;  %v13116_v13 = vmul.f32 %v18027_v38, %v13044_v6 }
 0x75b   : > { %v13117_v8 = vmul.f32 %v18027_v38, %v13045_v23  ;;  %13388 = vst [vmem:[%s21447_s27 + $0x180] sm:$0xff] %v13316_v12  ;;  %13389 = vst [vmem:[%s21447_s27 + $0x188] sm:$0xff] %v13317_v63  ;;  %v13118_v18 = vmul.f32 %v18027_v38, %v13046_v17  ;;  %v13119_v29 = vmul.f32 %v18027_v38, %v13047_v44  ;;  %v12975_v28 = vadd.f32 1e-12, %v12963_v56  ;;  %v22583_v17 = vld [vmem:[#allocation33_spill] sm:$0xff] }
 0x75c   : > { %13390 = vst [vmem:[%s21447_s27 + $0x190] sm:$0xff] %v13318_v7  ;;  %13391 = vst [vmem:[%s21447_s27 + $0x198] sm:$0xff] %v13319_v21  ;;  %v13218_v22 = vmul.f32 %v21358_v47, %v13114_v60  ;;  %v13219_v43 = vmul.f32 %v21364_v36, %v13115_v25  ;;  %v13220_v58 = vmul.f32 %v21370_v1, %v13116_v13  ;;  %v22587_v21 = vld [vmem:[#allocation103_spill] sm:$0xff] }
 0x75d   : > { %13392 = vst [vmem:[%s21447_s27 + $0x1a0] sm:$0xff] %v13320_v42  ;;  %13393 = vst [vmem:[%s21447_s27 + $0x1a8] sm:$0xff] %v13321_v41  ;;  %v13221_v53 = vmul.f32 %v21382_v51, %v13117_v8  ;;  %v13048_v45 = vsub.f32 %v22581_v33, %v21641_v54  ;;  %v13222_v39 = vmul.f32 %v21376_v4, %v13118_v18  ;;  %18030 = vrsqrt.f32 %v12975_v28  ;;  %v22588_v41 = vld [vmem:[#allocation120_spill] sm:$0xff]  ;;  %v22589_v8 = vld [vmem:[#allocation35_spill] sm:$0xff] }
 0x75e   : > { %v13223_v52 = vmul.f32 %v21390_v3, %v13119_v29  ;;  %v13322_v50 = vadd.f32 %v21361_v59, %v13218_v22  ;;  %v13323_v5 = vadd.f32 %v21367_v34, %v13219_v43  ;;  %v13324_v40 = vadd.f32 %v21373_v32, %v13220_v58  ;;  %v22590_v29 = vld [vmem:[#allocation37_spill] sm:$0xff]  ;;  %v22591_v58 = vld [vmem:[#allocation40_spill] sm:$0xff] }
 0x75f   : > { %v13325_v27 = vadd.f32 %v21387_v37, %v13221_v53  ;;  %v13049_v6 = vsub.f32 %v22582_v31, %v21641_v54  ;;  %v13326_v23 = vadd.f32 %v21379_v57, %v13222_v39  ;;  %v13050_v55 = vsub.f32 %v22583_v17, %v21641_v54  ;;  %v22592_v33 = vld [vmem:[#allocation41_spill] sm:$0xff] }
 0x760   : > { %v13327_v26 = vadd.f32 %v21393_v30, %v13223_v52  ;;  %13394 = vst [vmem:[%s21447_s27 + $0x1b0] sm:$0xff] %v13322_v50  ;;  %13395 = vst [vmem:[%s21447_s27 + $0x1b8] sm:$0xff] %v13323_v5  ;;  %v13051_v44 = vsub.f32 %v22584_v46, %v21641_v54  ;;  %v18029_v0 = vpop.eup %18028  ;;  %v13052_v10 = vsub.f32 %v22585_v24, %v21641_v54 }
 0x761   : > { %13396 = vst [vmem:[%s21447_s27 + $0x1c0] sm:$0xff] %v13324_v40  ;;  %13397 = vst [vmem:[%s21447_s27 + $0x1c8] sm:$0xff] %v13325_v27  ;;  %v13053_v11 = vsub.f32 %v22586_v35, %v21641_v54  ;;  %v13120_v19 = vmul.f32 %v18029_v0, %v13048_v45  ;;  %v13121_v48 = vmul.f32 %v18029_v0, %v13049_v6 }
 0x762   : > { %13398 = vst [vmem:[%s21447_s27 + $0x1d0] sm:$0xff] %v13326_v23  ;;  %13399 = vst [vmem:[%s21447_s27 + $0x1d8] sm:$0xff] %v13327_v26  ;;  %v13122_v38 = vmul.f32 %v18029_v0, %v13050_v55  ;;  %v13123_v9 = vmul.f32 %v18029_v0, %v13051_v44  ;;  %v13124_v15 = vmul.f32 %v18029_v0, %v13052_v10 }
 0x763   : > { %v13125_v56 = vmul.f32 %v18029_v0, %v13053_v11  ;;  %v13224_v2 = vmul.f32 %v21358_v47, %v13120_v19  ;;  %v13225_v61 = vmul.f32 %v21364_v36, %v13121_v48  ;;  %v13054_v42 = vsub.f32 %v22587_v21, %v21728_v20 }
 0x764   : > { %v13226_v16 = vmul.f32 %v21370_v1, %v13122_v38  ;;  %v13227_v54 = vmul.f32 %v21382_v51, %v13123_v9  ;;  %v13228_v49 = vmul.f32 %v21376_v4, %v13124_v15  ;;  %v13055_v13 = vsub.f32 %v22588_v41, %v21728_v20 }
 0x765   : > { %v13229_v14 = vmul.f32 %v21390_v3, %v13125_v56  ;;  %v13328_v62 = vadd.f32 %v21361_v59, %v13224_v2  ;;  %v13329_v60 = vadd.f32 %v21367_v34, %v13225_v61  ;;  %v13056_v18 = vsub.f32 %v22589_v8, %v21728_v20 }
 0x766   : > { %v13330_v25 = vadd.f32 %v21373_v32, %v13226_v16  ;;  %v13331_v12 = vadd.f32 %v21387_v37, %v13227_v54  ;;  %v13332_v63 = vadd.f32 %v21379_v57, %v13228_v49  ;;  %v13057_v22 = vsub.f32 %v22590_v29, %v21728_v20 }
 0x767   : > { %v13333_v7 = vadd.f32 %v21393_v30, %v13229_v14  ;;  %13400 = vst [vmem:[%s21447_s27 + $0x1e0] sm:$0xff] %v13328_v62  ;;  %13401 = vst [vmem:[%s21447_s27 + $0x1e8] sm:$0xff] %v13329_v60  ;;  %v18031_v43 = vpop.eup %18030  ;;  %v13058_v53 = vsub.f32 %v22591_v58, %v21728_v20  ;;  %v13059_v45 = vsub.f32 %v22592_v33, %v21728_v20 }
 0x768   : > { %13402 = vst [vmem:[%s21447_s27 + $0x1f0] sm:$0xff] %v13330_v25  ;;  %13403 = vst [vmem:[%s21447_s27 + $0x1f8] sm:$0xff] %v13331_v12  ;;  %v13126_v28 = vmul.f32 %v18031_v43, %v13054_v42  ;;  %v13127_v39 = vmul.f32 %v18031_v43, %v13055_v13  ;;  %v13128_v52 = vmul.f32 %v18031_v43, %v13056_v18 }
 0x769   : > { %13404 = vst [vmem:[%s21447_s27 + $0x200] sm:$0xff] %v13332_v63  ;;  %13405 = vst [vmem:[%s21447_s27 + $0x208] sm:$0xff] %v13333_v7  ;;  %v13129_v50 = vmul.f32 %v18031_v43, %v13057_v22  ;;  %v13130_v5 = vmul.f32 %v18031_v43, %v13058_v53  ;;  %v13131_v40 = vmul.f32 %v18031_v43, %v13059_v45 }
 0x76a   : > { %v13230_v27 = vmul.f32 %v21358_v47, %v13126_v28  ;;  %v13231_v31 = vmul.f32 %v21364_v36, %v13127_v39  ;;  %v13232_v6 = vmul.f32 %v21370_v1, %v13128_v52 }
 0x76b   : > { %v13233_v20 = vmul.f32 %v21382_v51, %v13129_v50  ;;  %v13234_v23 = vmul.f32 %v21376_v4, %v13130_v5  ;;  %v13235_v26 = vmul.f32 %v21390_v3, %v13131_v40 }
 0x76c   : > { %v13334_v17 = vadd.f32 %v21361_v59, %v13230_v27  ;;  %v13335_v55 = vadd.f32 %v21367_v34, %v13231_v31  ;;  %v13336_v47 = vadd.f32 %v21373_v32, %v13232_v6 }
 0x76d   : > { %v13337_v36 = vadd.f32 %v21387_v37, %v13233_v20  ;;  %v13338_v1 = vadd.f32 %v21379_v57, %v13234_v23  ;;  %v13339_v59 = vadd.f32 %v21393_v30, %v13235_v26 }
 0x76e   : > { %13406 = vst [vmem:[%s21447_s27 + $0x210] sm:$0xff] %v13334_v17  ;;  %13407 = vst [vmem:[%s21447_s27 + $0x218] sm:$0xff] %v13335_v55 }
 0x76f   : > { %13408 = vst [vmem:[%s21447_s27 + $0x220] sm:$0xff] %v13336_v47  ;;  %13409 = vst [vmem:[%s21447_s27 + $0x228] sm:$0xff] %v13337_v36 }
 0x770   : > { %13410 = vst [vmem:[%s21447_s27 + $0x230] sm:$0xff] %v13338_v1  ;;  %13411 = vst [vmem:[%s21447_s27 + $0x238] sm:$0xff] %v13339_v59 }
 0x771   : > { %18218 = shalt.err (!%p18215_p1)
}
 0x772   : > { %s18219_s17 = scalar_lea.hbm %s21861_s7, 9216  ;;  %s18223_s14 = scalar_lea.hbm %s21920_s6, 36864 }
 0x773   : > { %p18220_p10 = scmp.ne.s32.totalorder %s21861_s7, %s18219_s17  ;;  %p18224_p7 = scmp.lt.u32.totalorder %s21861_s7, %s21920_s6 }
 0x774   : > { %p18225_p9 = scmp.lt.u32.totalorder %s18223_s14, %s18219_s17  ;;  %p18227_p5 = scmp.lt.u32.totalorder %s18219_s17, %s21861_s7 }
 0x775   : > { %p18221_p13 = pnand %p18220_p10, %p18491_p8 }
 0x776   : > { %p18226_p12 = por %p18225_p9, %p18224_p7 }
 0x777   : > { %p18222_p3 = pneg %p18221_p13 }
 0x778   : > { %p18228_p11 = por %p18227_p5, %p18226_p12 }
 0x77a   : > { %p18229_p2 = pnand %p18228_p11, %p18222_p3 }
 0x77c   : > { %18232 = shalt.err (!%p18229_p2)
}
 0x77d   : > { %s18302_s29 = smov 768   ;;  %s18303_s15 = smov 48  }
 0x77e   : > { %15621 = dma.vmem_to_hbm [thread:$0]  (%p18491_p8), %s21863_s18, 9216, %s21861_s7, %s13413_s0, %s18302_s29, %s18302_s29, %s18303_s15  }
 0x77f PF: > { %p15659_p4 = scmp.ge.s32.totalorder %s18287_s24, 2  ;;  %s13442_s27 = sand.u32 1, %s18275_s21  }
 0x780   : > { %p22593_p6 = scmp.ne.s32.totalorder %s22221_s28, 0  ;;  %s13443_s8 = scalar_lea.sflag [#allocation4], %s13442_s27 }
 0x782   : > { %p15644_p0 = pnand %p15659_p4, %p22593_p6 }
 0x784   : > { %18270 = dma.done.wait (!%p15644_p0), %s13443_s8, 9216  }
 0x785   : > { %18272 = vsyncadd (!%p15644_p0), %s13443_s8, 4294958080  ;;  %p24_p1 = scmp.ge.s32.totalorder %s18477_s16, 6   ;;  %s22594_s21 = smov %s18279_s22 }
 0x786   : > { %s22595_s22 = smov %s18283_s23  ;;  %s22596_s23 = smov %s18487_s19 }
 0x787   : > { %s22597_s24 = smov %s18477_s16  ;;  %26 = sbr.rel (!%p24_p1) target bundleno = 14 (0xe), region = 118 }
 0x78e   :  { %13448 = vsyncpa [#allocation3], 1 }
 0x78f   :  { %13450 = vsyncpa [#allocation3 + $0x1], 1 }
 0x790   :  { %13451 = vsyncpa [#allocation6], 1 }
 0x791   :  { %13452 = vsyncpa [#allocation9], 1 }
 0x792   :  { %13454 = vsyncpa [#allocation9 + $0x1], 1 }
 0x793   :  { %13455 = vsyncpa [#allocation12], 1 }
 0x794   :  { %13456 = vsyncpa [#allocation4], 1 }
 0x795   :  { %13458 = vsyncpa [#allocation4 + $0x1], 1 }

</bundles_post_ra>
